<compile_context>
chip_gen: v7x
topology: tpu7x:2x2x1
jax: 0.10.0
libtpu: 0.0.40
codegen_flags: <defaults>
</compile_context>

<pallas_src>
import numpy as np
import jax
import jax.numpy as jnp
from jax.experimental import pallas as pl
from jax.experimental.pallas import tpu as pltpu

_BT = 32  # samples per grid step (multiple of 8; fits default scoped VMEM)


# --------------------------- host-side weight prep --------------------------
def _banded_weight(w_hwio, in_cols, out_cols):
    """Fold the stride-2 column (W) access of a 3x3/s2/p1 conv into a weight.

    Returns W of shape (3, len(in_cols)*Cin, len(out_cols)*Cout) with
      W[kh, v*Cin+ci, t*Cout+co] = w[kh, kw, ci, co],
      kw = in_cols[v] - 2*out_cols[t] + 1,
    whenever 0 <= kw <= 2.  Taps that fall in the zero padding (or in slab
    columns only present for lane alignment) are simply absent -> zero rows,
    so no physical pad columns are needed in the activation scratch.
    """
    w = np.asarray(w_hwio).astype(np.float32)
    _, _, cin, cout = w.shape
    W = np.zeros((3, len(in_cols) * cin, len(out_cols) * cout), np.float32)
    for kh in range(3):
        for t, oc in enumerate(out_cols):
            for v, ic in enumerate(in_cols):
                kw = ic - 2 * oc + 1
                if 0 <= kw <= 2:
                    W[kh, v * cin:(v + 1) * cin,
                      t * cout:(t + 1) * cout] = w[kh, kw]
    return W


def prepare_params(p):
    """One-time layout plumbing (banded conv weights, fused/permuted head)."""
    bf16, f32 = jnp.bfloat16, jnp.float32
    W1 = jnp.asarray(_banded_weight(p['w1'], range(0, 32), range(0, 16)), bf16)
    W2A = jnp.asarray(_banded_weight(p['w2'], range(0, 8), range(0, 4)), bf16)
    W2B = jnp.asarray(_banded_weight(p['w2'], range(4, 16), range(4, 8)), bf16)
    W3A = jnp.asarray(_banded_weight(p['w3'], range(0, 4), range(0, 2)), bf16)
    W3B = jnp.asarray(_banded_weight(p['w3'], range(2, 8), range(2, 4)), bf16)
    # fuse fc_mu / fc_logvar, permute rows from torch's (C,H,W) flatten order
    # to the kernel's feat layout feat[h, b, w*128 + c], and store as
    # (512, 16) = (k, h*4 + o) so the last dim is not lane-padding-wasteful.
    wcat = jnp.concatenate([p['wmu'], p['wlv']], axis=1)                 # (2048, 4)
    WH = wcat.reshape(128, 4, 4, 4).transpose(1, 2, 0, 3).reshape(4, 512, 4)
    WH = jnp.asarray(WH.transpose(1, 0, 2).reshape(512, 16), bf16)
    b1 = jnp.tile(p['b1'], 16)[None, :].astype(f32)                      # (1, 512)
    b2 = jnp.tile(p['b2'], 4)[None, :].astype(f32)                       # (1, 256)
    b3 = jnp.tile(p['b3'], 2)[None, :].astype(f32)                       # (1, 256)
    bh = jnp.concatenate([p['bmu'], p['blv']])[None, :].astype(f32)      # (1, 4)
    return dict(W1=W1, W2A=W2A, W2B=W2B, W3A=W3A, W3B=W3B, WH=WH,
                b1=b1, b2=b2, b3=b3, bh=bh)


# ------------------------------- fused kernel -------------------------------
def _encoder_vae_kernel(x_ref, eps_ref, w1_ref, w2a_ref, w2b_ref, w3a_ref,
                        w3b_ref, wh_ref, b1_ref, b2_ref, b3_ref, bh_ref,
                        out_ref, scr2, scr3, feat):
    f32, bf16 = jnp.float32, jnp.bfloat16
    BT = eps_ref.shape[0]

    # Only the top padding row (y=0) of each parity-split activation is ever
    # read without being rewritten below; zero just that halo row.
    scr2[0, 0, :, :] = jnp.zeros((BT, 512), bf16)
    scr3[0, 0, :, :] = jnp.zeros((BT, 512), bf16)

    # ---- conv1: (BT,1,32,32) -> (BT,16,16,32), one column group -------------
    # x_ref[p, i, b, w] = padded input row y = 2i+p; tap row for (oh, kh) is
    # y = 2oh+kh -> parity kh%2, index oh + kh//2 -> contiguous slab.
    acc = None
    for kh in range(3):
        a = x_ref[kh % 2, kh // 2:kh // 2 + 16, :, :].reshape(16 * BT, 32)
        d = jnp.dot(a, w1_ref[kh], preferred_element_type=f32)
        acc = d if acc is None else acc + d
    r = jnp.maximum(acc + b1_ref[...], 0.0).astype(bf16)        # (16*BT, 512)
    r = r.reshape(8, 2, BT, 512)                                # leading-dim split
    scr2[1, 0:8, :, :] = r[:, 0]    # even output rows -> odd padded rows
    scr2[0, 1:9, :, :] = r[:, 1]    # odd output rows  -> even padded rows

    # ---- conv2: (BT,16,16,32) -> (BT,8,8,64), two column groups -------------
    # group A: out cols 0..3 from real cols 0..7  (lanes   0:256, K=256)
    # group B: out cols 4..7 from real cols 4..15 (lanes 128:512, K=384)
    for w2_ref, c0, kk, o0 in ((w2a_ref, 0, 256, 0), (w2b_ref, 128, 384, 256)):
        acc = None
        for kh in range(3):
            a = scr2[kh % 2, kh // 2:kh // 2 + 8, :, c0:c0 + kk]
            d = jnp.dot(a.reshape(8 * BT, kk), w2_ref[kh],
                        preferred_element_type=f32)
            acc = d if acc is None else acc + d
        r = jnp.maximum(acc + b2_ref[...], 0.0).astype(bf16)    # (8*BT, 256)
        r = r.reshape(4, 2, BT, 256)
        scr3[1, 0:4, :, o0:o0 + 256] = r[:, 0]
        scr3[0, 1:5, :, o0:o0 + 256] = r[:, 1]

    # ---- conv3: (BT,8,8,64) -> (BT,4,4,128), two column groups --------------
    # group A: out cols 0,1 from real cols 0..3 (lanes   0:256, K=256)
    # group B: out cols 2,3 from real cols 2..7 (lanes 128:512, K=384)
    for w3_ref, c0, kk, o0 in ((w3a_ref, 0, 256, 0), (w3b_ref, 128, 384, 256)):
        acc = None
        for kh in range(3):
            a = scr3[kh % 2, kh // 2:kh // 2 + 4, :, c0:c0 + kk]
            d = jnp.dot(a.reshape(4 * BT, kk), w3_ref[kh],
                        preferred_element_type=f32)
            acc = d if acc is None else acc + d
        r = jnp.maximum(acc + b3_ref[...], 0.0).astype(bf16)    # (4*BT, 256)
        feat[:, :, o0:o0 + 256] = r.reshape(4, BT, 256)

    # ---- fused fc_mu / fc_logvar + reparameterization ------------------------
    acc = None
    for h in range(4):
        d = jnp.dot(feat[h, :, :], wh_ref[:, 4 * h:4 * h + 4],
                    preferred_element_type=f32)
        acc = d if acc is None else acc + d
    acc = acc + bh_ref[...]                                     # (BT, 4) = [mu | lv]
    mu = acc[:, 0:2]
    lv = acc[:, 2:4]
    z = mu + jnp.exp(0.5 * lv) * eps_ref[...]
    out_ref[:, 0:2] = z
    out_ref[:, 2:6] = acc
    out_ref[:, 6:8] = jnp.zeros((BT, 2), f32)


# ------------------------------- public forward -----------------------------
def encoder_vae_forward(x_nchw, prepped, eps):
    """x_nchw: (B, 1, 32, 32) f32; eps: (B, 2) f32. Returns (z, mu, logvar)."""
    B = x_nchw.shape[0]
    BT = _BT
    Bp = ((B + BT - 1) // BT) * BT
    # Pad batch to a multiple of BT, pad H by 1 (W padding lives in the banded
    # weights), move batch onto the sublane axis and split padded rows by
    # parity:  xprep[p, i, b, w] = x_padH[b, 2*i + p, w]   -> (2, 17, Bp, 32)
    xpad = jnp.pad(x_nchw[:, 0], ((0, Bp - B), (1, 1), (0, 0)))
    xprep = xpad.transpose(1, 0, 2).reshape(17, 2, Bp, 32)
    xprep = xprep.transpose(1, 0, 2, 3).astype(jnp.bfloat16)
    epsp = jnp.pad(eps, ((0, Bp - B), (0, 0))).astype(jnp.float32)

    def const_spec(arr):
        return pl.BlockSpec(arr.shape, lambda g, z=(0,) * arr.ndim: z)

    p = prepped
    consts = [p['W1'], p['W2A'], p['W2B'], p['W3A'], p['W3B'], p['WH'],
              p['b1'], p['b2'], p['b3'], p['bh']]

    out = pl.pallas_call(
        _encoder_vae_kernel,
        out_shape=jax.ShapeDtypeStruct((Bp, 8), jnp.float32),
        grid_spec=pltpu.PrefetchScalarGridSpec(
            num_scalar_prefetch=0,
            grid=(Bp // BT,),
            in_specs=[
                pl.BlockSpec((2, 17, BT, 32), lambda g: (0, 0, g, 0)),  # input
                pl.BlockSpec((BT, 2), lambda g: (g, 0)),                # eps
            ] + [const_spec(a) for a in consts],
            out_specs=pl.BlockSpec((BT, 8), lambda g: (g, 0)),
            scratch_shapes=[
                pltpu.VMEM((2, 9, BT, 512), jnp.bfloat16),   # padded conv1 out
                pltpu.VMEM((2, 5, BT, 512), jnp.bfloat16),   # padded conv2 out
                pltpu.VMEM((4, BT, 512), jnp.bfloat16),      # conv3 out (h,b,w*128+c)
            ]),
        compiler_params=pltpu.CompilerParams(
            dimension_semantics=("parallel",),
            vmem_limit_bytes=32 * 1024 * 1024),
    )(xprep, epsp, *consts)

    z = out[:B, 0:2]
    mu = out[:B, 2:4]
    lv = out[:B, 4:6]
    return z, mu, lv


# ------------------------------ pure-JAX reference ---------------------------
def reference_forward(x_nchw, params, eps):
    def conv(x, w, b):
        y = jax.lax.conv_general_dilated(
            x, w, window_strides=(2, 2), padding=((1, 1), (1, 1)),
            dimension_numbers=('NCHW', 'HWIO', 'NCHW'))
        return jax.nn.relu(y + b.reshape(1, -1, 1, 1))
    h = conv(x_nchw, params['w1'], params['b1'])
    h = conv(h, params['w2'], params['b2'])
    h = conv(h, params['w3'], params['b3'])
    h = h.reshape(h.shape[0], -1)
    mu = h @ params['wmu'] + params['bmu']
    lv = h @ params['wlv'] + params['blv']
    z = mu + jnp.exp(0.5 * lv) * eps
    return z, mu, lv


if __name__ == "__main__":
    key = jax.random.PRNGKey(0)
    kx, keps, kp = jax.random.split(key, 3)
    B = 64
    # fc layers require 128*4*4 features => input spatial must be 32x32, 1 ch
    x = jax.random.normal(kx, (B, 1, 32, 32), jnp.float32)

    pk = jax.random.split(kp, 10)
    params = dict(
        w1=jax.random.normal(pk[0], (3, 3, 1, 32), jnp.float32) * 0.10,
        b1=jax.random.normal(pk[1], (32,), jnp.float32) * 0.10,
        w2=jax.random.normal(pk[2], (3, 3, 32, 64), jnp.float32) * 0.05,
        b2=jax.random.normal(pk[3], (64,), jnp.float32) * 0.05,
        w3=jax.random.normal(pk[4], (3, 3, 64, 128), jnp.float32) * 0.05,
        b3=jax.random.normal(pk[5], (128,), jnp.float32) * 0.05,
        wmu=jax.random.normal(pk[6], (128 * 4 * 4, 2), jnp.float32) * 0.02,
        bmu=jax.random.normal(pk[7], (2,), jnp.float32) * 0.02,
        wlv=jax.random.normal(pk[8], (128 * 4 * 4, 2), jnp.float32) * 0.02,
        blv=jax.random.normal(pk[9], (2,), jnp.float32) * 0.02,
    )
    # eps ~ N(0,1) for the reparameterization trick (explicit, deterministic)
    eps = jax.random.normal(keps, (B, 2), jnp.float32)

    prepped = prepare_params(params)            # one-time layout plumbing
    fwd = jax.jit(encoder_vae_forward)
    z, mu, lv = jax.block_until_ready(fwd(x, prepped, eps))

    zr, mur, lvr = reference_forward(x, params, eps)
    assert jnp.allclose(mu, mur, atol=2e-2, rtol=2e-2), float(jnp.max(jnp.abs(mu - mur)))
    assert jnp.allclose(lv, lvr, atol=2e-2, rtol=2e-2), float(jnp.max(jnp.abs(lv - lvr)))
    assert jnp.allclose(z, zr, atol=2e-2, rtol=2e-2), float(jnp.max(jnp.abs(z - zr)))
    print("KERNEL_OK")
</pallas_src>

<mosaic_0001>
module attributes {stable_mosaic.version = 11 : i64} {
  func.func @_encoder_vae_kernel(%arg0: i32, %arg1: memref<2x17x32x32xbf16, #tpu.memory_space<vmem>>, %arg2: memref<32x2xf32, #tpu.memory_space<vmem>>, %arg3: memref<3x32x512xbf16, #tpu.memory_space<vmem>>, %arg4: memref<3x256x256xbf16, #tpu.memory_space<vmem>>, %arg5: memref<3x384x256xbf16, #tpu.memory_space<vmem>>, %arg6: memref<3x256x256xbf16, #tpu.memory_space<vmem>>, %arg7: memref<3x384x256xbf16, #tpu.memory_space<vmem>>, %arg8: memref<512x16xbf16, #tpu.memory_space<vmem>>, %arg9: memref<1x512xf32, #tpu.memory_space<vmem>>, %arg10: memref<1x256xf32, #tpu.memory_space<vmem>>, %arg11: memref<1x256xf32, #tpu.memory_space<vmem>>, %arg12: memref<1x4xf32, #tpu.memory_space<vmem>>, %arg13: memref<32x8xf32, #tpu.memory_space<vmem>>, %arg14: memref<2x9x32x512xbf16, #tpu.memory_space<vmem>>, %arg15: memref<2x5x32x512xbf16, #tpu.memory_space<vmem>>, %arg16: memref<4x32x512xbf16, #tpu.memory_space<vmem>>) attributes {dimension_semantics = [#tpu.dimension_semantics<parallel>], iteration_bounds = array<i64: 2>, scalar_prefetch = 0 : i64, scratch_operands = 3 : i64, tpu.core_type = #tpu.core_type<tc>, window_params = [{transform_indices = @transform_0, window_bounds = array<i64: 2, 17, 32, 32>}, {transform_indices = @transform_1, window_bounds = array<i64: 32, 2>}, {pipeline_mode = #tpu.pipeline_mode<synchronous>, transform_indices = @transform_2, window_bounds = array<i64: 3, 32, 512>}, {pipeline_mode = #tpu.pipeline_mode<synchronous>, transform_indices = @transform_3, window_bounds = array<i64: 3, 256, 256>}, {pipeline_mode = #tpu.pipeline_mode<synchronous>, transform_indices = @transform_4, window_bounds = array<i64: 3, 384, 256>}, {pipeline_mode = #tpu.pipeline_mode<synchronous>, transform_indices = @transform_5, window_bounds = array<i64: 3, 256, 256>}, {pipeline_mode = #tpu.pipeline_mode<synchronous>, transform_indices = @transform_6, window_bounds = array<i64: 3, 384, 256>}, {pipeline_mode = #tpu.pipeline_mode<synchronous>, transform_indices = @transform_7, window_bounds = array<i64: 512, 16>}, {pipeline_mode = #tpu.pipeline_mode<synchronous>, transform_indices = @transform_8, window_bounds = array<i64: 1, 512>}, {pipeline_mode = #tpu.pipeline_mode<synchronous>, transform_indices = @transform_9, window_bounds = array<i64: 1, 256>}, {pipeline_mode = #tpu.pipeline_mode<synchronous>, transform_indices = @transform_10, window_bounds = array<i64: 1, 256>}, {pipeline_mode = #tpu.pipeline_mode<synchronous>, transform_indices = @transform_11, window_bounds = array<i64: 1, 4>}, {transform_indices = @transform_12, window_bounds = array<i64: 32, 8>}]} {
    %cst = arith.constant 0.000000e+00 : bf16
    %0 = vector.broadcast %cst : bf16 to vector<32x512xbf16>
    %c0 = arith.constant 0 : index
    %c0_0 = arith.constant 0 : index
    %c0_1 = arith.constant 0 : index
    %c0_2 = arith.constant 0 : index
    %1 = vector.load %arg14[%c0, %c0_0, %c0_1, %c0_2] : memref<2x9x32x512xbf16, #tpu.memory_space<vmem>>, vector<1x1x32x512xbf16>
    %2 = vector.shape_cast %1 : vector<1x1x32x512xbf16> to vector<32x512xbf16>
    %3 = vector.shape_cast %0 : vector<32x512xbf16> to vector<1x1x32x512xbf16>
    tpu.vector_store %arg14[%c0, %c0_0, %c0_1, %c0_2], %3 {strides = array<i32>} : memref<2x9x32x512xbf16, #tpu.memory_space<vmem>>, vector<1x1x32x512xbf16>,
    %cst_3 = arith.constant 0.000000e+00 : bf16
    %4 = vector.broadcast %cst_3 : bf16 to vector<32x512xbf16>
    %c0_4 = arith.constant 0 : index
    %c0_5 = arith.constant 0 : index
    %c0_6 = arith.constant 0 : index
    %c0_7 = arith.constant 0 : index
    %5 = vector.load %arg15[%c0_4, %c0_5, %c0_6, %c0_7] : memref<2x5x32x512xbf16, #tpu.memory_space<vmem>>, vector<1x1x32x512xbf16>
    %6 = vector.shape_cast %5 : vector<1x1x32x512xbf16> to vector<32x512xbf16>
    %7 = vector.shape_cast %4 : vector<32x512xbf16> to vector<1x1x32x512xbf16>
    tpu.vector_store %arg15[%c0_4, %c0_5, %c0_6, %c0_7], %7 {strides = array<i32>} : memref<2x5x32x512xbf16, #tpu.memory_space<vmem>>, vector<1x1x32x512xbf16>,
    %c0_8 = arith.constant 0 : index
    %c0_9 = arith.constant 0 : index
    %c0_10 = arith.constant 0 : index
    %c0_11 = arith.constant 0 : index
    %8 = vector.load %arg1[%c0_8, %c0_9, %c0_10, %c0_11] : memref<2x17x32x32xbf16, #tpu.memory_space<vmem>>, vector<1x16x32x32xbf16>
    %9 = vector.shape_cast %8 : vector<1x16x32x32xbf16> to vector<16x32x32xbf16>
    %10 = vector.shape_cast %9 : vector<16x32x32xbf16> to vector<512x32xbf16>
    %c0_12 = arith.constant 0 : index
    %c0_13 = arith.constant 0 : index
    %c0_14 = arith.constant 0 : index
    %11 = vector.load %arg3[%c0_12, %c0_13, %c0_14] : memref<3x32x512xbf16, #tpu.memory_space<vmem>>, vector<1x32x512xbf16>
    %12 = vector.shape_cast %11 : vector<1x32x512xbf16> to vector<32x512xbf16>
    %cst_15 = arith.constant dense<0.000000e+00> : vector<512x512xf32>
    %13 = tpu.matmul %10, %12, %cst_15 {dimension_numbers = #tpu.dot_dimension_numbers<[1], [0], [0], [1], [0, 0, 1, 1], [], []>} : vector<512x32xbf16>, vector<32x512xbf16>, vector<512x512xf32> -> vector<512x512xf32>
    %c1 = arith.constant 1 : index
    %c0_16 = arith.constant 0 : index
    %c0_17 = arith.constant 0 : index
    %c0_18 = arith.constant 0 : index
    %14 = vector.load %arg1[%c1, %c0_16, %c0_17, %c0_18] : memref<2x17x32x32xbf16, #tpu.memory_space<vmem>>, vector<1x16x32x32xbf16>
    %15 = vector.shape_cast %14 : vector<1x16x32x32xbf16> to vector<16x32x32xbf16>
    %16 = vector.shape_cast %15 : vector<16x32x32xbf16> to vector<512x32xbf16>
    %c1_19 = arith.constant 1 : index
    %c0_20 = arith.constant 0 : index
    %c0_21 = arith.constant 0 : index
    %17 = vector.load %arg3[%c1_19, %c0_20, %c0_21] : memref<3x32x512xbf16, #tpu.memory_space<vmem>>, vector<1x32x512xbf16>
    %18 = vector.shape_cast %17 : vector<1x32x512xbf16> to vector<32x512xbf16>
    %cst_22 = arith.constant dense<0.000000e+00> : vector<512x512xf32>
    %19 = tpu.matmul %16, %18, %cst_22 {dimension_numbers = #tpu.dot_dimension_numbers<[1], [0], [0], [1], [0, 0, 1, 1], [], []>} : vector<512x32xbf16>, vector<32x512xbf16>, vector<512x512xf32> -> vector<512x512xf32>
    %20 = arith.addf %13, %19 : vector<512x512xf32>
    %c0_23 = arith.constant 0 : index
    %c1_24 = arith.constant 1 : index
    %c0_25 = arith.constant 0 : index
    %c0_26 = arith.constant 0 : index
    %21 = vector.load %arg1[%c0_23, %c1_24, %c0_25, %c0_26] : memref<2x17x32x32xbf16, #tpu.memory_space<vmem>>, vector<1x16x32x32xbf16>
    %22 = vector.shape_cast %21 : vector<1x16x32x32xbf16> to vector<16x32x32xbf16>
    %23 = vector.shape_cast %22 : vector<16x32x32xbf16> to vector<512x32xbf16>
    %c2 = arith.constant 2 : index
    %c0_27 = arith.constant 0 : index
    %c0_28 = arith.constant 0 : index
    %24 = vector.load %arg3[%c2, %c0_27, %c0_28] : memref<3x32x512xbf16, #tpu.memory_space<vmem>>, vector<1x32x512xbf16>
    %25 = vector.shape_cast %24 : vector<1x32x512xbf16> to vector<32x512xbf16>
    %cst_29 = arith.constant dense<0.000000e+00> : vector<512x512xf32>
    %26 = tpu.matmul %23, %25, %cst_29 {dimension_numbers = #tpu.dot_dimension_numbers<[1], [0], [0], [1], [0, 0, 1, 1], [], []>} : vector<512x32xbf16>, vector<32x512xbf16>, vector<512x512xf32> -> vector<512x512xf32>
    %27 = arith.addf %20, %26 : vector<512x512xf32>
    %c0_30 = arith.constant 0 : index
    %c0_31 = arith.constant 0 : index
    %28 = vector.load %arg9[%c0_30, %c0_31] : memref<1x512xf32, #tpu.memory_space<vmem>>, vector<1x512xf32>
    %29 = vector.broadcast %28 : vector<1x512xf32> to vector<512x512xf32>
    %30 = arith.addf %27, %29 : vector<512x512xf32>
    %cst_32 = arith.constant 0.000000e+00 : f32
    %31 = vector.broadcast %cst_32 : f32 to vector<512x512xf32>
    %32 = arith.maximumf %30, %31 : vector<512x512xf32>
    %33 = arith.truncf %32 : vector<512x512xf32> to vector<512x512xbf16>
    %34 = vector.shape_cast %33 : vector<512x512xbf16> to vector<8x2x32x512xbf16>
    %35 = vector.extract_strided_slice %34 {offsets = [0, 0, 0, 0], sizes = [8, 1, 32, 512], strides = [1, 1, 1, 1]} : vector<8x2x32x512xbf16> to vector<8x1x32x512xbf16>
    %36 = vector.shape_cast %35 : vector<8x1x32x512xbf16> to vector<8x32x512xbf16>
    %c1_33 = arith.constant 1 : index
    %c0_34 = arith.constant 0 : index
    %c0_35 = arith.constant 0 : index
    %c0_36 = arith.constant 0 : index
    %37 = vector.load %arg14[%c1_33, %c0_34, %c0_35, %c0_36] : memref<2x9x32x512xbf16, #tpu.memory_space<vmem>>, vector<1x8x32x512xbf16>
    %38 = vector.shape_cast %37 : vector<1x8x32x512xbf16> to vector<8x32x512xbf16>
    %39 = vector.shape_cast %36 : vector<8x32x512xbf16> to vector<1x8x32x512xbf16>
    tpu.vector_store %arg14[%c1_33, %c0_34, %c0_35, %c0_36], %39 {strides = array<i32>} : memref<2x9x32x512xbf16, #tpu.memory_space<vmem>>, vector<1x8x32x512xbf16>,
    %40 = vector.extract_strided_slice %34 {offsets = [0, 1, 0, 0], sizes = [8, 1, 32, 512], strides = [1, 1, 1, 1]} : vector<8x2x32x512xbf16> to vector<8x1x32x512xbf16>
    %41 = vector.shape_cast %40 : vector<8x1x32x512xbf16> to vector<8x32x512xbf16>
    %c0_37 = arith.constant 0 : index
    %c1_38 = arith.constant 1 : index
    %c0_39 = arith.constant 0 : index
    %c0_40 = arith.constant 0 : index
    %42 = vector.load %arg14[%c0_37, %c1_38, %c0_39, %c0_40] : memref<2x9x32x512xbf16, #tpu.memory_space<vmem>>, vector<1x8x32x512xbf16>
    %43 = vector.shape_cast %42 : vector<1x8x32x512xbf16> to vector<8x32x512xbf16>
    %44 = vector.shape_cast %41 : vector<8x32x512xbf16> to vector<1x8x32x512xbf16>
    tpu.vector_store %arg14[%c0_37, %c1_38, %c0_39, %c0_40], %44 {strides = array<i32>} : memref<2x9x32x512xbf16, #tpu.memory_space<vmem>>, vector<1x8x32x512xbf16>,
    %c0_41 = arith.constant 0 : index
    %c0_42 = arith.constant 0 : index
    %c0_43 = arith.constant 0 : index
    %c0_44 = arith.constant 0 : index
    %45 = vector.load %arg14[%c0_41, %c0_42, %c0_43, %c0_44] : memref<2x9x32x512xbf16, #tpu.memory_space<vmem>>, vector<1x8x32x256xbf16>
    %46 = vector.shape_cast %45 : vector<1x8x32x256xbf16> to vector<8x32x256xbf16>
    %47 = vector.shape_cast %46 : vector<8x32x256xbf16> to vector<256x256xbf16>
    %c0_45 = arith.constant 0 : index
    %c0_46 = arith.constant 0 : index
    %c0_47 = arith.constant 0 : index
    %48 = vector.load %arg4[%c0_45, %c0_46, %c0_47] : memref<3x256x256xbf16, #tpu.memory_space<vmem>>, vector<1x256x256xbf16>
    %49 = vector.shape_cast %48 : vector<1x256x256xbf16> to vector<256x256xbf16>
    %cst_48 = arith.constant dense<0.000000e+00> : vector<256x256xf32>
    %50 = tpu.matmul %47, %49, %cst_48 {dimension_numbers = #tpu.dot_dimension_numbers<[1], [0], [0], [1], [0, 0, 1, 1], [], []>} : vector<256x256xbf16>, vector<256x256xbf16>, vector<256x256xf32> -> vector<256x256xf32>
    %c1_49 = arith.constant 1 : index
    %c0_50 = arith.constant 0 : index
    %c0_51 = arith.constant 0 : index
    %c0_52 = arith.constant 0 : index
    %51 = vector.load %arg14[%c1_49, %c0_50, %c0_51, %c0_52] : memref<2x9x32x512xbf16, #tpu.memory_space<vmem>>, vector<1x8x32x256xbf16>
    %52 = vector.shape_cast %51 : vector<1x8x32x256xbf16> to vector<8x32x256xbf16>
    %53 = vector.shape_cast %52 : vector<8x32x256xbf16> to vector<256x256xbf16>
    %c1_53 = arith.constant 1 : index
    %c0_54 = arith.constant 0 : index
    %c0_55 = arith.constant 0 : index
    %54 = vector.load %arg4[%c1_53, %c0_54, %c0_55] : memref<3x256x256xbf16, #tpu.memory_space<vmem>>, vector<1x256x256xbf16>
    %55 = vector.shape_cast %54 : vector<1x256x256xbf16> to vector<256x256xbf16>
    %cst_56 = arith.constant dense<0.000000e+00> : vector<256x256xf32>
    %56 = tpu.matmul %53, %55, %cst_56 {dimension_numbers = #tpu.dot_dimension_numbers<[1], [0], [0], [1], [0, 0, 1, 1], [], []>} : vector<256x256xbf16>, vector<256x256xbf16>, vector<256x256xf32> -> vector<256x256xf32>
    %57 = arith.addf %50, %56 : vector<256x256xf32>
    %c0_57 = arith.constant 0 : index
    %c1_58 = arith.constant 1 : index
    %c0_59 = arith.constant 0 : index
    %c0_60 = arith.constant 0 : index
    %58 = vector.load %arg14[%c0_57, %c1_58, %c0_59, %c0_60] : memref<2x9x32x512xbf16, #tpu.memory_space<vmem>>, vector<1x8x32x256xbf16>
    %59 = vector.shape_cast %58 : vector<1x8x32x256xbf16> to vector<8x32x256xbf16>
    %60 = vector.shape_cast %59 : vector<8x32x256xbf16> to vector<256x256xbf16>
    %c2_61 = arith.constant 2 : index
    %c0_62 = arith.constant 0 : index
    %c0_63 = arith.constant 0 : index
    %61 = vector.load %arg4[%c2_61, %c0_62, %c0_63] : memref<3x256x256xbf16, #tpu.memory_space<vmem>>, vector<1x256x256xbf16>
    %62 = vector.shape_cast %61 : vector<1x256x256xbf16> to vector<256x256xbf16>
    %cst_64 = arith.constant dense<0.000000e+00> : vector<256x256xf32>
    %63 = tpu.matmul %60, %62, %cst_64 {dimension_numbers = #tpu.dot_dimension_numbers<[1], [0], [0], [1], [0, 0, 1, 1], [], []>} : vector<256x256xbf16>, vector<256x256xbf16>, vector<256x256xf32> -> vector<256x256xf32>
    %64 = arith.addf %57, %63 : vector<256x256xf32>
    %c0_65 = arith.constant 0 : index
    %c0_66 = arith.constant 0 : index
    %65 = vector.load %arg10[%c0_65, %c0_66] : memref<1x256xf32, #tpu.memory_space<vmem>>, vector<1x256xf32>
    %66 = vector.broadcast %65 : vector<1x256xf32> to vector<256x256xf32>
    %67 = arith.addf %64, %66 : vector<256x256xf32>
    %cst_67 = arith.constant 0.000000e+00 : f32
    %68 = vector.broadcast %cst_67 : f32 to vector<256x256xf32>
    %69 = arith.maximumf %67, %68 : vector<256x256xf32>
    %70 = arith.truncf %69 : vector<256x256xf32> to vector<256x256xbf16>
    %71 = vector.shape_cast %70 : vector<256x256xbf16> to vector<4x2x32x256xbf16>
    %72 = vector.extract_strided_slice %71 {offsets = [0, 0, 0, 0], sizes = [4, 1, 32, 256], strides = [1, 1, 1, 1]} : vector<4x2x32x256xbf16> to vector<4x1x32x256xbf16>
    %73 = vector.shape_cast %72 : vector<4x1x32x256xbf16> to vector<4x32x256xbf16>
    %c1_68 = arith.constant 1 : index
    %c0_69 = arith.constant 0 : index
    %c0_70 = arith.constant 0 : index
    %c0_71 = arith.constant 0 : index
    %74 = vector.load %arg15[%c1_68, %c0_69, %c0_70, %c0_71] : memref<2x5x32x512xbf16, #tpu.memory_space<vmem>>, vector<1x4x32x256xbf16>
    %75 = vector.shape_cast %74 : vector<1x4x32x256xbf16> to vector<4x32x256xbf16>
    %76 = vector.shape_cast %73 : vector<4x32x256xbf16> to vector<1x4x32x256xbf16>
    tpu.vector_store %arg15[%c1_68, %c0_69, %c0_70, %c0_71], %76 {strides = array<i32>} : memref<2x5x32x512xbf16, #tpu.memory_space<vmem>>, vector<1x4x32x256xbf16>,
    %77 = vector.extract_strided_slice %71 {offsets = [0, 1, 0, 0], sizes = [4, 1, 32, 256], strides = [1, 1, 1, 1]} : vector<4x2x32x256xbf16> to vector<4x1x32x256xbf16>
    %78 = vector.shape_cast %77 : vector<4x1x32x256xbf16> to vector<4x32x256xbf16>
    %c0_72 = arith.constant 0 : index
    %c1_73 = arith.constant 1 : index
    %c0_74 = arith.constant 0 : index
    %c0_75 = arith.constant 0 : index
    %79 = vector.load %arg15[%c0_72, %c1_73, %c0_74, %c0_75] : memref<2x5x32x512xbf16, #tpu.memory_space<vmem>>, vector<1x4x32x256xbf16>
    %80 = vector.shape_cast %79 : vector<1x4x32x256xbf16> to vector<4x32x256xbf16>
    %81 = vector.shape_cast %78 : vector<4x32x256xbf16> to vector<1x4x32x256xbf16>
    tpu.vector_store %arg15[%c0_72, %c1_73, %c0_74, %c0_75], %81 {strides = array<i32>} : memref<2x5x32x512xbf16, #tpu.memory_space<vmem>>, vector<1x4x32x256xbf16>,
    %c0_76 = arith.constant 0 : index
    %c0_77 = arith.constant 0 : index
    %c0_78 = arith.constant 0 : index
    %c128 = arith.constant 128 : index
    %82 = vector.load %arg14[%c0_76, %c0_77, %c0_78, %c128] : memref<2x9x32x512xbf16, #tpu.memory_space<vmem>>, vector<1x8x32x384xbf16>
    %83 = vector.shape_cast %82 : vector<1x8x32x384xbf16> to vector<8x32x384xbf16>
    %84 = vector.shape_cast %83 : vector<8x32x384xbf16> to vector<256x384xbf16>
    %c0_79 = arith.constant 0 : index
    %c0_80 = arith.constant 0 : index
    %c0_81 = arith.constant 0 : index
    %85 = vector.load %arg5[%c0_79, %c0_80, %c0_81] : memref<3x384x256xbf16, #tpu.memory_space<vmem>>, vector<1x384x256xbf16>
    %86 = vector.shape_cast %85 : vector<1x384x256xbf16> to vector<384x256xbf16>
    %cst_82 = arith.constant dense<0.000000e+00> : vector<256x256xf32>
    %87 = tpu.matmul %84, %86, %cst_82 {dimension_numbers = #tpu.dot_dimension_numbers<[1], [0], [0], [1], [0, 0, 1, 1], [], []>} : vector<256x384xbf16>, vector<384x256xbf16>, vector<256x256xf32> -> vector<256x256xf32>
    %c1_83 = arith.constant 1 : index
    %c0_84 = arith.constant 0 : index
    %c0_85 = arith.constant 0 : index
    %c128_86 = arith.constant 128 : index
    %88 = vector.load %arg14[%c1_83, %c0_84, %c0_85, %c128_86] : memref<2x9x32x512xbf16, #tpu.memory_space<vmem>>, vector<1x8x32x384xbf16>
    %89 = vector.shape_cast %88 : vector<1x8x32x384xbf16> to vector<8x32x384xbf16>
    %90 = vector.shape_cast %89 : vector<8x32x384xbf16> to vector<256x384xbf16>
    %c1_87 = arith.constant 1 : index
    %c0_88 = arith.constant 0 : index
    %c0_89 = arith.constant 0 : index
    %91 = vector.load %arg5[%c1_87, %c0_88, %c0_89] : memref<3x384x256xbf16, #tpu.memory_space<vmem>>, vector<1x384x256xbf16>
    %92 = vector.shape_cast %91 : vector<1x384x256xbf16> to vector<384x256xbf16>
    %cst_90 = arith.constant dense<0.000000e+00> : vector<256x256xf32>
    %93 = tpu.matmul %90, %92, %cst_90 {dimension_numbers = #tpu.dot_dimension_numbers<[1], [0], [0], [1], [0, 0, 1, 1], [], []>} : vector<256x384xbf16>, vector<384x256xbf16>, vector<256x256xf32> -> vector<256x256xf32>
    %94 = arith.addf %87, %93 : vector<256x256xf32>
    %c0_91 = arith.constant 0 : index
    %c1_92 = arith.constant 1 : index
    %c0_93 = arith.constant 0 : index
    %c128_94 = arith.constant 128 : index
    %95 = vector.load %arg14[%c0_91, %c1_92, %c0_93, %c128_94] : memref<2x9x32x512xbf16, #tpu.memory_space<vmem>>, vector<1x8x32x384xbf16>
    %96 = vector.shape_cast %95 : vector<1x8x32x384xbf16> to vector<8x32x384xbf16>
    %97 = vector.shape_cast %96 : vector<8x32x384xbf16> to vector<256x384xbf16>
    %c2_95 = arith.constant 2 : index
    %c0_96 = arith.constant 0 : index
    %c0_97 = arith.constant 0 : index
    %98 = vector.load %arg5[%c2_95, %c0_96, %c0_97] : memref<3x384x256xbf16, #tpu.memory_space<vmem>>, vector<1x384x256xbf16>
    %99 = vector.shape_cast %98 : vector<1x384x256xbf16> to vector<384x256xbf16>
    %cst_98 = arith.constant dense<0.000000e+00> : vector<256x256xf32>
    %100 = tpu.matmul %97, %99, %cst_98 {dimension_numbers = #tpu.dot_dimension_numbers<[1], [0], [0], [1], [0, 0, 1, 1], [], []>} : vector<256x384xbf16>, vector<384x256xbf16>, vector<256x256xf32> -> vector<256x256xf32>
    %101 = arith.addf %94, %100 : vector<256x256xf32>
    %c0_99 = arith.constant 0 : index
    %c0_100 = arith.constant 0 : index
    %102 = vector.load %arg10[%c0_99, %c0_100] : memref<1x256xf32, #tpu.memory_space<vmem>>, vector<1x256xf32>
    %103 = vector.broadcast %102 : vector<1x256xf32> to vector<256x256xf32>
    %104 = arith.addf %101, %103 : vector<256x256xf32>
    %cst_101 = arith.constant 0.000000e+00 : f32
    %105 = vector.broadcast %cst_101 : f32 to vector<256x256xf32>
    %106 = arith.maximumf %104, %105 : vector<256x256xf32>
    %107 = arith.truncf %106 : vector<256x256xf32> to vector<256x256xbf16>
    %108 = vector.shape_cast %107 : vector<256x256xbf16> to vector<4x2x32x256xbf16>
    %109 = vector.extract_strided_slice %108 {offsets = [0, 0, 0, 0], sizes = [4, 1, 32, 256], strides = [1, 1, 1, 1]} : vector<4x2x32x256xbf16> to vector<4x1x32x256xbf16>
    %110 = vector.shape_cast %109 : vector<4x1x32x256xbf16> to vector<4x32x256xbf16>
    %c1_102 = arith.constant 1 : index
    %c0_103 = arith.constant 0 : index
    %c0_104 = arith.constant 0 : index
    %c256 = arith.constant 256 : index
    %111 = vector.load %arg15[%c1_102, %c0_103, %c0_104, %c256] : memref<2x5x32x512xbf16, #tpu.memory_space<vmem>>, vector<1x4x32x256xbf16>
    %112 = vector.shape_cast %111 : vector<1x4x32x256xbf16> to vector<4x32x256xbf16>
    %113 = vector.shape_cast %110 : vector<4x32x256xbf16> to vector<1x4x32x256xbf16>
    tpu.vector_store %arg15[%c1_102, %c0_103, %c0_104, %c256], %113 {strides = array<i32>} : memref<2x5x32x512xbf16, #tpu.memory_space<vmem>>, vector<1x4x32x256xbf16>,
    %114 = vector.extract_strided_slice %108 {offsets = [0, 1, 0, 0], sizes = [4, 1, 32, 256], strides = [1, 1, 1, 1]} : vector<4x2x32x256xbf16> to vector<4x1x32x256xbf16>
    %115 = vector.shape_cast %114 : vector<4x1x32x256xbf16> to vector<4x32x256xbf16>
    %c0_105 = arith.constant 0 : index
    %c1_106 = arith.constant 1 : index
    %c0_107 = arith.constant 0 : index
    %c256_108 = arith.constant 256 : index
    %116 = vector.load %arg15[%c0_105, %c1_106, %c0_107, %c256_108] : memref<2x5x32x512xbf16, #tpu.memory_space<vmem>>, vector<1x4x32x256xbf16>
    %117 = vector.shape_cast %116 : vector<1x4x32x256xbf16> to vector<4x32x256xbf16>
    %118 = vector.shape_cast %115 : vector<4x32x256xbf16> to vector<1x4x32x256xbf16>
    tpu.vector_store %arg15[%c0_105, %c1_106, %c0_107, %c256_108], %118 {strides = array<i32>} : memref<2x5x32x512xbf16, #tpu.memory_space<vmem>>, vector<1x4x32x256xbf16>,
    %c0_109 = arith.constant 0 : index
    %c0_110 = arith.constant 0 : index
    %c0_111 = arith.constant 0 : index
    %c0_112 = arith.constant 0 : index
    %119 = vector.load %arg15[%c0_109, %c0_110, %c0_111, %c0_112] : memref<2x5x32x512xbf16, #tpu.memory_space<vmem>>, vector<1x4x32x256xbf16>
    %120 = vector.shape_cast %119 : vector<1x4x32x256xbf16> to vector<4x32x256xbf16>
    %121 = vector.shape_cast %120 : vector<4x32x256xbf16> to vector<128x256xbf16>
    %c0_113 = arith.constant 0 : index
    %c0_114 = arith.constant 0 : index
    %c0_115 = arith.constant 0 : index
    %122 = vector.load %arg6[%c0_113, %c0_114, %c0_115] : memref<3x256x256xbf16, #tpu.memory_space<vmem>>, vector<1x256x256xbf16>
    %123 = vector.shape_cast %122 : vector<1x256x256xbf16> to vector<256x256xbf16>
    %cst_116 = arith.constant dense<0.000000e+00> : vector<128x256xf32>
    %124 = tpu.matmul %121, %123, %cst_116 {dimension_numbers = #tpu.dot_dimension_numbers<[1], [0], [0], [1], [0, 0, 1, 1], [], []>} : vector<128x256xbf16>, vector<256x256xbf16>, vector<128x256xf32> -> vector<128x256xf32>
    %c1_117 = arith.constant 1 : index
    %c0_118 = arith.constant 0 : index
    %c0_119 = arith.constant 0 : index
    %c0_120 = arith.constant 0 : index
    %125 = vector.load %arg15[%c1_117, %c0_118, %c0_119, %c0_120] : memref<2x5x32x512xbf16, #tpu.memory_space<vmem>>, vector<1x4x32x256xbf16>
    %126 = vector.shape_cast %125 : vector<1x4x32x256xbf16> to vector<4x32x256xbf16>
    %127 = vector.shape_cast %126 : vector<4x32x256xbf16> to vector<128x256xbf16>
    %c1_121 = arith.constant 1 : index
    %c0_122 = arith.constant 0 : index
    %c0_123 = arith.constant 0 : index
    %128 = vector.load %arg6[%c1_121, %c0_122, %c0_123] : memref<3x256x256xbf16, #tpu.memory_space<vmem>>, vector<1x256x256xbf16>
    %129 = vector.shape_cast %128 : vector<1x256x256xbf16> to vector<256x256xbf16>
    %cst_124 = arith.constant dense<0.000000e+00> : vector<128x256xf32>
    %130 = tpu.matmul %127, %129, %cst_124 {dimension_numbers = #tpu.dot_dimension_numbers<[1], [0], [0], [1], [0, 0, 1, 1], [], []>} : vector<128x256xbf16>, vector<256x256xbf16>, vector<128x256xf32> -> vector<128x256xf32>
    %131 = arith.addf %124, %130 : vector<128x256xf32>
    %c0_125 = arith.constant 0 : index
    %c1_126 = arith.constant 1 : index
    %c0_127 = arith.constant 0 : index
    %c0_128 = arith.constant 0 : index
    %132 = vector.load %arg15[%c0_125, %c1_126, %c0_127, %c0_128] : memref<2x5x32x512xbf16, #tpu.memory_space<vmem>>, vector<1x4x32x256xbf16>
    %133 = vector.shape_cast %132 : vector<1x4x32x256xbf16> to vector<4x32x256xbf16>
    %134 = vector.shape_cast %133 : vector<4x32x256xbf16> to vector<128x256xbf16>
    %c2_129 = arith.constant 2 : index
    %c0_130 = arith.constant 0 : index
    %c0_131 = arith.constant 0 : index
    %135 = vector.load %arg6[%c2_129, %c0_130, %c0_131] : memref<3x256x256xbf16, #tpu.memory_space<vmem>>, vector<1x256x256xbf16>
    %136 = vector.shape_cast %135 : vector<1x256x256xbf16> to vector<256x256xbf16>
    %cst_132 = arith.constant dense<0.000000e+00> : vector<128x256xf32>
    %137 = tpu.matmul %134, %136, %cst_132 {dimension_numbers = #tpu.dot_dimension_numbers<[1], [0], [0], [1], [0, 0, 1, 1], [], []>} : vector<128x256xbf16>, vector<256x256xbf16>, vector<128x256xf32> -> vector<128x256xf32>
    %138 = arith.addf %131, %137 : vector<128x256xf32>
    %c0_133 = arith.constant 0 : index
    %c0_134 = arith.constant 0 : index
    %139 = vector.load %arg11[%c0_133, %c0_134] : memref<1x256xf32, #tpu.memory_space<vmem>>, vector<1x256xf32>
    %140 = vector.broadcast %139 : vector<1x256xf32> to vector<128x256xf32>
    %141 = arith.addf %138, %140 : vector<128x256xf32>
    %cst_135 = arith.constant 0.000000e+00 : f32
    %142 = vector.broadcast %cst_135 : f32 to vector<128x256xf32>
    %143 = arith.maximumf %141, %142 : vector<128x256xf32>
    %144 = arith.truncf %143 : vector<128x256xf32> to vector<128x256xbf16>
    %145 = vector.shape_cast %144 : vector<128x256xbf16> to vector<4x32x256xbf16>
    %c0_136 = arith.constant 0 : index
    %c0_137 = arith.constant 0 : index
    %c0_138 = arith.constant 0 : index
    %146 = vector.load %arg16[%c0_136, %c0_137, %c0_138] : memref<4x32x512xbf16, #tpu.memory_space<vmem>>, vector<4x32x256xbf16>
    tpu.vector_store %arg16[%c0_136, %c0_137, %c0_138], %145 {strides = array<i32>} : memref<4x32x512xbf16, #tpu.memory_space<vmem>>, vector<4x32x256xbf16>,
    %c0_139 = arith.constant 0 : index
    %c0_140 = arith.constant 0 : index
    %c0_141 = arith.constant 0 : index
    %c128_142 = arith.constant 128 : index
    %147 = vector.load %arg15[%c0_139, %c0_140, %c0_141, %c128_142] : memref<2x5x32x512xbf16, #tpu.memory_space<vmem>>, vector<1x4x32x384xbf16>
    %148 = vector.shape_cast %147 : vector<1x4x32x384xbf16> to vector<4x32x384xbf16>
    %149 = vector.shape_cast %148 : vector<4x32x384xbf16> to vector<128x384xbf16>
    %c0_143 = arith.constant 0 : index
    %c0_144 = arith.constant 0 : index
    %c0_145 = arith.constant 0 : index
    %150 = vector.load %arg7[%c0_143, %c0_144, %c0_145] : memref<3x384x256xbf16, #tpu.memory_space<vmem>>, vector<1x384x256xbf16>
    %151 = vector.shape_cast %150 : vector<1x384x256xbf16> to vector<384x256xbf16>
    %cst_146 = arith.constant dense<0.000000e+00> : vector<128x256xf32>
    %152 = tpu.matmul %149, %151, %cst_146 {dimension_numbers = #tpu.dot_dimension_numbers<[1], [0], [0], [1], [0, 0, 1, 1], [], []>} : vector<128x384xbf16>, vector<384x256xbf16>, vector<128x256xf32> -> vector<128x256xf32>
    %c1_147 = arith.constant 1 : index
    %c0_148 = arith.constant 0 : index
    %c0_149 = arith.constant 0 : index
    %c128_150 = arith.constant 128 : index
    %153 = vector.load %arg15[%c1_147, %c0_148, %c0_149, %c128_150] : memref<2x5x32x512xbf16, #tpu.memory_space<vmem>>, vector<1x4x32x384xbf16>
    %154 = vector.shape_cast %153 : vector<1x4x32x384xbf16> to vector<4x32x384xbf16>
    %155 = vector.shape_cast %154 : vector<4x32x384xbf16> to vector<128x384xbf16>
    %c1_151 = arith.constant 1 : index
    %c0_152 = arith.constant 0 : index
    %c0_153 = arith.constant 0 : index
    %156 = vector.load %arg7[%c1_151, %c0_152, %c0_153] : memref<3x384x256xbf16, #tpu.memory_space<vmem>>, vector<1x384x256xbf16>
    %157 = vector.shape_cast %156 : vector<1x384x256xbf16> to vector<384x256xbf16>
    %cst_154 = arith.constant dense<0.000000e+00> : vector<128x256xf32>
    %158 = tpu.matmul %155, %157, %cst_154 {dimension_numbers = #tpu.dot_dimension_numbers<[1], [0], [0], [1], [0, 0, 1, 1], [], []>} : vector<128x384xbf16>, vector<384x256xbf16>, vector<128x256xf32> -> vector<128x256xf32>
    %159 = arith.addf %152, %158 : vector<128x256xf32>
    %c0_155 = arith.constant 0 : index
    %c1_156 = arith.constant 1 : index
    %c0_157 = arith.constant 0 : index
    %c128_158 = arith.constant 128 : index
    %160 = vector.load %arg15[%c0_155, %c1_156, %c0_157, %c128_158] : memref<2x5x32x512xbf16, #tpu.memory_space<vmem>>, vector<1x4x32x384xbf16>
    %161 = vector.shape_cast %160 : vector<1x4x32x384xbf16> to vector<4x32x384xbf16>
    %162 = vector.shape_cast %161 : vector<4x32x384xbf16> to vector<128x384xbf16>
    %c2_159 = arith.constant 2 : index
    %c0_160 = arith.constant 0 : index
    %c0_161 = arith.constant 0 : index
    %163 = vector.load %arg7[%c2_159, %c0_160, %c0_161] : memref<3x384x256xbf16, #tpu.memory_space<vmem>>, vector<1x384x256xbf16>
    %164 = vector.shape_cast %163 : vector<1x384x256xbf16> to vector<384x256xbf16>
    %cst_162 = arith.constant dense<0.000000e+00> : vector<128x256xf32>
    %165 = tpu.matmul %162, %164, %cst_162 {dimension_numbers = #tpu.dot_dimension_numbers<[1], [0], [0], [1], [0, 0, 1, 1], [], []>} : vector<128x384xbf16>, vector<384x256xbf16>, vector<128x256xf32> -> vector<128x256xf32>
    %166 = arith.addf %159, %165 : vector<128x256xf32>
    %c0_163 = arith.constant 0 : index
    %c0_164 = arith.constant 0 : index
    %167 = vector.load %arg11[%c0_163, %c0_164] : memref<1x256xf32, #tpu.memory_space<vmem>>, vector<1x256xf32>
    %168 = vector.broadcast %167 : vector<1x256xf32> to vector<128x256xf32>
    %169 = arith.addf %166, %168 : vector<128x256xf32>
    %cst_165 = arith.constant 0.000000e+00 : f32
    %170 = vector.broadcast %cst_165 : f32 to vector<128x256xf32>
    %171 = arith.maximumf %169, %170 : vector<128x256xf32>
    %172 = arith.truncf %171 : vector<128x256xf32> to vector<128x256xbf16>
    %173 = vector.shape_cast %172 : vector<128x256xbf16> to vector<4x32x256xbf16>
    %c0_166 = arith.constant 0 : index
    %c0_167 = arith.constant 0 : index
    %c256_168 = arith.constant 256 : index
    %174 = vector.load %arg16[%c0_166, %c0_167, %c256_168] : memref<4x32x512xbf16, #tpu.memory_space<vmem>>, vector<4x32x256xbf16>
    tpu.vector_store %arg16[%c0_166, %c0_167, %c256_168], %173 {strides = array<i32>} : memref<4x32x512xbf16, #tpu.memory_space<vmem>>, vector<4x32x256xbf16>,
    %c0_169 = arith.constant 0 : index
    %c0_170 = arith.constant 0 : index
    %c0_171 = arith.constant 0 : index
    %175 = vector.load %arg16[%c0_169, %c0_170, %c0_171] : memref<4x32x512xbf16, #tpu.memory_space<vmem>>, vector<1x32x512xbf16>
    %176 = vector.shape_cast %175 : vector<1x32x512xbf16> to vector<32x512xbf16>
    %c0_172 = arith.constant 0 : index
    %c0_173 = arith.constant 0 : index
    %177 = vector.load %arg8[%c0_172, %c0_173] : memref<512x16xbf16, #tpu.memory_space<vmem>>, vector<512x4xbf16>
    %cst_174 = arith.constant dense<0.000000e+00> : vector<32x4xf32>
    %178 = tpu.matmul %176, %177, %cst_174 {dimension_numbers = #tpu.dot_dimension_numbers<[1], [0], [0], [1], [0, 0, 1, 1], [], []>} : vector<32x512xbf16>, vector<512x4xbf16>, vector<32x4xf32> -> vector<32x4xf32>
    %c1_175 = arith.constant 1 : index
    %c0_176 = arith.constant 0 : index
    %c0_177 = arith.constant 0 : index
    %179 = vector.load %arg16[%c1_175, %c0_176, %c0_177] : memref<4x32x512xbf16, #tpu.memory_space<vmem>>, vector<1x32x512xbf16>
    %180 = vector.shape_cast %179 : vector<1x32x512xbf16> to vector<32x512xbf16>
    %c0_178 = arith.constant 0 : index
    %c4 = arith.constant 4 : index
    %181 = vector.load %arg8[%c0_178, %c4] : memref<512x16xbf16, #tpu.memory_space<vmem>>, vector<512x4xbf16>
    %cst_179 = arith.constant dense<0.000000e+00> : vector<32x4xf32>
    %182 = tpu.matmul %180, %181, %cst_179 {dimension_numbers = #tpu.dot_dimension_numbers<[1], [0], [0], [1], [0, 0, 1, 1], [], []>} : vector<32x512xbf16>, vector<512x4xbf16>, vector<32x4xf32> -> vector<32x4xf32>
    %183 = arith.addf %178, %182 : vector<32x4xf32>
    %c2_180 = arith.constant 2 : index
    %c0_181 = arith.constant 0 : index
    %c0_182 = arith.constant 0 : index
    %184 = vector.load %arg16[%c2_180, %c0_181, %c0_182] : memref<4x32x512xbf16, #tpu.memory_space<vmem>>, vector<1x32x512xbf16>
    %185 = vector.shape_cast %184 : vector<1x32x512xbf16> to vector<32x512xbf16>
    %c0_183 = arith.constant 0 : index
    %c8 = arith.constant 8 : index
    %186 = vector.load %arg8[%c0_183, %c8] : memref<512x16xbf16, #tpu.memory_space<vmem>>, vector<512x4xbf16>
    %cst_184 = arith.constant dense<0.000000e+00> : vector<32x4xf32>
    %187 = tpu.matmul %185, %186, %cst_184 {dimension_numbers = #tpu.dot_dimension_numbers<[1], [0], [0], [1], [0, 0, 1, 1], [], []>} : vector<32x512xbf16>, vector<512x4xbf16>, vector<32x4xf32> -> vector<32x4xf32>
    %188 = arith.addf %183, %187 : vector<32x4xf32>
    %c3 = arith.constant 3 : index
    %c0_185 = arith.constant 0 : index
    %c0_186 = arith.constant 0 : index
    %189 = vector.load %arg16[%c3, %c0_185, %c0_186] : memref<4x32x512xbf16, #tpu.memory_space<vmem>>, vector<1x32x512xbf16>
    %190 = vector.shape_cast %189 : vector<1x32x512xbf16> to vector<32x512xbf16>
    %c0_187 = arith.constant 0 : index
    %c12 = arith.constant 12 : index
    %191 = vector.load %arg8[%c0_187, %c12] : memref<512x16xbf16, #tpu.memory_space<vmem>>, vector<512x4xbf16>
    %cst_188 = arith.constant dense<0.000000e+00> : vector<32x4xf32>
    %192 = tpu.matmul %190, %191, %cst_188 {dimension_numbers = #tpu.dot_dimension_numbers<[1], [0], [0], [1], [0, 0, 1, 1], [], []>} : vector<32x512xbf16>, vector<512x4xbf16>, vector<32x4xf32> -> vector<32x4xf32>
    %193 = arith.addf %188, %192 : vector<32x4xf32>
    %c0_189 = arith.constant 0 : index
    %c0_190 = arith.constant 0 : index
    %194 = vector.load %arg12[%c0_189, %c0_190] : memref<1x4xf32, #tpu.memory_space<vmem>>, vector<1x4xf32>
    %195 = vector.broadcast %194 : vector<1x4xf32> to vector<32x4xf32>
    %196 = arith.addf %193, %195 : vector<32x4xf32>
    %197 = vector.extract_strided_slice %196 {offsets = [0, 0], sizes = [32, 2], strides = [1, 1]} : vector<32x4xf32> to vector<32x2xf32>
    %198 = vector.extract_strided_slice %196 {offsets = [0, 2], sizes = [32, 2], strides = [1, 1]} : vector<32x4xf32> to vector<32x2xf32>
    %cst_191 = arith.constant 5.000000e-01 : f32
    %199 = vector.broadcast %cst_191 : f32 to vector<32x2xf32>
    %200 = arith.mulf %199, %198 : vector<32x2xf32>
    %201 = math.exp %200 : vector<32x2xf32>
    %c0_192 = arith.constant 0 : index
    %c0_193 = arith.constant 0 : index
    %202 = vector.load %arg2[%c0_192, %c0_193] : memref<32x2xf32, #tpu.memory_space<vmem>>, vector<32x2xf32>
    %203 = arith.mulf %201, %202 : vector<32x2xf32>
    %204 = arith.addf %197, %203 : vector<32x2xf32>
    %c0_194 = arith.constant 0 : index
    %c0_195 = arith.constant 0 : index
    %205 = vector.load %arg13[%c0_194, %c0_195] : memref<32x8xf32, #tpu.memory_space<vmem>>, vector<32x2xf32>
    tpu.vector_store %arg13[%c0_194, %c0_195], %204 {strides = array<i32>} : memref<32x8xf32, #tpu.memory_space<vmem>>, vector<32x2xf32>,
    %c0_196 = arith.constant 0 : index
    %c2_197 = arith.constant 2 : index
    %206 = vector.load %arg13[%c0_196, %c2_197] : memref<32x8xf32, #tpu.memory_space<vmem>>, vector<32x4xf32>
    tpu.vector_store %arg13[%c0_196, %c2_197], %196 {strides = array<i32>} : memref<32x8xf32, #tpu.memory_space<vmem>>, vector<32x4xf32>,
    %cst_198 = arith.constant 0.000000e+00 : f32
    %207 = vector.broadcast %cst_198 : f32 to vector<32x2xf32>
    %c0_199 = arith.constant 0 : index
    %c6 = arith.constant 6 : index
    %208 = vector.load %arg13[%c0_199, %c6] : memref<32x8xf32, #tpu.memory_space<vmem>>, vector<32x2xf32>
    tpu.vector_store %arg13[%c0_199, %c6], %207 {strides = array<i32>} : memref<32x8xf32, #tpu.memory_space<vmem>>, vector<32x2xf32>,
    return
  }
  func.func @transform_0(%arg0: i32) -> (i32, i32, i32, i32) {
    %c0_i32 = arith.constant 0 : i32
    %c0_i32_0 = arith.constant 0 : i32
    %c0_i32_1 = arith.constant 0 : i32
    %c0_i32_2 = arith.constant 0 : i32
    return %c0_i32, %c0_i32_0, %arg0, %c0_i32_1 : i32, i32, i32, i32
  }
  func.func @transform_1(%arg0: i32) -> (i32, i32) {
    %c0_i32 = arith.constant 0 : i32
    %c0_i32_0 = arith.constant 0 : i32
    return %arg0, %c0_i32 : i32, i32
  }
  func.func @transform_2(%arg0: i32) -> (i32, i32, i32) {
    %c0_i32 = arith.constant 0 : i32
    %c0_i32_0 = arith.constant 0 : i32
    %c0_i32_1 = arith.constant 0 : i32
    %c0_i32_2 = arith.constant 0 : i32
    return %c0_i32, %c0_i32_0, %c0_i32_1 : i32, i32, i32
  }
  func.func @transform_3(%arg0: i32) -> (i32, i32, i32) {
    %c0_i32 = arith.constant 0 : i32
    %c0_i32_0 = arith.constant 0 : i32
    %c0_i32_1 = arith.constant 0 : i32
    %c0_i32_2 = arith.constant 0 : i32
    return %c0_i32, %c0_i32_0, %c0_i32_1 : i32, i32, i32
  }
  func.func @transform_4(%arg0: i32) -> (i32, i32, i32) {
    %c0_i32 = arith.constant 0 : i32
    %c0_i32_0 = arith.constant 0 : i32
    %c0_i32_1 = arith.constant 0 : i32
    %c0_i32_2 = arith.constant 0 : i32
    return %c0_i32, %c0_i32_0, %c0_i32_1 : i32, i32, i32
  }
  func.func @transform_5(%arg0: i32) -> (i32, i32, i32) {
    %c0_i32 = arith.constant 0 : i32
    %c0_i32_0 = arith.constant 0 : i32
    %c0_i32_1 = arith.constant 0 : i32
    %c0_i32_2 = arith.constant 0 : i32
    return %c0_i32, %c0_i32_0, %c0_i32_1 : i32, i32, i32
  }
  func.func @transform_6(%arg0: i32) -> (i32, i32, i32) {
    %c0_i32 = arith.constant 0 : i32
    %c0_i32_0 = arith.constant 0 : i32
    %c0_i32_1 = arith.constant 0 : i32
    %c0_i32_2 = arith.constant 0 : i32
    return %c0_i32, %c0_i32_0, %c0_i32_1 : i32, i32, i32
  }
  func.func @transform_7(%arg0: i32) -> (i32, i32) {
    %c0_i32 = arith.constant 0 : i32
    %c0_i32_0 = arith.constant 0 : i32
    %c0_i32_1 = arith.constant 0 : i32
    return %c0_i32, %c0_i32_0 : i32, i32
  }
  func.func @transform_8(%arg0: i32) -> (i32, i32) {
    %c0_i32 = arith.constant 0 : i32
    %c0_i32_0 = arith.constant 0 : i32
    %c0_i32_1 = arith.constant 0 : i32
    return %c0_i32, %c0_i32_0 : i32, i32
  }
  func.func @transform_9(%arg0: i32) -> (i32, i32) {
    %c0_i32 = arith.constant 0 : i32
    %c0_i32_0 = arith.constant 0 : i32
    %c0_i32_1 = arith.constant 0 : i32
    return %c0_i32, %c0_i32_0 : i32, i32
  }
  func.func @transform_10(%arg0: i32) -> (i32, i32) {
    %c0_i32 = arith.constant 0 : i32
    %c0_i32_0 = arith.constant 0 : i32
    %c0_i32_1 = arith.constant 0 : i32
    return %c0_i32, %c0_i32_0 : i32, i32
  }
  func.func @transform_11(%arg0: i32) -> (i32, i32) {
    %c0_i32 = arith.constant 0 : i32
    %c0_i32_0 = arith.constant 0 : i32
    %c0_i32_1 = arith.constant 0 : i32
    return %c0_i32, %c0_i32_0 : i32, i32
  }
  func.func @transform_12(%arg0: i32) -> (i32, i32) {
    %c0_i32 = arith.constant 0 : i32
    %c0_i32_0 = arith.constant 0 : i32
    return %arg0, %c0_i32 : i32, i32
  }
}

</mosaic_0001>

<bundles_post_ra>
// kernel: encoder_vae_forward.1
= control target key start
LH: loop header
LB: loop body
LE: loop exit
PB: predicated region body
PF: predicated region fallthrough
CT: control target
= control target key end

     0   :  { %s17047_s21 = smov 0   ;;  %s17049_s22 = smov 0   ;;  %s21094_s0 = inlined_call_operand.vmem [shape: bf16[2,17,64,32], index: 0, kind: input, shape index: {}]   ;;  %s21095_s1 = inlined_call_operand.vmem [shape: f32[64,2], index: 1, kind: input, shape index: {}]   ;;  %s21096_s2 = inlined_call_operand.vmem [shape: bf16[3,32,512], index: 2, kind: input, shape index: {}]   ;;  %s21097_s3 = inlined_call_operand.vmem [shape: bf16[3,256,256], index: 3, kind: input, shape index: {}]   ;;  %s21098_s4 = inlined_call_operand.vmem [shape: bf16[3,384,256], index: 4, kind: input, shape index: {}]   ;;  %s21099_s5 = inlined_call_operand.vmem [shape: bf16[3,256,256], index: 5, kind: input, shape index: {}]   ;;  %s21100_s6 = inlined_call_operand.vmem [shape: bf16[3,384,256], index: 6, kind: input, shape index: {}]   ;;  %s21101_s7 = inlined_call_operand.vmem [shape: bf16[512,16], index: 7, kind: input, shape index: {}]   ;;  %s21102_s8 = inlined_call_operand.vmem [shape: f32[1,512], index: 8, kind: input, shape index: {}]   ;;  %s21103_s9 = inlined_call_operand.vmem [shape: f32[1,256], index: 9, kind: input, shape index: {}]   ;;  %s21104_s10 = inlined_call_operand.vmem [shape: f32[1,256], index: 10, kind: input, shape index: {}]   ;;  %s21105_s11 = inlined_call_operand.vmem [shape: f32[1,4], index: 11, kind: input, shape index: {}]   ;;  %s21106_s12 = inlined_call_operand.vmem [shape: f32[64,8], index: 12, kind: output, shape index: {}]  }
   0x1   :  { %s17051_s23 = smov 0  }
   0x2 LB: > { %s13283_s24 = sadd.s32 4294967295, %s16973_s23   ;;  %s17064_s25 = sadd.s32 1, %s16973_s23   ;;  %s16973_s23 = sphi %s17051_s23, %s21289_s23   ;;  %s16969_s22 = sphi %s17049_s22, %s21288_s22   ;;  %s16965_s21 = sphi %s17047_s21, %s21287_s21  }
   0x3   : > { %s26_s26 = ssub.s32 %s16973_s23, %s17064_s25  ;;  %s29_s27 = sadd.s32 1, %s16969_s22 }
   0x4   : > { %p27_p0 = scmp.eq.s32.totalorder %s26_s26, 0  ;;  %p36_p1 = scmp.ne.s32.totalorder %s16969_s22, %s16965_s21 }
   0x5   : > { %p37_p2 = scmp.eq.s32.totalorder %s16973_s23, 0  ;;  %p13286_p4 = scmp.ge.s32.totalorder %s16973_s23, 2 }
   0x6   : > { %s17073_s28 = scalar_select %p27_p0, %s16969_s22, %s29_s27  }
   0x7   : > { %p38_p3 = por %p37_p2, %p36_p1  ;;  %354 = sbr.rel (%p13286_p4) target bundleno = 52 (0x34), region = 56 }
   0xe   : > { %357 = sbr.rel (!%p38_p3) target bundleno = 52 (0x34), region = 60  ;;  %s359_s29 = sand.u32 (%p38_p3), 1, %s16969_s22  }
   0xf   : > { %s14585_s30 = sshll.u32 (%p38_p3), %s16973_s23, 4  ;;  %s15994_s13 = smul.u32 (%p38_p3), 544, %s359_s29 }
  0x10   : > { %s17081_s16 = scalar_lea.vmem (%p38_p3), %s21094_s0, %s14585_s30 }
  0x11   : > { %v380_v0 = vld [vmem:[%s17081_s16] sm:$0xff] (%p38_p3)   ;;  %v384_v1 = vld [vmem:[%s17081_s16 + $0x8] sm:$0xff] (%p38_p3)   ;;  %s17089_s17 = scalar_lea.vmem (%p38_p3), [#allocation5], %s15994_s13 }
  0x12   : > { %v388_v2 = vld [vmem:[%s17081_s16 + $0x20] sm:$0xff] (%p38_p3)   ;;  %v392_v3 = vld [vmem:[%s17081_s16 + $0x28] sm:$0xff] (%p38_p3)   ;;  %381 = vst [vmem:[%s17089_s17] sm:$0xff] (%p38_p3), %v380_v0   ;;  %385 = vst [vmem:[%s17089_s17 + $0x8] sm:$0xff] (%p38_p3), %v384_v1  }
  0x13   : > { %v396_v4 = vld [vmem:[%s17081_s16 + $0x40] sm:$0xff] (%p38_p3)   ;;  %v400_v5 = vld [vmem:[%s17081_s16 + $0x48] sm:$0xff] (%p38_p3)   ;;  %389 = vst [vmem:[%s17089_s17 + $0x10] sm:$0xff] (%p38_p3), %v388_v2   ;;  %393 = vst [vmem:[%s17089_s17 + $0x18] sm:$0xff] (%p38_p3), %v392_v3  }
  0x14   : > { %397 = vst [vmem:[%s17089_s17 + $0x20] sm:$0xff] (%p38_p3), %v396_v4   ;;  %401 = vst [vmem:[%s17089_s17 + $0x28] sm:$0xff] (%p38_p3), %v400_v5   ;;  %v404_v6 = vld [vmem:[%s17081_s16 + $0x60] sm:$0xff] (%p38_p3)   ;;  %v408_v7 = vld [vmem:[%s17081_s16 + $0x68] sm:$0xff] (%p38_p3)  }
  0x15   : > { %v412_v8 = vld [vmem:[%s17081_s16 + $0x80] sm:$0xff]   ;;  %405 = vst [vmem:[%s17089_s17 + $0x30] sm:$0xff] %v404_v6   ;;  %409 = vst [vmem:[%s17089_s17 + $0x38] sm:$0xff] %v408_v7   ;;  %v416_v9 = vld [vmem:[%s17081_s16 + $0x88] sm:$0xff]  }
  0x16   : > { %413 = vst [vmem:[%s17089_s17 + $0x40] sm:$0xff] %v412_v8   ;;  %v420_v10 = vld [vmem:[%s17081_s16 + $0xa0] sm:$0xff]   ;;  %v424_v11 = vld [vmem:[%s17081_s16 + $0xa8] sm:$0xff]   ;;  %417 = vst [vmem:[%s17089_s17 + $0x48] sm:$0xff] %v416_v9  }
  0x17   : > { %421 = vst [vmem:[%s17089_s17 + $0x50] sm:$0xff] %v420_v10   ;;  %425 = vst [vmem:[%s17089_s17 + $0x58] sm:$0xff] %v424_v11   ;;  %v428_v12 = vld [vmem:[%s17081_s16 + $0xc0] sm:$0xff]   ;;  %v432_v13 = vld [vmem:[%s17081_s16 + $0xc8] sm:$0xff]  }
  0x18   : > { %v436_v14 = vld [vmem:[%s17081_s16 + $0xe0] sm:$0xff]   ;;  %429 = vst [vmem:[%s17089_s17 + $0x60] sm:$0xff] %v428_v12   ;;  %433 = vst [vmem:[%s17089_s17 + $0x68] sm:$0xff] %v432_v13   ;;  %v440_v15 = vld [vmem:[%s17081_s16 + $0xe8] sm:$0xff]  }
  0x19   : > { %437 = vst [vmem:[%s17089_s17 + $0x70] sm:$0xff] %v436_v14   ;;  %v444_v16 = vld [vmem:[%s17081_s16 + $0x100] sm:$0xff]   ;;  %v448_v17 = vld [vmem:[%s17081_s16 + $0x108] sm:$0xff]   ;;  %441 = vst [vmem:[%s17089_s17 + $0x78] sm:$0xff] %v440_v15  }
  0x1a   : > { %445 = vst [vmem:[%s17089_s17 + $0x80] sm:$0xff] %v444_v16   ;;  %449 = vst [vmem:[%s17089_s17 + $0x88] sm:$0xff] %v448_v17   ;;  %v452_v18 = vld [vmem:[%s17081_s16 + $0x120] sm:$0xff]   ;;  %v456_v19 = vld [vmem:[%s17081_s16 + $0x128] sm:$0xff]  }
  0x1b   : > { %v460_v20 = vld [vmem:[%s17081_s16 + $0x140] sm:$0xff]   ;;  %453 = vst [vmem:[%s17089_s17 + $0x90] sm:$0xff] %v452_v18   ;;  %457 = vst [vmem:[%s17089_s17 + $0x98] sm:$0xff] %v456_v19   ;;  %v464_v21 = vld [vmem:[%s17081_s16 + $0x148] sm:$0xff]  }
  0x1c   : > { %461 = vst [vmem:[%s17089_s17 + $0xa0] sm:$0xff] %v460_v20   ;;  %v468_v22 = vld [vmem:[%s17081_s16 + $0x160] sm:$0xff]   ;;  %v472_v23 = vld [vmem:[%s17081_s16 + $0x168] sm:$0xff]   ;;  %465 = vst [vmem:[%s17089_s17 + $0xa8] sm:$0xff] %v464_v21  }
  0x1d   : > { %469 = vst [vmem:[%s17089_s17 + $0xb0] sm:$0xff] %v468_v22   ;;  %473 = vst [vmem:[%s17089_s17 + $0xb8] sm:$0xff] %v472_v23   ;;  %v476_v24 = vld [vmem:[%s17081_s16 + $0x180] sm:$0xff]   ;;  %v480_v25 = vld [vmem:[%s17081_s16 + $0x188] sm:$0xff]  }
  0x1e   : > { %v484_v26 = vld [vmem:[%s17081_s16 + $0x1a0] sm:$0xff]   ;;  %477 = vst [vmem:[%s17089_s17 + $0xc0] sm:$0xff] %v476_v24   ;;  %481 = vst [vmem:[%s17089_s17 + $0xc8] sm:$0xff] %v480_v25   ;;  %v488_v27 = vld [vmem:[%s17081_s16 + $0x1a8] sm:$0xff]  }
  0x1f   : > { %485 = vst [vmem:[%s17089_s17 + $0xd0] sm:$0xff] %v484_v26   ;;  %v492_v28 = vld [vmem:[%s17081_s16 + $0x1c0] sm:$0xff]   ;;  %v496_v29 = vld [vmem:[%s17081_s16 + $0x1c8] sm:$0xff]   ;;  %489 = vst [vmem:[%s17089_s17 + $0xd8] sm:$0xff] %v488_v27  }
  0x20   : > { %493 = vst [vmem:[%s17089_s17 + $0xe0] sm:$0xff] %v492_v28   ;;  %497 = vst [vmem:[%s17089_s17 + $0xe8] sm:$0xff] %v496_v29   ;;  %v500_v30 = vld [vmem:[%s17081_s16 + $0x1e0] sm:$0xff]   ;;  %v504_v31 = vld [vmem:[%s17081_s16 + $0x1e8] sm:$0xff]  }
  0x21   : > { %v508_v32 = vld [vmem:[%s17081_s16 + $0x200] sm:$0xff]   ;;  %501 = vst [vmem:[%s17089_s17 + $0xf0] sm:$0xff] %v500_v30   ;;  %505 = vst [vmem:[%s17089_s17 + $0xf8] sm:$0xff] %v504_v31   ;;  %v512_v33 = vld [vmem:[%s17081_s16 + $0x208] sm:$0xff]  }
  0x22   : > { %509 = vst [vmem:[%s17089_s17 + $0x100] sm:$0xff] %v508_v32   ;;  %v516_v34 = vld [vmem:[%s17081_s16 + $0x220] sm:$0xff]   ;;  %v520_v35 = vld [vmem:[%s17081_s16 + $0x228] sm:$0xff]   ;;  %513 = vst [vmem:[%s17089_s17 + $0x108] sm:$0xff] %v512_v33  }
  0x23   : > { %517 = vst [vmem:[%s17089_s17 + $0x110] sm:$0xff] %v516_v34   ;;  %521 = vst [vmem:[%s17089_s17 + $0x118] sm:$0xff] %v520_v35   ;;  %v524_v36 = vld [vmem:[%s17081_s16 + $0x240] sm:$0xff]   ;;  %v528_v37 = vld [vmem:[%s17081_s16 + $0x248] sm:$0xff]  }
  0x24   : > { %v532_v38 = vld [vmem:[%s17081_s16 + $0x260] sm:$0xff]   ;;  %525 = vst [vmem:[%s17089_s17 + $0x120] sm:$0xff] %v524_v36   ;;  %529 = vst [vmem:[%s17089_s17 + $0x128] sm:$0xff] %v528_v37   ;;  %v536_v39 = vld [vmem:[%s17081_s16 + $0x268] sm:$0xff]  }
  0x25   : > { %533 = vst [vmem:[%s17089_s17 + $0x130] sm:$0xff] %v532_v38   ;;  %v540_v40 = vld [vmem:[%s17081_s16 + $0x280] sm:$0xff]   ;;  %v544_v41 = vld [vmem:[%s17081_s16 + $0x288] sm:$0xff]   ;;  %537 = vst [vmem:[%s17089_s17 + $0x138] sm:$0xff] %v536_v39  }
  0x26   : > { %541 = vst [vmem:[%s17089_s17 + $0x140] sm:$0xff] %v540_v40   ;;  %545 = vst [vmem:[%s17089_s17 + $0x148] sm:$0xff] %v544_v41   ;;  %v548_v42 = vld [vmem:[%s17081_s16 + $0x2a0] sm:$0xff]   ;;  %v552_v43 = vld [vmem:[%s17081_s16 + $0x2a8] sm:$0xff]  }
  0x27   : > { %v556_v44 = vld [vmem:[%s17081_s16 + $0x2c0] sm:$0xff]   ;;  %549 = vst [vmem:[%s17089_s17 + $0x150] sm:$0xff] %v548_v42   ;;  %553 = vst [vmem:[%s17089_s17 + $0x158] sm:$0xff] %v552_v43   ;;  %v560_v45 = vld [vmem:[%s17081_s16 + $0x2c8] sm:$0xff]  }
  0x28   : > { %557 = vst [vmem:[%s17089_s17 + $0x160] sm:$0xff] %v556_v44   ;;  %v564_v46 = vld [vmem:[%s17081_s16 + $0x2e0] sm:$0xff]   ;;  %v568_v47 = vld [vmem:[%s17081_s16 + $0x2e8] sm:$0xff]   ;;  %561 = vst [vmem:[%s17089_s17 + $0x168] sm:$0xff] %v560_v45  }
  0x29   : > { %565 = vst [vmem:[%s17089_s17 + $0x170] sm:$0xff] %v564_v46   ;;  %569 = vst [vmem:[%s17089_s17 + $0x178] sm:$0xff] %v568_v47   ;;  %v572_v48 = vld [vmem:[%s17081_s16 + $0x300] sm:$0xff]   ;;  %v576_v49 = vld [vmem:[%s17081_s16 + $0x308] sm:$0xff]  }
  0x2a   : > { %v580_v50 = vld [vmem:[%s17081_s16 + $0x320] sm:$0xff]   ;;  %573 = vst [vmem:[%s17089_s17 + $0x180] sm:$0xff] %v572_v48   ;;  %577 = vst [vmem:[%s17089_s17 + $0x188] sm:$0xff] %v576_v49   ;;  %v584_v51 = vld [vmem:[%s17081_s16 + $0x328] sm:$0xff]  }
  0x2b   : > { %581 = vst [vmem:[%s17089_s17 + $0x190] sm:$0xff] %v580_v50   ;;  %v588_v52 = vld [vmem:[%s17081_s16 + $0x340] sm:$0xff]   ;;  %v592_v53 = vld [vmem:[%s17081_s16 + $0x348] sm:$0xff]   ;;  %585 = vst [vmem:[%s17089_s17 + $0x198] sm:$0xff] %v584_v51  }
  0x2c   : > { %589 = vst [vmem:[%s17089_s17 + $0x1a0] sm:$0xff] %v588_v52   ;;  %593 = vst [vmem:[%s17089_s17 + $0x1a8] sm:$0xff] %v592_v53   ;;  %v596_v54 = vld [vmem:[%s17081_s16 + $0x360] sm:$0xff]   ;;  %v600_v55 = vld [vmem:[%s17081_s16 + $0x368] sm:$0xff]  }
  0x2d   : > { %v604_v56 = vld [vmem:[%s17081_s16 + $0x380] sm:$0xff]   ;;  %597 = vst [vmem:[%s17089_s17 + $0x1b0] sm:$0xff] %v596_v54   ;;  %601 = vst [vmem:[%s17089_s17 + $0x1b8] sm:$0xff] %v600_v55   ;;  %v608_v57 = vld [vmem:[%s17081_s16 + $0x388] sm:$0xff]  }
  0x2e   : > { %605 = vst [vmem:[%s17089_s17 + $0x1c0] sm:$0xff] %v604_v56   ;;  %v612_v58 = vld [vmem:[%s17081_s16 + $0x3a0] sm:$0xff]   ;;  %v616_v59 = vld [vmem:[%s17081_s16 + $0x3a8] sm:$0xff]   ;;  %609 = vst [vmem:[%s17089_s17 + $0x1c8] sm:$0xff] %v608_v57  }
  0x2f   : > { %613 = vst [vmem:[%s17089_s17 + $0x1d0] sm:$0xff] %v612_v58   ;;  %617 = vst [vmem:[%s17089_s17 + $0x1d8] sm:$0xff] %v616_v59   ;;  %v620_v60 = vld [vmem:[%s17081_s16 + $0x3c0] sm:$0xff]   ;;  %v624_v61 = vld [vmem:[%s17081_s16 + $0x3c8] sm:$0xff]  }
  0x30   : > { %v628_v62 = vld [vmem:[%s17081_s16 + $0x3e0] sm:$0xff]   ;;  %621 = vst [vmem:[%s17089_s17 + $0x1e0] sm:$0xff] %v620_v60   ;;  %625 = vst [vmem:[%s17089_s17 + $0x1e8] sm:$0xff] %v624_v61   ;;  %v632_v63 = vld [vmem:[%s17081_s16 + $0x3e8] sm:$0xff]  }
  0x31   : > { %629 = vst [vmem:[%s17089_s17 + $0x1f0] sm:$0xff] %v628_v62   ;;  %v636_v0 = vld [vmem:[%s17081_s16 + $0x400] sm:$0xff]   ;;  %v640_v1 = vld [vmem:[%s17081_s16 + $0x408] sm:$0xff]   ;;  %633 = vst [vmem:[%s17089_s17 + $0x1f8] sm:$0xff] %v632_v63  }
  0x32   : > { %637 = vst [vmem:[%s17089_s17 + $0x200] sm:$0xff] %v636_v0   ;;  %641 = vst [vmem:[%s17089_s17 + $0x208] sm:$0xff] %v640_v1   ;;  %v644_v2 = vld [vmem:[%s17081_s16 + $0x420] sm:$0xff]   ;;  %v648_v3 = vld [vmem:[%s17081_s16 + $0x428] sm:$0xff]  }
  0x33   : > { %645 = vst [vmem:[%s17089_s17 + $0x210] sm:$0xff] %v644_v2   ;;  %649 = vst [vmem:[%s17089_s17 + $0x218] sm:$0xff] %v648_v3  }
  0x34 PF: > { %p13289_p5 = scmp.ge.s32.totalorder %s16973_s23, 1  ;;  %p954_p6 = scmp.lt.s32.totalorder %s16973_s23, 3 }
  0x36   : > { %p955_p7 = pnand %p13289_p5, %p954_p6 }
  0x38   : > { %958 = sbr.rel (%p955_p7) target bundleno = 2918 (0xb66), region = 105 }
  0x3f   : > { %v16027_v4 = vld [vmem:[%s21096_s2 + $0x44] ss:$16 sps:$4 sm:$0xff]   ;;  %s961_s20 = sand.u32 1, %s16965_s21   ;;  %v16029_v5 = vld [vmem:[%s21096_s2 + $0x4c] ss:$16 sps:$4 sm:$0xff]   ;;  %v21107_v6 = vmov 0  }
  0x40   : > { %1512 = vmatprep.mubr.bf16.mxu0 %v21107_v6  ;;  %1865 = vmatprep.mubr.bf16.mxu1 %v21107_v6  ;;  %s15995_s29 = smul.u32 544, %s961_s20  ;;  %v16031_v7 = vld [vmem:[%s21096_s2 + $0x40] ss:$16 sps:$4 sm:$0xff]   ;;  %v16032_v8 = vld [vmem:[%s21096_s2 + $0x48] ss:$16 sps:$4 sm:$0xff]   ;;  %vm1383_vm0 = vcmask 261120  }
  0x41   : > { %1480 = vmatprep.subr.bf16.mxu0 %v16027_v4  ;;  %1833 = vmatprep.subr.bf16.mxu1 %v16029_v5  ;;  %v16033_v9 = vld [vmem:[%s21096_s2 + $0x64] ss:$16 sps:$4 sm:$0xff]   ;;  %v16035_v10 = vld [vmem:[%s21096_s2 + $0x6c] ss:$16 sps:$4 sm:$0xff]   ;;  %v16037_v11 = vld [vmem:[%s21096_s2 + $0x60] ss:$16 sps:$4 sm:$0xff]  }
  0x42   : > { %1481 = vmatpush1.bf16.msra.mxu0 %v16031_v7  ;;  %1834 = vmatpush1.bf16.msra.mxu1 %v16032_v8  ;;  %v16038_v12 = vld [vmem:[%s21096_s2 + $0x68] ss:$16 sps:$4 sm:$0xff]   ;;  %s17250_s30 = scalar_lea.vmem [#allocation5], %s15995_s29  ;;  %v16040_v14 = vld [vmem:[%s21096_s2] ss:$16 sps:$4 sm:$0xff]   ;;  %s16976_s19 = smov 124  }
  0x43   : > { %1482 = vmatprep.subr.bf16.mxu0 %v16033_v9  ;;  %1835 = vmatprep.subr.bf16.mxu1 %v16035_v10  ;;  %v16039_v13 = vld [vmem:[%s17250_s30 + $0x110] sm:$0xff]   ;;  %v16043_v16 = vld [vmem:[%s21096_s2 + $0x8] ss:$16 sps:$4 sm:$0xff]   ;;  %v16045_v17 = vld [vmem:[%s21096_s2 + $0xc] ss:$16 sps:$4 sm:$0xff]   ;;  %s16977_s17 = smov 120  }
  0x44   : > { %v16042_v15 = vld [vmem:[%s21096_s2 + $0x4] ss:$16 sps:$4 sm:$0xff]   ;;  %v16046_v18 = vld [vmem:[%s17250_s30 + $0x118] sm:$0xff]   ;;  %v16062_v20 = vld [vmem:[%s21096_s2 + $0x20] ss:$16 sps:$4 sm:$0xff]   ;;  %s16978_s18 = smov 116  }
  0x45   : > { %v16047_v19 = vld [vmem:[%s17250_s30 + $0x120] sm:$0xff]   ;;  %v16065_v22 = vld [vmem:[%s21096_s2 + $0x28] ss:$16 sps:$4 sm:$0xff]   ;;  %v16067_v23 = vld [vmem:[%s21096_s2 + $0x2c] ss:$16 sps:$4 sm:$0xff]   ;;  %s13290_s16 = sshll.u32 %s13283_s24, 2 }
  0x46   : > { %1483 = vmatpush1.bf16.msra.mxu0 %v16037_v11  ;;  %1836 = vmatpush1.bf16.msra.mxu1 %v16038_v12  ;;  %v16064_v21 = vld [vmem:[%s21096_s2 + $0x24] ss:$16 sps:$4 sm:$0xff]   ;;  %v16048_v24 = vld [vmem:[%s17250_s30 + $0x128] sm:$0xff]   ;;  %v16050_v26 = vld [vmem:[%s17250_s30 + $0x138] sm:$0xff]   ;;  %p1009_p8 = scmp.lt.s32.totalorder %s13290_s16, 7  ;;  %s16979_s26 = smov 2  }
  0x47   : > { %2482 = vmatprep.subr.bf16.mxu0 %v16042_v15  ;;  %2835 = vmatprep.subr.bf16.mxu1 %v16045_v17  ;;  %v16049_v25 = vld [vmem:[%s17250_s30 + $0x130] sm:$0xff]   ;;  %v16051_v27 = vld [vmem:[%s17250_s30 + $0x140] sm:$0xff]   ;;  %v16052_v28 = vld [vmem:[%s17250_s30 + $0x148] sm:$0xff]   ;;  %vm13178_vm1 = vcmask 15360   ;;  %vm13199_vm2 = vcmask 48144   ;;  %vm13204_vm3 = vcmask 64560  }
  0x48   : > { %v16053_v29 = vld [vmem:[%s17250_s30 + $0x150] sm:$0xff]   ;;  %v16054_v30 = vld [vmem:[%s17250_s30 + $0x158] sm:$0xff]   ;;  %v16055_v31 = vld [vmem:[%s17250_s30 + $0x160] sm:$0xff]   ;;  %s21291_s16 = smov (!%p1009_p8, %s13290_s16), 7 }
  0x49   : > { %13406 = vmatmul.mubr.msk.bf16.vlgmr.msra.gmra.mrb[0].mxu0 %vm1383_vm0, %v16039_v13  ;;  %13438 = vmatmul.mubr.msk.bf16.vlgmr.msra.gmra.mrb[0].mxu1 %vm1383_vm0, %v16039_v13  ;;  %v16056_v32 = vld [vmem:[%s17250_s30 + $0x168] sm:$0xff]   ;;  %v16057_v33 = vld [vmem:[%s17250_s30 + $0x170] sm:$0xff]   ;;  %v16058_v34 = vld [vmem:[%s17250_s30 + $0x178] sm:$0xff]   ;;  %s13291_s29 = sshll.u32 %s21291_s16, 3 }
  0x4a   : > { %2483 = vmatpush1.bf16.msra.mxu0 %v16040_v14  ;;  %2836 = vmatpush1.bf16.msra.mxu1 %v16043_v16  ;;  %v16059_v35 = vld [vmem:[%s17250_s30 + $0x180] sm:$0xff]   ;;  %v16060_v36 = vld [vmem:[%s17250_s30 + $0x188] sm:$0xff]   ;;  %v16061_v37 = vld [vmem:[%s17250_s30 + $0x190] sm:$0xff]   ;;  %s1018_s14 = scalar_lea.vmem %s21106_s12, %s13291_s29 }
  0x4b   : > { %1522 = vmatprep.mubr.bf16.mxu0 %v21107_v6  ;;  %1875 = vmatprep.mubr.bf16.mxu1 %v21107_v6  ;;  %v16086_v38 = vld [vmem:[%s21096_s2 + $0x84] ss:$16 sps:$4 sm:$0xff]   ;;  %v16089_v39 = vld [vmem:[%s21096_s2 + $0x8c] ss:$16 sps:$4 sm:$0xff]   ;;  %v16084_v56 = vld [vmem:[%s21096_s2 + $0x80] ss:$16 sps:$4 sm:$0xff]  }
  0x4c   : > { %2484 = vmatprep.subr.bf16.mxu0 %v16064_v21  ;;  %2837 = vmatprep.subr.bf16.mxu1 %v16067_v23  ;;  %v16068_v40 = vld [vmem:[%s17250_s30 + $0x198] sm:$0xff]   ;;  %v16069_v41 = vld [vmem:[%s17250_s30 + $0x1a0] sm:$0xff]   ;;  %v16070_v42 = vld [vmem:[%s17250_s30 + $0x1a8] sm:$0xff]  }
  0x4d   : > { %v16071_v43 = vld [vmem:[%s17250_s30 + $0x1b0] sm:$0xff]   ;;  %v16072_v44 = vld [vmem:[%s17250_s30 + $0x1b8] sm:$0xff]   ;;  %v16073_v45 = vld [vmem:[%s17250_s30 + $0x1c0] sm:$0xff]  }
  0x4e   : > { %2485 = vmatpush1.bf16.msra.mxu0 %v16062_v20  ;;  %2838 = vmatpush1.bf16.msra.mxu1 %v16065_v22  ;;  %v16074_v46 = vld [vmem:[%s17250_s30 + $0x1c8] sm:$0xff]   ;;  %v16075_v47 = vld [vmem:[%s17250_s30 + $0x1d0] sm:$0xff]   ;;  %v16076_v48 = vld [vmem:[%s17250_s30 + $0x1d8] sm:$0xff]  }
  0x4f   : > { %3558 = vmatprep.subr.bf16.mxu0 %v16086_v38  ;;  %3911 = vmatprep.subr.bf16.mxu1 %v16089_v39  ;;  %v16077_v49 = vld [vmem:[%s17250_s30 + $0x1e0] sm:$0xff]   ;;  %v16078_v50 = vld [vmem:[%s17250_s30 + $0x1e8] sm:$0xff]   ;;  %v16079_v51 = vld [vmem:[%s17250_s30 + $0x1f0] sm:$0xff]  }
  0x50   : > { %v16080_v52 = vld [vmem:[%s17250_s30 + $0x1f8] sm:$0xff]   ;;  %v16081_v53 = vld [vmem:[%s17250_s30 + $0x200] sm:$0xff]   ;;  %v16082_v54 = vld [vmem:[%s17250_s30 + $0x208] sm:$0xff]  }
  0x51   : > { %13407 = vmatmul.mubr.msk.bf16.gmra.mrb[4].mxu0 %vm1383_vm0, %v16046_v18  ;;  %13439 = vmatmul.mubr.msk.bf16.gmra.mrb[4].mxu1 %vm1383_vm0, %v16046_v18  ;;  %v16083_v55 = vld [vmem:[%s17250_s30] sm:$0xff]   ;;  %v16087_v57 = vld [vmem:[%s21096_s2 + $0x88] ss:$16 sps:$4 sm:$0xff]   ;;  %v16111_v61 = vld [vmem:[%s21096_s2 + $0xac] ss:$16 sps:$4 sm:$0xff]  }
  0x52   : > { %1532 = vmatprep.mubr.bf16.mxu0 %v21107_v6  ;;  %1885 = vmatprep.mubr.bf16.mxu1 %v21107_v6  ;;  %v16106_v58 = vld [vmem:[%s21096_s2 + $0xa0] ss:$16 sps:$4 sm:$0xff]   ;;  %v16108_v59 = vld [vmem:[%s21096_s2 + $0xa4] ss:$16 sps:$4 sm:$0xff]   ;;  %v16109_v60 = vld [vmem:[%s21096_s2 + $0xa8] ss:$16 sps:$4 sm:$0xff]  }
  0x53   : > { %v16090_v62 = vld [vmem:[%s17250_s30 + $0x8] sm:$0xff]   ;;  %v16091_v63 = vld [vmem:[%s17250_s30 + $0x10] sm:$0xff]   ;;  %v16092_v0 = vld [vmem:[%s17250_s30 + $0x18] sm:$0xff]  }
  0x54   : > { %v16093_v1 = vld [vmem:[%s17250_s30 + $0x20] sm:$0xff]   ;;  %v16094_v2 = vld [vmem:[%s17250_s30 + $0x28] sm:$0xff]   ;;  %v16095_v3 = vld [vmem:[%s17250_s30 + $0x30] sm:$0xff]  }
  0x55   : > { %v16096_v4 = vld [vmem:[%s17250_s30 + $0x38] sm:$0xff]   ;;  %v16097_v5 = vld [vmem:[%s17250_s30 + $0x40] sm:$0xff]   ;;  %v16098_v7 = vld [vmem:[%s17250_s30 + $0x48] sm:$0xff]  }
  0x56   : > { %v16099_v8 = vld [vmem:[%s17250_s30 + $0x50] sm:$0xff]   ;;  %v16100_v9 = vld [vmem:[%s17250_s30 + $0x58] sm:$0xff]   ;;  %v16101_v10 = vld [vmem:[%s17250_s30 + $0x60] sm:$0xff]  }
  0x57   : > { %v16102_v11 = vld [vmem:[%s17250_s30 + $0x68] sm:$0xff]   ;;  %v16103_v12 = vld [vmem:[%s17250_s30 + $0x70] sm:$0xff]   ;;  %v16104_v13 = vld [vmem:[%s17250_s30 + $0x78] sm:$0xff]  }
  0x58   : > { %v16105_v14 = vld [vmem:[%s17250_s30 + $0x80] sm:$0xff]   ;;  %v16112_v15 = vld [vmem:[%s17250_s30 + $0x88] sm:$0xff]   ;;  %v16113_v16 = vld [vmem:[%s17250_s30 + $0x90] sm:$0xff]  }
  0x59   : > { %13408 = vmatmul.mubr.msk.bf16.gmra.mrb[8].mxu0 %vm1383_vm0, %v16047_v19  ;;  %13440 = vmatmul.mubr.msk.bf16.gmra.mrb[8].mxu1 %vm1383_vm0, %v16047_v19  ;;  %v16114_v17 = vld [vmem:[%s17250_s30 + $0x98] sm:$0xff]   ;;  %v16115_v18 = vld [vmem:[%s17250_s30 + $0xa0] sm:$0xff]   ;;  %v16116_v19 = vld [vmem:[%s17250_s30 + $0xa8] sm:$0xff]  }
  0x5a   : > { %1542 = vmatprep.mubr.bf16.mxu0 %v21107_v6  ;;  %1895 = vmatprep.mubr.bf16.mxu1 %v21107_v6  ;;  %v16117_v20 = vld [vmem:[%s17250_s30 + $0xb0] sm:$0xff]   ;;  %v16118_v21 = vld [vmem:[%s17250_s30 + $0xb8] sm:$0xff]   ;;  %v16119_v22 = vld [vmem:[%s17250_s30 + $0xc0] sm:$0xff]  }
  0x5b   : > { %v16120_v23 = vld [vmem:[%s17250_s30 + $0xc8] sm:$0xff]   ;;  %v16154_v38 = vld [vmem:[%s21098_s4 + $0x1b4] ss:$8 sps:$4 sm:$0xff]   ;;  %v16152_v39 = vld [vmem:[%s21098_s4 + $0x1b0] ss:$8 sps:$4 sm:$0xff]  }
  0x61   : > { %13409 = vmatmul.mubr.msk.bf16.gmra.mrb[12].mxu0 %vm1383_vm0, %v16048_v24  ;;  %13441 = vmatmul.mubr.msk.bf16.gmra.mrb[12].mxu1 %vm1383_vm0, %v16048_v24  ;;  %v16139_v24 = vld [vmem:[%s21098_s4 + $0x184] ss:$8 sps:$4 sm:$0xff]  }
  0x62   : > { %1552 = vmatprep.mubr.bf16.mxu0 %v21107_v6  ;;  %1905 = vmatprep.mubr.bf16.mxu1 %v21107_v6 }
  0x69   : > { %13410 = vmatmul.mubr.msk.bf16.gmra.mrb[16].mxu0 %vm1383_vm0, %v16049_v25  ;;  %13442 = vmatmul.mubr.msk.bf16.gmra.mrb[16].mxu1 %vm1383_vm0, %v16049_v25  ;;  %v16121_v25 = vld [vmem:[%s17250_s30 + $0xd0] sm:$0xff]  }
  0x6a   : > { %1562 = vmatprep.mubr.bf16.mxu0 %v21107_v6  ;;  %1915 = vmatprep.mubr.bf16.mxu1 %v21107_v6 }
  0x71   : > { %13411 = vmatmul.mubr.msk.bf16.gmra.mrb[20].mxu0 %vm1383_vm0, %v16050_v26  ;;  %13443 = vmatmul.mubr.msk.bf16.gmra.mrb[20].mxu1 %vm1383_vm0, %v16050_v26  ;;  %v16122_v26 = vld [vmem:[%s17250_s30 + $0xd8] sm:$0xff]  }
  0x72   : > { %1572 = vmatprep.mubr.bf16.mxu0 %v21107_v6  ;;  %1925 = vmatprep.mubr.bf16.mxu1 %v21107_v6 }
  0x79   : > { %13412 = vmatmul.mubr.msk.bf16.gmra.mrb[24].mxu0 %vm1383_vm0, %v16051_v27  ;;  %13444 = vmatmul.mubr.msk.bf16.gmra.mrb[24].mxu1 %vm1383_vm0, %v16051_v27  ;;  %v16123_v27 = vld [vmem:[%s17250_s30 + $0xe0] sm:$0xff]  }
  0x7a   : > { %1582 = vmatprep.mubr.bf16.mxu0 %v21107_v6  ;;  %1935 = vmatprep.mubr.bf16.mxu1 %v21107_v6 }
  0x81   : > { %13413 = vmatmul.mubr.msk.bf16.gmra.mrb[28].mxu0 %vm1383_vm0, %v16052_v28  ;;  %13445 = vmatmul.mubr.msk.bf16.gmra.mrb[28].mxu1 %vm1383_vm0, %v16052_v28  ;;  %v16124_v28 = vld [vmem:[%s17250_s30 + $0xe8] sm:$0xff]  }
  0x82   : > { %1592 = vmatprep.mubr.bf16.mxu0 %v21107_v6  ;;  %1945 = vmatprep.mubr.bf16.mxu1 %v21107_v6 }
  0x89   : > { %13414 = vmatmul.mubr.msk.bf16.gmra.mrb[32].mxu0 %vm1383_vm0, %v16053_v29  ;;  %13446 = vmatmul.mubr.msk.bf16.gmra.mrb[32].mxu1 %vm1383_vm0, %v16053_v29  ;;  %v16125_v29 = vld [vmem:[%s17250_s30 + $0xf0] sm:$0xff]  }
  0x8a   : > { %1602 = vmatprep.mubr.bf16.mxu0 %v21107_v6  ;;  %1955 = vmatprep.mubr.bf16.mxu1 %v21107_v6 }
  0x91   : > { %13415 = vmatmul.mubr.msk.bf16.gmra.mrb[36].mxu0 %vm1383_vm0, %v16054_v30  ;;  %13447 = vmatmul.mubr.msk.bf16.gmra.mrb[36].mxu1 %vm1383_vm0, %v16054_v30  ;;  %v16126_v30 = vld [vmem:[%s17250_s30 + $0xf8] sm:$0xff]  }
  0x92   : > { %1612 = vmatprep.mubr.bf16.mxu0 %v21107_v6  ;;  %1965 = vmatprep.mubr.bf16.mxu1 %v21107_v6 }
  0x99   : > { %13416 = vmatmul.mubr.msk.bf16.gmra.mrb[40].mxu0 %vm1383_vm0, %v16055_v31  ;;  %13448 = vmatmul.mubr.msk.bf16.gmra.mrb[40].mxu1 %vm1383_vm0, %v16055_v31  ;;  %v16127_v31 = vld [vmem:[%s17250_s30 + $0x10] sm:$0xff]  }
  0x9a   : > { %1622 = vmatprep.mubr.bf16.mxu0 %v21107_v6  ;;  %1975 = vmatprep.mubr.bf16.mxu1 %v21107_v6 }
  0xa1   : > { %13417 = vmatmul.mubr.msk.bf16.gmra.mrb[44].mxu0 %vm1383_vm0, %v16056_v32  ;;  %13449 = vmatmul.mubr.msk.bf16.gmra.mrb[44].mxu1 %vm1383_vm0, %v16056_v32  ;;  %v16137_v32 = vld [vmem:[%s21098_s4 + $0x180] ss:$8 sps:$4 sm:$0xff]  }
  0xa2   : > { %1632 = vmatprep.mubr.bf16.mxu0 %v21107_v6  ;;  %1985 = vmatprep.mubr.bf16.mxu1 %v21107_v6 }
  0xa9   : > { %13418 = vmatmul.mubr.msk.bf16.gmra.mrb[48].mxu0 %vm1383_vm0, %v16057_v33  ;;  %13450 = vmatmul.mubr.msk.bf16.gmra.mrb[48].mxu1 %vm1383_vm0, %v16057_v33  ;;  %v16144_v33 = vld [vmem:[%s21098_s4 + $0x194] ss:$8 sps:$4 sm:$0xff]  }
  0xaa   : > { %1642 = vmatprep.mubr.bf16.mxu0 %v21107_v6  ;;  %1995 = vmatprep.mubr.bf16.mxu1 %v21107_v6 }
  0xb1   : > { %13419 = vmatmul.mubr.msk.bf16.gmra.mrb[52].mxu0 %vm1383_vm0, %v16058_v34  ;;  %13451 = vmatmul.mubr.msk.bf16.gmra.mrb[52].mxu1 %vm1383_vm0, %v16058_v34  ;;  %v16142_v34 = vld [vmem:[%s21098_s4 + $0x190] ss:$8 sps:$4 sm:$0xff]  }
  0xb2   : > { %1652 = vmatprep.mubr.bf16.mxu0 %v21107_v6  ;;  %2005 = vmatprep.mubr.bf16.mxu1 %v21107_v6 }
  0xb9   : > { %13420 = vmatmul.mubr.msk.bf16.gmra.mrb[56].mxu0 %vm1383_vm0, %v16059_v35  ;;  %13452 = vmatmul.mubr.msk.bf16.gmra.mrb[56].mxu1 %vm1383_vm0, %v16059_v35  ;;  %v16149_v35 = vld [vmem:[%s21098_s4 + $0x1a4] ss:$8 sps:$4 sm:$0xff]  }
  0xba   : > { %1662 = vmatprep.mubr.bf16.mxu0 %v21107_v6  ;;  %2015 = vmatprep.mubr.bf16.mxu1 %v21107_v6 }
  0xc1   : > { %13421 = vmatmul.mubr.msk.bf16.gmra.mrb[60].mxu0 %vm1383_vm0, %v16060_v36  ;;  %13453 = vmatmul.mubr.msk.bf16.gmra.mrb[60].mxu1 %vm1383_vm0, %v16060_v36  ;;  %v16128_v36 = vld [vmem:[%s17250_s30 + $0x18] sm:$0xff]  }
  0xc2   : > { %1672 = vmatprep.mubr.bf16.mxu0 %v21107_v6  ;;  %2025 = vmatprep.mubr.bf16.mxu1 %v21107_v6 }
  0xc9   : > { %13422 = vmatmul.mubr.msk.bf16.gmra.mrb[64].mxu0 %vm1383_vm0, %v16061_v37  ;;  %13454 = vmatmul.mubr.msk.bf16.gmra.mrb[64].mxu1 %vm1383_vm0, %v16061_v37  ;;  %v16147_v37 = vld [vmem:[%s21098_s4 + $0x1a0] ss:$8 sps:$4 sm:$0xff]  }
  0xca   : > { %1682 = vmatprep.mubr.bf16.mxu0 %v21107_v6  ;;  %2035 = vmatprep.mubr.bf16.mxu1 %v21107_v6 }
  0xd1   : > { %13423 = vmatmul.mubr.msk.bf16.gmra.mrb[68].mxu0 %vm1383_vm0, %v16068_v40  ;;  %13455 = vmatmul.mubr.msk.bf16.gmra.mrb[68].mxu1 %vm1383_vm0, %v16068_v40  ;;  %v16159_v40 = vld [vmem:[%s21098_s4 + $0x1c4] ss:$8 sps:$4 sm:$0xff]  }
  0xd2   : > { %1692 = vmatprep.mubr.bf16.mxu0 %v21107_v6  ;;  %2045 = vmatprep.mubr.bf16.mxu1 %v21107_v6 }
  0xd9   : > { %13424 = vmatmul.mubr.msk.bf16.gmra.mrb[72].mxu0 %vm1383_vm0, %v16069_v41  ;;  %13456 = vmatmul.mubr.msk.bf16.gmra.mrb[72].mxu1 %vm1383_vm0, %v16069_v41  ;;  %v16129_v41 = vld [vmem:[%s17250_s30 + $0x20] sm:$0xff]  }
  0xda   : > { %1702 = vmatprep.mubr.bf16.mxu0 %v21107_v6  ;;  %2055 = vmatprep.mubr.bf16.mxu1 %v21107_v6 }
  0xe1   : > { %13425 = vmatmul.mubr.msk.bf16.gmra.mrb[76].mxu0 %vm1383_vm0, %v16070_v42  ;;  %13457 = vmatmul.mubr.msk.bf16.gmra.mrb[76].mxu1 %vm1383_vm0, %v16070_v42  ;;  %v16157_v42 = vld [vmem:[%s21098_s4 + $0x1c0] ss:$8 sps:$4 sm:$0xff]  }
  0xe2   : > { %1712 = vmatprep.mubr.bf16.mxu0 %v21107_v6  ;;  %2065 = vmatprep.mubr.bf16.mxu1 %v21107_v6 }
  0xe9   : > { %13426 = vmatmul.mubr.msk.bf16.gmra.mrb[80].mxu0 %vm1383_vm0, %v16071_v43  ;;  %13458 = vmatmul.mubr.msk.bf16.gmra.mrb[80].mxu1 %vm1383_vm0, %v16071_v43  ;;  %v16130_v43 = vld [vmem:[%s17250_s30 + $0x28] sm:$0xff]  }
  0xea   : > { %1722 = vmatprep.mubr.bf16.mxu0 %v21107_v6  ;;  %2075 = vmatprep.mubr.bf16.mxu1 %v21107_v6 }
  0xf1   : > { %13427 = vmatmul.mubr.msk.bf16.gmra.mrb[84].mxu0 %vm1383_vm0, %v16072_v44  ;;  %13459 = vmatmul.mubr.msk.bf16.gmra.mrb[84].mxu1 %vm1383_vm0, %v16072_v44  ;;  %v16162_v44 = vld [vmem:[%s21098_s4 + $0x1d0] ss:$8 sps:$4 sm:$0xff]  }
  0xf2   : > { %1732 = vmatprep.mubr.bf16.mxu0 %v21107_v6  ;;  %2085 = vmatprep.mubr.bf16.mxu1 %v21107_v6 }
  0xf9   : > { %13428 = vmatmul.mubr.msk.bf16.gmra.mrb[88].mxu0 %vm1383_vm0, %v16073_v45  ;;  %13460 = vmatmul.mubr.msk.bf16.gmra.mrb[88].mxu1 %vm1383_vm0, %v16073_v45  ;;  %v16164_v45 = vld [vmem:[%s21098_s4 + $0x1d4] ss:$8 sps:$4 sm:$0xff]  }
  0xfa   : > { %1742 = vmatprep.mubr.bf16.mxu0 %v21107_v6  ;;  %2095 = vmatprep.mubr.bf16.mxu1 %v21107_v6 }
 0x101   : > { %13429 = vmatmul.mubr.msk.bf16.gmra.mrb[92].mxu0 %vm1383_vm0, %v16074_v46  ;;  %13461 = vmatmul.mubr.msk.bf16.gmra.mrb[92].mxu1 %vm1383_vm0, %v16074_v46  ;;  %v16131_v46 = vld [vmem:[%s17250_s30 + $0x30] sm:$0xff]  }
 0x102   : > { %1752 = vmatprep.mubr.bf16.mxu0 %v21107_v6  ;;  %2105 = vmatprep.mubr.bf16.mxu1 %v21107_v6 }
 0x109   : > { %13430 = vmatmul.mubr.msk.bf16.gmra.mrb[96].mxu0 %vm1383_vm0, %v16075_v47  ;;  %13462 = vmatmul.mubr.msk.bf16.gmra.mrb[96].mxu1 %vm1383_vm0, %v16075_v47  ;;  %v16132_v47 = vld [vmem:[%s17250_s30 + $0x38] sm:$0xff]  }
 0x10a   : > { %1762 = vmatprep.mubr.bf16.mxu0 %v21107_v6  ;;  %2115 = vmatprep.mubr.bf16.mxu1 %v21107_v6 }
 0x111   : > { %13431 = vmatmul.mubr.msk.bf16.gmra.mrb[100].mxu0 %vm1383_vm0, %v16076_v48  ;;  %13463 = vmatmul.mubr.msk.bf16.gmra.mrb[100].mxu1 %vm1383_vm0, %v16076_v48  ;;  %v16167_v48 = vld [vmem:[%s21098_s4 + $0x1e0] ss:$8 sps:$4 sm:$0xff]  }
 0x112   : > { %1772 = vmatprep.mubr.bf16.mxu0 %v21107_v6  ;;  %2125 = vmatprep.mubr.bf16.mxu1 %v21107_v6 }
 0x119   : > { %13432 = vmatmul.mubr.msk.bf16.gmra.mrb[104].mxu0 %vm1383_vm0, %v16077_v49  ;;  %13464 = vmatmul.mubr.msk.bf16.gmra.mrb[104].mxu1 %vm1383_vm0, %v16077_v49  ;;  %v16169_v49 = vld [vmem:[%s21098_s4 + $0x1e4] ss:$8 sps:$4 sm:$0xff]  }
 0x11a   : > { %1782 = vmatprep.mubr.bf16.mxu0 %v21107_v6  ;;  %2135 = vmatprep.mubr.bf16.mxu1 %v21107_v6 }
 0x121   : > { %13433 = vmatmul.mubr.msk.bf16.gmra.mrb[108].mxu0 %vm1383_vm0, %v16078_v50  ;;  %13465 = vmatmul.mubr.msk.bf16.gmra.mrb[108].mxu1 %vm1383_vm0, %v16078_v50  ;;  %v16133_v50 = vld [vmem:[%s17250_s30 + $0x40] sm:$0xff]  }
 0x122   : > { %1792 = vmatprep.mubr.bf16.mxu0 %v21107_v6  ;;  %2145 = vmatprep.mubr.bf16.mxu1 %v21107_v6 }
 0x129   : > { %13434 = vmatmul.mubr.msk.bf16.gmra.mrb[112].mxu0 %vm1383_vm0, %v16079_v51  ;;  %13466 = vmatmul.mubr.msk.bf16.gmra.mrb[112].mxu1 %vm1383_vm0, %v16079_v51  ;;  %v16134_v51 = vld [vmem:[%s17250_s30 + $0x48] sm:$0xff]  }
 0x12a   : > { %1802 = vmatprep.mubr.bf16.mxu0 %v21107_v6  ;;  %2155 = vmatprep.mubr.bf16.mxu1 %v21107_v6 }
 0x131   : > { %13435 = vmatmul.mubr.msk.bf16.gmra.mrb[116].mxu0 %vm1383_vm0, %v16080_v52  ;;  %13467 = vmatmul.mubr.msk.bf16.gmra.mrb[116].mxu1 %vm1383_vm0, %v16080_v52  ;;  %v16172_v52 = vld [vmem:[%s21098_s4 + $0x1f0] ss:$8 sps:$4 sm:$0xff]  }
 0x132   : > { %1812 = vmatprep.mubr.bf16.mxu0 %v21107_v6  ;;  %2165 = vmatprep.mubr.bf16.mxu1 %v21107_v6 }
 0x139   : > { %13436 = vmatmul.mubr.msk.bf16.gmra.mrb[120].mxu0 %vm1383_vm0, %v16081_v53  ;;  %13468 = vmatmul.mubr.msk.bf16.gmra.mrb[120].mxu1 %vm1383_vm0, %v16081_v53  ;;  %v16174_v53 = vld [vmem:[%s21098_s4 + $0x1f4] ss:$8 sps:$4 sm:$0xff]  }
 0x13a   : > { %1822 = vmatprep.mubr.bf16.mxu0 %v21107_v6  ;;  %2175 = vmatprep.mubr.bf16.mxu1 %v21107_v6 }
 0x141   : > { %13437 = vmatmul.mubr.msk.bf16.gmra.mrb[124].mxu0 %vm1383_vm0, %v16082_v54  ;;  %13469 = vmatmul.mubr.msk.bf16.gmra.mrb[124].mxu1 %vm1383_vm0, %v16082_v54  ;;  %v16135_v54 = vld [vmem:[%s17250_s30 + $0x50] sm:$0xff]  }
 0x142   : > { %2514 = vmatprep.mubr.bf16.mxu0 %v21107_v6  ;;  %2867 = vmatprep.mubr.bf16.mxu1 %v21107_v6 }
 0x149   : > { %13510 = vmatmul.mubr.msk.bf16.vlgmr.msra.gmra.mrb[0].mxu0 %vm1383_vm0, %v16083_v55  ;;  %13542 = vmatmul.mubr.msk.bf16.vlgmr.msra.gmra.mrb[0].mxu1 %vm1383_vm0, %v16083_v55  ;;  %v16178_v55 = vld [vmem:[%s21097_s3 + $0x104] ss:$8 sps:$4 sm:$0xff]  }
 0x14a   : > { %3559 = vmatpush1.bf16.msra.mxu0 %v16084_v56  ;;  %3912 = vmatpush1.bf16.msra.mxu1 %v16087_v57  ;;  %v16176_v56 = vld [vmem:[%s21097_s3 + $0x100] ss:$8 sps:$4 sm:$0xff]   ;;  %v16181_v57 = vld [vmem:[%s21097_s3 + $0x114] ss:$8 sps:$4 sm:$0xff]  }
 0x14b   : > { %2524 = vmatprep.mubr.bf16.mxu0 %v21107_v6  ;;  %2877 = vmatprep.mubr.bf16.mxu1 %v21107_v6 }
 0x14c   : > { %3560 = vmatprep.subr.bf16.mxu0 %v16108_v59  ;;  %3913 = vmatprep.subr.bf16.mxu1 %v16111_v61  ;;  %v16136_v59 = vld [vmem:[%s17250_s30 + $0x58] sm:$0xff]   ;;  %v16183_v61 = vld [vmem:[%s21097_s3 + $0x120] ss:$8 sps:$4 sm:$0xff]  }
 0x14e   : > { %3561 = vmatpush1.bf16.msra.mxu0 %v16106_v58  ;;  %3914 = vmatpush1.bf16.msra.mxu1 %v16109_v60  ;;  %v16179_v58 = vld [vmem:[%s21097_s3 + $0x110] ss:$8 sps:$4 sm:$0xff]   ;;  %v16185_v60 = vld [vmem:[%s21097_s3 + $0x124] ss:$8 sps:$4 sm:$0xff]  }
 0x14f   : > { %7268 = vmatprep.subr.bf16.mxu1 %v16139_v24  ;;  %5601 = vmatprep.subr.bf16.mxu0 %v16178_v55  ;;  %v16213_v24 = vld [vmem:[%s21097_s3 + $0x190] ss:$8 sps:$4 sm:$0xff]   ;;  %v16161_v55 = vld [vmem:[%s17250_s30 + $0xa8] sm:$0xff]  }
 0x151   : > { %13511 = vmatmul.mubr.msk.bf16.gmra.mrb[4].mxu0 %vm1383_vm0, %v16090_v62  ;;  %13543 = vmatmul.mubr.msk.bf16.gmra.mrb[4].mxu1 %vm1383_vm0, %v16090_v62  ;;  %v16188_v62 = vld [vmem:[%s21097_s3 + $0x134] ss:$8 sps:$4 sm:$0xff]  }
 0x152   : > { %2534 = vmatprep.mubr.bf16.mxu0 %v21107_v6  ;;  %2887 = vmatprep.mubr.bf16.mxu1 %v21107_v6 }
 0x159   : > { %13512 = vmatmul.mubr.msk.bf16.gmra.mrb[8].mxu0 %vm1383_vm0, %v16091_v63  ;;  %13544 = vmatmul.mubr.msk.bf16.gmra.mrb[8].mxu1 %vm1383_vm0, %v16091_v63  ;;  %v16189_v63 = vld [vmem:[%s21098_s4 + $0x200] ss:$8 sps:$4 sm:$0xff]  }
 0x15a   : > { %2544 = vmatprep.mubr.bf16.mxu0 %v21107_v6  ;;  %2897 = vmatprep.mubr.bf16.mxu1 %v21107_v6 }
 0x161   : > { %13513 = vmatmul.mubr.msk.bf16.gmra.mrb[12].mxu0 %vm1383_vm0, %v16092_v0  ;;  %13545 = vmatmul.mubr.msk.bf16.gmra.mrb[12].mxu1 %vm1383_vm0, %v16092_v0  ;;  %v16191_v0 = vld [vmem:[%s21098_s4 + $0x204] ss:$8 sps:$4 sm:$0xff]  }
 0x162   : > { %2554 = vmatprep.mubr.bf16.mxu0 %v21107_v6  ;;  %2907 = vmatprep.mubr.bf16.mxu1 %v21107_v6 }
 0x169   : > { %13514 = vmatmul.mubr.msk.bf16.gmra.mrb[16].mxu0 %vm1383_vm0, %v16093_v1  ;;  %13546 = vmatmul.mubr.msk.bf16.gmra.mrb[16].mxu1 %vm1383_vm0, %v16093_v1  ;;  %v16186_v1 = vld [vmem:[%s21097_s3 + $0x130] ss:$8 sps:$4 sm:$0xff]  }
 0x16a   : > { %2564 = vmatprep.mubr.bf16.mxu0 %v21107_v6  ;;  %2917 = vmatprep.mubr.bf16.mxu1 %v21107_v6 }
 0x171   : > { %13515 = vmatmul.mubr.msk.bf16.gmra.mrb[20].mxu0 %vm1383_vm0, %v16094_v2  ;;  %13547 = vmatmul.mubr.msk.bf16.gmra.mrb[20].mxu1 %vm1383_vm0, %v16094_v2  ;;  %v16140_v2 = vld [vmem:[%s17250_s30 + $0x60] sm:$0xff]  }
 0x172   : > { %2574 = vmatprep.mubr.bf16.mxu0 %v21107_v6  ;;  %2927 = vmatprep.mubr.bf16.mxu1 %v21107_v6 }
 0x179   : > { %13516 = vmatmul.mubr.msk.bf16.gmra.mrb[24].mxu0 %vm1383_vm0, %v16095_v3  ;;  %13548 = vmatmul.mubr.msk.bf16.gmra.mrb[24].mxu1 %vm1383_vm0, %v16095_v3  ;;  %v4522_v3 = vlaneseq }
 0x17a   : > { %2584 = vmatprep.mubr.bf16.mxu0 %v21107_v6  ;;  %2937 = vmatprep.mubr.bf16.mxu1 %v21107_v6 }
 0x181   : > { %13517 = vmatmul.mubr.msk.bf16.gmra.mrb[28].mxu0 %vm1383_vm0, %v16096_v4  ;;  %13549 = vmatmul.mubr.msk.bf16.gmra.mrb[28].mxu1 %vm1383_vm0, %v16096_v4  ;;  %v16195_v4 = vld [vmem:[%s21097_s3 + $0x144] ss:$8 sps:$4 sm:$0xff]  }
 0x182   : > { %2594 = vmatprep.mubr.bf16.mxu0 %v21107_v6  ;;  %2947 = vmatprep.mubr.bf16.mxu1 %v21107_v6 }
 0x189   : > { %13518 = vmatmul.mubr.msk.bf16.gmra.mrb[32].mxu0 %vm1383_vm0, %v16097_v5  ;;  %13550 = vmatmul.mubr.msk.bf16.gmra.mrb[32].mxu1 %vm1383_vm0, %v16097_v5  ;;  %v17752_v5 = vshrl.u32 %v4522_v3, 7 }
 0x18a   : > { %2604 = vmatprep.mubr.bf16.mxu0 %v21107_v6  ;;  %2957 = vmatprep.mubr.bf16.mxu1 %v21107_v6 }
 0x191   : > { %13519 = vmatmul.mubr.msk.bf16.gmra.mrb[36].mxu0 %vm1383_vm0, %v16098_v7  ;;  %13551 = vmatmul.mubr.msk.bf16.gmra.mrb[36].mxu1 %vm1383_vm0, %v16098_v7  ;;  %v16193_v7 = vld [vmem:[%s21097_s3 + $0x140] ss:$8 sps:$4 sm:$0xff]  }
 0x192   : > { %2614 = vmatprep.mubr.bf16.mxu0 %v21107_v6  ;;  %2967 = vmatprep.mubr.bf16.mxu1 %v21107_v6 }
 0x199   : > { %13520 = vmatmul.mubr.msk.bf16.gmra.mrb[40].mxu0 %vm1383_vm0, %v16099_v8  ;;  %13552 = vmatmul.mubr.msk.bf16.gmra.mrb[40].mxu1 %vm1383_vm0, %v16099_v8  ;;  %v17764_v8 = vld [vmem:[%s21102_s8] sm:$0xf] }
 0x19a   : > { %2624 = vmatprep.mubr.bf16.mxu0 %v21107_v6  ;;  %2977 = vmatprep.mubr.bf16.mxu1 %v21107_v6 }
 0x1a1   : > { %13521 = vmatmul.mubr.msk.bf16.gmra.mrb[44].mxu0 %vm1383_vm0, %v16100_v9  ;;  %13553 = vmatmul.mubr.msk.bf16.gmra.mrb[44].mxu1 %vm1383_vm0, %v16100_v9  ;;  %v4536_v9 = vsub.s32 3, %v17752_v5 }
 0x1a2   : > { %2634 = vmatprep.mubr.bf16.mxu0 %v21107_v6  ;;  %2987 = vmatprep.mubr.bf16.mxu1 %v21107_v6 }
 0x1a9   : > { %13522 = vmatmul.mubr.msk.bf16.gmra.mrb[48].mxu0 %vm1383_vm0, %v16101_v10  ;;  %13554 = vmatmul.mubr.msk.bf16.gmra.mrb[48].mxu1 %vm1383_vm0, %v16101_v10  ;;  %v16198_v10 = vld [vmem:[%s21097_s3 + $0x154] ss:$8 sps:$4 sm:$0xff]  }
 0x1aa   : > { %2644 = vmatprep.mubr.bf16.mxu0 %v21107_v6  ;;  %2997 = vmatprep.mubr.bf16.mxu1 %v21107_v6 }
 0x1b1   : > { %13523 = vmatmul.mubr.msk.bf16.gmra.mrb[52].mxu0 %vm1383_vm0, %v16102_v11  ;;  %13555 = vmatmul.mubr.msk.bf16.gmra.mrb[52].mxu1 %vm1383_vm0, %v16102_v11  ;;  %v17771_v11 = vrot.slane %v17764_v8, %v4536_v9 }
 0x1b2   : > { %2654 = vmatprep.mubr.bf16.mxu0 %v21107_v6  ;;  %3007 = vmatprep.mubr.bf16.mxu1 %v21107_v6 }
 0x1b9   : > { %13524 = vmatmul.mubr.msk.bf16.gmra.mrb[56].mxu0 %vm1383_vm0, %v16103_v12  ;;  %13556 = vmatmul.mubr.msk.bf16.gmra.mrb[56].mxu1 %vm1383_vm0, %v16103_v12  ;;  %v16196_v12 = vld [vmem:[%s21097_s3 + $0x150] ss:$8 sps:$4 sm:$0xff]  }
 0x1ba   : > { %2664 = vmatprep.mubr.bf16.mxu0 %v21107_v6  ;;  %3017 = vmatprep.mubr.bf16.mxu1 %v21107_v6 }
 0x1c1   : > { %13525 = vmatmul.mubr.msk.bf16.gmra.mrb[60].mxu0 %vm1383_vm0, %v16104_v13  ;;  %13557 = vmatmul.mubr.msk.bf16.gmra.mrb[60].mxu1 %vm1383_vm0, %v16104_v13  ;;  %v16141_v13 = vld [vmem:[%s17250_s30 + $0x68] sm:$0xff]  }
 0x1c2   : > { %2674 = vmatprep.mubr.bf16.mxu0 %v21107_v6  ;;  %3027 = vmatprep.mubr.bf16.mxu1 %v21107_v6 }
 0x1c9   : > { %13526 = vmatmul.mubr.msk.bf16.gmra.mrb[64].mxu0 %vm1383_vm0, %v16105_v14  ;;  %13558 = vmatmul.mubr.msk.bf16.gmra.mrb[64].mxu1 %vm1383_vm0, %v16105_v14  ;;  %v16202_v14 = vld [vmem:[%s21097_s3 + $0x164] ss:$8 sps:$4 sm:$0xff]  }
 0x1ca   : > { %2684 = vmatprep.mubr.bf16.mxu0 %v21107_v6  ;;  %3037 = vmatprep.mubr.bf16.mxu1 %v21107_v6 }
 0x1d1   : > { %13527 = vmatmul.mubr.msk.bf16.gmra.mrb[68].mxu0 %vm1383_vm0, %v16112_v15  ;;  %13559 = vmatmul.mubr.msk.bf16.gmra.mrb[68].mxu1 %vm1383_vm0, %v16112_v15  ;;  %v16200_v15 = vld [vmem:[%s21097_s3 + $0x160] ss:$8 sps:$4 sm:$0xff]  }
 0x1d2   : > { %2694 = vmatprep.mubr.bf16.mxu0 %v21107_v6  ;;  %3047 = vmatprep.mubr.bf16.mxu1 %v21107_v6 }
 0x1d9   : > { %13528 = vmatmul.mubr.msk.bf16.gmra.mrb[72].mxu0 %vm1383_vm0, %v16113_v16  ;;  %13560 = vmatmul.mubr.msk.bf16.gmra.mrb[72].mxu1 %vm1383_vm0, %v16113_v16  ;;  %v16205_v16 = vld [vmem:[%s21097_s3 + $0x174] ss:$8 sps:$4 sm:$0xff]  }
 0x1da   : > { %2704 = vmatprep.mubr.bf16.mxu0 %v21107_v6  ;;  %3057 = vmatprep.mubr.bf16.mxu1 %v21107_v6 }
 0x1e1   : > { %13529 = vmatmul.mubr.msk.bf16.gmra.mrb[76].mxu0 %vm1383_vm0, %v16114_v17  ;;  %13561 = vmatmul.mubr.msk.bf16.gmra.mrb[76].mxu1 %vm1383_vm0, %v16114_v17  ;;  %v16203_v17 = vld [vmem:[%s21097_s3 + $0x170] ss:$8 sps:$4 sm:$0xff]  }
 0x1e2   : > { %2714 = vmatprep.mubr.bf16.mxu0 %v21107_v6  ;;  %3067 = vmatprep.mubr.bf16.mxu1 %v21107_v6 }
 0x1e9   : > { %13530 = vmatmul.mubr.msk.bf16.gmra.mrb[80].mxu0 %vm1383_vm0, %v16115_v18  ;;  %13562 = vmatmul.mubr.msk.bf16.gmra.mrb[80].mxu1 %vm1383_vm0, %v16115_v18  ;;  %v16145_v18 = vld [vmem:[%s17250_s30 + $0x70] sm:$0xff]  }
 0x1ea   : > { %2724 = vmatprep.mubr.bf16.mxu0 %v21107_v6  ;;  %3077 = vmatprep.mubr.bf16.mxu1 %v21107_v6 }
 0x1f1   : > { %13531 = vmatmul.mubr.msk.bf16.gmra.mrb[84].mxu0 %vm1383_vm0, %v16116_v19  ;;  %13563 = vmatmul.mubr.msk.bf16.gmra.mrb[84].mxu1 %vm1383_vm0, %v16116_v19  ;;  %v16212_v19 = vld [vmem:[%s21097_s3 + $0x184] ss:$8 sps:$4 sm:$0xff]  }
 0x1f2   : > { %2734 = vmatprep.mubr.bf16.mxu0 %v21107_v6  ;;  %3087 = vmatprep.mubr.bf16.mxu1 %v21107_v6 }
 0x1f9   : > { %13532 = vmatmul.mubr.msk.bf16.gmra.mrb[88].mxu0 %vm1383_vm0, %v16117_v20  ;;  %13564 = vmatmul.mubr.msk.bf16.gmra.mrb[88].mxu1 %vm1383_vm0, %v16117_v20  ;;  %v16210_v20 = vld [vmem:[%s21097_s3 + $0x180] ss:$8 sps:$4 sm:$0xff]  }
 0x1fa   : > { %2744 = vmatprep.mubr.bf16.mxu0 %v21107_v6  ;;  %3097 = vmatprep.mubr.bf16.mxu1 %v21107_v6 }
 0x201   : > { %13533 = vmatmul.mubr.msk.bf16.gmra.mrb[92].mxu0 %vm1383_vm0, %v16118_v21  ;;  %13565 = vmatmul.mubr.msk.bf16.gmra.mrb[92].mxu1 %vm1383_vm0, %v16118_v21  ;;  %v16206_v21 = vld [vmem:[%s21098_s4 + $0x210] ss:$8 sps:$4 sm:$0xff]  }
 0x202   : > { %2754 = vmatprep.mubr.bf16.mxu0 %v21107_v6  ;;  %3107 = vmatprep.mubr.bf16.mxu1 %v21107_v6 }
 0x209   : > { %13534 = vmatmul.mubr.msk.bf16.gmra.mrb[96].mxu0 %vm1383_vm0, %v16119_v22  ;;  %13566 = vmatmul.mubr.msk.bf16.gmra.mrb[96].mxu1 %vm1383_vm0, %v16119_v22  ;;  %v16208_v22 = vld [vmem:[%s21098_s4 + $0x214] ss:$8 sps:$4 sm:$0xff]  }
 0x20a   : > { %2764 = vmatprep.mubr.bf16.mxu0 %v21107_v6  ;;  %3117 = vmatprep.mubr.bf16.mxu1 %v21107_v6 }
 0x211   : > { %13535 = vmatmul.mubr.msk.bf16.gmra.mrb[100].mxu0 %vm1383_vm0, %v16120_v23  ;;  %13567 = vmatmul.mubr.msk.bf16.gmra.mrb[100].mxu1 %vm1383_vm0, %v16120_v23  ;;  %v16215_v23 = vld [vmem:[%s21097_s3 + $0x194] ss:$8 sps:$4 sm:$0xff]  }
 0x212   : > { %2774 = vmatprep.mubr.bf16.mxu0 %v21107_v6  ;;  %3127 = vmatprep.mubr.bf16.mxu1 %v21107_v6 }
 0x219   : > { %13536 = vmatmul.mubr.msk.bf16.gmra.mrb[104].mxu0 %vm1383_vm0, %v16121_v25  ;;  %13568 = vmatmul.mubr.msk.bf16.gmra.mrb[104].mxu1 %vm1383_vm0, %v16121_v25  ;;  %v16146_v25 = vld [vmem:[%s17250_s30 + $0x78] sm:$0xff]  }
 0x21a   : > { %2784 = vmatprep.mubr.bf16.mxu0 %v21107_v6  ;;  %3137 = vmatprep.mubr.bf16.mxu1 %v21107_v6 }
 0x221   : > { %13537 = vmatmul.mubr.msk.bf16.gmra.mrb[108].mxu0 %vm1383_vm0, %v16122_v26  ;;  %13569 = vmatmul.mubr.msk.bf16.gmra.mrb[108].mxu1 %vm1383_vm0, %v16122_v26  ;;  %v16219_v26 = vld [vmem:[%s21097_s3 + $0x1a4] ss:$8 sps:$4 sm:$0xff]  }
 0x222   : > { %2794 = vmatprep.mubr.bf16.mxu0 %v21107_v6  ;;  %3147 = vmatprep.mubr.bf16.mxu1 %v21107_v6 }
 0x229   : > { %13538 = vmatmul.mubr.msk.bf16.gmra.mrb[112].mxu0 %vm1383_vm0, %v16123_v27  ;;  %13570 = vmatmul.mubr.msk.bf16.gmra.mrb[112].mxu1 %vm1383_vm0, %v16123_v27  ;;  %v16222_v27 = vld [vmem:[%s21098_s4 + $0x224] ss:$8 sps:$4 sm:$0xff]  }
 0x22a   : > { %2804 = vmatprep.mubr.bf16.mxu0 %v21107_v6  ;;  %3157 = vmatprep.mubr.bf16.mxu1 %v21107_v6 }
 0x231   : > { %13539 = vmatmul.mubr.msk.bf16.gmra.mrb[116].mxu0 %vm1383_vm0, %v16124_v28  ;;  %13571 = vmatmul.mubr.msk.bf16.gmra.mrb[116].mxu1 %vm1383_vm0, %v16124_v28  ;;  %v16217_v28 = vld [vmem:[%s21097_s3 + $0x1a0] ss:$8 sps:$4 sm:$0xff]  }
 0x232   : > { %2814 = vmatprep.mubr.bf16.mxu0 %v21107_v6  ;;  %3167 = vmatprep.mubr.bf16.mxu1 %v21107_v6 }
 0x239   : > { %13540 = vmatmul.mubr.msk.bf16.gmra.mrb[120].mxu0 %vm1383_vm0, %v16125_v29  ;;  %13572 = vmatmul.mubr.msk.bf16.gmra.mrb[120].mxu1 %vm1383_vm0, %v16125_v29  ;;  %v16220_v29 = vld [vmem:[%s21098_s4 + $0x220] ss:$8 sps:$4 sm:$0xff]  }
 0x23a   : > { %2824 = vmatprep.mubr.bf16.mxu0 %v21107_v6  ;;  %3177 = vmatprep.mubr.bf16.mxu1 %v21107_v6 }
 0x241   : > { %13541 = vmatmul.mubr.msk.bf16.gmra.mrb[124].mxu0 %vm1383_vm0, %v16126_v30  ;;  %13573 = vmatmul.mubr.msk.bf16.gmra.mrb[124].mxu1 %vm1383_vm0, %v16126_v30  ;;  %v16225_v30 = vld [vmem:[%s21097_s3 + $0x1b4] ss:$8 sps:$4 sm:$0xff]  }
 0x242   : > { %3590 = vmatprep.mubr.bf16.mxu0 %v21107_v6  ;;  %3943 = vmatprep.mubr.bf16.mxu1 %v21107_v6 }
 0x249   : > { %13686 = vmatmul.mubr.msk.bf16.vlgmr.msra.gmra.mrb[0].mxu0 %vm1383_vm0, %v16127_v31  ;;  %13718 = vmatmul.mubr.msk.bf16.vlgmr.msra.gmra.mrb[0].mxu1 %vm1383_vm0, %v16127_v31  ;;  %v16228_v31 = vld [vmem:[%s21098_s4 + $0x234] ss:$8 sps:$4 sm:$0xff]  }
 0x24a   : > { %3600 = vmatprep.mubr.bf16.mxu0 %v21107_v6  ;;  %3953 = vmatprep.mubr.bf16.mxu1 %v21107_v6 }
 0x24b   : > { %7269 = vmatpush1.bf16.msra.mxu1 %v16137_v32  ;;  %5602 = vmatpush1.bf16.msra.mxu0 %v16176_v56  ;;  %v16223_v32 = vld [vmem:[%s21097_s3 + $0x1b0] ss:$8 sps:$4 sm:$0xff]  }
 0x24c   : > { %7270 = vmatprep.subr.bf16.mxu1 %v16144_v33  ;;  %5603 = vmatprep.subr.bf16.mxu0 %v16181_v57  ;;  %v16226_v33 = vld [vmem:[%s21098_s4 + $0x230] ss:$8 sps:$4 sm:$0xff]  }
 0x24d   : > { %v16165_v56 = vld [vmem:[%s17250_s30 + $0xb0] sm:$0xff]   ;;  %v16166_v57 = vld [vmem:[%s17250_s30 + $0xb8] sm:$0xff]  }
 0x24f   : > { %7271 = vmatpush1.bf16.msra.mxu1 %v16142_v34  ;;  %5604 = vmatpush1.bf16.msra.mxu0 %v16179_v58  ;;  %v16150_v34 = vld [vmem:[%s17250_s30 + $0x80] sm:$0xff]  }
 0x250   : > { %7272 = vmatprep.subr.bf16.mxu1 %v16149_v35  ;;  %5605 = vmatprep.subr.bf16.mxu0 %v16185_v60  ;;  %v16232_v35 = vld [vmem:[%s21097_s3 + $0x1c4] ss:$8 sps:$4 sm:$0xff]   ;;  %v16175_v60 = vld [vmem:[%s17250_s30 + $0xd0] sm:$0xff]  }
 0x251   : > { %13687 = vmatmul.mubr.msk.bf16.gmra.mrb[4].mxu0 %vm1383_vm0, %v16128_v36  ;;  %13719 = vmatmul.mubr.msk.bf16.gmra.mrb[4].mxu1 %vm1383_vm0, %v16128_v36  ;;  %v16235_v36 = vld [vmem:[%s21098_s4 + $0x244] ss:$8 sps:$4 sm:$0xff]  }
 0x252   : > { %3610 = vmatprep.mubr.bf16.mxu0 %v21107_v6  ;;  %3963 = vmatprep.mubr.bf16.mxu1 %v21107_v6  ;;  %v16170_v58 = vld [vmem:[%s17250_s30 + $0xc0] sm:$0xff]  }
 0x253   : > { %7273 = vmatpush1.bf16.msra.mxu1 %v16147_v37  ;;  %5606 = vmatpush1.bf16.msra.mxu0 %v16183_v61  ;;  %v16230_v37 = vld [vmem:[%s21097_s3 + $0x1c0] ss:$8 sps:$4 sm:$0xff]   ;;  %v16182_v61 = vld [vmem:[%s17250_s30 + $0xd8] sm:$0xff]  }
 0x254   : > { %7274 = vmatprep.subr.bf16.mxu1 %v16154_v38  ;;  %5607 = vmatprep.subr.bf16.mxu0 %v16188_v62  ;;  %v16233_v38 = vld [vmem:[%s21098_s4 + $0x240] ss:$8 sps:$4 sm:$0xff]  }
 0x255   : > { %v16192_v62 = vld [vmem:[%s17250_s30 + $0xe0] sm:$0xff]  }
 0x257   : > { %7275 = vmatpush1.bf16.msra.mxu1 %v16152_v39  ;;  %5608 = vmatpush1.bf16.msra.mxu0 %v16186_v1  ;;  %v16238_v39 = vld [vmem:[%s21097_s3 + $0x1d4] ss:$8 sps:$4 sm:$0xff]   ;;  %v17959_v1 = vsub.s32 1, %v17752_v5 }
 0x258   : > { %7276 = vmatprep.subr.bf16.mxu1 %v16159_v40  ;;  %5609 = vmatprep.subr.bf16.mxu0 %v16195_v4  ;;  %v16241_v40 = vld [vmem:[%s21098_s4 + $0x254] ss:$8 sps:$4 sm:$0xff]  }
 0x259   : > { %13688 = vmatmul.mubr.msk.bf16.gmra.mrb[8].mxu0 %vm1383_vm0, %v16129_v41  ;;  %13720 = vmatmul.mubr.msk.bf16.gmra.mrb[8].mxu1 %vm1383_vm0, %v16129_v41  ;;  %v16236_v41 = vld [vmem:[%s21097_s3 + $0x1d0] ss:$8 sps:$4 sm:$0xff]   ;;  %21153 = vst [vmem:[#allocation7_spill] sm:$0xff] %v17959_v1  ;;  %v17972_v4 = vrot.slane %v17764_v8, %v17959_v1 }
 0x25a   : > { %3620 = vmatprep.mubr.bf16.mxu0 %v21107_v6  ;;  %3973 = vmatprep.mubr.bf16.mxu1 %v21107_v6 }
 0x25b   : > { %7277 = vmatpush1.bf16.msra.mxu1 %v16157_v42  ;;  %5610 = vmatpush1.bf16.msra.mxu0 %v16193_v7  ;;  %v16239_v42 = vld [vmem:[%s21098_s4 + $0x250] ss:$8 sps:$4 sm:$0xff]  }
 0x25c   : > { %7278 = vmatprep.subr.bf16.mxu1 %v16164_v45  ;;  %5611 = vmatprep.subr.bf16.mxu0 %v16198_v10  ;;  %v16248_v45 = vld [vmem:[%s21098_s4 + $0x264] ss:$8 sps:$4 sm:$0xff]  }
 0x25f   : > { %7279 = vmatpush1.bf16.msra.mxu1 %v16162_v44  ;;  %5612 = vmatpush1.bf16.msra.mxu0 %v16196_v12  ;;  %v16245_v44 = vld [vmem:[%s21097_s3 + $0x1e4] ss:$8 sps:$4 sm:$0xff]  }
 0x260   : > { %7280 = vmatprep.subr.bf16.mxu1 %v16169_v49  ;;  %5613 = vmatprep.subr.bf16.mxu0 %v16202_v14  ;;  %v16254_v49 = vld [vmem:[%s21098_s4 + $0x274] ss:$8 sps:$4 sm:$0xff]  }
 0x261   : > { %13689 = vmatmul.mubr.msk.bf16.gmra.mrb[12].mxu0 %vm1383_vm0, %v16130_v43  ;;  %13721 = vmatmul.mubr.msk.bf16.gmra.mrb[12].mxu1 %vm1383_vm0, %v16130_v43  ;;  %v16151_v43 = vld [vmem:[%s17250_s30 + $0x88] sm:$0xff]  }
 0x262   : > { %3630 = vmatprep.mubr.bf16.mxu0 %v21107_v6  ;;  %3983 = vmatprep.mubr.bf16.mxu1 %v21107_v6 }
 0x263   : > { %7281 = vmatpush1.bf16.msra.mxu1 %v16167_v48  ;;  %5614 = vmatpush1.bf16.msra.mxu0 %v16200_v15  ;;  %v16251_v48 = vld [vmem:[%s21097_s3 + $0x1f4] ss:$8 sps:$4 sm:$0xff]   ;;  %v16199_v15 = vld [vmem:[%s17250_s30 + $0xe8] sm:$0xff]  }
 0x264   : > { %7282 = vmatprep.subr.bf16.mxu1 %v16174_v53  ;;  %5615 = vmatprep.subr.bf16.mxu0 %v16205_v16  ;;  %v16156_v53 = vld [vmem:[%s17250_s30 + $0x98] sm:$0xff]  }
 0x267   : > { %7283 = vmatpush1.bf16.msra.mxu1 %v16172_v52  ;;  %5616 = vmatpush1.bf16.msra.mxu0 %v16203_v17  ;;  %v16155_v52 = vld [vmem:[%s17250_s30 + $0x90] sm:$0xff]  }
 0x268   : > { %7284 = vmatprep.subr.bf16.mxu1 %v16191_v0  ;;  %5617 = vmatprep.subr.bf16.mxu0 %v16212_v19  ;;  %v4532_v0 = vsub.s32 2, %v17752_v5 }
 0x269   : > { %13690 = vmatmul.mubr.msk.bf16.gmra.mrb[16].mxu0 %vm1383_vm0, %v16131_v46  ;;  %13722 = vmatmul.mubr.msk.bf16.gmra.mrb[16].mxu1 %vm1383_vm0, %v16131_v46  ;;  %v16243_v46 = vld [vmem:[%s21097_s3 + $0x1e0] ss:$8 sps:$4 sm:$0xff]  }
 0x26a   : > { %3640 = vmatprep.mubr.bf16.mxu0 %v21107_v6  ;;  %3993 = vmatprep.mubr.bf16.mxu1 %v21107_v6  ;;  %v17968_v3 = vrot.slane %v17764_v8, %v4532_v0 }
 0x26b   : > { %7285 = vmatpush1.bf16.msra.mxu1 %v16189_v63  ;;  %5618 = vmatpush1.bf16.msra.mxu0 %v16210_v20  ;;  %v17955_v63 = vsub.s32 0, %v17752_v5  ;;  %v16257_v5 = vld [vmem:[%s21098_s4 + $0x284] ss:$8 sps:$4 sm:$0xff]  }
 0x26c   : > { %7286 = vmatprep.subr.bf16.mxu1 %v16208_v22  ;;  %5619 = vmatprep.subr.bf16.mxu0 %v16215_v23 }
 0x26d   : > { %21152 = vst [vmem:[#allocation6_spill] sm:$0xff] %v17955_v63 }
 0x26f   : > { %7287 = vmatpush1.bf16.msra.mxu1 %v16206_v21  ;;  %5620 = vmatpush1.bf16.msra.mxu0 %v16213_v24 }
 0x270   : > { %5621 = vmatprep.subr.bf16.mxu0 %v16219_v26  ;;  %7288 = vmatprep.subr.bf16.mxu1 %v16222_v27 }
 0x271   : > { %13691 = vmatmul.mubr.msk.bf16.gmra.mrb[20].mxu0 %vm1383_vm0, %v16132_v47  ;;  %13723 = vmatmul.mubr.msk.bf16.gmra.mrb[20].mxu1 %vm1383_vm0, %v16132_v47  ;;  %v16246_v47 = vld [vmem:[%s21098_s4 + $0x260] ss:$8 sps:$4 sm:$0xff]  }
 0x272   : > { %3650 = vmatprep.mubr.bf16.mxu0 %v21107_v6  ;;  %4003 = vmatprep.mubr.bf16.mxu1 %v21107_v6 }
 0x273   : > { %5622 = vmatpush1.bf16.msra.mxu0 %v16217_v28  ;;  %7289 = vmatpush1.bf16.msra.mxu1 %v16220_v29 }
 0x274   : > { %5623 = vmatprep.subr.bf16.mxu0 %v16225_v30  ;;  %7290 = vmatprep.subr.bf16.mxu1 %v16228_v31 }
 0x277   : > { %5624 = vmatpush1.bf16.msra.mxu0 %v16223_v32  ;;  %7291 = vmatpush1.bf16.msra.mxu1 %v16226_v33 }
 0x278   : > { %5625 = vmatprep.subr.bf16.mxu0 %v16232_v35  ;;  %7292 = vmatprep.subr.bf16.mxu1 %v16235_v36 }
 0x279   : > { %13692 = vmatmul.mubr.msk.bf16.gmra.mrb[24].mxu0 %vm1383_vm0, %v16133_v50  ;;  %13724 = vmatmul.mubr.msk.bf16.gmra.mrb[24].mxu1 %vm1383_vm0, %v16133_v50  ;;  %v16249_v50 = vld [vmem:[%s21097_s3 + $0x1f0] ss:$8 sps:$4 sm:$0xff]  }
 0x27a   : > { %3660 = vmatprep.mubr.bf16.mxu0 %v21107_v6  ;;  %4013 = vmatprep.mubr.bf16.mxu1 %v21107_v6 }
 0x27b   : > { %5626 = vmatpush1.bf16.msra.mxu0 %v16230_v37  ;;  %7293 = vmatpush1.bf16.msra.mxu1 %v16233_v38 }
 0x27c   : > { %5627 = vmatprep.subr.bf16.mxu0 %v16238_v39  ;;  %7294 = vmatprep.subr.bf16.mxu1 %v16241_v40 }
 0x27f   : > { %5628 = vmatpush1.bf16.msra.mxu0 %v16236_v41  ;;  %7295 = vmatpush1.bf16.msra.mxu1 %v16239_v42 }
 0x280   : > { %5629 = vmatprep.subr.bf16.mxu0 %v16245_v44  ;;  %7296 = vmatprep.subr.bf16.mxu1 %v16248_v45 }
 0x281   : > { %13693 = vmatmul.mubr.msk.bf16.gmra.mrb[28].mxu0 %vm1383_vm0, %v16134_v51  ;;  %13725 = vmatmul.mubr.msk.bf16.gmra.mrb[28].mxu1 %vm1383_vm0, %v16134_v51  ;;  %v16252_v51 = vld [vmem:[%s21098_s4 + $0x270] ss:$8 sps:$4 sm:$0xff]  }
 0x282   : > { %3670 = vmatprep.mubr.bf16.mxu0 %v21107_v6  ;;  %4023 = vmatprep.mubr.bf16.mxu1 %v21107_v6 }
 0x283   : > { %5630 = vmatpush1.bf16.msra.mxu0 %v16243_v46  ;;  %7297 = vmatpush1.bf16.msra.mxu1 %v16246_v47 }
 0x284   : > { %5631 = vmatprep.subr.bf16.mxu0 %v16251_v48  ;;  %7298 = vmatprep.subr.bf16.mxu1 %v16254_v49 }
 0x287   : > { %5632 = vmatpush1.bf16.msra.mxu0 %v16249_v50  ;;  %7299 = vmatpush1.bf16.msra.mxu1 %v16252_v51 }
 0x288   : > { %7461 = vmatprep.subr.bf16.mxu1 %v16257_v5 }
 0x289   : > { %13694 = vmatmul.mubr.msk.bf16.gmra.mrb[32].mxu0 %vm1383_vm0, %v16135_v54  ;;  %13726 = vmatmul.mubr.msk.bf16.gmra.mrb[32].mxu1 %vm1383_vm0, %v16135_v54  ;;  %v16160_v54 = vld [vmem:[%s17250_s30 + $0xa0] sm:$0xff]  }
 0x28a   : > { %3680 = vmatprep.mubr.bf16.mxu0 %v21107_v6  ;;  %4033 = vmatprep.mubr.bf16.mxu1 %v21107_v6 }
 0x291   : > { %13695 = vmatmul.mubr.msk.bf16.gmra.mrb[36].mxu0 %vm1383_vm0, %v16136_v59  ;;  %13727 = vmatmul.mubr.msk.bf16.gmra.mrb[36].mxu1 %vm1383_vm0, %v16136_v59  ;;  %v16171_v59 = vld [vmem:[%s17250_s30 + $0xc8] sm:$0xff]  }
 0x292   : > { %3690 = vmatprep.mubr.bf16.mxu0 %v21107_v6  ;;  %4043 = vmatprep.mubr.bf16.mxu1 %v21107_v6 }
 0x299   : > { %13696 = vmatmul.mubr.msk.bf16.gmra.mrb[40].mxu0 %vm1383_vm0, %v16140_v2  ;;  %13728 = vmatmul.mubr.msk.bf16.gmra.mrb[40].mxu1 %vm1383_vm0, %v16140_v2  ;;  %v17965_v2 = vrot.slane %v17764_v8, %v17955_v63 }
 0x29a   : > { %3700 = vmatprep.mubr.bf16.mxu0 %v21107_v6  ;;  %4053 = vmatprep.mubr.bf16.mxu1 %v21107_v6 }
 0x2a1   : > { %13697 = vmatmul.mubr.msk.bf16.gmra.mrb[44].mxu0 %vm1383_vm0, %v16141_v13  ;;  %13729 = vmatmul.mubr.msk.bf16.gmra.mrb[44].mxu1 %vm1383_vm0, %v16141_v13 }
 0x2a2   : > { %3710 = vmatprep.mubr.bf16.mxu0 %v21107_v6  ;;  %4063 = vmatprep.mubr.bf16.mxu1 %v21107_v6 }
 0x2a9   : > { %13698 = vmatmul.mubr.msk.bf16.gmra.mrb[48].mxu0 %vm1383_vm0, %v16145_v18  ;;  %13730 = vmatmul.mubr.msk.bf16.gmra.mrb[48].mxu1 %vm1383_vm0, %v16145_v18 }
 0x2aa   : > { %3720 = vmatprep.mubr.bf16.mxu0 %v21107_v6  ;;  %4073 = vmatprep.mubr.bf16.mxu1 %v21107_v6 }
 0x2b1   : > { %13699 = vmatmul.mubr.msk.bf16.gmra.mrb[52].mxu0 %vm1383_vm0, %v16146_v25  ;;  %13731 = vmatmul.mubr.msk.bf16.gmra.mrb[52].mxu1 %vm1383_vm0, %v16146_v25 }
 0x2b2   : > { %3730 = vmatprep.mubr.bf16.mxu0 %v21107_v6  ;;  %4083 = vmatprep.mubr.bf16.mxu1 %v21107_v6 }
 0x2b9   : > { %13700 = vmatmul.mubr.msk.bf16.gmra.mrb[56].mxu0 %vm1383_vm0, %v16150_v34  ;;  %13732 = vmatmul.mubr.msk.bf16.gmra.mrb[56].mxu1 %vm1383_vm0, %v16150_v34 }
 0x2ba   : > { %3740 = vmatprep.mubr.bf16.mxu0 %v21107_v6  ;;  %4093 = vmatprep.mubr.bf16.mxu1 %v21107_v6 }
 0x2c1   : > { %13701 = vmatmul.mubr.msk.bf16.gmra.mrb[60].mxu0 %vm1383_vm0, %v16151_v43  ;;  %13733 = vmatmul.mubr.msk.bf16.gmra.mrb[60].mxu1 %vm1383_vm0, %v16151_v43  ;;  %v16209_v43 = vld [vmem:[%s17250_s30 + $0xf0] sm:$0xff]  }
 0x2c2   : > { %3750 = vmatprep.mubr.bf16.mxu0 %v21107_v6  ;;  %4103 = vmatprep.mubr.bf16.mxu1 %v21107_v6 }
 0x2c9   : > { %13702 = vmatmul.mubr.msk.bf16.gmra.mrb[64].mxu0 %vm1383_vm0, %v16155_v52  ;;  %13734 = vmatmul.mubr.msk.bf16.gmra.mrb[64].mxu1 %vm1383_vm0, %v16155_v52 }
 0x2ca   : > { %3760 = vmatprep.mubr.bf16.mxu0 %v21107_v6  ;;  %4113 = vmatprep.mubr.bf16.mxu1 %v21107_v6 }
 0x2d1   : > { %13703 = vmatmul.mubr.msk.bf16.gmra.mrb[68].mxu0 %vm1383_vm0, %v16156_v53  ;;  %13735 = vmatmul.mubr.msk.bf16.gmra.mrb[68].mxu1 %vm1383_vm0, %v16156_v53 }
 0x2d2   : > { %3770 = vmatprep.mubr.bf16.mxu0 %v21107_v6  ;;  %4123 = vmatprep.mubr.bf16.mxu1 %v21107_v6 }
 0x2d9   : > { %13704 = vmatmul.mubr.msk.bf16.gmra.mrb[72].mxu0 %vm1383_vm0, %v16160_v54  ;;  %13736 = vmatmul.mubr.msk.bf16.gmra.mrb[72].mxu1 %vm1383_vm0, %v16160_v54 }
 0x2da   : > { %3780 = vmatprep.mubr.bf16.mxu0 %v21107_v6  ;;  %4133 = vmatprep.mubr.bf16.mxu1 %v21107_v6 }
 0x2e1   : > { %13705 = vmatmul.mubr.msk.bf16.gmra.mrb[76].mxu0 %vm1383_vm0, %v16161_v55  ;;  %13737 = vmatmul.mubr.msk.bf16.gmra.mrb[76].mxu1 %vm1383_vm0, %v16161_v55 }
 0x2e2   : > { %3790 = vmatprep.mubr.bf16.mxu0 %v21107_v6  ;;  %4143 = vmatprep.mubr.bf16.mxu1 %v21107_v6 }
 0x2e9   : > { %13706 = vmatmul.mubr.msk.bf16.gmra.mrb[80].mxu0 %vm1383_vm0, %v16165_v56  ;;  %13738 = vmatmul.mubr.msk.bf16.gmra.mrb[80].mxu1 %vm1383_vm0, %v16165_v56 }
 0x2ea   : > { %3800 = vmatprep.mubr.bf16.mxu0 %v21107_v6  ;;  %4153 = vmatprep.mubr.bf16.mxu1 %v21107_v6 }
 0x2f1   : > { %13707 = vmatmul.mubr.msk.bf16.gmra.mrb[84].mxu0 %vm1383_vm0, %v16166_v57  ;;  %13739 = vmatmul.mubr.msk.bf16.gmra.mrb[84].mxu1 %vm1383_vm0, %v16166_v57 }
 0x2f2   : > { %3810 = vmatprep.mubr.bf16.mxu0 %v21107_v6  ;;  %4163 = vmatprep.mubr.bf16.mxu1 %v21107_v6 }
 0x2f9   : > { %13708 = vmatmul.mubr.msk.bf16.gmra.mrb[88].mxu0 %vm1383_vm0, %v16170_v58  ;;  %13740 = vmatmul.mubr.msk.bf16.gmra.mrb[88].mxu1 %vm1383_vm0, %v16170_v58 }
 0x2fa   : > { %3820 = vmatprep.mubr.bf16.mxu0 %v21107_v6  ;;  %4173 = vmatprep.mubr.bf16.mxu1 %v21107_v6 }
 0x301   : > { %13709 = vmatmul.mubr.msk.bf16.gmra.mrb[92].mxu0 %vm1383_vm0, %v16171_v59  ;;  %13741 = vmatmul.mubr.msk.bf16.gmra.mrb[92].mxu1 %vm1383_vm0, %v16171_v59 }
 0x302   : > { %3830 = vmatprep.mubr.bf16.mxu0 %v21107_v6  ;;  %4183 = vmatprep.mubr.bf16.mxu1 %v21107_v6 }
 0x309   : > { %13710 = vmatmul.mubr.msk.bf16.gmra.mrb[96].mxu0 %vm1383_vm0, %v16175_v60  ;;  %13742 = vmatmul.mubr.msk.bf16.gmra.mrb[96].mxu1 %vm1383_vm0, %v16175_v60 }
 0x30a   : > { %3840 = vmatprep.mubr.bf16.mxu0 %v21107_v6  ;;  %4193 = vmatprep.mubr.bf16.mxu1 %v21107_v6 }
 0x311   : > { %13711 = vmatmul.mubr.msk.bf16.gmra.mrb[100].mxu0 %vm1383_vm0, %v16182_v61  ;;  %13743 = vmatmul.mubr.msk.bf16.gmra.mrb[100].mxu1 %vm1383_vm0, %v16182_v61 }
 0x312   : > { %3850 = vmatprep.mubr.bf16.mxu0 %v21107_v6  ;;  %4203 = vmatprep.mubr.bf16.mxu1 %v21107_v6 }
 0x319   : > { %13712 = vmatmul.mubr.msk.bf16.gmra.mrb[104].mxu0 %vm1383_vm0, %v16192_v62  ;;  %13744 = vmatmul.mubr.msk.bf16.gmra.mrb[104].mxu1 %vm1383_vm0, %v16192_v62 }
 0x31a   : > { %3860 = vmatprep.mubr.bf16.mxu0 %v21107_v6  ;;  %4213 = vmatprep.mubr.bf16.mxu1 %v21107_v6 }
 0x31c   : > { %v3592_v7 = vpop.f32.mrb[0].mxu0  ;;  %v3945_v9 = vpop.f32.mrb[0].mxu1 }
 0x31d   : > { %v4542_v10 = vadd.f32 %v17965_v2, %v3592_v7  ;;  %v4544_v12 = vadd.f32 %v17968_v3, %v3945_v9  ;;  %v3594_v13 = vpop.f32.mrb[1].mxu0  ;;  %v3947_v14 = vpop.f32.mrb[1].mxu1 }
 0x31e   : > { %v4543_v8 = vadd.f32 %v17972_v4, %v3594_v13  ;;  %v4545_v16 = vadd.f32 %v17771_v11, %v3947_v14  ;;  %v3596_v17 = vpop.f32.mrb[2].mxu0  ;;  %v3949_v18 = vpop.f32.mrb[2].mxu1 }
 0x31f   : > { %v4546_v19 = vadd.f32 %v17965_v2, %v3596_v17  ;;  %v4548_v20 = vadd.f32 %v17968_v3, %v3949_v18  ;;  %v3598_v21 = vpop.f32.mrb[3].mxu0  ;;  %v3951_v22 = vpop.f32.mrb[3].mxu1  ;;  %v4798_v25 = vmax.f32 %v4542_v10, 0.0  ;;  %v4800_v26 = vmax.f32 %v4544_v12, 0.0 }
 0x320   : > { %v4547_v23 = vadd.f32 %v17972_v4, %v3598_v21  ;;  %v4549_v24 = vadd.f32 %v17771_v11, %v3951_v22  ;;  %v4799_v29 = vmax.f32 %v4543_v8, 0.0  ;;  %v4801_v30 = vmax.f32 %v4545_v16, 0.0  ;;  %v16216_v8 = vld [vmem:[%s17250_s30 + $0xf8] sm:$0xff]  }
 0x321   : > { %v4802_v27 = vmax.f32 %v4546_v19, 0.0  ;;  %v4804_v28 = vmax.f32 %v4548_v20, 0.0  ;;  %13713 = vmatmul.mubr.msk.bf16.gmra.mrb[108].mxu0 %vm1383_vm0, %v16199_v15  ;;  %13745 = vmatmul.mubr.msk.bf16.gmra.mrb[108].mxu1 %vm1383_vm0, %v16199_v15 }
 0x322   : > { %v4803_v31 = vmax.f32 %v4547_v23, 0.0  ;;  %v4805_v32 = vmax.f32 %v4549_v24, 0.0  ;;  %3870 = vmatprep.mubr.bf16.mxu0 %v21107_v6  ;;  %4223 = vmatprep.mubr.bf16.mxu1 %v21107_v6 }
 0x323   : > { %v17992_v33 = vpack.c.bf16 %v4802_v27, %v4798_v25  ;;  %v17994_v34 = vpack.c.bf16 %v4804_v28, %v4800_v26 }
 0x324   : > { %v17996_v35 = vpack.c.bf16 %v4805_v32, %v4801_v30  ;;  %v3602_v36 = vpop.f32.mrb[4].mxu0  ;;  %v3955_v37 = vpop.f32.mrb[4].mxu1  ;;  %v17998_v38 = vpack.c.bf16 %v4803_v31, %v4799_v29 }
 0x325   : > { %v4550_v39 = vadd.f32 %v17965_v2, %v3602_v36  ;;  %v4552_v40 = vadd.f32 %v17968_v3, %v3955_v37  ;;  %v3604_v41 = vpop.f32.mrb[5].mxu0  ;;  %v3957_v42 = vpop.f32.mrb[5].mxu1 }
 0x326   : > { %v4551_v44 = vadd.f32 %v17972_v4, %v3604_v41  ;;  %v4553_v45 = vadd.f32 %v17771_v11, %v3957_v42  ;;  %v3606_v46 = vpop.f32.mrb[6].mxu0  ;;  %v3959_v47 = vpop.f32.mrb[6].mxu1 }
 0x327   : > { %v4554_v48 = vadd.f32 %v17965_v2, %v3606_v46  ;;  %v4556_v49 = vadd.f32 %v17968_v3, %v3959_v47  ;;  %v3608_v50 = vpop.f32.mrb[7].mxu0  ;;  %v3961_v51 = vpop.f32.mrb[7].mxu1  ;;  %v4806_v54 = vmax.f32 %v4550_v39, 0.0  ;;  %v4808_v55 = vmax.f32 %v4552_v40, 0.0 }
 0x328   : > { %v4555_v52 = vadd.f32 %v17972_v4, %v3608_v50  ;;  %v4557_v53 = vadd.f32 %v17771_v11, %v3961_v51  ;;  %v4807_v58 = vmax.f32 %v4551_v44, 0.0  ;;  %v4809_v59 = vmax.f32 %v4553_v45, 0.0 }
 0x329   : > { %v4810_v56 = vmax.f32 %v4554_v48, 0.0  ;;  %v4812_v57 = vmax.f32 %v4556_v49, 0.0  ;;  %13714 = vmatmul.mubr.msk.bf16.gmra.mrb[112].mxu0 %vm1383_vm0, %v16209_v43  ;;  %13746 = vmatmul.mubr.msk.bf16.gmra.mrb[112].mxu1 %vm1383_vm0, %v16209_v43  ;;  %v16229_v48 = vld [vmem:[%s17250_s30 + $0x100] sm:$0xff]  }
 0x32a   : > { %v4811_v60 = vmax.f32 %v4555_v52, 0.0  ;;  %v4813_v61 = vmax.f32 %v4557_v53, 0.0  ;;  %3880 = vmatprep.mubr.bf16.mxu0 %v21107_v6  ;;  %4233 = vmatprep.mubr.bf16.mxu1 %v21107_v6 }
 0x32b   : > { %v18013_v62 = vpack.c.bf16 %v4812_v57, %v4808_v55  ;;  %v18015_v0 = vpack.c.bf16 %v4810_v56, %v4806_v54 }
 0x32c   : > { %v18017_v5 = vpack.c.bf16 %v4813_v61, %v4809_v59  ;;  %v3612_v7 = vpop.f32.mrb[8].mxu0  ;;  %v3965_v9 = vpop.f32.mrb[8].mxu1  ;;  %v18019_v10 = vpack.c.bf16 %v4811_v60, %v4807_v58 }
 0x32d   : > { %v4558_v12 = vadd.f32 %v17965_v2, %v3612_v7  ;;  %v4560_v13 = vadd.f32 %v17968_v3, %v3965_v9  ;;  %v3614_v14 = vpop.f32.mrb[9].mxu0  ;;  %v3967_v15 = vpop.f32.mrb[9].mxu1 }
 0x32e   : > { %v4559_v16 = vadd.f32 %v17972_v4, %v3614_v14  ;;  %v4561_v17 = vadd.f32 %v17771_v11, %v3967_v15  ;;  %v3616_v18 = vpop.f32.mrb[10].mxu0  ;;  %v3969_v19 = vpop.f32.mrb[10].mxu1 }
 0x32f   : > { %v4562_v20 = vadd.f32 %v17965_v2, %v3616_v18  ;;  %v4564_v21 = vadd.f32 %v17968_v3, %v3969_v19  ;;  %v3618_v22 = vpop.f32.mrb[11].mxu0  ;;  %v3971_v23 = vpop.f32.mrb[11].mxu1  ;;  %v4814_v26 = vmax.f32 %v4558_v12, 0.0  ;;  %v4816_v27 = vmax.f32 %v4560_v13, 0.0 }
 0x330   : > { %v4563_v24 = vadd.f32 %v17972_v4, %v3618_v22  ;;  %v4565_v25 = vadd.f32 %v17771_v11, %v3971_v23  ;;  %v4815_v30 = vmax.f32 %v4559_v16, 0.0  ;;  %v4817_v31 = vmax.f32 %v4561_v17, 0.0 }
 0x331   : > { %v4818_v28 = vmax.f32 %v4562_v20, 0.0  ;;  %v4820_v29 = vmax.f32 %v4564_v21, 0.0  ;;  %13715 = vmatmul.mubr.msk.bf16.gmra.mrb[116].mxu0 %vm1383_vm0, %v16216_v8  ;;  %13747 = vmatmul.mubr.msk.bf16.gmra.mrb[116].mxu1 %vm1383_vm0, %v16216_v8 }
 0x332   : > { %v4819_v32 = vmax.f32 %v4563_v24, 0.0  ;;  %v4821_v36 = vmax.f32 %v4565_v25, 0.0  ;;  %3890 = vmatprep.mubr.bf16.mxu0 %v21107_v6  ;;  %4243 = vmatprep.mubr.bf16.mxu1 %v21107_v6  ;;  %v16242_v24 = vld [vmem:[%s17250_s30 + $0x108] sm:$0xff]  }
 0x333   : > { %v18034_v37 = vpack.c.bf16 %v4818_v28, %v4814_v26  ;;  %v18036_v39 = vpack.c.bf16 %v4820_v29, %v4816_v27 }
 0x334   : > { %v18038_v40 = vpack.c.bf16 %v4819_v32, %v4815_v30  ;;  %v18040_v41 = vpack.c.bf16 %v4821_v36, %v4817_v31  ;;  %v3622_v42 = vpop.f32.mrb[12].mxu0  ;;  %v3975_v43 = vpop.f32.mrb[12].mxu1 }
 0x335   : > { %21154 = vst [vmem:[#allocation8_spill] sm:$0xff] %v18036_v39  ;;  %v4566_v44 = vadd.f32 %v17965_v2, %v3622_v42  ;;  %v4568_v45 = vadd.f32 %v17968_v3, %v3975_v43  ;;  %v3624_v46 = vpop.f32.mrb[13].mxu0  ;;  %v3977_v47 = vpop.f32.mrb[13].mxu1 }
 0x336   : > { %21155 = vst [vmem:[#allocation9_spill] sm:$0xff] %v18040_v41  ;;  %v4567_v49 = vadd.f32 %v17972_v4, %v3624_v46  ;;  %v4569_v50 = vadd.f32 %v17771_v11, %v3977_v47  ;;  %v3626_v51 = vpop.f32.mrb[14].mxu0  ;;  %v3979_v52 = vpop.f32.mrb[14].mxu1 }
 0x337   : > { %v4570_v53 = vadd.f32 %v17965_v2, %v3626_v51  ;;  %v4572_v54 = vadd.f32 %v17968_v3, %v3979_v52  ;;  %v3628_v55 = vpop.f32.mrb[15].mxu0  ;;  %v3981_v56 = vpop.f32.mrb[15].mxu1  ;;  %v4822_v59 = vmax.f32 %v4566_v44, 0.0  ;;  %v4824_v60 = vmax.f32 %v4568_v45, 0.0 }
 0x338   : > { %v4571_v57 = vadd.f32 %v17972_v4, %v3628_v55  ;;  %v4573_v58 = vadd.f32 %v17771_v11, %v3981_v56  ;;  %v4823_v9 = vmax.f32 %v4567_v49, 0.0  ;;  %v4825_v12 = vmax.f32 %v4569_v50, 0.0 }
 0x339   : > { %v4826_v61 = vmax.f32 %v4570_v53, 0.0  ;;  %v4828_v7 = vmax.f32 %v4572_v54, 0.0  ;;  %13716 = vmatmul.mubr.msk.bf16.gmra.mrb[120].mxu0 %vm1383_vm0, %v16229_v48  ;;  %13748 = vmatmul.mubr.msk.bf16.gmra.mrb[120].mxu1 %vm1383_vm0, %v16229_v48 }
 0x33a   : > { %v4827_v13 = vmax.f32 %v4571_v57, 0.0  ;;  %v4829_v14 = vmax.f32 %v4573_v58, 0.0  ;;  %3900 = vmatprep.mubr.bf16.mxu0 %v21107_v6  ;;  %4253 = vmatprep.mubr.bf16.mxu1 %v21107_v6 }
 0x33b   : > { %v18055_v15 = vpack.c.bf16 %v4826_v61, %v4822_v59  ;;  %v18057_v8 = vpack.c.bf16 %v4828_v7, %v4824_v60 }
 0x33c   : > { %v18059_v16 = vpack.c.bf16 %v4827_v13, %v4823_v9  ;;  %v18061_v17 = vpack.c.bf16 %v4829_v14, %v4825_v12  ;;  %v3632_v18 = vpop.f32.mrb[16].mxu0  ;;  %v3985_v19 = vpop.f32.mrb[16].mxu1 }
 0x33d   : > { %21156 = vst [vmem:[#allocation10_spill] sm:$0xff] %v18057_v8  ;;  %v4574_v20 = vadd.f32 %v17965_v2, %v3632_v18  ;;  %v4576_v21 = vadd.f32 %v17968_v3, %v3985_v19  ;;  %v3634_v22 = vpop.f32.mrb[17].mxu0  ;;  %v3987_v23 = vpop.f32.mrb[17].mxu1  ;;  %v16255_v19 = vld [vmem:[%s21098_s4 + $0x280] ss:$8 sps:$4 sm:$0xff]  }
 0x33e   : > { %21157 = vst [vmem:[#allocation11_spill] sm:$0xff] %v18061_v17  ;;  %v4575_v25 = vadd.f32 %v17972_v4, %v3634_v22  ;;  %v4577_v26 = vadd.f32 %v17771_v11, %v3987_v23  ;;  %v3636_v27 = vpop.f32.mrb[18].mxu0  ;;  %v3989_v28 = vpop.f32.mrb[18].mxu1  ;;  %v16260_v22 = vld [vmem:[%s21098_s4 + $0x294] ss:$8 sps:$4 sm:$0xff]  }
 0x33f   : > { %v4578_v29 = vadd.f32 %v17965_v2, %v3636_v27  ;;  %v4580_v30 = vadd.f32 %v17968_v3, %v3989_v28  ;;  %v3638_v31 = vpop.f32.mrb[19].mxu0  ;;  %v3991_v32 = vpop.f32.mrb[19].mxu1  ;;  %v4830_v43 = vmax.f32 %v4574_v20, 0.0  ;;  %v4832_v44 = vmax.f32 %v4576_v21, 0.0 }
 0x340   : > { %v4579_v36 = vadd.f32 %v17972_v4, %v3638_v31  ;;  %v4581_v42 = vadd.f32 %v17771_v11, %v3991_v32  ;;  %v4831_v47 = vmax.f32 %v4575_v25, 0.0  ;;  %v4833_v48 = vmax.f32 %v4577_v26, 0.0 }
 0x341   : > { %v4834_v45 = vmax.f32 %v4578_v29, 0.0  ;;  %v4836_v46 = vmax.f32 %v4580_v30, 0.0  ;;  %13717 = vmatmul.mubr.msk.bf16.gmra.mrb[124].mxu0 %vm1383_vm0, %v16242_v24  ;;  %13749 = vmatmul.mubr.msk.bf16.gmra.mrb[124].mxu1 %vm1383_vm0, %v16242_v24 }
 0x342   : > { %v4835_v49 = vmax.f32 %v4579_v36, 0.0  ;;  %v4837_v50 = vmax.f32 %v4581_v42, 0.0  ;;  %5633 = vmatprep.mubr.bf16.mxu0 %v17998_v38  ;;  %7300 = vmatprep.mubr.bf16.mxu1 %v17994_v34  ;;  %v16258_v36 = vld [vmem:[%s21098_s4 + $0x290] ss:$8 sps:$4 sm:$0xff]  }
 0x343   : > { %v18076_v51 = vpack.c.bf16 %v4834_v45, %v4830_v43  ;;  %v18078_v52 = vpack.c.bf16 %v4836_v46, %v4832_v44 }
 0x344   : > { %v18080_v53 = vpack.c.bf16 %v4835_v49, %v4831_v47  ;;  %v18082_v54 = vpack.c.bf16 %v4837_v50, %v4833_v48  ;;  %v3642_v55 = vpop.f32.mrb[20].mxu0  ;;  %v3995_v56 = vpop.f32.mrb[20].mxu1 }
 0x345   : > { %v4582_v57 = vadd.f32 %v17965_v2, %v3642_v55  ;;  %v4584_v58 = vadd.f32 %v17968_v3, %v3995_v56  ;;  %v3644_v59 = vpop.f32.mrb[21].mxu0  ;;  %v3997_v60 = vpop.f32.mrb[21].mxu1 }
 0x346   : > { %v4583_v61 = vadd.f32 %v17972_v4, %v3644_v59  ;;  %v4585_v34 = vadd.f32 %v17771_v11, %v3997_v60  ;;  %v3646_v7 = vpop.f32.mrb[22].mxu0  ;;  %v3999_v9 = vpop.f32.mrb[22].mxu1  ;;  %v16261_v60 = vld [vmem:[%s21098_s4 + $0x2a0] ss:$8 sps:$4 sm:$0xff]  }
 0x347   : > { %v4586_v12 = vadd.f32 %v17965_v2, %v3646_v7  ;;  %v4588_v13 = vadd.f32 %v17968_v3, %v3999_v9  ;;  %v3648_v14 = vpop.f32.mrb[23].mxu0  ;;  %v4001_v18 = vpop.f32.mrb[23].mxu1  ;;  %v4838_v23 = vmax.f32 %v4582_v57, 0.0  ;;  %v4840_v24 = vmax.f32 %v4584_v58, 0.0  ;;  %v16266_v7 = vld [vmem:[%s21098_s4 + $0x2b4] ss:$8 sps:$4 sm:$0xff]  }
 0x348   : > { %v4587_v20 = vadd.f32 %v17972_v4, %v3648_v14  ;;  %v4589_v21 = vadd.f32 %v17771_v11, %v4001_v18  ;;  %v4839_v27 = vmax.f32 %v4583_v61, 0.0  ;;  %v4841_v28 = vmax.f32 %v4585_v34, 0.0 }
 0x349   : > { %v4842_v25 = vmax.f32 %v4586_v12, 0.0  ;;  %v4844_v26 = vmax.f32 %v4588_v13, 0.0  ;;  %5634 = vmatmul.mubr.bf16.vlgmr.msra.gmra.mrb[128].mxu0 %v17992_v33  ;;  %7301 = vmatmul.mubr.bf16.vlgmr.msra.gmra.mrb[128].mxu1 %v17998_v38 }
 0x34a   : > { %v4843_v29 = vmax.f32 %v4587_v20, 0.0  ;;  %v4845_v30 = vmax.f32 %v4589_v21, 0.0  ;;  %5643 = vmatprep.mubr.bf16.mxu0 %v18019_v10  ;;  %7310 = vmatprep.mubr.bf16.mxu1 %v18013_v62  ;;  %v16263_v62 = vld [vmem:[%s21098_s4 + $0x2a4] ss:$8 sps:$4 sm:$0xff]  }
 0x34b   : > { %v18102_v31 = vpack.c.bf16 %v4842_v25, %v4838_v23  ;;  %v18104_v32 = vpack.c.bf16 %v4844_v26, %v4840_v24  ;;  %7462 = vmatpush1.bf16.msra.mxu1 %v16255_v19  ;;  %v16264_v24 = vld [vmem:[%s21098_s4 + $0x2b0] ss:$8 sps:$4 sm:$0xff]  }
 0x34c   : > { %v18109_v33 = vpack.c.bf16 %v4843_v29, %v4839_v27  ;;  %v18111_v38 = vpack.c.bf16 %v4845_v30, %v4841_v28  ;;  %v3652_v42 = vpop.f32.mrb[24].mxu0  ;;  %v4005_v43 = vpop.f32.mrb[24].mxu1  ;;  %7463 = vmatprep.subr.bf16.mxu1 %v16260_v22  ;;  %v16272_v30 = vld [vmem:[%s21097_s3 + $0x4] ss:$8 sps:$4 sm:$0xff]  }
 0x34d   : > { %v4590_v44 = vadd.f32 %v17965_v2, %v3652_v42  ;;  %v4592_v45 = vadd.f32 %v17968_v3, %v4005_v43  ;;  %v3654_v46 = vpop.f32.mrb[25].mxu0  ;;  %v4007_v47 = vpop.f32.mrb[25].mxu1  ;;  %5954 = vmatprep.subr.bf16.mxu0 %v16272_v30  ;;  %v16276_v30 = vld [vmem:[%s21097_s3 + $0x20] ss:$8 sps:$4 sm:$0xff]  }
 0x34e   : > { %v4591_v48 = vadd.f32 %v17972_v4, %v3654_v46  ;;  %v4593_v49 = vadd.f32 %v17771_v11, %v4007_v47  ;;  %v3656_v50 = vpop.f32.mrb[26].mxu0  ;;  %v4009_v55 = vpop.f32.mrb[26].mxu1 }
 0x34f   : > { %v4594_v56 = vadd.f32 %v17965_v2, %v3656_v50  ;;  %v4596_v57 = vadd.f32 %v17968_v3, %v4009_v55  ;;  %v3658_v58 = vpop.f32.mrb[27].mxu0  ;;  %v4011_v59 = vpop.f32.mrb[27].mxu1  ;;  %7464 = vmatpush1.bf16.msra.mxu1 %v16258_v36  ;;  %v4846_v9 = vmax.f32 %v4590_v44, 0.0  ;;  %v4848_v12 = vmax.f32 %v4592_v45, 0.0  ;;  %v16270_v44 = vld [vmem:[%s21097_s3] ss:$8 sps:$4 sm:$0xff]  }
 0x350   : > { %v4595_v61 = vadd.f32 %v17972_v4, %v3658_v58  ;;  %v4597_v34 = vadd.f32 %v17771_v11, %v4011_v59  ;;  %7465 = vmatprep.subr.bf16.mxu1 %v16263_v62  ;;  %v4847_v18 = vmax.f32 %v4591_v48, 0.0  ;;  %v4849_v19 = vmax.f32 %v4593_v49, 0.0  ;;  %5955 = vmatpush1.bf16.msra.mxu0 %v16270_v44  ;;  %v16275_v59 = vld [vmem:[%s21097_s3 + $0x14] ss:$8 sps:$4 sm:$0xff]  }
 0x351   : > { %v4850_v13 = vmax.f32 %v4594_v56, 0.0  ;;  %v4852_v14 = vmax.f32 %v4596_v57, 0.0  ;;  %5644 = vmatmul.mubr.bf16.gmra.mrb[132].mxu0 %v18015_v0  ;;  %7311 = vmatmul.mubr.bf16.gmra.mrb[132].mxu1 %v18019_v10 }
 0x352   : > { %v4851_v20 = vmax.f32 %v4595_v61, 0.0  ;;  %v4853_v21 = vmax.f32 %v4597_v34, 0.0  ;;  %5653 = vmatprep.mubr.bf16.mxu0 %v18080_v53  ;;  %7320 = vmatprep.mubr.bf16.mxu1 %v18078_v52 }
 0x353   : > { %v18134_v22 = vpack.c.bf16 %v4850_v13, %v4846_v9  ;;  %v18136_v23 = vpack.c.bf16 %v4852_v14, %v4848_v12  ;;  %7466 = vmatpush1.bf16.msra.mxu1 %v16261_v60  ;;  %v16273_v9 = vld [vmem:[%s21097_s3 + $0x10] ss:$8 sps:$4 sm:$0xff]   ;;  %v16269_v13 = vld [vmem:[%s21098_s4 + $0x2c4] ss:$8 sps:$4 sm:$0xff]   ;;  %5956 = vmatprep.subr.bf16.mxu0 %v16275_v59 }
 0x354   : > { %v18141_v0 = vpack.c.bf16 %v4851_v20, %v4847_v18  ;;  %v18143_v10 = vpack.c.bf16 %v4853_v21, %v4849_v19  ;;  %v3662_v25 = vpop.f32.mrb[28].mxu0  ;;  %v4015_v26 = vpop.f32.mrb[28].mxu1  ;;  %7467 = vmatprep.subr.bf16.mxu1 %v16266_v7  ;;  %5957 = vmatpush1.bf16.msra.mxu0 %v16273_v9  ;;  %v16279_v59 = vld [vmem:[%s21097_s3 + $0x30] ss:$8 sps:$4 sm:$0xff]  }
 0x355   : > { %21158 = vst [vmem:[#allocation12_spill] sm:$0xff] %v18136_v23  ;;  %v4598_v27 = vadd.f32 %v17965_v2, %v3662_v25  ;;  %v4600_v52 = vadd.f32 %v17968_v3, %v4015_v26  ;;  %v3664_v28 = vpop.f32.mrb[29].mxu0  ;;  %v4017_v29 = vpop.f32.mrb[29].mxu1  ;;  %v16278_v26 = vld [vmem:[%s21097_s3 + $0x24] ss:$8 sps:$4 sm:$0xff]  }
 0x356   : > { %21159 = vst [vmem:[#allocation13_spill] sm:$0xff] %v18143_v10  ;;  %v4599_v36 = vadd.f32 %v17972_v4, %v3664_v28  ;;  %v4601_v42 = vadd.f32 %v17771_v11, %v4017_v29  ;;  %v3666_v43 = vpop.f32.mrb[30].mxu0  ;;  %v4019_v62 = vpop.f32.mrb[30].mxu1  ;;  %5958 = vmatprep.subr.bf16.mxu0 %v16278_v26  ;;  %v16285_v26 = vld [vmem:[%s21097_s3 + $0x40] ss:$8 sps:$4 sm:$0xff]  }
 0x357   : > { %v4602_v45 = vadd.f32 %v17965_v2, %v3666_v43  ;;  %v4604_v46 = vadd.f32 %v17968_v3, %v4019_v62  ;;  %v3668_v47 = vpop.f32.mrb[31].mxu0  ;;  %v4021_v48 = vpop.f32.mrb[31].mxu1  ;;  %7468 = vmatpush1.bf16.msra.mxu1 %v16264_v24  ;;  %v4854_v55 = vmax.f32 %v4598_v27, 0.0  ;;  %v4856_v56 = vmax.f32 %v4600_v52, 0.0 }
 0x358   : > { %v4603_v49 = vadd.f32 %v17972_v4, %v3668_v47  ;;  %v4605_v50 = vadd.f32 %v17771_v11, %v4021_v48  ;;  %v4855_v60 = vmax.f32 %v4599_v36, 0.0  ;;  %v4857_v61 = vmax.f32 %v4601_v42, 0.0  ;;  %7469 = vmatprep.subr.bf16.mxu1 %v16269_v13  ;;  %5959 = vmatpush1.bf16.msra.mxu0 %v16276_v30 }
 0x359   : > { %v4858_v57 = vmax.f32 %v4602_v45, 0.0  ;;  %v4860_v58 = vmax.f32 %v4604_v46, 0.0  ;;  %5654 = vmatmul.mubr.bf16.gmra.mrb[136].mxu0 %v18076_v51  ;;  %7321 = vmatmul.mubr.bf16.gmra.mrb[136].mxu1 %v18080_v53  ;;  %v16267_v53 = vld [vmem:[%s21098_s4 + $0x2c0] ss:$8 sps:$4 sm:$0xff]  }
 0x35a   : > { %v4859_v34 = vmax.f32 %v4603_v49, 0.0  ;;  %v4861_v7 = vmax.f32 %v4605_v50, 0.0  ;;  %5663 = vmatprep.mubr.bf16.mxu0 %v18109_v33  ;;  %7330 = vmatprep.mubr.bf16.mxu1 %v18104_v32  ;;  %v16281_v50 = vld [vmem:[%s21097_s3 + $0x34] ss:$8 sps:$4 sm:$0xff]  }
 0x35b   : > { %v18169_v12 = vpack.c.bf16 %v4858_v57, %v4854_v55  ;;  %v18171_v51 = vpack.c.bf16 %v4860_v58, %v4856_v56  ;;  %7470 = vmatpush1.bf16.msra.mxu1 %v16267_v53  ;;  %5960 = vmatprep.subr.bf16.mxu0 %v16281_v50  ;;  %v16288_v50 = vld [vmem:[%s21097_s3 + $0x50] ss:$8 sps:$4 sm:$0xff]  }
 0x35c   : > { %v18179_v14 = vpack.c.bf16 %v4859_v34, %v4855_v60  ;;  %v18181_v32 = vpack.c.bf16 %v4861_v7, %v4857_v61  ;;  %v3672_v18 = vpop.f32.mrb[32].mxu0  ;;  %v4025_v19 = vpop.f32.mrb[32].mxu1  ;;  %5961 = vmatpush1.bf16.msra.mxu0 %v16279_v59 }
 0x35d   : > { %21160 = vst [vmem:[#allocation14_spill] sm:$0xff] %v18171_v51  ;;  %v4606_v20 = vadd.f32 %v17965_v2, %v3672_v18  ;;  %v4608_v21 = vadd.f32 %v17968_v3, %v4025_v19  ;;  %v3674_v24 = vpop.f32.mrb[33].mxu0  ;;  %v4027_v25 = vpop.f32.mrb[33].mxu1  ;;  %v16287_v19 = vld [vmem:[%s21097_s3 + $0x44] ss:$8 sps:$4 sm:$0xff]  }
 0x35e   : > { %21161 = vst [vmem:[#allocation15_spill] sm:$0xff] %v18181_v32  ;;  %v4607_v27 = vadd.f32 %v17972_v4, %v3674_v24  ;;  %v4609_v52 = vadd.f32 %v17771_v11, %v4027_v25  ;;  %v3676_v28 = vpop.f32.mrb[34].mxu0  ;;  %v4029_v29 = vpop.f32.mrb[34].mxu1  ;;  %5962 = vmatprep.subr.bf16.mxu0 %v16287_v19 }
 0x35f   : > { %v4610_v36 = vadd.f32 %v17965_v2, %v3676_v28  ;;  %v4612_v42 = vadd.f32 %v17968_v3, %v4029_v29  ;;  %v3678_v43 = vpop.f32.mrb[35].mxu0  ;;  %v4031_v62 = vpop.f32.mrb[35].mxu1  ;;  %v4862_v46 = vmax.f32 %v4606_v20, 0.0  ;;  %v4864_v47 = vmax.f32 %v4608_v21, 0.0 }
 0x360   : > { %v4611_v44 = vadd.f32 %v17972_v4, %v3678_v43  ;;  %v4613_v45 = vadd.f32 %v17771_v11, %v4031_v62  ;;  %v4863_v55 = vmax.f32 %v4607_v27, 0.0  ;;  %v4865_v56 = vmax.f32 %v4609_v52, 0.0  ;;  %5963 = vmatpush1.bf16.msra.mxu0 %v16285_v26 }
 0x361   : > { %v4866_v48 = vmax.f32 %v4610_v36, 0.0  ;;  %v4868_v49 = vmax.f32 %v4612_v42, 0.0  ;;  %5664 = vmatmul.mubr.bf16.gmra.mrb[140].mxu0 %v18102_v31  ;;  %7331 = vmatmul.mubr.bf16.gmra.mrb[140].mxu1 %v18109_v33 }
 0x362   : > { %v4867_v57 = vmax.f32 %v4611_v44, 0.0  ;;  %v4869_v58 = vmax.f32 %v4613_v45, 0.0  ;;  %v16290_v45 = vld [vmem:[%s21097_s3 + $0x54] ss:$8 sps:$4 sm:$0xff]  }
 0x363   : > { %v5086_v60 = vpack.c.bf16 %v4866_v48, %v4862_v46  ;;  %v5088_v61 = vpack.c.bf16 %v4868_v49, %v4864_v47  ;;  %5964 = vmatprep.subr.bf16.mxu0 %v16290_v45 }
 0x364   : > { %v5087_v34 = vpack.c.bf16 %v4867_v57, %v4863_v55  ;;  %v18205_v7 = vpack.c.bf16 %v4869_v58, %v4865_v56  ;;  %v3682_v31 = vpop.f32.mrb[36].mxu0  ;;  %v4035_v33 = vpop.f32.mrb[36].mxu1  ;;  %v16282_v57 = vld [vmem:[%s21098_s4 + $0x2d0] ss:$8 sps:$4 sm:$0xff]   ;;  %v16284_v58 = vld [vmem:[%s21098_s4 + $0x2d4] ss:$8 sps:$4 sm:$0xff]   ;;  %5965 = vmatpush1.bf16.msra.mxu0 %v16288_v50 }
 0x365   : > { %v4614_v9 = vadd.f32 %v17965_v2, %v3682_v31  ;;  %v4616_v53 = vadd.f32 %v17968_v3, %v4035_v33  ;;  %v3684_v13 = vpop.f32.mrb[37].mxu0  ;;  %v4037_v18 = vpop.f32.mrb[37].mxu1  ;;  %7340 = vmatprep.mubr.bf16.mxu1 %v5088_v61  ;;  %7471 = vmatprep.subr.bf16.mxu1 %v16284_v58 }
 0x366   : > { %v4615_v20 = vadd.f32 %v17972_v4, %v3684_v13  ;;  %v4617_v21 = vadd.f32 %v17771_v11, %v4037_v18  ;;  %v3686_v24 = vpop.f32.mrb[38].mxu0  ;;  %v4039_v25 = vpop.f32.mrb[38].mxu1  ;;  %5673 = vmatprep.mubr.bf16.mxu0 %v5087_v34  ;;  %v16293_v13 = vld [vmem:[%s21097_s3 + $0x64] ss:$8 sps:$4 sm:$0xff]   ;;  %7472 = vmatpush1.bf16.msra.mxu1 %v16282_v57 }
 0x367   : > { %v4618_v27 = vadd.f32 %v17965_v2, %v3686_v24  ;;  %v4620_v52 = vadd.f32 %v17968_v3, %v4039_v25  ;;  %v3688_v28 = vpop.f32.mrb[39].mxu0  ;;  %v4041_v29 = vpop.f32.mrb[39].mxu1  ;;  %v4870_v42 = vmax.f32 %v4614_v9, 0.0  ;;  %v4872_v43 = vmax.f32 %v4616_v53, 0.0  ;;  %v16291_v24 = vld [vmem:[%s21097_s3 + $0x60] ss:$8 sps:$4 sm:$0xff]   ;;  %5966 = vmatprep.subr.bf16.mxu0 %v16293_v13 }
 0x368   : > { %v4619_v30 = vadd.f32 %v17972_v4, %v3688_v28  ;;  %v4621_v36 = vadd.f32 %v17771_v11, %v4041_v29  ;;  %v4871_v46 = vmax.f32 %v4615_v20, 0.0  ;;  %v4873_v47 = vmax.f32 %v4617_v21, 0.0  ;;  %5967 = vmatpush1.bf16.msra.mxu0 %v16291_v24 }
 0x369   : > { %v4874_v62 = vmax.f32 %v4618_v27, 0.0  ;;  %v4876_v44 = vmax.f32 %v4620_v52, 0.0  ;;  %5674 = vmatmul.mubr.bf16.gmra.mrb[144].mxu0 %v5086_v60  ;;  %7341 = vmatmul.mubr.bf16.gmra.mrb[144].mxu1 %v5087_v34 }
 0x36a   : > { %v4875_v48 = vmax.f32 %v4619_v30, 0.0  ;;  %v4877_v49 = vmax.f32 %v4621_v36, 0.0 }
 0x36b   : > { %v5090_v55 = vpack.c.bf16 %v4874_v62, %v4870_v42  ;;  %v5092_v56 = vpack.c.bf16 %v4876_v44, %v4872_v43  ;;  %v16296_v62 = vld [vmem:[%s21097_s3 + $0x74] ss:$8 sps:$4 sm:$0xff]  }
 0x36c   : > { %v5091_v59 = vpack.c.bf16 %v4875_v48, %v4871_v46  ;;  %v18233_v60 = vpack.c.bf16 %v4877_v49, %v4873_v47  ;;  %v3692_v61 = vpop.f32.mrb[40].mxu0  ;;  %v4045_v34 = vpop.f32.mrb[40].mxu1  ;;  %v16294_v48 = vld [vmem:[%s21097_s3 + $0x70] ss:$8 sps:$4 sm:$0xff]   ;;  %5968 = vmatprep.subr.bf16.mxu0 %v16296_v62 }
 0x36d   : > { %v4622_v31 = vadd.f32 %v17965_v2, %v3692_v61  ;;  %v4624_v33 = vadd.f32 %v17968_v3, %v4045_v34  ;;  %v3694_v9 = vpop.f32.mrb[41].mxu0  ;;  %v4047_v53 = vpop.f32.mrb[41].mxu1  ;;  %7350 = vmatprep.mubr.bf16.mxu1 %v5092_v56  ;;  %5969 = vmatpush1.bf16.msra.mxu0 %v16294_v48  ;;  %v16297_v48 = vld [vmem:[%s21098_s4 + $0x2e0] ss:$8 sps:$4 sm:$0xff]  }
 0x36e   : > { %v4623_v18 = vadd.f32 %v17972_v4, %v3694_v9  ;;  %v4625_v19 = vadd.f32 %v17771_v11, %v4047_v53  ;;  %v3696_v20 = vpop.f32.mrb[42].mxu0  ;;  %v4049_v21 = vpop.f32.mrb[42].mxu1  ;;  %5683 = vmatprep.mubr.bf16.mxu0 %v5091_v59 }
 0x36f   : > { %v4626_v25 = vadd.f32 %v17965_v2, %v3696_v20  ;;  %v4628_v26 = vadd.f32 %v17968_v3, %v4049_v21  ;;  %v3698_v27 = vpop.f32.mrb[43].mxu0  ;;  %v4051_v52 = vpop.f32.mrb[43].mxu1  ;;  %v4878_v30 = vmax.f32 %v4622_v31, 0.0  ;;  %v4880_v36 = vmax.f32 %v4624_v33, 0.0  ;;  %v16302_v33 = vld [vmem:[%s21097_s3 + $0x84] ss:$8 sps:$4 sm:$0xff]  }
 0x370   : > { %v4627_v28 = vadd.f32 %v17972_v4, %v3698_v27  ;;  %v4629_v29 = vadd.f32 %v17771_v11, %v4051_v52  ;;  %v4879_v44 = vmax.f32 %v4623_v18, 0.0  ;;  %v4881_v45 = vmax.f32 %v4625_v19, 0.0  ;;  %v16300_v19 = vld [vmem:[%s21097_s3 + $0x80] ss:$8 sps:$4 sm:$0xff]   ;;  %5970 = vmatprep.subr.bf16.mxu0 %v16302_v33 }
 0x371   : > { %v4882_v42 = vmax.f32 %v4626_v25, 0.0  ;;  %v4884_v43 = vmax.f32 %v4628_v26, 0.0  ;;  %5684 = vmatmul.mubr.bf16.gmra.mrb[148].mxu0 %v5090_v55  ;;  %7351 = vmatmul.mubr.bf16.gmra.mrb[148].mxu1 %v5091_v59 }
 0x372   : > { %v4883_v46 = vmax.f32 %v4627_v28, 0.0  ;;  %v4885_v47 = vmax.f32 %v4629_v29, 0.0  ;;  %5971 = vmatpush1.bf16.msra.mxu0 %v16300_v19 }
 0x373   : > { %v18255_v49 = vpack.c.bf16 %v4882_v42, %v4878_v30  ;;  %v18257_v50 = vpack.c.bf16 %v4884_v43, %v4880_v36  ;;  %v16305_v36 = vld [vmem:[%s21097_s3 + $0x94] ss:$8 sps:$4 sm:$0xff]  }
 0x374   : > { %v18259_v56 = vpack.c.bf16 %v4883_v46, %v4879_v44  ;;  %v18261_v55 = vpack.c.bf16 %v4885_v47, %v4881_v45  ;;  %v3702_v57 = vpop.f32.mrb[44].mxu0  ;;  %v4055_v58 = vpop.f32.mrb[44].mxu1  ;;  %v16303_v45 = vld [vmem:[%s21097_s3 + $0x90] ss:$8 sps:$4 sm:$0xff]   ;;  %5972 = vmatprep.subr.bf16.mxu0 %v16305_v36 }
 0x375   : > { %21162 = vst [vmem:[#allocation16_spill] sm:$0xff] %v18257_v50  ;;  %v4630_v59 = vadd.f32 %v17965_v2, %v3702_v57  ;;  %v4632_v61 = vadd.f32 %v17968_v3, %v4055_v58  ;;  %v3704_v34 = vpop.f32.mrb[45].mxu0  ;;  %v4057_v31 = vpop.f32.mrb[45].mxu1  ;;  %v16299_v57 = vld [vmem:[%s21098_s4 + $0x2e4] ss:$8 sps:$4 sm:$0xff]  }
 0x376   : > { %21163 = vst [vmem:[#allocation17_spill] sm:$0xff] %v18261_v55  ;;  %v4631_v9 = vadd.f32 %v17972_v4, %v3704_v34  ;;  %v4633_v53 = vadd.f32 %v17771_v11, %v4057_v31  ;;  %v3706_v13 = vpop.f32.mrb[46].mxu0  ;;  %v4059_v18 = vpop.f32.mrb[46].mxu1  ;;  %5973 = vmatpush1.bf16.msra.mxu0 %v16303_v45  ;;  %7473 = vmatprep.subr.bf16.mxu1 %v16299_v57 }
 0x377   : > { %v4634_v20 = vadd.f32 %v17965_v2, %v3706_v13  ;;  %v4636_v21 = vadd.f32 %v17968_v3, %v4059_v18  ;;  %v3708_v24 = vpop.f32.mrb[47].mxu0  ;;  %v4061_v25 = vpop.f32.mrb[47].mxu1  ;;  %v4886_v52 = vmax.f32 %v4630_v59, 0.0  ;;  %v4888_v28 = vmax.f32 %v4632_v61, 0.0  ;;  %v16308_v13 = vld [vmem:[%s21097_s3 + $0xa4] ss:$8 sps:$4 sm:$0xff]   ;;  %7474 = vmatpush1.bf16.msra.mxu1 %v16297_v48 }
 0x378   : > { %v4635_v26 = vadd.f32 %v17972_v4, %v3708_v24  ;;  %v4637_v27 = vadd.f32 %v17771_v11, %v4061_v25  ;;  %v4887_v42 = vmax.f32 %v4631_v9, 0.0  ;;  %v4889_v43 = vmax.f32 %v4633_v53, 0.0  ;;  %v16306_v24 = vld [vmem:[%s21097_s3 + $0xa0] ss:$8 sps:$4 sm:$0xff]   ;;  %5974 = vmatprep.subr.bf16.mxu0 %v16308_v13 }
 0x379   : > { %v4890_v29 = vmax.f32 %v4634_v20, 0.0  ;;  %v4892_v30 = vmax.f32 %v4636_v21, 0.0 }
 0x37a   : > { %v4891_v62 = vmax.f32 %v4635_v26, 0.0  ;;  %v4893_v44 = vmax.f32 %v4637_v27, 0.0  ;;  %5975 = vmatpush1.bf16.msra.mxu0 %v16306_v24  ;;  %v16317_v24 = vld [vmem:[%s21097_s3 + $0xc4] ss:$8 sps:$4 sm:$0xff]  }
 0x37b   : > { %v18283_v46 = vpack.c.bf16 %v4890_v29, %v4886_v52  ;;  %v18285_v47 = vpack.c.bf16 %v4892_v30, %v4888_v28 }
 0x37c   : > { %v18293_v58 = vpack.c.bf16 %v4891_v62, %v4887_v42  ;;  %v18295_v59 = vpack.c.bf16 %v4893_v44, %v4889_v43  ;;  %v3712_v61 = vpop.f32.mrb[48].mxu0  ;;  %v4065_v34 = vpop.f32.mrb[48].mxu1  ;;  %v16311_v62 = vld [vmem:[%s21097_s3 + $0xb4] ss:$8 sps:$4 sm:$0xff]  }
 0x37d   : > { %21164 = vst [vmem:[#allocation18_spill] sm:$0xff] %v18285_v47  ;;  %v4638_v31 = vadd.f32 %v17965_v2, %v3712_v61  ;;  %v4640_v33 = vadd.f32 %v17968_v3, %v4065_v34  ;;  %v3714_v9 = vpop.f32.mrb[49].mxu0  ;;  %v4067_v53 = vpop.f32.mrb[49].mxu1  ;;  %v16309_v61 = vld [vmem:[%s21097_s3 + $0xb0] ss:$8 sps:$4 sm:$0xff]   ;;  %5976 = vmatprep.subr.bf16.mxu0 %v16311_v62 }
 0x37e   : > { %21165 = vst [vmem:[#allocation19_spill] sm:$0xff] %v18295_v59  ;;  %v4639_v18 = vadd.f32 %v17972_v4, %v3714_v9  ;;  %v4641_v19 = vadd.f32 %v17771_v11, %v4067_v53  ;;  %v3716_v20 = vpop.f32.mrb[50].mxu0  ;;  %v4069_v21 = vpop.f32.mrb[50].mxu1  ;;  %5977 = vmatpush1.bf16.msra.mxu0 %v16309_v61  ;;  %v16320_v61 = vld [vmem:[%s21097_s3 + $0xd4] ss:$8 sps:$4 sm:$0xff]  }
 0x37f   : > { %v4642_v25 = vadd.f32 %v17965_v2, %v3716_v20  ;;  %v4644_v26 = vadd.f32 %v17968_v3, %v4069_v21  ;;  %v3718_v27 = vpop.f32.mrb[51].mxu0  ;;  %v4071_v52 = vpop.f32.mrb[51].mxu1  ;;  %v4894_v30 = vmax.f32 %v4638_v31, 0.0  ;;  %v4896_v36 = vmax.f32 %v4640_v33, 0.0  ;;  %5978 = vmatprep.subr.bf16.mxu0 %v16317_v24 }
 0x380   : > { %v4643_v28 = vadd.f32 %v17972_v4, %v3718_v27  ;;  %v4645_v29 = vadd.f32 %v17771_v11, %v4071_v52  ;;  %v4895_v44 = vmax.f32 %v4639_v18, 0.0  ;;  %v4897_v45 = vmax.f32 %v4641_v19, 0.0 }
 0x381   : > { %v4898_v42 = vmax.f32 %v4642_v25, 0.0  ;;  %v4900_v43 = vmax.f32 %v4644_v26, 0.0 }
 0x382   : > { %v4899_v48 = vmax.f32 %v4643_v28, 0.0  ;;  %v4901_v57 = vmax.f32 %v4645_v29, 0.0  ;;  %v16315_v28 = vld [vmem:[%s21097_s3 + $0xc0] ss:$8 sps:$4 sm:$0xff]  }
 0x383   : > { %v5102_v34 = vpack.c.bf16 %v4898_v42, %v4894_v30  ;;  %v5104_v9 = vpack.c.bf16 %v4900_v43, %v4896_v36  ;;  %5979 = vmatpush1.bf16.msra.mxu0 %v16315_v28 }
 0x384   : > { %v5103_v53 = vpack.c.bf16 %v4899_v48, %v4895_v44  ;;  %v18317_v31 = vpack.c.bf16 %v4901_v57, %v4897_v45  ;;  %v3722_v33 = vpop.f32.mrb[52].mxu0  ;;  %v4075_v13 = vpop.f32.mrb[52].mxu1  ;;  %5980 = vmatprep.subr.bf16.mxu0 %v16320_v61 }
 0x385   : > { %v4646_v20 = vadd.f32 %v17965_v2, %v3722_v33  ;;  %v4648_v18 = vadd.f32 %v17968_v3, %v4075_v13  ;;  %v3724_v19 = vpop.f32.mrb[53].mxu0  ;;  %v4077_v21 = vpop.f32.mrb[53].mxu1  ;;  %7360 = vmatprep.mubr.bf16.mxu1 %v5104_v9 }
 0x386   : > { %v4647_v25 = vadd.f32 %v17972_v4, %v3724_v19  ;;  %v4649_v26 = vadd.f32 %v17771_v11, %v4077_v21  ;;  %v3726_v27 = vpop.f32.mrb[54].mxu0  ;;  %v4079_v52 = vpop.f32.mrb[54].mxu1  ;;  %5693 = vmatprep.mubr.bf16.mxu0 %v5103_v53  ;;  %7361 = vmatmul.mubr.bf16.gmra.mrb[152].mxu1 %v5103_v53 }
 0x387   : > { %v4650_v29 = vadd.f32 %v17965_v2, %v3726_v27  ;;  %v4652_v30 = vadd.f32 %v17968_v3, %v4079_v52  ;;  %v3728_v36 = vpop.f32.mrb[55].mxu0  ;;  %v4081_v42 = vpop.f32.mrb[55].mxu1  ;;  %5694 = vmatmul.mubr.bf16.gmra.mrb[152].mxu0 %v5102_v34  ;;  %v4902_v44 = vmax.f32 %v4646_v20, 0.0  ;;  %v4904_v45 = vmax.f32 %v4648_v18, 0.0  ;;  %v16318_v34 = vld [vmem:[%s21097_s3 + $0xd0] ss:$8 sps:$4 sm:$0xff]  }
 0x388   : > { %v4651_v43 = vadd.f32 %v17972_v4, %v3728_v36  ;;  %v4653_v62 = vadd.f32 %v17771_v11, %v4081_v42  ;;  %v4903_v9 = vmax.f32 %v4647_v25, 0.0  ;;  %v4905_v53 = vmax.f32 %v4649_v26, 0.0  ;;  %v16312_v20 = vld [vmem:[%s21098_s4 + $0x2f0] ss:$8 sps:$4 sm:$0xff]   ;;  %v16314_v18 = vld [vmem:[%s21098_s4 + $0x2f4] ss:$8 sps:$4 sm:$0xff]   ;;  %5981 = vmatpush1.bf16.msra.mxu0 %v16318_v34 }
 0x389   : > { %v4906_v48 = vmax.f32 %v4650_v29, 0.0  ;;  %v4908_v57 = vmax.f32 %v4652_v30, 0.0  ;;  %7475 = vmatprep.subr.bf16.mxu1 %v16314_v18  ;;  %v16323_v36 = vld [vmem:[%s21097_s3 + $0xe4] ss:$8 sps:$4 sm:$0xff]  }
 0x38a   : > { %v4907_v33 = vmax.f32 %v4651_v43, 0.0  ;;  %v4909_v13 = vmax.f32 %v4653_v62, 0.0  ;;  %7476 = vmatpush1.bf16.msra.mxu1 %v16312_v20  ;;  %5982 = vmatprep.subr.bf16.mxu0 %v16323_v36 }
 0x38b   : > { %v5106_v19 = vpack.c.bf16 %v4906_v48, %v4902_v44  ;;  %v5108_v21 = vpack.c.bf16 %v4908_v57, %v4904_v45  ;;  %v16321_v45 = vld [vmem:[%s21097_s3 + $0xe0] ss:$8 sps:$4 sm:$0xff]  }
 0x38c   : > { %v5107_v24 = vpack.c.bf16 %v4907_v33, %v4903_v9  ;;  %v18345_v25 = vpack.c.bf16 %v4909_v13, %v4905_v53  ;;  %v3732_v26 = vpop.f32.mrb[56].mxu0  ;;  %v4085_v27 = vpop.f32.mrb[56].mxu1  ;;  %5983 = vmatpush1.bf16.msra.mxu0 %v16321_v45 }
 0x38d   : > { %v4654_v52 = vadd.f32 %v17965_v2, %v3732_v26  ;;  %v4656_v28 = vadd.f32 %v17968_v3, %v4085_v27  ;;  %v3734_v29 = vpop.f32.mrb[57].mxu0  ;;  %v4087_v30 = vpop.f32.mrb[57].mxu1  ;;  %7370 = vmatprep.mubr.bf16.mxu1 %v5108_v21 }
 0x38e   : > { %v4655_v42 = vadd.f32 %v17972_v4, %v3734_v29  ;;  %v4657_v43 = vadd.f32 %v17771_v11, %v4087_v30  ;;  %v3736_v62 = vpop.f32.mrb[58].mxu0  ;;  %v4089_v44 = vpop.f32.mrb[58].mxu1  ;;  %5703 = vmatprep.mubr.bf16.mxu0 %v5107_v24  ;;  %7371 = vmatmul.mubr.bf16.gmra.mrb[156].mxu1 %v5107_v24  ;;  %v16326_v24 = vld [vmem:[%s21097_s3 + $0xf4] ss:$8 sps:$4 sm:$0xff]  }
 0x38f   : > { %v4658_v48 = vadd.f32 %v17965_v2, %v3736_v62  ;;  %v4660_v57 = vadd.f32 %v17968_v3, %v4089_v44  ;;  %v3738_v61 = vpop.f32.mrb[59].mxu0  ;;  %v4091_v9 = vpop.f32.mrb[59].mxu1  ;;  %5704 = vmatmul.mubr.bf16.gmra.mrb[156].mxu0 %v5106_v19  ;;  %v4910_v13 = vmax.f32 %v4654_v52, 0.0  ;;  %v4912_v34 = vmax.f32 %v4656_v28, 0.0  ;;  %v16324_v19 = vld [vmem:[%s21097_s3 + $0xf0] ss:$8 sps:$4 sm:$0xff]   ;;  %5984 = vmatprep.subr.bf16.mxu0 %v16326_v24 }
 0x390   : > { %v4659_v53 = vadd.f32 %v17972_v4, %v3738_v61  ;;  %v4661_v33 = vadd.f32 %v17771_v11, %v4091_v9  ;;  %v4911_v26 = vmax.f32 %v4655_v42, 0.0  ;;  %v4913_v27 = vmax.f32 %v4657_v43, 0.0  ;;  %5985 = vmatpush1.bf16.msra.mxu0 %v16324_v19 }
 0x391   : > { %v4914_v21 = vmax.f32 %v4658_v48, 0.0  ;;  %v4916_v18 = vmax.f32 %v4660_v57, 0.0 }
 0x392   : > { %v4915_v29 = vmax.f32 %v4659_v53, 0.0  ;;  %v4917_v30 = vmax.f32 %v4661_v33, 0.0 }
 0x393   : > { %v18367_v20 = vpack.c.bf16 %v4914_v21, %v4910_v13  ;;  %v18369_v36 = vpack.c.bf16 %v4916_v18, %v4912_v34 }
 0x394   : > { %v18371_v52 = vpack.c.bf16 %v4915_v29, %v4911_v26  ;;  %v18373_v28 = vpack.c.bf16 %v4917_v30, %v4913_v27  ;;  %v3742_v62 = vpop.f32.mrb[60].mxu0  ;;  %v4095_v44 = vpop.f32.mrb[60].mxu1 }
 0x395   : > { %21166 = vst [vmem:[#allocation20_spill] sm:$0xff] %v18369_v36  ;;  %v4662_v42 = vadd.f32 %v17965_v2, %v3742_v62  ;;  %v4664_v43 = vadd.f32 %v17968_v3, %v4095_v44  ;;  %v3744_v45 = vpop.f32.mrb[61].mxu0  ;;  %v4097_v48 = vpop.f32.mrb[61].mxu1 }
 0x396   : > { %21167 = vst [vmem:[#allocation21_spill] sm:$0xff] %v18373_v28  ;;  %v4663_v57 = vadd.f32 %v17972_v4, %v3744_v45  ;;  %v4665_v61 = vadd.f32 %v17771_v11, %v4097_v48  ;;  %v3746_v9 = vpop.f32.mrb[62].mxu0  ;;  %v4099_v53 = vpop.f32.mrb[62].mxu1 }
 0x397   : > { %v4666_v33 = vadd.f32 %v17965_v2, %v3746_v9  ;;  %v4668_v13 = vadd.f32 %v17968_v3, %v4099_v53  ;;  %v3748_v34 = vpop.f32.mrb[63].mxu0  ;;  %v4101_v21 = vpop.f32.mrb[63].mxu1  ;;  %v4918_v26 = vmax.f32 %v4662_v42, 0.0  ;;  %v4920_v27 = vmax.f32 %v4664_v43, 0.0  ;;  %v16329_v9 = vld [vmem:[%s21098_s4 + $0x4] ss:$8 sps:$4 sm:$0xff]  }
 0x398   : > { %v4667_v18 = vadd.f32 %v17972_v4, %v3748_v34  ;;  %v4669_v24 = vadd.f32 %v17771_v11, %v4101_v21  ;;  %v4919_v19 = vmax.f32 %v4663_v57, 0.0  ;;  %v4921_v62 = vmax.f32 %v4665_v61, 0.0  ;;  %7894 = vmatprep.subr.bf16.mxu1 %v16329_v9 }
 0x399   : > { %v4922_v29 = vmax.f32 %v4666_v33, 0.0  ;;  %v4924_v30 = vmax.f32 %v4668_v13, 0.0 }
 0x39a   : > { %v4923_v44 = vmax.f32 %v4667_v18, 0.0  ;;  %v4925_v45 = vmax.f32 %v4669_v24, 0.0 }
 0x39b   : > { %v18383_v48 = vpack.c.bf16 %v4922_v29, %v4918_v26  ;;  %v18385_v6 = vpack.c.bf16 %v4924_v30, %v4920_v27 }
 0x39c   : > { %v18390_v53 = vpack.c.bf16 %v4923_v44, %v4919_v19  ;;  %v18392_v34 = vpack.c.bf16 %v4925_v45, %v4921_v62  ;;  %v3752_v42 = vpop.f32.mrb[64].mxu0  ;;  %v4105_v43 = vpop.f32.mrb[64].mxu1 }
 0x39d   : > { %21168 = vst [vmem:[#allocation22_spill] sm:$0xff] %v18385_v6  ;;  %v4670_v33 = vadd.f32 %v17965_v2, %v3752_v42  ;;  %v4672_v57 = vadd.f32 %v17968_v3, %v4105_v43  ;;  %v3754_v61 = vpop.f32.mrb[65].mxu0  ;;  %v4107_v13 = vpop.f32.mrb[65].mxu1 }
 0x39e   : > { %21169 = vst [vmem:[#allocation23_spill] sm:$0xff] %v18392_v34  ;;  %v4671_v21 = vadd.f32 %v17972_v4, %v3754_v61  ;;  %v4673_v18 = vadd.f32 %v17771_v11, %v4107_v13  ;;  %v3756_v24 = vpop.f32.mrb[66].mxu0  ;;  %v4109_v26 = vpop.f32.mrb[66].mxu1 }
 0x39f   : > { %v4674_v27 = vadd.f32 %v17965_v2, %v3756_v24  ;;  %v4676_v29 = vadd.f32 %v17968_v3, %v4109_v26  ;;  %v3758_v30 = vpop.f32.mrb[67].mxu0  ;;  %v4111_v19 = vpop.f32.mrb[67].mxu1  ;;  %v4926_v45 = vmax.f32 %v4670_v33, 0.0  ;;  %v4928_v42 = vmax.f32 %v4672_v57, 0.0 }
 0x3a0   : > { %v4675_v62 = vadd.f32 %v17972_v4, %v3758_v30  ;;  %v4677_v44 = vadd.f32 %v17771_v11, %v4111_v19  ;;  %v4927_v1 = vmax.f32 %v4671_v21, 0.0  ;;  %v4929_v61 = vmax.f32 %v4673_v18, 0.0 }
 0x3a1   : > { %v4930_v43 = vmax.f32 %v4674_v27, 0.0  ;;  %v4932_v9 = vmax.f32 %v4676_v29, 0.0 }
 0x3a2   : > { %v4931_v63 = vmax.f32 %v4675_v62, 0.0  ;;  %v4933_v13 = vmax.f32 %v4677_v44, 0.0 }
 0x3a3   : > { %v5118_v34 = vpack.c.bf16 %v4930_v43, %v4926_v45  ;;  %v5120_v28 = vpack.c.bf16 %v4932_v9, %v4928_v42 }
 0x3a4   : > { %v5119_v59 = vpack.c.bf16 %v4931_v63, %v4927_v1  ;;  %v18402_v24 = vpack.c.bf16 %v4933_v13, %v4929_v61  ;;  %v3762_v26 = vpop.f32.mrb[68].mxu0  ;;  %v4115_v55 = vpop.f32.mrb[68].mxu1 }
 0x3a5   : > { %v4678_v32 = vadd.f32 %v17965_v2, %v3762_v26  ;;  %v4680_v30 = vadd.f32 %v17968_v3, %v4115_v55  ;;  %v3764_v19 = vpop.f32.mrb[69].mxu0  ;;  %v4117_v33 = vpop.f32.mrb[69].mxu1  ;;  %7380 = vmatprep.mubr.bf16.mxu1 %v5120_v28 }
 0x3a6   : > { %v4679_v57 = vadd.f32 %v17972_v4, %v3764_v19  ;;  %v4681_v21 = vadd.f32 %v17771_v11, %v4117_v33  ;;  %v3766_v18 = vpop.f32.mrb[70].mxu0  ;;  %v4119_v27 = vpop.f32.mrb[70].mxu1  ;;  %5713 = vmatprep.mubr.bf16.mxu0 %v5119_v59  ;;  %7381 = vmatmul.mubr.bf16.gmra.mrb[160].mxu1 %v5119_v59 }
 0x3a7   : > { %v4682_v63 = vadd.f32 %v17965_v2, %v3766_v18  ;;  %v4684_v1 = vadd.f32 %v17968_v3, %v4119_v27  ;;  %v3768_v29 = vpop.f32.mrb[71].mxu0  ;;  %v4121_v62 = vpop.f32.mrb[71].mxu1  ;;  %5714 = vmatmul.mubr.bf16.gmra.mrb[160].mxu0 %v5118_v34  ;;  %v4934_v28 = vmax.f32 %v4678_v32, 0.0  ;;  %v4936_v45 = vmax.f32 %v4680_v30, 0.0 }
 0x3a8   : > { %v4683_v55 = vadd.f32 %v17972_v4, %v3768_v29  ;;  %v4685_v44 = vadd.f32 %v17771_v11, %v4121_v62  ;;  %v4935_v9 = vmax.f32 %v4679_v57, 0.0  ;;  %v4937_v61 = vmax.f32 %v4681_v21, 0.0 }
 0x3a9   : > { %v4938_v42 = vmax.f32 %v4682_v63, 0.0  ;;  %v4940_v43 = vmax.f32 %v4684_v1, 0.0 }
 0x3aa   : > { %v4939_v13 = vmax.f32 %v4683_v55, 0.0  ;;  %v4941_v26 = vmax.f32 %v4685_v44, 0.0 }
 0x3ab   : > { %v5122_v59 = vpack.c.bf16 %v4938_v42, %v4934_v28  ;;  %v5124_v19 = vpack.c.bf16 %v4940_v43, %v4936_v45 }
 0x3ac   : > { %v5123_v33 = vpack.c.bf16 %v4939_v13, %v4935_v9  ;;  %v18412_v18 = vpack.c.bf16 %v4941_v26, %v4937_v61  ;;  %v3772_v27 = vpop.f32.mrb[72].mxu0  ;;  %v4125_v10 = vpop.f32.mrb[72].mxu1 }
 0x3ad   : > { %v4686_v34 = vadd.f32 %v17965_v2, %v3772_v27  ;;  %v4688_v29 = vadd.f32 %v17968_v3, %v4125_v10  ;;  %v3774_v62 = vpop.f32.mrb[73].mxu0  ;;  %v4127_v32 = vpop.f32.mrb[73].mxu1  ;;  %7390 = vmatprep.mubr.bf16.mxu1 %v5124_v19 }
 0x3ae   : > { %v4687_v30 = vadd.f32 %v17972_v4, %v3774_v62  ;;  %v4689_v57 = vadd.f32 %v17771_v11, %v4127_v32  ;;  %v3776_v21 = vpop.f32.mrb[74].mxu0  ;;  %v4129_v63 = vpop.f32.mrb[74].mxu1  ;;  %5723 = vmatprep.mubr.bf16.mxu0 %v5123_v33  ;;  %7391 = vmatmul.mubr.bf16.gmra.mrb[164].mxu1 %v5123_v33 }
 0x3af   : > { %v4690_v1 = vadd.f32 %v17965_v2, %v3776_v21  ;;  %v4692_v55 = vadd.f32 %v17968_v3, %v4129_v63  ;;  %v3778_v44 = vpop.f32.mrb[75].mxu0  ;;  %v4131_v28 = vpop.f32.mrb[75].mxu1  ;;  %5724 = vmatmul.mubr.bf16.gmra.mrb[164].mxu0 %v5122_v59  ;;  %v4942_v42 = vmax.f32 %v4686_v34, 0.0  ;;  %v4944_v43 = vmax.f32 %v4688_v29, 0.0 }
 0x3b0   : > { %v4691_v10 = vadd.f32 %v17972_v4, %v3778_v44  ;;  %v4693_v45 = vadd.f32 %v17771_v11, %v4131_v28  ;;  %v4943_v13 = vmax.f32 %v4687_v30, 0.0  ;;  %v4945_v26 = vmax.f32 %v4689_v57, 0.0 }
 0x3b1   : > { %v4946_v9 = vmax.f32 %v4690_v1, 0.0  ;;  %v4948_v61 = vmax.f32 %v4692_v55, 0.0 }
 0x3b2   : > { %v4947_v19 = vmax.f32 %v4691_v10, 0.0  ;;  %v4949_v27 = vmax.f32 %v4693_v45, 0.0 }
 0x3b3   : > { %v18422_v33 = vpack.c.bf16 %v4946_v9, %v4942_v42  ;;  %v18424_v62 = vpack.c.bf16 %v4948_v61, %v4944_v43 }
 0x3b4   : > { %v18426_v32 = vpack.c.bf16 %v4947_v19, %v4943_v13  ;;  %v18428_v21 = vpack.c.bf16 %v4949_v27, %v4945_v26  ;;  %v3782_v59 = vpop.f32.mrb[76].mxu0  ;;  %v4135_v63 = vpop.f32.mrb[76].mxu1 }
 0x3b5   : > { %21170 = vst [vmem:[#allocation24_spill] sm:$0xff] %v18424_v62  ;;  %v4694_v44 = vadd.f32 %v17965_v2, %v3782_v59  ;;  %v4696_v34 = vadd.f32 %v17968_v3, %v4135_v63  ;;  %v3784_v29 = vpop.f32.mrb[77].mxu0  ;;  %v4137_v1 = vpop.f32.mrb[77].mxu1 }
 0x3b6   : > { %21171 = vst [vmem:[#allocation25_spill] sm:$0xff] %v18428_v21  ;;  %v4695_v30 = vadd.f32 %v17972_v4, %v3784_v29  ;;  %v4697_v57 = vadd.f32 %v17771_v11, %v4137_v1  ;;  %v3786_v55 = vpop.f32.mrb[78].mxu0  ;;  %v4139_v28 = vpop.f32.mrb[78].mxu1 }
 0x3b7   : > { %v4698_v10 = vadd.f32 %v17965_v2, %v3786_v55  ;;  %v4700_v45 = vadd.f32 %v17968_v3, %v4139_v28  ;;  %v3788_v42 = vpop.f32.mrb[79].mxu0  ;;  %v4141_v43 = vpop.f32.mrb[79].mxu1  ;;  %v4950_v13 = vmax.f32 %v4694_v44, 0.0  ;;  %v4952_v26 = vmax.f32 %v4696_v34, 0.0 }
 0x3b8   : > { %v4699_v9 = vadd.f32 %v17972_v4, %v3788_v42  ;;  %v4701_v61 = vadd.f32 %v17771_v11, %v4141_v43  ;;  %v4951_v59 = vmax.f32 %v4695_v30, 0.0  ;;  %v4953_v63 = vmax.f32 %v4697_v57, 0.0 }
 0x3b9   : > { %v4954_v19 = vmax.f32 %v4698_v10, 0.0  ;;  %v4956_v27 = vmax.f32 %v4700_v45, 0.0 }
 0x3ba   : > { %v4955_v29 = vmax.f32 %v4699_v9, 0.0  ;;  %v4957_v1 = vmax.f32 %v4701_v61, 0.0 }
 0x3bb   : > { %v18438_v21 = vpack.c.bf16 %v4954_v19, %v4950_v13  ;;  %v18440_v17 = vpack.c.bf16 %v4956_v27, %v4952_v26 }
 0x3bc   : > { %v18442_v55 = vpack.c.bf16 %v4955_v29, %v4951_v59  ;;  %v18444_v28 = vpack.c.bf16 %v4957_v1, %v4953_v63  ;;  %v3792_v41 = vpop.f32.mrb[80].mxu0  ;;  %v4145_v42 = vpop.f32.mrb[80].mxu1 }
 0x3bd   : > { %21172 = vst [vmem:[#allocation26_spill] sm:$0xff] %v18440_v17  ;;  %v4702_v43 = vadd.f32 %v17965_v2, %v3792_v41  ;;  %v4704_v44 = vadd.f32 %v17968_v3, %v4145_v42  ;;  %v3794_v34 = vpop.f32.mrb[81].mxu0  ;;  %v4147_v10 = vpop.f32.mrb[81].mxu1 }
 0x3be   : > { %21173 = vst [vmem:[#allocation27_spill] sm:$0xff] %v18444_v28  ;;  %v4703_v30 = vadd.f32 %v17972_v4, %v3794_v34  ;;  %v4705_v57 = vadd.f32 %v17771_v11, %v4147_v10  ;;  %v3796_v45 = vpop.f32.mrb[82].mxu0  ;;  %v4149_v9 = vpop.f32.mrb[82].mxu1 }
 0x3bf   : > { %v4706_v61 = vadd.f32 %v17965_v2, %v3796_v45  ;;  %v4708_v13 = vadd.f32 %v17968_v3, %v4149_v9  ;;  %v3798_v26 = vpop.f32.mrb[83].mxu0  ;;  %v4151_v19 = vpop.f32.mrb[83].mxu1  ;;  %v4958_v59 = vmax.f32 %v4702_v43, 0.0  ;;  %v4960_v63 = vmax.f32 %v4704_v44, 0.0 }
 0x3c0   : > { %v4707_v27 = vadd.f32 %v17972_v4, %v3798_v26  ;;  %v4709_v41 = vadd.f32 %v17771_v11, %v4151_v19  ;;  %v4959_v42 = vmax.f32 %v4703_v30, 0.0  ;;  %v4961_v34 = vmax.f32 %v4705_v57, 0.0 }
 0x3c1   : > { %v4962_v29 = vmax.f32 %v4706_v61, 0.0  ;;  %v4964_v1 = vmax.f32 %v4708_v13, 0.0 }
 0x3c2   : > { %v4963_v28 = vmax.f32 %v4707_v27, 0.0  ;;  %v4965_v10 = vmax.f32 %v4709_v41, 0.0 }
 0x3c3   : > { %v5134_v17 = vpack.c.bf16 %v4962_v29, %v4958_v59  ;;  %v5136_v62 = vpack.c.bf16 %v4964_v1, %v4960_v63 }
 0x3c4   : > { %v5135_v6 = vpack.c.bf16 %v4963_v28, %v4959_v42  ;;  %v18454_v45 = vpack.c.bf16 %v4965_v10, %v4961_v34  ;;  %v3802_v9 = vpop.f32.mrb[84].mxu0  ;;  %v4155_v36 = vpop.f32.mrb[84].mxu1 }
 0x3c5   : > { %v4710_v47 = vadd.f32 %v17965_v2, %v3802_v9  ;;  %v4712_v26 = vadd.f32 %v17968_v3, %v4155_v36  ;;  %v3804_v19 = vpop.f32.mrb[85].mxu0  ;;  %v4157_v43 = vpop.f32.mrb[85].mxu1  ;;  %7400 = vmatprep.mubr.bf16.mxu1 %v5136_v62 }
 0x3c6   : > { %v4711_v44 = vadd.f32 %v17972_v4, %v3804_v19  ;;  %v4713_v30 = vadd.f32 %v17771_v11, %v4157_v43  ;;  %v3806_v57 = vpop.f32.mrb[86].mxu0  ;;  %v4159_v61 = vpop.f32.mrb[86].mxu1  ;;  %5733 = vmatprep.mubr.bf16.mxu0 %v5135_v6  ;;  %7401 = vmatmul.mubr.bf16.gmra.mrb[168].mxu1 %v5135_v6 }
 0x3c7   : > { %v4714_v28 = vadd.f32 %v17965_v2, %v3806_v57  ;;  %v4716_v13 = vadd.f32 %v17968_v3, %v4159_v61  ;;  %v3808_v27 = vpop.f32.mrb[87].mxu0  ;;  %v4161_v41 = vpop.f32.mrb[87].mxu1  ;;  %5734 = vmatmul.mubr.bf16.gmra.mrb[168].mxu0 %v5134_v17  ;;  %v4966_v62 = vmax.f32 %v4710_v47, 0.0  ;;  %v4968_v63 = vmax.f32 %v4712_v26, 0.0 }
 0x3c8   : > { %v4715_v36 = vadd.f32 %v17972_v4, %v3808_v27  ;;  %v4717_v59 = vadd.f32 %v17771_v11, %v4161_v41  ;;  %v4967_v42 = vmax.f32 %v4711_v44, 0.0  ;;  %v4969_v34 = vmax.f32 %v4713_v30, 0.0 }
 0x3c9   : > { %v4970_v29 = vmax.f32 %v4714_v28, 0.0  ;;  %v4972_v1 = vmax.f32 %v4716_v13, 0.0 }
 0x3ca   : > { %v4971_v10 = vmax.f32 %v4715_v36, 0.0  ;;  %v4973_v9 = vmax.f32 %v4717_v59, 0.0 }
 0x3cb   : > { %v5138_v6 = vpack.c.bf16 %v4970_v29, %v4966_v62  ;;  %v5140_v19 = vpack.c.bf16 %v4972_v1, %v4968_v63 }
 0x3cc   : > { %v5139_v43 = vpack.c.bf16 %v4971_v10, %v4967_v42  ;;  %v18464_v57 = vpack.c.bf16 %v4973_v9, %v4969_v34  ;;  %v3812_v61 = vpop.f32.mrb[88].mxu0  ;;  %v4165_v50 = vpop.f32.mrb[88].mxu1 }
 0x3cd   : > { %v4718_v17 = vadd.f32 %v17965_v2, %v3812_v61  ;;  %v4720_v27 = vadd.f32 %v17968_v3, %v4165_v50  ;;  %v3814_v41 = vpop.f32.mrb[89].mxu0  ;;  %v4167_v47 = vpop.f32.mrb[89].mxu1  ;;  %7410 = vmatprep.mubr.bf16.mxu1 %v5140_v19 }
 0x3ce   : > { %v4719_v26 = vadd.f32 %v17972_v4, %v3814_v41  ;;  %v4721_v44 = vadd.f32 %v17771_v11, %v4167_v47  ;;  %v3816_v30 = vpop.f32.mrb[90].mxu0  ;;  %v4169_v28 = vpop.f32.mrb[90].mxu1  ;;  %5743 = vmatprep.mubr.bf16.mxu0 %v5139_v43  ;;  %7411 = vmatmul.mubr.bf16.gmra.mrb[172].mxu1 %v5139_v43 }
 0x3cf   : > { %v4722_v13 = vadd.f32 %v17965_v2, %v3816_v30  ;;  %v4724_v36 = vadd.f32 %v17968_v3, %v4169_v28  ;;  %v3818_v59 = vpop.f32.mrb[91].mxu0  ;;  %v4171_v62 = vpop.f32.mrb[91].mxu1  ;;  %5744 = vmatmul.mubr.bf16.gmra.mrb[172].mxu0 %v5138_v6  ;;  %v4974_v29 = vmax.f32 %v4718_v17, 0.0  ;;  %v4976_v1 = vmax.f32 %v4720_v27, 0.0 }
 0x3d0   : > { %v4723_v50 = vadd.f32 %v17972_v4, %v3818_v59  ;;  %v4725_v63 = vadd.f32 %v17771_v11, %v4171_v62  ;;  %v4975_v10 = vmax.f32 %v4719_v26, 0.0  ;;  %v4977_v9 = vmax.f32 %v4721_v44, 0.0  ;;  %v16356_v26 = vld [vmem:[%s21097_s3 + $0x204] ss:$8 sps:$4 sm:$0xff]  }
 0x3d1   : > { %v4978_v42 = vmax.f32 %v4722_v13, 0.0  ;;  %v4980_v34 = vmax.f32 %v4724_v36, 0.0  ;;  %6372 = vmatprep.subr.bf16.mxu0 %v16356_v26 }
 0x3d2   : > { %v4979_v19 = vmax.f32 %v4723_v50, 0.0  ;;  %v4981_v61 = vmax.f32 %v4725_v63, 0.0 }
 0x3d3   : > { %v18474_v43 = vpack.c.bf16 %v4978_v42, %v4974_v29  ;;  %v18476_v41 = vpack.c.bf16 %v4980_v34, %v4976_v1 }
 0x3d4   : > { %v18478_v47 = vpack.c.bf16 %v4979_v19, %v4975_v10  ;;  %v18480_v30 = vpack.c.bf16 %v4981_v61, %v4977_v9  ;;  %v3822_v6 = vpop.f32.mrb[92].mxu0  ;;  %v4175_v28 = vpop.f32.mrb[92].mxu1 }
 0x3d5   : > { %21174 = vst [vmem:[#allocation28_spill] sm:$0xff] %v18476_v41  ;;  %v4726_v59 = vadd.f32 %v17965_v2, %v3822_v6  ;;  %v4728_v17 = vadd.f32 %v17968_v3, %v4175_v28  ;;  %v3824_v27 = vpop.f32.mrb[93].mxu0  ;;  %v4177_v13 = vpop.f32.mrb[93].mxu1 }
 0x3d6   : > { %21175 = vst [vmem:[#allocation29_spill] sm:$0xff] %v18480_v30  ;;  %v4727_v44 = vadd.f32 %v17972_v4, %v3824_v27  ;;  %v4729_v36 = vadd.f32 %v17771_v11, %v4177_v13  ;;  %v3826_v62 = vpop.f32.mrb[94].mxu0  ;;  %v4179_v50 = vpop.f32.mrb[94].mxu1 }
 0x3d7   : > { %v4730_v63 = vadd.f32 %v17965_v2, %v3826_v62  ;;  %v4732_v29 = vadd.f32 %v17968_v3, %v4179_v50  ;;  %v3828_v1 = vpop.f32.mrb[95].mxu0  ;;  %v4181_v42 = vpop.f32.mrb[95].mxu1  ;;  %v4982_v9 = vmax.f32 %v4726_v59, 0.0  ;;  %v4984_v19 = vmax.f32 %v4728_v17, 0.0 }
 0x3d8   : > { %v4731_v34 = vadd.f32 %v17972_v4, %v3828_v1  ;;  %v4733_v10 = vadd.f32 %v17771_v11, %v4181_v42  ;;  %v4983_v28 = vmax.f32 %v4727_v44, 0.0  ;;  %v4985_v27 = vmax.f32 %v4729_v36, 0.0 }
 0x3d9   : > { %v4986_v61 = vmax.f32 %v4730_v63, 0.0  ;;  %v4988_v6 = vmax.f32 %v4732_v29, 0.0 }
 0x3da   : > { %v4987_v13 = vmax.f32 %v4731_v34, 0.0  ;;  %v4989_v30 = vmax.f32 %v4733_v10, 0.0 }
 0x3db   : > { %v18493_v41 = vpack.c.bf16 %v4986_v61, %v4982_v9  ;;  %v18495_v62 = vpack.c.bf16 %v4988_v6, %v4984_v19 }
 0x3dc   : > { %v18497_v50 = vpack.c.bf16 %v4987_v13, %v4983_v28  ;;  %v18499_v51 = vpack.c.bf16 %v4989_v30, %v4985_v27  ;;  %v3832_v26 = vpop.f32.mrb[96].mxu0  ;;  %v4185_v1 = vpop.f32.mrb[96].mxu1 }
 0x3dd   : > { %21176 = vst [vmem:[#allocation30_spill] sm:$0xff] %v18493_v41  ;;  %21177 = vst [vmem:[#allocation31_spill] sm:$0xff] %v18495_v62  ;;  %v4734_v42 = vadd.f32 %v17965_v2, %v3832_v26  ;;  %v4736_v59 = vadd.f32 %v17968_v3, %v4185_v1  ;;  %v3834_v17 = vpop.f32.mrb[97].mxu0  ;;  %v4187_v63 = vpop.f32.mrb[97].mxu1 }
 0x3de   : > { %21178 = vst [vmem:[#allocation32_spill] sm:$0xff] %v18497_v50  ;;  %21179 = vst [vmem:[#allocation33_spill] sm:$0xff] %v18499_v51  ;;  %v4735_v44 = vadd.f32 %v17972_v4, %v3834_v17  ;;  %v4737_v36 = vadd.f32 %v17771_v11, %v4187_v63  ;;  %v3836_v29 = vpop.f32.mrb[98].mxu0  ;;  %v4189_v34 = vpop.f32.mrb[98].mxu1 }
 0x3df   : > { %v4738_v10 = vadd.f32 %v17965_v2, %v3836_v29  ;;  %v4740_v9 = vadd.f32 %v17968_v3, %v4189_v34  ;;  %v3838_v30 = vpop.f32.mrb[99].mxu0  ;;  %v4191_v19 = vpop.f32.mrb[99].mxu1  ;;  %v4990_v28 = vmax.f32 %v4734_v42, 0.0  ;;  %v4992_v27 = vmax.f32 %v4736_v59, 0.0 }
 0x3e0   : > { %v4739_v61 = vadd.f32 %v17972_v4, %v3838_v30  ;;  %v4741_v6 = vadd.f32 %v17771_v11, %v4191_v19  ;;  %v4991_v1 = vmax.f32 %v4735_v44, 0.0  ;;  %v4993_v17 = vmax.f32 %v4737_v36, 0.0 }
 0x3e1   : > { %v4994_v13 = vmax.f32 %v4738_v10, 0.0  ;;  %v4996_v26 = vmax.f32 %v4740_v9, 0.0 }
 0x3e2   : > { %v4995_v51 = vmax.f32 %v4739_v61, 0.0  ;;  %v4997_v63 = vmax.f32 %v4741_v6, 0.0 }
 0x3e3   : > { %v5150_v62 = vpack.c.bf16 %v4994_v13, %v4990_v28  ;;  %v5152_v23 = vpack.c.bf16 %v4996_v26, %v4992_v27 }
 0x3e4   : > { %v5151_v8 = vpack.c.bf16 %v4995_v51, %v4991_v1  ;;  %v18509_v29 = vpack.c.bf16 %v4997_v63, %v4993_v17  ;;  %v3842_v34 = vpop.f32.mrb[100].mxu0  ;;  %v4195_v39 = vpop.f32.mrb[100].mxu1 }
 0x3e5   : > { %v4742_v41 = vadd.f32 %v17965_v2, %v3842_v34  ;;  %v4744_v30 = vadd.f32 %v17968_v3, %v4195_v39  ;;  %v3844_v19 = vpop.f32.mrb[101].mxu0  ;;  %v4197_v42 = vpop.f32.mrb[101].mxu1  ;;  %7420 = vmatprep.mubr.bf16.mxu1 %v5152_v23 }
 0x3e6   : > { %v4743_v59 = vadd.f32 %v17972_v4, %v3844_v19  ;;  %v4745_v44 = vadd.f32 %v17771_v11, %v4197_v42  ;;  %v3846_v36 = vpop.f32.mrb[102].mxu0  ;;  %v4199_v10 = vpop.f32.mrb[102].mxu1  ;;  %5753 = vmatprep.mubr.bf16.mxu0 %v5151_v8  ;;  %7421 = vmatmul.mubr.bf16.gmra.mrb[176].mxu1 %v5151_v8 }
 0x3e7   : > { %v4746_v51 = vadd.f32 %v17965_v2, %v3846_v36  ;;  %v4748_v9 = vadd.f32 %v17968_v3, %v4199_v10  ;;  %v3848_v61 = vpop.f32.mrb[103].mxu0  ;;  %v4201_v6 = vpop.f32.mrb[103].mxu1  ;;  %5754 = vmatmul.mubr.bf16.gmra.mrb[176].mxu0 %v5150_v62  ;;  %v4998_v23 = vmax.f32 %v4742_v41, 0.0  ;;  %v5000_v27 = vmax.f32 %v4744_v30, 0.0 }
 0x3e8   : > { %v4747_v39 = vadd.f32 %v17972_v4, %v3848_v61  ;;  %v4749_v28 = vadd.f32 %v17771_v11, %v4201_v6  ;;  %v4999_v1 = vmax.f32 %v4743_v59, 0.0  ;;  %v5001_v17 = vmax.f32 %v4745_v44, 0.0 }
 0x3e9   : > { %v5002_v13 = vmax.f32 %v4746_v51, 0.0  ;;  %v5004_v26 = vmax.f32 %v4748_v9, 0.0 }
 0x3ea   : > { %v5003_v63 = vmax.f32 %v4747_v39, 0.0  ;;  %v5005_v34 = vmax.f32 %v4749_v28, 0.0 }
 0x3eb   : > { %v5154_v8 = vpack.c.bf16 %v5002_v13, %v4998_v23  ;;  %v5156_v19 = vpack.c.bf16 %v5004_v26, %v5000_v27 }
 0x3ec   : > { %v5155_v42 = vpack.c.bf16 %v5003_v63, %v4999_v1  ;;  %v18519_v36 = vpack.c.bf16 %v5005_v34, %v5001_v17  ;;  %v3852_v10 = vpop.f32.mrb[104].mxu0  ;;  %v4205_v50 = vpop.f32.mrb[104].mxu1 }
 0x3ed   : > { %v4750_v62 = vadd.f32 %v17965_v2, %v3852_v10  ;;  %v4752_v61 = vadd.f32 %v17968_v3, %v4205_v50  ;;  %v3854_v6 = vpop.f32.mrb[105].mxu0  ;;  %v4207_v41 = vpop.f32.mrb[105].mxu1  ;;  %7430 = vmatprep.mubr.bf16.mxu1 %v5156_v19 }
 0x3ee   : > { %21180 = vst [vmem:[#allocation34_spill] sm:$0xff] %v18519_v36  ;;  %v4751_v30 = vadd.f32 %v17972_v4, %v3854_v6  ;;  %v4753_v59 = vadd.f32 %v17771_v11, %v4207_v41  ;;  %v3856_v44 = vpop.f32.mrb[106].mxu0  ;;  %v4209_v51 = vpop.f32.mrb[106].mxu1  ;;  %5763 = vmatprep.mubr.bf16.mxu0 %v5155_v42  ;;  %7431 = vmatmul.mubr.bf16.gmra.mrb[180].mxu1 %v5155_v42 }
 0x3ef   : > { %v4754_v9 = vadd.f32 %v17965_v2, %v3856_v44  ;;  %v4756_v39 = vadd.f32 %v17968_v3, %v4209_v51  ;;  %v3858_v28 = vpop.f32.mrb[107].mxu0  ;;  %v4211_v23 = vpop.f32.mrb[107].mxu1  ;;  %5764 = vmatmul.mubr.bf16.gmra.mrb[180].mxu0 %v5154_v8  ;;  %v5006_v13 = vmax.f32 %v4750_v62, 0.0  ;;  %v5008_v26 = vmax.f32 %v4752_v61, 0.0 }
 0x3f0   : > { %v4755_v50 = vadd.f32 %v17972_v4, %v3858_v28  ;;  %v4757_v27 = vadd.f32 %v17771_v11, %v4211_v23  ;;  %v5007_v63 = vmax.f32 %v4751_v30, 0.0  ;;  %v5009_v34 = vmax.f32 %v4753_v59, 0.0 }
 0x3f1   : > { %v5010_v1 = vmax.f32 %v4754_v9, 0.0  ;;  %v5012_v17 = vmax.f32 %v4756_v39, 0.0 }
 0x3f2   : > { %v5011_v19 = vmax.f32 %v4755_v50, 0.0  ;;  %v5013_v10 = vmax.f32 %v4757_v27, 0.0 }
 0x3f3   : > { %v18529_v42 = vpack.c.bf16 %v5010_v1, %v5006_v13  ;;  %v18531_v6 = vpack.c.bf16 %v5012_v17, %v5008_v26 }
 0x3f4   : > { %v18533_v41 = vpack.c.bf16 %v5011_v19, %v5007_v63  ;;  %v18535_v44 = vpack.c.bf16 %v5013_v10, %v5009_v34  ;;  %v3862_v8 = vpop.f32.mrb[108].mxu0  ;;  %v4215_v51 = vpop.f32.mrb[108].mxu1 }
 0x3f5   : > { %21181 = vst [vmem:[#allocation35_spill] sm:$0xff] %v18529_v42  ;;  %21182 = vst [vmem:[#allocation36_spill] sm:$0xff] %v18531_v6  ;;  %v4758_v28 = vadd.f32 %v17965_v2, %v3862_v8  ;;  %v4760_v62 = vadd.f32 %v17968_v3, %v4215_v51  ;;  %v3864_v61 = vpop.f32.mrb[109].mxu0  ;;  %v4217_v9 = vpop.f32.mrb[109].mxu1 }
 0x3f6   : > { %21183 = vst [vmem:[#allocation37_spill] sm:$0xff] %v18533_v41  ;;  %21184 = vst [vmem:[#allocation38_spill] sm:$0xff] %v18535_v44  ;;  %v4759_v30 = vadd.f32 %v17972_v4, %v3864_v61  ;;  %v4761_v59 = vadd.f32 %v17771_v11, %v4217_v9  ;;  %v3866_v39 = vpop.f32.mrb[110].mxu0  ;;  %v4219_v23 = vpop.f32.mrb[110].mxu1 }
 0x3f7   : > { %v4762_v50 = vadd.f32 %v17965_v2, %v3866_v39  ;;  %v4764_v27 = vadd.f32 %v17968_v3, %v4219_v23  ;;  %v3868_v13 = vpop.f32.mrb[111].mxu0  ;;  %v4221_v26 = vpop.f32.mrb[111].mxu1  ;;  %v5014_v63 = vmax.f32 %v4758_v28, 0.0  ;;  %v5016_v34 = vmax.f32 %v4760_v62, 0.0 }
 0x3f8   : > { %v4763_v1 = vadd.f32 %v17972_v4, %v3868_v13  ;;  %v4765_v17 = vadd.f32 %v17771_v11, %v4221_v26  ;;  %v5015_v8 = vmax.f32 %v4759_v30, 0.0  ;;  %v5017_v51 = vmax.f32 %v4761_v59, 0.0 }
 0x3f9   : > { %v5018_v19 = vmax.f32 %v4762_v50, 0.0  ;;  %v5020_v10 = vmax.f32 %v4764_v27, 0.0 }
 0x3fa   : > { %v5019_v61 = vmax.f32 %v4763_v1, 0.0  ;;  %v5021_v9 = vmax.f32 %v4765_v17, 0.0 }
 0x3fb   : > { %v18545_v44 = vpack.c.bf16 %v5018_v19, %v5014_v63  ;;  %v18547_v6 = vpack.c.bf16 %v5020_v10, %v5016_v34 }
 0x3fc   : > { %v18549_v39 = vpack.c.bf16 %v5019_v61, %v5015_v8  ;;  %v18551_v23 = vpack.c.bf16 %v5021_v9, %v5017_v51  ;;  %v3872_v42 = vpop.f32.mrb[112].mxu0  ;;  %v4225_v13 = vpop.f32.mrb[112].mxu1 }
 0x3fd   : > { %21185 = vst [vmem:[#allocation39_spill] sm:$0xff] %v18545_v44  ;;  %21186 = vst [vmem:[#allocation40_spill] sm:$0xff] %v18547_v6  ;;  %v4766_v26 = vadd.f32 %v17965_v2, %v3872_v42  ;;  %v4768_v28 = vadd.f32 %v17968_v3, %v4225_v13  ;;  %v3874_v62 = vpop.f32.mrb[113].mxu0  ;;  %v4227_v50 = vpop.f32.mrb[113].mxu1 }
 0x3fe   : > { %21187 = vst [vmem:[#allocation41_spill] sm:$0xff] %v18549_v39  ;;  %21188 = vst [vmem:[#allocation42_spill] sm:$0xff] %v18551_v23  ;;  %v4767_v30 = vadd.f32 %v17972_v4, %v3874_v62  ;;  %v4769_v59 = vadd.f32 %v17771_v11, %v4227_v50  ;;  %v3876_v27 = vpop.f32.mrb[114].mxu0  ;;  %v4229_v1 = vpop.f32.mrb[114].mxu1 }
 0x3ff   : > { %v4770_v17 = vadd.f32 %v17965_v2, %v3876_v27  ;;  %v4772_v63 = vadd.f32 %v17968_v3, %v4229_v1  ;;  %v3878_v34 = vpop.f32.mrb[115].mxu0  ;;  %v4231_v19 = vpop.f32.mrb[115].mxu1  ;;  %v5022_v8 = vmax.f32 %v4766_v26, 0.0  ;;  %v5024_v51 = vmax.f32 %v4768_v28, 0.0 }
 0x400   : > { %v4771_v10 = vadd.f32 %v17972_v4, %v3878_v34  ;;  %v4773_v42 = vadd.f32 %v17771_v11, %v4231_v19  ;;  %v5023_v13 = vmax.f32 %v4767_v30, 0.0  ;;  %v5025_v62 = vmax.f32 %v4769_v59, 0.0 }
 0x401   : > { %v5026_v61 = vmax.f32 %v4770_v17, 0.0  ;;  %v5028_v9 = vmax.f32 %v4772_v63, 0.0 }
 0x402   : > { %v5027_v23 = vmax.f32 %v4771_v10, 0.0  ;;  %v5029_v50 = vmax.f32 %v4773_v42, 0.0 }
 0x403   : > { %v5166_v6 = vpack.c.bf16 %v5026_v61, %v5022_v8  ;;  %v5168_v44 = vpack.c.bf16 %v5028_v9, %v5024_v51 }
 0x404   : > { %v5167_v39 = vpack.c.bf16 %v5027_v23, %v5023_v13  ;;  %v18561_v27 = vpack.c.bf16 %v5029_v50, %v5025_v62  ;;  %v3882_v1 = vpop.f32.mrb[116].mxu0  ;;  %v4235_v41 = vpop.f32.mrb[116].mxu1 }
 0x405   : > { %v4774_v36 = vadd.f32 %v17965_v2, %v3882_v1  ;;  %v4776_v34 = vadd.f32 %v17968_v3, %v4235_v41  ;;  %v3884_v19 = vpop.f32.mrb[117].mxu0  ;;  %v4237_v26 = vpop.f32.mrb[117].mxu1  ;;  %7440 = vmatprep.mubr.bf16.mxu1 %v5168_v44 }
 0x406   : > { %21189 = vst [vmem:[#allocation43_spill] sm:$0xff] %v18561_v27  ;;  %v4775_v28 = vadd.f32 %v17972_v4, %v3884_v19  ;;  %v4777_v30 = vadd.f32 %v17771_v11, %v4237_v26  ;;  %v3886_v59 = vpop.f32.mrb[118].mxu0  ;;  %v4239_v17 = vpop.f32.mrb[118].mxu1  ;;  %5773 = vmatprep.mubr.bf16.mxu0 %v5167_v39  ;;  %7441 = vmatmul.mubr.bf16.gmra.mrb[184].mxu1 %v5167_v39 }
 0x407   : > { %v4778_v23 = vadd.f32 %v17965_v2, %v3886_v59  ;;  %v4780_v63 = vadd.f32 %v17968_v3, %v4239_v17  ;;  %v3888_v10 = vpop.f32.mrb[119].mxu0  ;;  %v4241_v42 = vpop.f32.mrb[119].mxu1  ;;  %5774 = vmatmul.mubr.bf16.gmra.mrb[184].mxu0 %v5166_v6  ;;  %v5030_v44 = vmax.f32 %v4774_v36, 0.0  ;;  %v5032_v51 = vmax.f32 %v4776_v34, 0.0 }
 0x408   : > { %v4779_v41 = vadd.f32 %v17972_v4, %v3888_v10  ;;  %v4781_v8 = vadd.f32 %v17771_v11, %v4241_v42  ;;  %v5031_v13 = vmax.f32 %v4775_v28, 0.0  ;;  %v5033_v62 = vmax.f32 %v4777_v30, 0.0 }
 0x409   : > { %v5034_v61 = vmax.f32 %v4778_v23, 0.0  ;;  %v5036_v9 = vmax.f32 %v4780_v63, 0.0 }
 0x40a   : > { %v5035_v50 = vmax.f32 %v4779_v41, 0.0  ;;  %v5037_v1 = vmax.f32 %v4781_v8, 0.0 }
 0x40b   : > { %v5170_v39 = vpack.c.bf16 %v5034_v61, %v5030_v44  ;;  %v5172_v19 = vpack.c.bf16 %v5036_v9, %v5032_v51  ;;  %v21190_v51 = vmov 0  }
 0x40c   : > { %v5171_v26 = vpack.c.bf16 %v5035_v50, %v5031_v13  ;;  %v18571_v59 = vpack.c.bf16 %v5037_v1, %v5033_v62  ;;  %v3892_v17 = vpop.f32.mrb[120].mxu0  ;;  %v4245_v27 = vpop.f32.mrb[120].mxu1 }
 0x40d   : > { %v4782_v6 = vadd.f32 %v17965_v2, %v3892_v17  ;;  %v4784_v10 = vadd.f32 %v17968_v3, %v4245_v27  ;;  %v3894_v42 = vpop.f32.mrb[121].mxu0  ;;  %v4247_v36 = vpop.f32.mrb[121].mxu1  ;;  %7450 = vmatprep.mubr.bf16.mxu1 %v5172_v19 }
 0x40e   : > { %v4783_v34 = vadd.f32 %v17972_v4, %v3894_v42  ;;  %v4785_v28 = vadd.f32 %v17771_v11, %v4247_v36  ;;  %v3896_v30 = vpop.f32.mrb[122].mxu0  ;;  %v4249_v23 = vpop.f32.mrb[122].mxu1  ;;  %5783 = vmatprep.mubr.bf16.mxu0 %v5171_v26  ;;  %7451 = vmatmul.mubr.bf16.gmra.mrb[188].mxu1 %v5171_v26 }
 0x40f   : > { %v4786_v63 = vadd.f32 %v17965_v2, %v3896_v30  ;;  %v4788_v41 = vadd.f32 %v17968_v3, %v4249_v23  ;;  %v3898_v8 = vpop.f32.mrb[123].mxu0  ;;  %v4251_v44 = vpop.f32.mrb[123].mxu1  ;;  %5784 = vmatmul.mubr.bf16.gmra.mrb[188].mxu0 %v5170_v39  ;;  %7493 = vmatprep.mubr.bf16.mxu1 %v21190_v51  ;;  %v5038_v9 = vmax.f32 %v4782_v6, 0.0  ;;  %v5040_v13 = vmax.f32 %v4784_v10, 0.0  ;;  %v16327_v39 = vld [vmem:[%s21098_s4] ss:$8 sps:$4 sm:$0xff]  }
 0x410   : > { %v4787_v27 = vadd.f32 %v17972_v4, %v3898_v8  ;;  %v4789_v61 = vadd.f32 %v17771_v11, %v4251_v44  ;;  %5986 = vmatprep.mubr.bf16.mxu0 %v21190_v51  ;;  %v5039_v1 = vmax.f32 %v4783_v34, 0.0  ;;  %v5041_v19 = vmax.f32 %v4785_v28, 0.0  ;;  %v16332_v8 = vld [vmem:[%s21098_s4 + $0x14] ss:$8 sps:$4 sm:$0xff]   ;;  %v16354_v44 = vld [vmem:[%s21097_s3 + $0x200] ss:$8 sps:$4 sm:$0xff]  }
 0x411   : > { %v5042_v62 = vmax.f32 %v4786_v63, 0.0  ;;  %v5044_v50 = vmax.f32 %v4788_v41, 0.0 }
 0x412   : > { %v5043_v26 = vmax.f32 %v4787_v27, 0.0  ;;  %v5045_v17 = vmax.f32 %v4789_v61, 0.0 }
 0x413   : > { %v18583_v42 = vpack.c.bf16 %v5042_v62, %v5038_v9  ;;  %v18585_v36 = vpack.c.bf16 %v5044_v50, %v5040_v13  ;;  %v16359_v62 = vld [vmem:[%s21097_s3 + $0x214] ss:$8 sps:$4 sm:$0xff]  }
 0x414   : > { %v18590_v30 = vpack.c.bf16 %v5043_v26, %v5039_v1  ;;  %v18592_v23 = vpack.c.bf16 %v5045_v17, %v5041_v19  ;;  %v3902_v6 = vpop.f32.mrb[124].mxu0  ;;  %v4255_v10 = vpop.f32.mrb[124].mxu1  ;;  %v16330_v17 = vld [vmem:[%s21098_s4 + $0x10] ss:$8 sps:$4 sm:$0xff]  }
 0x415   : > { %v4790_v63 = vadd.f32 %v17965_v2, %v3902_v6  ;;  %v4792_v34 = vadd.f32 %v17968_v3, %v4255_v10  ;;  %v3904_v28 = vpop.f32.mrb[125].mxu0  ;;  %v4257_v41 = vpop.f32.mrb[125].mxu1 }
 0x416   : > { %21191 = vst [vmem:[#allocation44_spill] sm:$0xff] %v18592_v23  ;;  %v4791_v27 = vadd.f32 %v17972_v4, %v3904_v28  ;;  %v4793_v61 = vadd.f32 %v17771_v11, %v4257_v41  ;;  %v3906_v9 = vpop.f32.mrb[126].mxu0  ;;  %v4259_v13 = vpop.f32.mrb[126].mxu1  ;;  %7494 = vmatmul.mubr.bf16.vlgmr.msra.gmra.mrb[128].mxu1 %v17996_v35 }
 0x417   : > { %v4794_v50 = vadd.f32 %v17965_v2, %v3906_v9  ;;  %v4796_v1 = vadd.f32 %v17968_v3, %v4259_v13  ;;  %v3908_v19 = vpop.f32.mrb[127].mxu0  ;;  %v4261_v26 = vpop.f32.mrb[127].mxu1  ;;  %5987 = vmatmul.mubr.bf16.vlgmr.msra.gmra.mrb[128].mxu0 %v21190_v51  ;;  %7895 = vmatpush1.bf16.msra.mxu1 %v16327_v39  ;;  %v16335_v2 = vld [vmem:[%s21098_s4 + $0x24] ss:$8 sps:$4 sm:$0xff]   ;;  %v5046_v3 = vmax.f32 %v4790_v63, 0.0  ;;  %v5048_v10 = vmax.f32 %v4792_v34, 0.0 }
 0x418   : > { %v4795_v6 = vadd.f32 %v17972_v4, %v3908_v19  ;;  %v4797_v35 = vadd.f32 %v17771_v11, %v4261_v26  ;;  %7503 = vmatprep.mubr.bf16.mxu1 %v21190_v51  ;;  %5996 = vmatprep.mubr.bf16.mxu0 %v21190_v51  ;;  %v16357_v4 = vld [vmem:[%s21097_s3 + $0x210] ss:$8 sps:$4 sm:$0xff]   ;;  %v5047_v41 = vmax.f32 %v4791_v27, 0.0  ;;  %v5049_v11 = vmax.f32 %v4793_v61, 0.0  ;;  %v16365_v19 = vld [vmem:[%s21097_s3 + $0x224] ss:$8 sps:$4 sm:$0xff]  }
 0x419   : > { %v5050_v28 = vmax.f32 %v4794_v50, 0.0  ;;  %v5052_v39 = vmax.f32 %v4796_v1, 0.0  ;;  %7896 = vmatprep.subr.bf16.mxu1 %v16332_v8  ;;  %6373 = vmatpush1.bf16.msra.mxu0 %v16354_v44  ;;  %v16333_v44 = vld [vmem:[%s21098_s4 + $0x20] ss:$8 sps:$4 sm:$0xff]   ;;  %v16338_v27 = vld [vmem:[%s21098_s4 + $0x34] ss:$8 sps:$4 sm:$0xff]  }
 0x41a   : > { %v5051_v9 = vmax.f32 %v4795_v6, 0.0  ;;  %v5053_v13 = vmax.f32 %v4797_v35, 0.0  ;;  %6374 = vmatprep.subr.bf16.mxu0 %v16359_v62  ;;  %v16363_v61 = vld [vmem:[%s21097_s3 + $0x220] ss:$8 sps:$4 sm:$0xff]   ;;  %v16368_v62 = vld [vmem:[%s21097_s3 + $0x234] ss:$8 sps:$4 sm:$0xff]  }
 0x41b   : > { %v18627_v26 = vpack.c.bf16 %v5050_v28, %v5046_v3  ;;  %v18629_v63 = vpack.c.bf16 %v5052_v39, %v5048_v10  ;;  %7897 = vmatpush1.bf16.msra.mxu1 %v16330_v17  ;;  %v16336_v50 = vld [vmem:[%s21098_s4 + $0x30] ss:$8 sps:$4 sm:$0xff]   ;;  %v16374_v17 = vld [vmem:[%s21097_s3 + $0x244] ss:$8 sps:$4 sm:$0xff]   ;;  %v16339_v6 = vld [vmem:[%s21098_s4 + $0x40] ss:$8 sps:$4 sm:$0xff]  }
 0x41c   : > { %v18631_v34 = vpack.c.bf16 %v5051_v9, %v5047_v41  ;;  %v18633_v8 = vpack.c.bf16 %v5053_v13, %v5049_v11  ;;  %7898 = vmatprep.subr.bf16.mxu1 %v16335_v2  ;;  %v16366_v1 = vld [vmem:[%s21097_s3 + $0x230] ss:$8 sps:$4 sm:$0xff]   ;;  %v16344_v35 = vld [vmem:[%s21098_s4 + $0x54] ss:$8 sps:$4 sm:$0xff]   ;;  %v16372_v2 = vld [vmem:[%s21097_s3 + $0x240] ss:$8 sps:$4 sm:$0xff]  }
 0x41d   : > { %6375 = vmatpush1.bf16.msra.mxu0 %v16357_v4  ;;  %v16377_v3 = vld [vmem:[%s21097_s3 + $0x254] ss:$8 sps:$4 sm:$0xff]   ;;  %v16342_v10 = vld [vmem:[%s21098_s4 + $0x50] ss:$8 sps:$4 sm:$0xff]   ;;  %v16383_v39 = vld [vmem:[%s21097_s3 + $0x264] ss:$8 sps:$4 sm:$0xff]  }
 0x41e   : > { %21192 = vst [vmem:[#allocation45_spill] sm:$0xff] %v18633_v8  ;;  %7504 = vmatmul.mubr.bf16.gmra.mrb[132].mxu1 %v18017_v5  ;;  %6376 = vmatprep.subr.bf16.mxu0 %v16365_v19  ;;  %v16341_v5 = vld [vmem:[%s21098_s4 + $0x44] ss:$8 sps:$4 sm:$0xff]   ;;  %v16375_v28 = vld [vmem:[%s21097_s3 + $0x250] ss:$8 sps:$4 sm:$0xff]  }
 0x41f   : > { %5997 = vmatmul.mubr.bf16.gmra.mrb[132].mxu0 %v21190_v51  ;;  %7513 = vmatprep.mubr.bf16.mxu1 %v21190_v51  ;;  %v16345_v4 = vld [vmem:[%s21098_s4 + $0x60] ss:$8 sps:$4 sm:$0xff]   ;;  %v16350_v41 = vld [vmem:[%s21098_s4 + $0x74] ss:$8 sps:$4 sm:$0xff]   ;;  %v16348_v13 = vld [vmem:[%s21098_s4 + $0x70] ss:$8 sps:$4 sm:$0xff]  }
 0x420   : > { %6006 = vmatprep.mubr.bf16.mxu0 %v18038_v40  ;;  %7899 = vmatpush1.bf16.msra.mxu1 %v16333_v44  ;;  %v16381_v11 = vld [vmem:[%s21097_s3 + $0x260] ss:$8 sps:$4 sm:$0xff]   ;;  %v16386_v9 = vld [vmem:[%s21097_s3 + $0x274] ss:$8 sps:$4 sm:$0xff]   ;;  %v16384_v19 = vld [vmem:[%s21097_s3 + $0x270] ss:$8 sps:$4 sm:$0xff]  }
 0x421   : > { %7900 = vmatprep.subr.bf16.mxu1 %v16338_v27  ;;  %6377 = vmatpush1.bf16.msra.mxu0 %v16363_v61  ;;  %v16392_v44 = vld [vmem:[%s21097_s3 + $0x284] ss:$8 sps:$4 sm:$0xff]   ;;  %v16351_v27 = vld [vmem:[%s21098_s4 + $0x80] ss:$8 sps:$4 sm:$0xff]   ;;  %v16362_v61 = vld [vmem:[%s21098_s4 + $0x94] ss:$8 sps:$4 sm:$0xff]  }
 0x422   : > { %6378 = vmatprep.subr.bf16.mxu0 %v16368_v62  ;;  %v16390_v62 = vld [vmem:[%s21097_s3 + $0x280] ss:$8 sps:$4 sm:$0xff]  }
 0x424   : > { %7901 = vmatpush1.bf16.msra.mxu1 %v16336_v50  ;;  %v16395_v50 = vld [vmem:[%s21097_s3 + $0x294] ss:$8 sps:$4 sm:$0xff]  }
 0x425   : > { %7902 = vmatprep.subr.bf16.mxu1 %v16341_v5  ;;  %6379 = vmatpush1.bf16.msra.mxu0 %v16366_v1  ;;  %v16360_v5 = vld [vmem:[%s21098_s4 + $0x90] ss:$8 sps:$4 sm:$0xff]  }
 0x426   : > { %7514 = vmatmul.mubr.bf16.gmra.mrb[136].mxu1 %v18082_v54  ;;  %6380 = vmatprep.subr.bf16.mxu0 %v16374_v17  ;;  %v16347_v54 = vld [vmem:[%s21098_s4 + $0x64] ss:$8 sps:$4 sm:$0xff]   ;;  %v16393_v1 = vld [vmem:[%s21097_s3 + $0x290] ss:$8 sps:$4 sm:$0xff]  }
 0x427   : > { %6007 = vmatmul.mubr.bf16.gmra.mrb[136].mxu0 %v18034_v37  ;;  %7523 = vmatprep.mubr.bf16.mxu1 %v21190_v51  ;;  %v16401_v17 = vld [vmem:[%s21097_s3 + $0x2a4] ss:$8 sps:$4 sm:$0xff]  }
 0x428   : > { %6016 = vmatprep.mubr.bf16.mxu0 %v18059_v16  ;;  %7903 = vmatpush1.bf16.msra.mxu1 %v16339_v6  ;;  %v16369_v6 = vld [vmem:[%s21098_s4 + $0xa0] ss:$8 sps:$4 sm:$0xff]  }
 0x429   : > { %7904 = vmatprep.subr.bf16.mxu1 %v16344_v35  ;;  %6381 = vmatpush1.bf16.msra.mxu0 %v16372_v2  ;;  %v16380_v35 = vld [vmem:[%s21098_s4 + $0xb4] ss:$8 sps:$4 sm:$0xff]   ;;  %v16399_v2 = vld [vmem:[%s21097_s3 + $0x2a0] ss:$8 sps:$4 sm:$0xff]  }
 0x42a   : > { %6382 = vmatprep.subr.bf16.mxu0 %v16377_v3  ;;  %v16404_v3 = vld [vmem:[%s21097_s3 + $0x2b4] ss:$8 sps:$4 sm:$0xff]  }
 0x42c   : > { %7905 = vmatpush1.bf16.msra.mxu1 %v16342_v10  ;;  %v16378_v10 = vld [vmem:[%s21098_s4 + $0xb0] ss:$8 sps:$4 sm:$0xff]  }
 0x42d   : > { %7906 = vmatprep.subr.bf16.mxu1 %v16347_v54  ;;  %6383 = vmatpush1.bf16.msra.mxu0 %v16375_v28  ;;  %v16402_v54 = vld [vmem:[%s21097_s3 + $0x2b0] ss:$8 sps:$4 sm:$0xff]   ;;  %v16410_v28 = vld [vmem:[%s21097_s3 + $0x2c4] ss:$8 sps:$4 sm:$0xff]  }
 0x42e   : > { %7524 = vmatmul.mubr.bf16.gmra.mrb[140].mxu1 %v18111_v38  ;;  %6384 = vmatprep.subr.bf16.mxu0 %v16383_v39  ;;  %v16353_v38 = vld [vmem:[%s21098_s4 + $0x84] ss:$8 sps:$4 sm:$0xff]   ;;  %v16387_v39 = vld [vmem:[%s21098_s4 + $0xc0] ss:$8 sps:$4 sm:$0xff]  }
 0x42f   : > { %6017 = vmatmul.mubr.bf16.gmra.mrb[140].mxu0 %v18055_v15  ;;  %7533 = vmatprep.mubr.bf16.mxu1 %v21190_v51 }
 0x430   : > { %6026 = vmatprep.mubr.bf16.mxu0 %v18141_v0  ;;  %7907 = vmatpush1.bf16.msra.mxu1 %v16345_v4  ;;  %v16398_v4 = vld [vmem:[%s21098_s4 + $0xd4] ss:$8 sps:$4 sm:$0xff]  }
 0x431   : > { %7908 = vmatprep.subr.bf16.mxu1 %v16350_v41  ;;  %6385 = vmatpush1.bf16.msra.mxu0 %v16381_v11  ;;  %v16408_v41 = vld [vmem:[%s21097_s3 + $0x2c0] ss:$8 sps:$4 sm:$0xff]   ;;  %v16413_v11 = vld [vmem:[%s21097_s3 + $0x2d4] ss:$8 sps:$4 sm:$0xff]  }
 0x432   : > { %6386 = vmatprep.subr.bf16.mxu0 %v16386_v9  ;;  %v16396_v9 = vld [vmem:[%s21098_s4 + $0xd0] ss:$8 sps:$4 sm:$0xff]  }
 0x434   : > { %7909 = vmatpush1.bf16.msra.mxu1 %v16348_v13  ;;  %v16411_v13 = vld [vmem:[%s21097_s3 + $0x2d0] ss:$8 sps:$4 sm:$0xff]  }
 0x435   : > { %7910 = vmatprep.subr.bf16.mxu1 %v16353_v38  ;;  %6387 = vmatpush1.bf16.msra.mxu0 %v16384_v19  ;;  %v16419_v38 = vld [vmem:[%s21097_s3 + $0x2e4] ss:$8 sps:$4 sm:$0xff]   ;;  %v16405_v19 = vld [vmem:[%s21098_s4 + $0xe0] ss:$8 sps:$4 sm:$0xff]  }
 0x436   : > { %7534 = vmatmul.mubr.bf16.gmra.mrb[144].mxu1 %v18205_v7  ;;  %6388 = vmatprep.subr.bf16.mxu0 %v16392_v44  ;;  %v16371_v7 = vld [vmem:[%s21098_s4 + $0xa4] ss:$8 sps:$4 sm:$0xff]   ;;  %v16416_v44 = vld [vmem:[%s21098_s4 + $0xf4] ss:$8 sps:$4 sm:$0xff]  }
 0x437   : > { %6027 = vmatmul.mubr.bf16.gmra.mrb[144].mxu0 %v18134_v22  ;;  %7543 = vmatprep.mubr.bf16.mxu1 %v21190_v51 }
 0x438   : > { %6036 = vmatprep.mubr.bf16.mxu0 %v18179_v14  ;;  %7911 = vmatpush1.bf16.msra.mxu1 %v16351_v27  ;;  %v16417_v27 = vld [vmem:[%s21097_s3 + $0x2e0] ss:$8 sps:$4 sm:$0xff]  }
 0x439   : > { %7912 = vmatprep.subr.bf16.mxu1 %v16362_v61  ;;  %6389 = vmatpush1.bf16.msra.mxu0 %v16390_v62  ;;  %v16422_v61 = vld [vmem:[%s21097_s3 + $0x2f4] ss:$8 sps:$4 sm:$0xff]   ;;  %v16414_v62 = vld [vmem:[%s21098_s4 + $0xf0] ss:$8 sps:$4 sm:$0xff]  }
 0x43a   : > { %6390 = vmatprep.subr.bf16.mxu0 %v16395_v50  ;;  %v16425_v50 = vld [vmem:[%s21098_s4 + $0x104] ss:$8 sps:$4 sm:$0xff]  }
 0x43c   : > { %7913 = vmatpush1.bf16.msra.mxu1 %v16360_v5  ;;  %v21197_v5 = vld [vmem:[#allocation43_spill] sm:$0xff] }
 0x43d   : > { %7914 = vmatprep.subr.bf16.mxu1 %v16371_v7  ;;  %6391 = vmatpush1.bf16.msra.mxu0 %v16393_v1  ;;  %v21198_v7 = vld [vmem:[#allocation35_spill] sm:$0xff] }
 0x43e   : > { %7544 = vmatmul.mubr.bf16.gmra.mrb[148].mxu1 %v18233_v60  ;;  %6392 = vmatprep.subr.bf16.mxu0 %v16401_v17  ;;  %v16389_v60 = vld [vmem:[%s21098_s4 + $0xc4] ss:$8 sps:$4 sm:$0xff]   ;;  %v16423_v17 = vld [vmem:[%s21098_s4 + $0x100] ss:$8 sps:$4 sm:$0xff]  }
 0x43f   : > { %6037 = vmatmul.mubr.bf16.gmra.mrb[148].mxu0 %v18169_v12  ;;  %7553 = vmatprep.mubr.bf16.mxu1 %v21190_v51  ;;  %v21200_v1 = vld [vmem:[#allocation39_spill] sm:$0xff] }
 0x440   : > { %6046 = vmatprep.mubr.bf16.mxu0 %v18259_v56  ;;  %7915 = vmatpush1.bf16.msra.mxu1 %v16369_v6  ;;  %v16428_v6 = vld [vmem:[%s21098_s4 + $0x114] ss:$8 sps:$4 sm:$0xff]  }
 0x441   : > { %7916 = vmatprep.subr.bf16.mxu1 %v16380_v35  ;;  %6393 = vmatpush1.bf16.msra.mxu0 %v16399_v2  ;;  %v16431_v35 = vld [vmem:[%s21098_s4 + $0x124] ss:$8 sps:$4 sm:$0xff]   ;;  %v16429_v2 = vld [vmem:[%s21098_s4 + $0x120] ss:$8 sps:$4 sm:$0xff]  }
 0x442   : > { %6394 = vmatprep.subr.bf16.mxu0 %v16404_v3  ;;  %v21201_v3 = vld [vmem:[#allocation8_spill] sm:$0xff] }
 0x444   : > { %7917 = vmatpush1.bf16.msra.mxu1 %v16378_v10  ;;  %v16432_v10 = vld [vmem:[%s21098_s4 + $0x130] ss:$8 sps:$4 sm:$0xff]  }
 0x445   : > { %7918 = vmatprep.subr.bf16.mxu1 %v16389_v60  ;;  %6395 = vmatpush1.bf16.msra.mxu0 %v16402_v54  ;;  %v16437_v60 = vld [vmem:[%s21098_s4 + $0x144] ss:$8 sps:$4 sm:$0xff]   ;;  %v16435_v54 = vld [vmem:[%s21098_s4 + $0x140] ss:$8 sps:$4 sm:$0xff]  }
 0x446   : > { %7554 = vmatmul.mubr.bf16.gmra.mrb[152].mxu1 %v18317_v31  ;;  %6396 = vmatprep.subr.bf16.mxu0 %v16410_v28  ;;  %v16407_v31 = vld [vmem:[%s21098_s4 + $0xe4] ss:$8 sps:$4 sm:$0xff]  }
 0x447   : > { %6047 = vmatmul.mubr.bf16.gmra.mrb[152].mxu0 %v18255_v49  ;;  %7563 = vmatprep.mubr.bf16.mxu1 %v21190_v51  ;;  %v21202_v28 = vld [vmem:[#allocation10_spill] sm:$0xff] }
 0x448   : > { %6056 = vmatprep.mubr.bf16.mxu0 %v18293_v58  ;;  %7919 = vmatpush1.bf16.msra.mxu1 %v16387_v39  ;;  %v16438_v39 = vld [vmem:[%s21098_s4 + $0x150] ss:$8 sps:$4 sm:$0xff]  }
 0x449   : > { %7920 = vmatprep.subr.bf16.mxu1 %v16398_v4  ;;  %6397 = vmatpush1.bf16.msra.mxu0 %v16408_v41  ;;  %v16443_v4 = vld [vmem:[%s21098_s4 + $0x164] ss:$8 sps:$4 sm:$0xff]   ;;  %v16441_v41 = vld [vmem:[%s21098_s4 + $0x160] ss:$8 sps:$4 sm:$0xff]  }
 0x44a   : > { %6398 = vmatprep.subr.bf16.mxu0 %v16413_v11  ;;  %v21203_v11 = vld [vmem:[#allocation12_spill] sm:$0xff] }
 0x44c   : > { %7921 = vmatpush1.bf16.msra.mxu1 %v16396_v9  ;;  %v16459_v9 = vld [vmem:[%s21099_s5 + $0x100] ss:$8 sps:$4 sm:$0xff]  }
 0x44d   : > { %7922 = vmatprep.subr.bf16.mxu1 %v16407_v31  ;;  %6399 = vmatpush1.bf16.msra.mxu0 %v16411_v13  ;;  %v16461_v31 = vld [vmem:[%s21099_s5 + $0x104] ss:$8 sps:$4 sm:$0xff]   ;;  %v16444_v13 = vld [vmem:[%s21098_s4 + $0x170] ss:$8 sps:$4 sm:$0xff]  }
 0x44e   : > { %7564 = vmatmul.mubr.bf16.gmra.mrb[156].mxu1 %v18345_v25  ;;  %6400 = vmatprep.subr.bf16.mxu0 %v16419_v38  ;;  %v16420_v25 = vld [vmem:[%s21097_s3 + $0x2f0] ss:$8 sps:$4 sm:$0xff]  }
 0x44f   : > { %6057 = vmatmul.mubr.bf16.gmra.mrb[156].mxu0 %v18283_v46  ;;  %7573 = vmatprep.mubr.bf16.mxu1 %v21190_v51  ;;  %v16465_v38 = vld [vmem:[%s21099_s5 + $0x110] ss:$8 sps:$4 sm:$0xff]  }
 0x450   : > { %6066 = vmatprep.mubr.bf16.mxu0 %v18371_v52  ;;  %7923 = vmatpush1.bf16.msra.mxu1 %v16405_v19  ;;  %v21204_v19 = vld [vmem:[#allocation14_spill] sm:$0xff] }
 0x451   : > { %7924 = vmatprep.subr.bf16.mxu1 %v16416_v44  ;;  %6401 = vmatpush1.bf16.msra.mxu0 %v16417_v27  ;;  %v16467_v44 = vld [vmem:[%s21099_s5 + $0x114] ss:$8 sps:$4 sm:$0xff]   ;;  %v16470_v27 = vld [vmem:[%s21099_s5 + $0x124] ss:$8 sps:$4 sm:$0xff]  }
 0x452   : > { %6402 = vmatprep.subr.bf16.mxu0 %v16422_v61  ;;  %v16468_v61 = vld [vmem:[%s21099_s5 + $0x120] ss:$8 sps:$4 sm:$0xff]  }
 0x454   : > { %7925 = vmatpush1.bf16.msra.mxu1 %v16414_v62  ;;  %v21205_v62 = vld [vmem:[#allocation16_spill] sm:$0xff] }
 0x455   : > { %6403 = vmatpush1.bf16.msra.mxu0 %v16420_v25  ;;  %8087 = vmatprep.subr.bf16.mxu1 %v16425_v50  ;;  %v16476_v25 = vld [vmem:[%s21099_s5 + $0x134] ss:$8 sps:$4 sm:$0xff]   ;;  %v16479_v50 = vld [vmem:[%s21099_s5 + $0x144] ss:$8 sps:$4 sm:$0xff]  }
 0x456   : > { %7574 = vmatmul.mubr.bf16.gmra.mrb[160].mxu1 %v18402_v24  ;;  %v21193_v24 = vld [vmem:[#allocation32_spill] sm:$0xff]  ;;  %9528 = vmatprep.subr.bf16.mxu0 %v16461_v31  ;;  %v21210_v31 = vld [vmem:[#allocation26_spill] sm:$0xff] }
 0x457   : > { %6067 = vmatmul.mubr.bf16.gmra.mrb[160].mxu0 %v18367_v20  ;;  %7583 = vmatprep.mubr.bf16.mxu1 %v21190_v51 }
 0x458   : > { %6076 = vmatprep.mubr.bf16.mxu0 %v18390_v53 }
 0x45e   : > { %7584 = vmatmul.mubr.bf16.gmra.mrb[164].mxu1 %v18412_v18  ;;  %v21194_v18 = vld [vmem:[#allocation34_spill] sm:$0xff] }
 0x45f   : > { %6077 = vmatmul.mubr.bf16.gmra.mrb[164].mxu0 %v18383_v48  ;;  %7593 = vmatprep.mubr.bf16.mxu1 %v21190_v51 }
 0x460   : > { %6086 = vmatprep.mubr.bf16.mxu0 %v18426_v32 }
 0x466   : > { %7594 = vmatmul.mubr.bf16.gmra.mrb[168].mxu1 %v18454_v45  ;;  %v21195_v45 = vld [vmem:[#allocation30_spill] sm:$0xff] }
 0x467   : > { %6087 = vmatmul.mubr.bf16.gmra.mrb[168].mxu0 %v18422_v33  ;;  %7603 = vmatprep.mubr.bf16.mxu1 %v21190_v51 }
 0x468   : > { %6096 = vmatprep.mubr.bf16.mxu0 %v18442_v55 }
 0x46e   : > { %7604 = vmatmul.mubr.bf16.gmra.mrb[172].mxu1 %v18464_v57  ;;  %v21196_v57 = vld [vmem:[#allocation37_spill] sm:$0xff] }
 0x46f   : > { %6097 = vmatmul.mubr.bf16.gmra.mrb[172].mxu0 %v18438_v21  ;;  %7613 = vmatprep.mubr.bf16.mxu1 %v21190_v51 }
 0x470   : > { %6106 = vmatprep.mubr.bf16.mxu0 %v18478_v47 }
 0x476   : > { %7614 = vmatmul.mubr.bf16.gmra.mrb[176].mxu1 %v18509_v29  ;;  %v21199_v29 = vld [vmem:[#allocation41_spill] sm:$0xff] }
 0x477   : > { %6107 = vmatmul.mubr.bf16.gmra.mrb[176].mxu0 %v18474_v43  ;;  %7623 = vmatprep.mubr.bf16.mxu1 %v21190_v51 }
 0x478   : > { %6116 = vmatprep.mubr.bf16.mxu0 %v21193_v24 }
 0x47e   : > { %7624 = vmatmul.mubr.bf16.gmra.mrb[180].mxu1 %v21194_v18  ;;  %v16477_v18 = vld [vmem:[%s21099_s5 + $0x140] ss:$8 sps:$4 sm:$0xff]  }
 0x47f   : > { %6117 = vmatmul.mubr.bf16.gmra.mrb[180].mxu0 %v21195_v45  ;;  %7633 = vmatprep.mubr.bf16.mxu1 %v21190_v51 }
 0x480   : > { %6126 = vmatprep.mubr.bf16.mxu0 %v21196_v57 }
 0x486   : > { %7634 = vmatmul.mubr.bf16.gmra.mrb[184].mxu1 %v21197_v5  ;;  %v21206_v5 = vld [vmem:[#allocation18_spill] sm:$0xff] }
 0x487   : > { %6127 = vmatmul.mubr.bf16.gmra.mrb[184].mxu0 %v21198_v7  ;;  %7643 = vmatprep.mubr.bf16.mxu1 %v21190_v51 }
 0x488   : > { %6136 = vmatprep.mubr.bf16.mxu0 %v21199_v29 }
 0x48e   : > { %7644 = vmatmul.mubr.bf16.gmra.mrb[188].mxu1 %v18571_v59  ;;  %v16426_v59 = vld [vmem:[%s21098_s4 + $0x110] ss:$8 sps:$4 sm:$0xff]  }
 0x48f   : > { %6137 = vmatmul.mubr.bf16.gmra.mrb[188].mxu0 %v21200_v1  ;;  %7926 = vmatprep.mubr.bf16.mxu1 %v21190_v51 }
 0x490   : > { %6404 = vmatprep.mubr.bf16.mxu0 %v18038_v40 }
 0x496   : > { %7927 = vmatmul.mubr.bf16.vlgmr.msra.gmra.mrb[128].mxu1 %v21190_v51 }
 0x497   : > { %6405 = vmatmul.mubr.bf16.vlgmr.msra.gmra.mrb[128].mxu0 %v18034_v37  ;;  %8088 = vmatpush1.bf16.msra.mxu1 %v16423_v17  ;;  %v16434_v37 = vld [vmem:[%s21098_s4 + $0x134] ss:$8 sps:$4 sm:$0xff]  }
 0x498   : > { %6414 = vmatprep.mubr.bf16.mxu0 %v18059_v16  ;;  %7936 = vmatprep.mubr.bf16.mxu1 %v21190_v51  ;;  %v16485_v17 = vld [vmem:[%s21099_s5 + $0x154] ss:$8 sps:$4 sm:$0xff]  }
 0x499   : > { %8089 = vmatprep.subr.bf16.mxu1 %v16428_v6  ;;  %9529 = vmatpush1.bf16.msra.mxu0 %v16459_v9  ;;  %v16488_v6 = vld [vmem:[%s21099_s5 + $0x164] ss:$8 sps:$4 sm:$0xff]   ;;  %v16513_v9 = vld [vmem:[%s21099_s5 + $0x1c0] ss:$8 sps:$4 sm:$0xff]  }
 0x49a   : > { %9530 = vmatprep.subr.bf16.mxu0 %v16467_v44  ;;  %v16530_v44 = vld [vmem:[%s21099_s5 + $0x1f4] ss:$8 sps:$4 sm:$0xff]  }
 0x49b   : > { %8090 = vmatpush1.bf16.msra.mxu1 %v16426_v59  ;;  %v16486_v59 = vld [vmem:[%s21099_s5 + $0x160] ss:$8 sps:$4 sm:$0xff]  }
 0x49c   : > { %8091 = vmatprep.subr.bf16.mxu1 %v16431_v35  ;;  %v21207_v35 = vld [vmem:[#allocation20_spill] sm:$0xff] }
 0x49d   : > { %9531 = vmatpush1.bf16.msra.mxu0 %v16465_v38  ;;  %v16522_v38 = vld [vmem:[%s21099_s5 + $0x1e0] ss:$8 sps:$4 sm:$0xff]  }
 0x49e   : > { %7937 = vmatmul.mubr.bf16.gmra.mrb[132].mxu1 %v21190_v51  ;;  %9532 = vmatprep.subr.bf16.mxu0 %v16470_v27  ;;  %v16528_v27 = vld [vmem:[%s21099_s5 + $0x1f0] ss:$8 sps:$4 sm:$0xff]  }
 0x49f   : > { %6415 = vmatmul.mubr.bf16.gmra.mrb[132].mxu0 %v18055_v15  ;;  %7946 = vmatprep.mubr.bf16.mxu1 %v21201_v3  ;;  %v16440_v15 = vld [vmem:[%s21098_s4 + $0x154] ss:$8 sps:$4 sm:$0xff]  }
 0x4a0   : > { %6424 = vmatprep.mubr.bf16.mxu0 %v18141_v0  ;;  %8092 = vmatpush1.bf16.msra.mxu1 %v16429_v2  ;;  %v16494_v2 = vld [vmem:[%s21099_s5 + $0x174] ss:$8 sps:$4 sm:$0xff]  }
 0x4a1   : > { %8093 = vmatprep.subr.bf16.mxu1 %v16434_v37  ;;  %9533 = vmatpush1.bf16.msra.mxu0 %v16468_v61  ;;  %v16497_v37 = vld [vmem:[%s21099_s5 + $0x184] ss:$8 sps:$4 sm:$0xff]  }
 0x4a2   : > { %9534 = vmatprep.subr.bf16.mxu0 %v16476_v25  ;;  %v21212_v61 = vld [vmem:[#allocation31_spill] sm:$0xff] }
 0x4a3   : > { %v16453_v25 = vld [vmem:[%s21098_s4 + $0x320] ss:$8 sps:$4 sm:$0xff]  }
 0x4a4   : > { %8094 = vmatpush1.bf16.msra.mxu1 %v16432_v10  ;;  %v16495_v10 = vld [vmem:[%s21099_s5 + $0x180] ss:$8 sps:$4 sm:$0xff]  }
 0x4a5   : > { %8095 = vmatprep.subr.bf16.mxu1 %v16437_v60  ;;  %v21208_v60 = vld [vmem:[#allocation22_spill] sm:$0xff] }
 0x4a6   : > { %7947 = vmatmul.mubr.bf16.gmra.mrb[136].mxu1 %v18038_v40 }
 0x4a7   : > { %6425 = vmatmul.mubr.bf16.gmra.mrb[136].mxu0 %v18134_v22  ;;  %7956 = vmatprep.mubr.bf16.mxu1 %v21202_v28  ;;  %v16446_v22 = vld [vmem:[%s21098_s4 + $0x174] ss:$8 sps:$4 sm:$0xff]  }
 0x4a8   : > { %6434 = vmatprep.mubr.bf16.mxu0 %v18179_v14  ;;  %8096 = vmatpush1.bf16.msra.mxu1 %v16435_v54  ;;  %v16503_v54 = vld [vmem:[%s21099_s5 + $0x194] ss:$8 sps:$4 sm:$0xff]  }
 0x4a9   : > { %8097 = vmatprep.subr.bf16.mxu1 %v16440_v15  ;;  %v16506_v15 = vld [vmem:[%s21099_s5 + $0x1a4] ss:$8 sps:$4 sm:$0xff]  }
 0x4ac   : > { %8098 = vmatpush1.bf16.msra.mxu1 %v16438_v39  ;;  %v16504_v39 = vld [vmem:[%s21099_s5 + $0x1a0] ss:$8 sps:$4 sm:$0xff]  }
 0x4ad   : > { %8099 = vmatprep.subr.bf16.mxu1 %v16443_v4  ;;  %v21209_v4 = vld [vmem:[#allocation24_spill] sm:$0xff] }
 0x4ae   : > { %7957 = vmatmul.mubr.bf16.gmra.mrb[140].mxu1 %v18059_v16 }
 0x4af   : > { %6435 = vmatmul.mubr.bf16.gmra.mrb[140].mxu0 %v18169_v12  ;;  %7966 = vmatprep.mubr.bf16.mxu1 %v21203_v11  ;;  %v16449_v12 = vld [vmem:[%s21098_s4 + $0x304] ss:$8 sps:$4 sm:$0xff]  }
 0x4b0   : > { %6444 = vmatprep.mubr.bf16.mxu0 %v18259_v56  ;;  %8100 = vmatpush1.bf16.msra.mxu1 %v16441_v41  ;;  %v16512_v41 = vld [vmem:[%s21099_s5 + $0x1b4] ss:$8 sps:$4 sm:$0xff]  }
 0x4b1   : > { %8101 = vmatprep.subr.bf16.mxu1 %v16446_v22  ;;  %v16515_v22 = vld [vmem:[%s21099_s5 + $0x1c4] ss:$8 sps:$4 sm:$0xff]  }
 0x4b4   : > { %8102 = vmatpush1.bf16.msra.mxu1 %v16444_v13  ;;  %v16521_v13 = vld [vmem:[%s21099_s5 + $0x1d4] ss:$8 sps:$4 sm:$0xff]  }
 0x4b5   : > { %8617 = vmatprep.subr.bf16.mxu1 %v16449_v12  ;;  %v16524_v12 = vld [vmem:[%s21099_s5 + $0x1e4] ss:$8 sps:$4 sm:$0xff]  }
 0x4b6   : > { %7967 = vmatmul.mubr.bf16.gmra.mrb[144].mxu1 %v18141_v0 }
 0x4b7   : > { %6445 = vmatmul.mubr.bf16.gmra.mrb[144].mxu0 %v18255_v49  ;;  %7976 = vmatprep.mubr.bf16.mxu1 %v21204_v19  ;;  %v16474_v49 = vld [vmem:[%s21099_s5 + $0x130] ss:$8 sps:$4 sm:$0xff]  }
 0x4b8   : > { %6454 = vmatprep.mubr.bf16.mxu0 %v18293_v58  ;;  %9535 = vmatpush1.bf16.msra.mxu0 %v16474_v49  ;;  %v21214_v49 = vld [vmem:[#allocation40_spill] sm:$0xff] }
 0x4b9   : > { %9536 = vmatprep.subr.bf16.mxu0 %v16479_v50  ;;  %v16458_v50 = vld [vmem:[%s21098_s4 + $0x334] ss:$8 sps:$4 sm:$0xff]  }
 0x4bc   : > { %9537 = vmatpush1.bf16.msra.mxu0 %v16477_v18  ;;  %v16456_v18 = vld [vmem:[%s21098_s4 + $0x330] ss:$8 sps:$4 sm:$0xff]  }
 0x4bd   : > { %9538 = vmatprep.subr.bf16.mxu0 %v16485_v17  ;;  %v16462_v17 = vld [vmem:[%s21098_s4 + $0x340] ss:$8 sps:$4 sm:$0xff]  }
 0x4be   : > { %7977 = vmatmul.mubr.bf16.gmra.mrb[148].mxu1 %v18179_v14 }
 0x4bf   : > { %6455 = vmatmul.mubr.bf16.gmra.mrb[148].mxu0 %v18283_v46  ;;  %7986 = vmatprep.mubr.bf16.mxu1 %v21205_v62  ;;  %v16483_v46 = vld [vmem:[%s21099_s5 + $0x150] ss:$8 sps:$4 sm:$0xff]  }
 0x4c0   : > { %6464 = vmatprep.mubr.bf16.mxu0 %v18371_v52  ;;  %9539 = vmatpush1.bf16.msra.mxu0 %v16483_v46  ;;  %v16464_v46 = vld [vmem:[%s21098_s4 + $0x344] ss:$8 sps:$4 sm:$0xff]  }
 0x4c1   : > { %9540 = vmatprep.subr.bf16.mxu0 %v16488_v6  ;;  %v16548_v6 = vld [vmem:[%s21099_s5 + $0x4] ss:$8 sps:$4 sm:$0xff]  }
 0x4c4   : > { %9541 = vmatpush1.bf16.msra.mxu0 %v16486_v59  ;;  %v16473_v59 = vld [vmem:[%s21098_s4 + $0x354] ss:$8 sps:$4 sm:$0xff]  }
 0x4c5   : > { %9542 = vmatprep.subr.bf16.mxu0 %v16494_v2  ;;  %v16471_v2 = vld [vmem:[%s21098_s4 + $0x350] ss:$8 sps:$4 sm:$0xff]  }
 0x4c6   : > { %7987 = vmatmul.mubr.bf16.gmra.mrb[152].mxu1 %v18259_v56 }
 0x4c7   : > { %6465 = vmatmul.mubr.bf16.gmra.mrb[152].mxu0 %v18367_v20  ;;  %7996 = vmatprep.mubr.bf16.mxu1 %v21206_v5  ;;  %v16492_v20 = vld [vmem:[%s21099_s5 + $0x170] ss:$8 sps:$4 sm:$0xff]  }
 0x4c8   : > { %6474 = vmatprep.mubr.bf16.mxu0 %v18390_v53  ;;  %9543 = vmatpush1.bf16.msra.mxu0 %v16492_v20  ;;  %v21215_v20 = vld [vmem:[#allocation9_spill] sm:$0xff] }
 0x4c9   : > { %9544 = vmatprep.subr.bf16.mxu0 %v16497_v37  ;;  %v16482_v37 = vld [vmem:[%s21098_s4 + $0x364] ss:$8 sps:$4 sm:$0xff]  }
 0x4cc   : > { %9545 = vmatpush1.bf16.msra.mxu0 %v16495_v10  ;;  %v16480_v10 = vld [vmem:[%s21098_s4 + $0x360] ss:$8 sps:$4 sm:$0xff]  }
 0x4cd   : > { %9546 = vmatprep.subr.bf16.mxu0 %v16503_v54  ;;  %v21216_v54 = vld [vmem:[#allocation11_spill] sm:$0xff] }
 0x4ce   : > { %7997 = vmatmul.mubr.bf16.gmra.mrb[156].mxu1 %v18293_v58 }
 0x4cf   : > { %6475 = vmatmul.mubr.bf16.gmra.mrb[156].mxu0 %v18383_v48  ;;  %8006 = vmatprep.mubr.bf16.mxu1 %v21207_v35  ;;  %v16501_v48 = vld [vmem:[%s21099_s5 + $0x190] ss:$8 sps:$4 sm:$0xff]  }
 0x4d0   : > { %6484 = vmatprep.mubr.bf16.mxu0 %v18426_v32  ;;  %9547 = vmatpush1.bf16.msra.mxu0 %v16501_v48  ;;  %v16491_v48 = vld [vmem:[%s21098_s4 + $0x374] ss:$8 sps:$4 sm:$0xff]  }
 0x4d1   : > { %9548 = vmatprep.subr.bf16.mxu0 %v16506_v15  ;;  %v16489_v15 = vld [vmem:[%s21098_s4 + $0x370] ss:$8 sps:$4 sm:$0xff]  }
 0x4d4   : > { %9549 = vmatpush1.bf16.msra.mxu0 %v16504_v39  ;;  %v16500_v39 = vld [vmem:[%s21098_s4 + $0x384] ss:$8 sps:$4 sm:$0xff]  }
 0x4d5   : > { %9550 = vmatprep.subr.bf16.mxu0 %v16512_v41  ;;  %v16509_v41 = vld [vmem:[%s21098_s4 + $0x394] ss:$8 sps:$4 sm:$0xff]  }
 0x4d6   : > { %8007 = vmatmul.mubr.bf16.gmra.mrb[160].mxu1 %v18371_v52 }
 0x4d7   : > { %6485 = vmatmul.mubr.bf16.gmra.mrb[160].mxu0 %v18422_v33  ;;  %8016 = vmatprep.mubr.bf16.mxu1 %v21208_v60  ;;  %v16510_v33 = vld [vmem:[%s21099_s5 + $0x1b0] ss:$8 sps:$4 sm:$0xff]  }
 0x4d8   : > { %6494 = vmatprep.mubr.bf16.mxu0 %v18442_v55  ;;  %9551 = vmatpush1.bf16.msra.mxu0 %v16510_v33  ;;  %v16498_v33 = vld [vmem:[%s21098_s4 + $0x380] ss:$8 sps:$4 sm:$0xff]  }
 0x4d9   : > { %9552 = vmatprep.subr.bf16.mxu0 %v16515_v22  ;;  %v21217_v22 = vld [vmem:[#allocation13_spill] sm:$0xff] }
 0x4dc   : > { %9553 = vmatpush1.bf16.msra.mxu0 %v16513_v9  ;;  %v16507_v9 = vld [vmem:[%s21098_s4 + $0x390] ss:$8 sps:$4 sm:$0xff]  }
 0x4dd   : > { %9554 = vmatprep.subr.bf16.mxu0 %v16521_v13  ;;  %v16516_v13 = vld [vmem:[%s21098_s4 + $0x3a0] ss:$8 sps:$4 sm:$0xff]  }
 0x4de   : > { %8017 = vmatmul.mubr.bf16.gmra.mrb[164].mxu1 %v18390_v53 }
 0x4df   : > { %6495 = vmatmul.mubr.bf16.gmra.mrb[164].mxu0 %v18438_v21  ;;  %8026 = vmatprep.mubr.bf16.mxu1 %v21209_v4  ;;  %v16519_v21 = vld [vmem:[%s21099_s5 + $0x1d0] ss:$8 sps:$4 sm:$0xff]  }
 0x4e0   : > { %6504 = vmatprep.mubr.bf16.mxu0 %v18478_v47  ;;  %9555 = vmatpush1.bf16.msra.mxu0 %v16519_v21  ;;  %v16518_v21 = vld [vmem:[%s21098_s4 + $0x3a4] ss:$8 sps:$4 sm:$0xff]  }
 0x4e1   : > { %9556 = vmatprep.subr.bf16.mxu0 %v16524_v12  ;;  %v16527_v12 = vld [vmem:[%s21098_s4 + $0x3b4] ss:$8 sps:$4 sm:$0xff]  }
 0x4e4   : > { %9557 = vmatpush1.bf16.msra.mxu0 %v16522_v38  ;;  %v21218_v38 = vld [vmem:[#allocation15_spill] sm:$0xff] }
 0x4e5   : > { %9558 = vmatprep.subr.bf16.mxu0 %v16530_v44  ;;  %v16525_v44 = vld [vmem:[%s21098_s4 + $0x3b0] ss:$8 sps:$4 sm:$0xff]  }
 0x4e6   : > { %8027 = vmatmul.mubr.bf16.gmra.mrb[168].mxu1 %v18426_v32 }
 0x4e7   : > { %6505 = vmatmul.mubr.bf16.gmra.mrb[168].mxu0 %v18474_v43  ;;  %8036 = vmatprep.mubr.bf16.mxu1 %v21210_v31  ;;  %v21211_v43 = vld [vmem:[#allocation28_spill] sm:$0xff] }
 0x4e8   : > { %6514 = vmatprep.mubr.bf16.mxu0 %v21193_v24  ;;  %9559 = vmatpush1.bf16.msra.mxu0 %v16528_v27  ;;  %v16533_v27 = vld [vmem:[%s21098_s4 + $0x3c4] ss:$8 sps:$4 sm:$0xff]  }
 0x4e9   : > { %9801 = vmatprep.subr.bf16.mxu0 %v16548_v6  ;;  %v16545_v6 = vld [vmem:[%s21098_s4 + $0x404] ss:$8 sps:$4 sm:$0xff]  }
 0x4ee   : > { %8037 = vmatmul.mubr.bf16.gmra.mrb[172].mxu1 %v18442_v55 }
 0x4ef   : > { %6515 = vmatmul.mubr.bf16.gmra.mrb[172].mxu0 %v21195_v45  ;;  %8046 = vmatprep.mubr.bf16.mxu1 %v21211_v43  ;;  %v21213_v45 = vld [vmem:[#allocation36_spill] sm:$0xff] }
 0x4f0   : > { %6524 = vmatprep.mubr.bf16.mxu0 %v21196_v57 }
 0x4f6   : > { %8047 = vmatmul.mubr.bf16.gmra.mrb[176].mxu1 %v18478_v47 }
 0x4f7   : > { %6525 = vmatmul.mubr.bf16.gmra.mrb[176].mxu0 %v21198_v7  ;;  %8056 = vmatprep.mubr.bf16.mxu1 %v21212_v61  ;;  %v16447_v7 = vld [vmem:[%s21098_s4 + $0x300] ss:$8 sps:$4 sm:$0xff]  }
 0x4f8   : > { %6534 = vmatprep.mubr.bf16.mxu0 %v21199_v29 }
 0x4fe   : > { %8057 = vmatmul.mubr.bf16.gmra.mrb[180].mxu1 %v21193_v24 }
 0x4ff   : > { %6535 = vmatmul.mubr.bf16.gmra.mrb[180].mxu0 %v21200_v1  ;;  %8066 = vmatprep.mubr.bf16.mxu1 %v21213_v45  ;;  %v16452_v1 = vld [vmem:[%s21098_s4 + $0x314] ss:$8 sps:$4 sm:$0xff]  }
 0x500   : > { %6544 = vmatprep.mubr.bf16.mxu0 %v18590_v30 }
 0x506   : > { %8067 = vmatmul.mubr.bf16.gmra.mrb[184].mxu1 %v21196_v57 }
 0x507   : > { %6545 = vmatmul.mubr.bf16.gmra.mrb[184].mxu0 %v18583_v42  ;;  %8076 = vmatprep.mubr.bf16.mxu1 %v21214_v49  ;;  %v16450_v42 = vld [vmem:[%s21098_s4 + $0x310] ss:$8 sps:$4 sm:$0xff]  }
 0x508   : > { %6554 = vmatprep.mubr.bf16.mxu0 %v18631_v34 }
 0x50e   : > { %8077 = vmatmul.mubr.bf16.gmra.mrb[188].mxu1 %v21199_v29 }
 0x50f   : > { %6555 = vmatmul.mubr.bf16.gmra.mrb[188].mxu0 %v18627_v26  ;;  %8119 = vmatprep.mubr.bf16.mxu1 %v21190_v51  ;;  %v16455_v26 = vld [vmem:[%s21098_s4 + $0x324] ss:$8 sps:$4 sm:$0xff]  }
 0x516   : > { %8120 = vmatmul.mubr.bf16.vlgmr.msra.gmra.mrb[128].mxu1 %v21190_v51 }
 0x517   : > { %8618 = vmatpush1.bf16.msra.mxu1 %v16447_v7  ;;  %8129 = vmatprep.mubr.bf16.mxu1 %v21190_v51  ;;  %v16531_v7 = vld [vmem:[%s21098_s4 + $0x3c0] ss:$8 sps:$4 sm:$0xff]  }
 0x518   : > { %8619 = vmatprep.subr.bf16.mxu1 %v16452_v1  ;;  %v16536_v1 = vld [vmem:[%s21098_s4 + $0x3d4] ss:$8 sps:$4 sm:$0xff]  }
 0x51b   : > { %8620 = vmatpush1.bf16.msra.mxu1 %v16450_v42  ;;  %v21219_v42 = vld [vmem:[#allocation17_spill] sm:$0xff] }
 0x51c   : > { %8621 = vmatprep.subr.bf16.mxu1 %v16455_v26  ;;  %v16534_v26 = vld [vmem:[%s21098_s4 + $0x3d0] ss:$8 sps:$4 sm:$0xff]  }
 0x51e   : > { %8130 = vmatmul.mubr.bf16.gmra.mrb[132].mxu1 %v21190_v51 }
 0x51f   : > { %8139 = vmatprep.mubr.bf16.mxu1 %v21190_v51  ;;  %8622 = vmatpush1.bf16.msra.mxu1 %v16453_v25  ;;  %v16539_v25 = vld [vmem:[%s21098_s4 + $0x3e4] ss:$8 sps:$4 sm:$0xff]  }
 0x520   : > { %8623 = vmatprep.subr.bf16.mxu1 %v16458_v50  ;;  %v16537_v50 = vld [vmem:[%s21098_s4 + $0x3e0] ss:$8 sps:$4 sm:$0xff]  }
 0x523   : > { %8624 = vmatpush1.bf16.msra.mxu1 %v16456_v18  ;;  %v16542_v18 = vld [vmem:[%s21098_s4 + $0x3f4] ss:$8 sps:$4 sm:$0xff]  }
 0x524   : > { %8625 = vmatprep.subr.bf16.mxu1 %v16464_v46  ;;  %v21220_v46 = vld [vmem:[#allocation19_spill] sm:$0xff] }
 0x526   : > { %8140 = vmatmul.mubr.bf16.gmra.mrb[136].mxu1 %v21215_v20 }
 0x527   : > { %8149 = vmatprep.mubr.bf16.mxu1 %v21190_v51  ;;  %8626 = vmatpush1.bf16.msra.mxu1 %v16462_v17  ;;  %v16540_v17 = vld [vmem:[%s21098_s4 + $0x3f0] ss:$8 sps:$4 sm:$0xff]  }
 0x528   : > { %8627 = vmatprep.subr.bf16.mxu1 %v16473_v59  ;;  %v21221_v59 = vld [vmem:[#allocation21_spill] sm:$0xff] }
 0x52b   : > { %8628 = vmatpush1.bf16.msra.mxu1 %v16471_v2  ;;  %v21222_v2 = vld [vmem:[#allocation23_spill] sm:$0xff] }
 0x52c   : > { %8629 = vmatprep.subr.bf16.mxu1 %v16482_v37  ;;  %v6629_v37 = vld [vmem:[%s21103_s9] sm:$0x3] }
 0x52e   : > { %8150 = vmatmul.mubr.bf16.gmra.mrb[140].mxu1 %v21216_v54 }
 0x52f   : > { %8159 = vmatprep.mubr.bf16.mxu1 %v21190_v51  ;;  %8630 = vmatpush1.bf16.msra.mxu1 %v16480_v10  ;;  %v21223_v10 = vld [vmem:[#allocation25_spill] sm:$0xff] }
 0x530   : > { %8631 = vmatprep.subr.bf16.mxu1 %v16491_v48  ;;  %v21224_v48 = vld [vmem:[#allocation6_spill] sm:$0xff] }
 0x533   : > { %8632 = vmatpush1.bf16.msra.mxu1 %v16489_v15  ;;  %v19191_v15 = vrot.slane %v6629_v37, %v21224_v48 }
 0x534   : > { %8633 = vmatprep.subr.bf16.mxu1 %v16500_v39  ;;  %v21225_v39 = vld [vmem:[#allocation7_spill] sm:$0xff] }
 0x536   : > { %8160 = vmatmul.mubr.bf16.gmra.mrb[144].mxu1 %v21217_v22 }
 0x537   : > { %8169 = vmatprep.mubr.bf16.mxu1 %v21190_v51  ;;  %8634 = vmatpush1.bf16.msra.mxu1 %v16498_v33  ;;  %v19195_v33 = vrot.slane %v6629_v37, %v21225_v39 }
 0x538   : > { %8635 = vmatprep.subr.bf16.mxu1 %v16509_v41 }
 0x53b   : > { %8636 = vmatpush1.bf16.msra.mxu1 %v16507_v9 }
 0x53c   : > { %8637 = vmatprep.subr.bf16.mxu1 %v16518_v21 }
 0x53e   : > { %8170 = vmatmul.mubr.bf16.gmra.mrb[148].mxu1 %v21218_v38 }
 0x53f   : > { %8179 = vmatprep.mubr.bf16.mxu1 %v21190_v51  ;;  %8638 = vmatpush1.bf16.msra.mxu1 %v16516_v13 }
 0x540   : > { %8639 = vmatprep.subr.bf16.mxu1 %v16527_v12 }
 0x543   : > { %8640 = vmatpush1.bf16.msra.mxu1 %v16525_v44 }
 0x544   : > { %8641 = vmatprep.subr.bf16.mxu1 %v16533_v27 }
 0x546   : > { %8180 = vmatmul.mubr.bf16.gmra.mrb[152].mxu1 %v21219_v42 }
 0x547   : > { %8189 = vmatprep.mubr.bf16.mxu1 %v21190_v51  ;;  %8642 = vmatpush1.bf16.msra.mxu1 %v16531_v7 }
 0x548   : > { %8643 = vmatprep.subr.bf16.mxu1 %v16536_v1  ;;  %v21226_v1 = vld [vmem:[#allocation27_spill] sm:$0xff] }
 0x54b   : > { %8644 = vmatpush1.bf16.msra.mxu1 %v16534_v26 }
 0x54c   : > { %8645 = vmatprep.subr.bf16.mxu1 %v16539_v25 }
 0x54e   : > { %8190 = vmatmul.mubr.bf16.gmra.mrb[156].mxu1 %v21220_v46 }
 0x54f   : > { %8199 = vmatprep.mubr.bf16.mxu1 %v21190_v51  ;;  %8646 = vmatpush1.bf16.msra.mxu1 %v16537_v50 }
 0x550   : > { %8647 = vmatprep.subr.bf16.mxu1 %v16542_v18 }
 0x553   : > { %8648 = vmatpush1.bf16.msra.mxu1 %v16540_v17 }
 0x554   : > { %8810 = vmatprep.subr.bf16.mxu1 %v16545_v6 }
 0x556   : > { %8200 = vmatmul.mubr.bf16.gmra.mrb[160].mxu1 %v21221_v59 }
 0x557   : > { %8209 = vmatprep.mubr.bf16.mxu1 %v21190_v51 }
 0x55e   : > { %8210 = vmatmul.mubr.bf16.gmra.mrb[164].mxu1 %v21222_v2 }
 0x55f   : > { %8219 = vmatprep.mubr.bf16.mxu1 %v21190_v51 }
 0x566   : > { %8220 = vmatmul.mubr.bf16.gmra.mrb[168].mxu1 %v21223_v10 }
 0x567   : > { %8229 = vmatprep.mubr.bf16.mxu1 %v21190_v51 }
 0x56a   : > { %v6406_v41 = vpop.f32.mrb[128].mxu0 }
 0x56b   : > { %v6641_v9 = vadd.f32 %v19191_v15, %v6406_v41  ;;  %v6408_v21 = vpop.f32.mrb[129].mxu0  ;;  %v16546_v41 = vld [vmem:[%s21099_s5] ss:$8 sps:$4 sm:$0xff]  }
 0x56c   : > { %v6642_v13 = vadd.f32 %v19195_v33, %v6408_v21  ;;  %v6410_v12 = vpop.f32.mrb[130].mxu0 }
 0x56d   : > { %v6643_v44 = vadd.f32 %v19191_v15, %v6410_v12  ;;  %v6412_v27 = vpop.f32.mrb[131].mxu0  ;;  %v6705_v26 = vmax.f32 %v6641_v9, 0.0  ;;  %v16554_v9 = vld [vmem:[%s21099_s5 + $0x14] ss:$8 sps:$4 sm:$0xff]  }
 0x56e   : > { %v6644_v7 = vadd.f32 %v19195_v33, %v6412_v27  ;;  %8230 = vmatmul.mubr.bf16.gmra.mrb[172].mxu1 %v21226_v1  ;;  %v6706_v50 = vmax.f32 %v6642_v13, 0.0 }
 0x56f   : > { %v6707_v25 = vmax.f32 %v6643_v44, 0.0  ;;  %8239 = vmatprep.mubr.bf16.mxu1 %v21190_v51 }
 0x570   : > { %v6708_v18 = vmax.f32 %v6644_v7, 0.0 }
 0x571   : > { %v6769_v17 = vpack.c.bf16 %v6707_v25, %v6705_v26  ;;  %v21228_v25 = vld [vmem:[#allocation29_spill] sm:$0xff] }
 0x572   : > { %v19203_v6 = vpack.c.bf16 %v6708_v18, %v6706_v50  ;;  %v6416_v37 = vpop.f32.mrb[132].mxu0  ;;  %v16552_v50 = vld [vmem:[%s21099_s5 + $0x10] ss:$8 sps:$4 sm:$0xff]  }
 0x573   : > { %v6645_v21 = vadd.f32 %v19191_v15, %v6416_v37  ;;  %v6418_v12 = vpop.f32.mrb[133].mxu0 }
 0x574   : > { %21227 = vst [vmem:[#allocation32_spill] sm:$0xff] %v19203_v6  ;;  %v6646_v44 = vadd.f32 %v19195_v33, %v6418_v12  ;;  %v6420_v27 = vpop.f32.mrb[134].mxu0  ;;  %9560 = vmatprep.mubr.bf16.mxu0 %v19203_v6  ;;  %v16557_v12 = vld [vmem:[%s21099_s5 + $0x24] ss:$8 sps:$4 sm:$0xff]  }
 0x575   : > { %v6647_v13 = vadd.f32 %v19191_v15, %v6420_v27  ;;  %v6422_v7 = vpop.f32.mrb[135].mxu0  ;;  %9561 = vmatmul.mubr.bf16.vlgmr.msra.gmra.mrb[192].mxu0 %v6769_v17  ;;  %v6709_v18 = vmax.f32 %v6645_v21, 0.0 }
 0x576   : > { %v6648_v26 = vadd.f32 %v19195_v33, %v6422_v7  ;;  %8240 = vmatmul.mubr.bf16.gmra.mrb[176].mxu1 %v21228_v25  ;;  %9802 = vmatpush1.bf16.msra.mxu0 %v16546_v41  ;;  %v6710_v27 = vmax.f32 %v6646_v44, 0.0  ;;  %v16555_v41 = vld [vmem:[%s21099_s5 + $0x20] ss:$8 sps:$4 sm:$0xff]  }
 0x577   : > { %v6711_v37 = vmax.f32 %v6647_v13, 0.0  ;;  %8249 = vmatprep.mubr.bf16.mxu1 %v21190_v51  ;;  %9803 = vmatprep.subr.bf16.mxu0 %v16554_v9  ;;  %v16560_v9 = vld [vmem:[%s21099_s5 + $0x34] ss:$8 sps:$4 sm:$0xff]  }
 0x578   : > { %v6712_v17 = vmax.f32 %v6648_v26, 0.0 }
 0x579   : > { %v6771_v6 = vpack.c.bf16 %v6711_v37, %v6709_v18 }
 0x57a   : > { %v19224_v7 = vpack.c.bf16 %v6712_v17, %v6710_v27  ;;  %v6426_v39 = vpop.f32.mrb[136].mxu0  ;;  %9804 = vmatpush1.bf16.msra.mxu0 %v16552_v50  ;;  %v21230_v27 = vld [vmem:[#allocation33_spill] sm:$0xff] }
 0x57b   : > { %v6649_v21 = vadd.f32 %v19191_v15, %v6426_v39  ;;  %v6428_v13 = vpop.f32.mrb[137].mxu0  ;;  %9805 = vmatprep.subr.bf16.mxu0 %v16557_v12  ;;  %v16558_v39 = vld [vmem:[%s21099_s5 + $0x30] ss:$8 sps:$4 sm:$0xff]  }
 0x57c   : > { %21229 = vst [vmem:[#allocation34_spill] sm:$0xff] %v19224_v7  ;;  %v6650_v44 = vadd.f32 %v19195_v33, %v6428_v13  ;;  %v6430_v26 = vpop.f32.mrb[138].mxu0  ;;  %9570 = vmatprep.mubr.bf16.mxu0 %v19224_v7  ;;  %v16563_v13 = vld [vmem:[%s21099_s5 + $0x44] ss:$8 sps:$4 sm:$0xff]  }
 0x57d   : > { %v6651_v18 = vadd.f32 %v19191_v15, %v6430_v26  ;;  %v6432_v50 = vpop.f32.mrb[139].mxu0  ;;  %9571 = vmatmul.mubr.bf16.gmra.mrb[196].mxu0 %v6771_v6  ;;  %v6713_v12 = vmax.f32 %v6649_v21, 0.0  ;;  %v16561_v21 = vld [vmem:[%s21099_s5 + $0x40] ss:$8 sps:$4 sm:$0xff]  }
 0x57e   : > { %v6652_v37 = vadd.f32 %v19195_v33, %v6432_v50  ;;  %8250 = vmatmul.mubr.bf16.gmra.mrb[180].mxu1 %v21230_v27  ;;  %9806 = vmatpush1.bf16.msra.mxu0 %v16555_v41  ;;  %v6714_v26 = vmax.f32 %v6650_v44, 0.0 }
 0x57f   : > { %v6715_v17 = vmax.f32 %v6651_v18, 0.0  ;;  %8259 = vmatprep.mubr.bf16.mxu1 %v21190_v51  ;;  %9807 = vmatprep.subr.bf16.mxu0 %v16560_v9  ;;  %v16569_v9 = vld [vmem:[%s21099_s5 + $0x54] ss:$8 sps:$4 sm:$0xff]  }
 0x580   : > { %v6716_v6 = vmax.f32 %v6652_v37, 0.0 }
 0x581   : > { %v19245_v7 = vpack.c.bf16 %v6715_v17, %v6713_v12 }
 0x582   : > { %v19247_v50 = vpack.c.bf16 %v6716_v6, %v6714_v26  ;;  %v6436_v41 = vpop.f32.mrb[140].mxu0  ;;  %9808 = vmatpush1.bf16.msra.mxu0 %v16558_v39  ;;  %v21231_v26 = vld [vmem:[#allocation38_spill] sm:$0xff]  ;;  %v16567_v6 = vld [vmem:[%s21099_s5 + $0x50] ss:$8 sps:$4 sm:$0xff]  }
 0x583   : > { %v6653_v18 = vadd.f32 %v19191_v15, %v6436_v41  ;;  %v6438_v48 = vpop.f32.mrb[141].mxu0  ;;  %9809 = vmatprep.subr.bf16.mxu0 %v16563_v13 }
 0x584   : > { %v6654_v44 = vadd.f32 %v19195_v33, %v6438_v48  ;;  %v6440_v37 = vpop.f32.mrb[142].mxu0  ;;  %v16572_v48 = vld [vmem:[%s21099_s5 + $0x64] ss:$8 sps:$4 sm:$0xff]  }
 0x585   : > { %v6655_v12 = vadd.f32 %v19191_v15, %v6440_v37  ;;  %v6442_v17 = vpop.f32.mrb[143].mxu0  ;;  %v6717_v13 = vmax.f32 %v6653_v18, 0.0  ;;  %v16570_v18 = vld [vmem:[%s21099_s5 + $0x60] ss:$8 sps:$4 sm:$0xff]  }
 0x586   : > { %v6656_v39 = vadd.f32 %v19195_v33, %v6442_v17  ;;  %8260 = vmatmul.mubr.bf16.gmra.mrb[184].mxu1 %v21231_v26  ;;  %9810 = vmatpush1.bf16.msra.mxu0 %v16561_v21  ;;  %v6718_v37 = vmax.f32 %v6654_v44, 0.0 }
 0x587   : > { %v6719_v41 = vmax.f32 %v6655_v12, 0.0  ;;  %8269 = vmatprep.mubr.bf16.mxu1 %v21190_v51  ;;  %9811 = vmatprep.subr.bf16.mxu0 %v16569_v9  ;;  %v16575_v9 = vld [vmem:[%s21099_s5 + $0x74] ss:$8 sps:$4 sm:$0xff]  }
 0x588   : > { %v6720_v8 = vmax.f32 %v6656_v39, 0.0 }
 0x589   : > { %v19267_v23 = vpack.c.bf16 %v6719_v41, %v6717_v13  ;;  %v21232_v41 = vld [vmem:[#allocation42_spill] sm:$0xff] }
 0x58a   : > { %v19269_v17 = vpack.c.bf16 %v6720_v8, %v6718_v37  ;;  %v6446_v21 = vpop.f32.mrb[144].mxu0  ;;  %9812 = vmatpush1.bf16.msra.mxu0 %v16567_v6  ;;  %v16573_v37 = vld [vmem:[%s21099_s5 + $0x70] ss:$8 sps:$4 sm:$0xff]  }
 0x58b   : > { %v6657_v12 = vadd.f32 %v19191_v15, %v6446_v21  ;;  %v6448_v26 = vpop.f32.mrb[145].mxu0  ;;  %9813 = vmatprep.subr.bf16.mxu0 %v16572_v48 }
 0x58c   : > { %v6658_v44 = vadd.f32 %v19195_v33, %v6448_v26  ;;  %v6450_v39 = vpop.f32.mrb[146].mxu0  ;;  %v16578_v26 = vld [vmem:[%s21099_s5 + $0x84] ss:$8 sps:$4 sm:$0xff]  }
 0x58d   : > { %v6659_v8 = vadd.f32 %v19191_v15, %v6450_v39  ;;  %v6452_v13 = vpop.f32.mrb[147].mxu0  ;;  %v6721_v48 = vmax.f32 %v6657_v12, 0.0 }
 0x58e   : > { %v6660_v6 = vadd.f32 %v19195_v33, %v6452_v13  ;;  %8270 = vmatmul.mubr.bf16.gmra.mrb[188].mxu1 %v21232_v41  ;;  %9814 = vmatpush1.bf16.msra.mxu0 %v16570_v18  ;;  %v6722_v39 = vmax.f32 %v6658_v44, 0.0  ;;  %v16576_v18 = vld [vmem:[%s21099_s5 + $0x80] ss:$8 sps:$4 sm:$0xff]  }
 0x58f   : > { %v6723_v21 = vmax.f32 %v6659_v8, 0.0  ;;  %8649 = vmatprep.mubr.bf16.mxu1 %v21201_v3  ;;  %9815 = vmatprep.subr.bf16.mxu0 %v16575_v9  ;;  %v16543_v3 = vld [vmem:[%s21098_s4 + $0x400] ss:$8 sps:$4 sm:$0xff]  }
 0x590   : > { %v6724_v27 = vmax.f32 %v6660_v6, 0.0  ;;  %v16584_v6 = vld [vmem:[%s21099_s5 + $0x94] ss:$8 sps:$4 sm:$0xff]  }
 0x591   : > { %v6777_v25 = vpack.c.bf16 %v6723_v21, %v6721_v48  ;;  %v16582_v21 = vld [vmem:[%s21099_s5 + $0x90] ss:$8 sps:$4 sm:$0xff]  }
 0x592   : > { %v19289_v13 = vpack.c.bf16 %v6724_v27, %v6722_v39  ;;  %v6456_v41 = vpop.f32.mrb[148].mxu0  ;;  %9816 = vmatpush1.bf16.msra.mxu0 %v16573_v37  ;;  %v16551_v27 = vld [vmem:[%s21098_s4 + $0x414] ss:$8 sps:$4 sm:$0xff]  }
 0x593   : > { %v6661_v12 = vadd.f32 %v19191_v15, %v6456_v41  ;;  %v6458_v8 = vpop.f32.mrb[149].mxu0  ;;  %9817 = vmatprep.subr.bf16.mxu0 %v16578_v26 }
 0x594   : > { %21233 = vst [vmem:[#allocation30_spill] sm:$0xff] %v19289_v13  ;;  %v6662_v9 = vadd.f32 %v19195_v33, %v6458_v8  ;;  %v6460_v44 = vpop.f32.mrb[150].mxu0  ;;  %9580 = vmatprep.mubr.bf16.mxu0 %v19289_v13  ;;  %v16549_v8 = vld [vmem:[%s21098_s4 + $0x410] ss:$8 sps:$4 sm:$0xff]  }
 0x595   : > { %v6663_v41 = vadd.f32 %v19191_v15, %v6460_v44  ;;  %v6462_v37 = vpop.f32.mrb[151].mxu0  ;;  %9581 = vmatmul.mubr.bf16.gmra.mrb[200].mxu0 %v6777_v25  ;;  %v6725_v26 = vmax.f32 %v6661_v12, 0.0  ;;  %v16587_v25 = vld [vmem:[%s21099_s5 + $0xa4] ss:$8 sps:$4 sm:$0xff]  }
 0x596   : > { %v6664_v48 = vadd.f32 %v19195_v33, %v6462_v37  ;;  %8650 = vmatmul.mubr.bf16.vlgmr.msra.gmra.mrb[128].mxu1 %v18038_v40  ;;  %9818 = vmatpush1.bf16.msra.mxu0 %v16576_v18  ;;  %v6726_v44 = vmax.f32 %v6662_v9, 0.0  ;;  %v16566_v18 = vld [vmem:[%s21098_s4 + $0x424] ss:$8 sps:$4 sm:$0xff]   ;;  %v16564_v9 = vld [vmem:[%s21098_s4 + $0x420] ss:$8 sps:$4 sm:$0xff]  }
 0x597   : > { %v6727_v39 = vmax.f32 %v6663_v41, 0.0  ;;  %8659 = vmatprep.mubr.bf16.mxu1 %v21202_v28  ;;  %8811 = vmatpush1.bf16.msra.mxu1 %v16543_v3  ;;  %v16585_v3 = vld [vmem:[%s21099_s5 + $0xa0] ss:$8 sps:$4 sm:$0xff]  }
 0x598   : > { %v6728_v40 = vmax.f32 %v6664_v48, 0.0  ;;  %8812 = vmatprep.subr.bf16.mxu1 %v16551_v27  ;;  %9819 = vmatprep.subr.bf16.mxu0 %v16584_v6  ;;  %v16581_v48 = vld [vmem:[%s21098_s4 + $0x434] ss:$8 sps:$4 sm:$0xff]  }
 0x599   : > { %v6779_v12 = vpack.c.bf16 %v6727_v39, %v6725_v26 }
 0x59a   : > { %v19322_v41 = vpack.c.bf16 %v6728_v40, %v6726_v44  ;;  %v6466_v28 = vpop.f32.mrb[152].mxu0  ;;  %9820 = vmatpush1.bf16.msra.mxu0 %v16582_v21  ;;  %v16590_v21 = vld [vmem:[%s21099_s5 + $0xb4] ss:$8 sps:$4 sm:$0xff]   ;;  %v16579_v40 = vld [vmem:[%s21098_s4 + $0x430] ss:$8 sps:$4 sm:$0xff]  }
 0x59b   : > { %v6665_v37 = vadd.f32 %v19191_v15, %v6466_v28  ;;  %v6468_v13 = vpop.f32.mrb[153].mxu0  ;;  %8813 = vmatpush1.bf16.msra.mxu1 %v16549_v8  ;;  %9821 = vmatprep.subr.bf16.mxu0 %v16587_v25  ;;  %v16596_v28 = vld [vmem:[%s21098_s4 + $0x444] ss:$8 sps:$4 sm:$0xff]  }
 0x59c   : > { %v6666_v27 = vadd.f32 %v19195_v33, %v6468_v13  ;;  %v6470_v6 = vpop.f32.mrb[154].mxu0  ;;  %9590 = vmatprep.mubr.bf16.mxu0 %v19322_v41  ;;  %8814 = vmatprep.subr.bf16.mxu1 %v16566_v18  ;;  %v16588_v13 = vld [vmem:[%s21099_s5 + $0xb0] ss:$8 sps:$4 sm:$0xff]   ;;  %v16593_v18 = vld [vmem:[%s21099_s5 + $0xc4] ss:$8 sps:$4 sm:$0xff]  }
 0x59d   : > { %v6667_v26 = vadd.f32 %v19191_v15, %v6470_v6  ;;  %v6472_v39 = vpop.f32.mrb[155].mxu0  ;;  %9591 = vmatmul.mubr.bf16.gmra.mrb[204].mxu0 %v6779_v12  ;;  %v6729_v25 = vmax.f32 %v6665_v37, 0.0 }
 0x59e   : > { %v6668_v8 = vadd.f32 %v19195_v33, %v6472_v39  ;;  %8660 = vmatmul.mubr.bf16.gmra.mrb[132].mxu1 %v18059_v16  ;;  %9822 = vmatpush1.bf16.msra.mxu0 %v16585_v3  ;;  %v6730_v12 = vmax.f32 %v6666_v27, 0.0  ;;  %v16599_v39 = vld [vmem:[%s21099_s5 + $0xd4] ss:$8 sps:$4 sm:$0xff]  }
 0x59f   : > { %v6731_v44 = vmax.f32 %v6667_v26, 0.0  ;;  %8669 = vmatprep.mubr.bf16.mxu1 %v21203_v11  ;;  %8815 = vmatpush1.bf16.msra.mxu1 %v16564_v9  ;;  %v16591_v9 = vld [vmem:[%s21099_s5 + $0xc0] ss:$8 sps:$4 sm:$0xff]  }
 0x5a0   : > { %v6732_v16 = vmax.f32 %v6668_v8, 0.0  ;;  %8816 = vmatprep.subr.bf16.mxu1 %v16581_v48  ;;  %9823 = vmatprep.subr.bf16.mxu0 %v16590_v21  ;;  %v16594_v48 = vld [vmem:[%s21098_s4 + $0x440] ss:$8 sps:$4 sm:$0xff]   ;;  %v16611_v8 = vld [vmem:[%s21098_s4 + $0x454] ss:$8 sps:$4 sm:$0xff]  }
 0x5a1   : > { %v19355_v3 = vpack.c.bf16 %v6731_v44, %v6729_v25 }
 0x5a2   : > { %v19357_v11 = vpack.c.bf16 %v6732_v16, %v6730_v12  ;;  %v6476_v37 = vpop.f32.mrb[156].mxu0  ;;  %9824 = vmatpush1.bf16.msra.mxu0 %v16588_v13  ;;  %v16602_v16 = vld [vmem:[%s21099_s5 + $0xe4] ss:$8 sps:$4 sm:$0xff]  }
 0x5a3   : > { %v6669_v6 = vadd.f32 %v19191_v15, %v6476_v37  ;;  %v6478_v27 = vpop.f32.mrb[157].mxu0  ;;  %8817 = vmatpush1.bf16.msra.mxu1 %v16579_v40  ;;  %9825 = vmatprep.subr.bf16.mxu0 %v16593_v18  ;;  %v16597_v40 = vld [vmem:[%s21099_s5 + $0xd0] ss:$8 sps:$4 sm:$0xff]  }
 0x5a4   : > { %v6670_v21 = vadd.f32 %v19195_v33, %v6478_v27  ;;  %v6480_v26 = vpop.f32.mrb[158].mxu0  ;;  %8818 = vmatprep.subr.bf16.mxu1 %v16596_v28  ;;  %v16609_v28 = vld [vmem:[%s21098_s4 + $0x450] ss:$8 sps:$4 sm:$0xff]  }
 0x5a5   : > { %v6671_v13 = vadd.f32 %v19191_v15, %v6480_v26  ;;  %v6482_v25 = vpop.f32.mrb[159].mxu0  ;;  %v6733_v18 = vmax.f32 %v6669_v6, 0.0 }
 0x5a6   : > { %v6672_v44 = vadd.f32 %v19195_v33, %v6482_v25  ;;  %8670 = vmatmul.mubr.bf16.gmra.mrb[136].mxu1 %v18141_v0  ;;  %9826 = vmatpush1.bf16.msra.mxu0 %v16591_v9  ;;  %v6734_v37 = vmax.f32 %v6670_v21, 0.0  ;;  %v16626_v9 = vld [vmem:[%s21098_s4 + $0x464] ss:$8 sps:$4 sm:$0xff]   ;;  %v16624_v25 = vld [vmem:[%s21098_s4 + $0x460] ss:$8 sps:$4 sm:$0xff]  }
 0x5a7   : > { %v6735_v12 = vmax.f32 %v6671_v13, 0.0  ;;  %8679 = vmatprep.mubr.bf16.mxu1 %v21204_v19  ;;  %8819 = vmatpush1.bf16.msra.mxu1 %v16594_v48  ;;  %v16600_v48 = vld [vmem:[%s21099_s5 + $0xe0] ss:$8 sps:$4 sm:$0xff]  }
 0x5a8   : > { %v6736_v0 = vmax.f32 %v6672_v44, 0.0  ;;  %9827 = vmatprep.subr.bf16.mxu0 %v16599_v39  ;;  %8820 = vmatprep.subr.bf16.mxu1 %v16611_v8  ;;  %v16605_v39 = vld [vmem:[%s21099_s5 + $0xf4] ss:$8 sps:$4 sm:$0xff]  }
 0x5a9   : > { %v19389_v6 = vpack.c.bf16 %v6735_v12, %v6733_v18  ;;  %v16641_v18 = vld [vmem:[%s21098_s4 + $0x474] ss:$8 sps:$4 sm:$0xff]  }
 0x5aa   : > { %v19391_v19 = vpack.c.bf16 %v6736_v0, %v6734_v37  ;;  %v6486_v27 = vpop.f32.mrb[160].mxu0  ;;  %9828 = vmatpush1.bf16.msra.mxu0 %v16597_v40  ;;  %v16608_v0 = vld [vmem:[%s21099_s5 + $0x204] ss:$8 sps:$4 sm:$0xff]  }
 0x5ab   : > { %v6673_v26 = vadd.f32 %v19191_v15, %v6486_v27  ;;  %v6488_v21 = vpop.f32.mrb[161].mxu0  ;;  %9829 = vmatprep.subr.bf16.mxu0 %v16602_v16  ;;  %8821 = vmatpush1.bf16.msra.mxu1 %v16609_v28  ;;  %v16603_v16 = vld [vmem:[%s21099_s5 + $0xf0] ss:$8 sps:$4 sm:$0xff]  }
 0x5ac   : > { %v6674_v8 = vadd.f32 %v19195_v33, %v6488_v21  ;;  %v6490_v13 = vpop.f32.mrb[162].mxu0  ;;  %8822 = vmatprep.subr.bf16.mxu1 %v16626_v9 }
 0x5ad   : > { %v6675_v44 = vadd.f32 %v19191_v15, %v6490_v13  ;;  %v6492_v40 = vpop.f32.mrb[163].mxu0  ;;  %v6737_v28 = vmax.f32 %v6673_v26, 0.0 }
 0x5ae   : > { %v6676_v12 = vadd.f32 %v19195_v33, %v6492_v40  ;;  %8680 = vmatmul.mubr.bf16.gmra.mrb[140].mxu1 %v18179_v14  ;;  %9830 = vmatpush1.bf16.msra.mxu0 %v16600_v48  ;;  %v6738_v9 = vmax.f32 %v6674_v8, 0.0  ;;  %v16639_v14 = vld [vmem:[%s21098_s4 + $0x470] ss:$8 sps:$4 sm:$0xff]  }
 0x5af   : > { %v6739_v37 = vmax.f32 %v6675_v44, 0.0  ;;  %8689 = vmatprep.mubr.bf16.mxu1 %v21205_v62  ;;  %9831 = vmatprep.subr.bf16.mxu0 %v16605_v39 }
 0x5b0   : > { %v6740_v27 = vmax.f32 %v6676_v12, 0.0  ;;  %8823 = vmatpush1.bf16.msra.mxu1 %v16624_v25 }
 0x5b1   : > { %v6785_v48 = vpack.c.bf16 %v6739_v37, %v6737_v28  ;;  %8824 = vmatprep.subr.bf16.mxu1 %v16641_v18 }
 0x5b2   : > { %v19420_v21 = vpack.c.bf16 %v6740_v27, %v6738_v9  ;;  %v6496_v26 = vpop.f32.mrb[164].mxu0  ;;  %9832 = vmatpush1.bf16.msra.mxu0 %v16603_v16 }
 0x5b3   : > { %v6677_v62 = vadd.f32 %v19191_v15, %v6496_v26  ;;  %v6498_v39 = vpop.f32.mrb[165].mxu0  ;;  %10123 = vmatprep.subr.bf16.mxu0 %v16608_v0 }
 0x5b4   : > { %v6678_v13 = vadd.f32 %v19195_v33, %v6498_v39  ;;  %v6500_v44 = vpop.f32.mrb[166].mxu0  ;;  %9600 = vmatprep.mubr.bf16.mxu0 %v19420_v21  ;;  %8825 = vmatpush1.bf16.msra.mxu1 %v16639_v14 }
 0x5b5   : > { %v6679_v8 = vadd.f32 %v19191_v15, %v6500_v44  ;;  %v6502_v25 = vpop.f32.mrb[167].mxu0  ;;  %9601 = vmatmul.mubr.bf16.gmra.mrb[208].mxu0 %v6785_v48  ;;  %v6741_v18 = vmax.f32 %v6677_v62, 0.0 }
 0x5b6   : > { %v6680_v40 = vadd.f32 %v19195_v33, %v6502_v25  ;;  %8690 = vmatmul.mubr.bf16.gmra.mrb[144].mxu1 %v18259_v56  ;;  %v6742_v16 = vmax.f32 %v6678_v13, 0.0 }
 0x5b7   : > { %v6743_v12 = vmax.f32 %v6679_v8, 0.0  ;;  %8699 = vmatprep.mubr.bf16.mxu1 %v21206_v5 }
 0x5b8   : > { %v6744_v28 = vmax.f32 %v6680_v40, 0.0 }
 0x5b9   : > { %v6787_v37 = vpack.c.bf16 %v6743_v12, %v6741_v18 }
 0x5ba   : > { %v19429_v0 = vpack.c.bf16 %v6744_v28, %v6742_v16  ;;  %v6506_v9 = vpop.f32.mrb[168].mxu0 }
 0x5bb   : > { %v6681_v27 = vadd.f32 %v19191_v15, %v6506_v9  ;;  %v6508_v14 = vpop.f32.mrb[169].mxu0 }
 0x5bc   : > { %v6682_v26 = vadd.f32 %v19195_v33, %v6508_v14  ;;  %v6510_v48 = vpop.f32.mrb[170].mxu0  ;;  %9610 = vmatprep.mubr.bf16.mxu0 %v19429_v0 }
 0x5bd   : > { %v6683_v56 = vadd.f32 %v19191_v15, %v6510_v48  ;;  %v6512_v62 = vpop.f32.mrb[171].mxu0  ;;  %9611 = vmatmul.mubr.bf16.gmra.mrb[212].mxu0 %v6787_v37  ;;  %v6745_v39 = vmax.f32 %v6681_v27, 0.0 }
 0x5be   : > { %v6684_v5 = vadd.f32 %v19195_v33, %v6512_v62  ;;  %8700 = vmatmul.mubr.bf16.gmra.mrb[148].mxu1 %v18293_v58  ;;  %v6746_v44 = vmax.f32 %v6682_v26, 0.0 }
 0x5bf   : > { %v6747_v13 = vmax.f32 %v6683_v56, 0.0  ;;  %8709 = vmatprep.mubr.bf16.mxu1 %v21207_v35 }
 0x5c0   : > { %v6748_v8 = vmax.f32 %v6684_v5, 0.0 }
 0x5c1   : > { %v19438_v25 = vpack.c.bf16 %v6747_v13, %v6745_v39 }
 0x5c2   : > { %v19440_v40 = vpack.c.bf16 %v6748_v8, %v6746_v44  ;;  %v6516_v18 = vpop.f32.mrb[172].mxu0 }
 0x5c3   : > { %v6685_v12 = vadd.f32 %v19191_v15, %v6516_v18  ;;  %v6518_v16 = vpop.f32.mrb[173].mxu0 }
 0x5c4   : > { %v6686_v28 = vadd.f32 %v19195_v33, %v6518_v16  ;;  %v6520_v37 = vpop.f32.mrb[174].mxu0 }
 0x5c5   : > { %v6687_v9 = vadd.f32 %v19191_v15, %v6520_v37  ;;  %v6522_v58 = vpop.f32.mrb[175].mxu0  ;;  %v6749_v35 = vmax.f32 %v6685_v12, 0.0 }
 0x5c6   : > { %v6688_v27 = vadd.f32 %v19195_v33, %v6522_v58  ;;  %8710 = vmatmul.mubr.bf16.gmra.mrb[152].mxu1 %v18371_v52  ;;  %v6750_v26 = vmax.f32 %v6686_v28, 0.0 }
 0x5c7   : > { %v6751_v14 = vmax.f32 %v6687_v9, 0.0  ;;  %8719 = vmatprep.mubr.bf16.mxu1 %v21208_v60 }
 0x5c8   : > { %v6752_v48 = vmax.f32 %v6688_v27, 0.0 }
 0x5c9   : > { %v19448_v56 = vpack.c.bf16 %v6751_v14, %v6749_v35 }
 0x5ca   : > { %v19450_v62 = vpack.c.bf16 %v6752_v48, %v6750_v26  ;;  %v6526_v5 = vpop.f32.mrb[176].mxu0 }
 0x5cb   : > { %v6689_v39 = vadd.f32 %v19191_v15, %v6526_v5  ;;  %v6528_v13 = vpop.f32.mrb[177].mxu0 }
 0x5cc   : > { %v6690_v44 = vadd.f32 %v19195_v33, %v6528_v13  ;;  %v6530_v8 = vpop.f32.mrb[178].mxu0 }
 0x5cd   : > { %v6691_v18 = vadd.f32 %v19191_v15, %v6530_v8  ;;  %v6532_v52 = vpop.f32.mrb[179].mxu0  ;;  %v6753_v60 = vmax.f32 %v6689_v39, 0.0 }
 0x5ce   : > { %v6692_v12 = vadd.f32 %v19195_v33, %v6532_v52  ;;  %8720 = vmatmul.mubr.bf16.gmra.mrb[156].mxu1 %v18390_v53  ;;  %v6754_v28 = vmax.f32 %v6690_v44, 0.0 }
 0x5cf   : > { %v6755_v16 = vmax.f32 %v6691_v18, 0.0  ;;  %8729 = vmatprep.mubr.bf16.mxu1 %v21209_v4 }
 0x5d0   : > { %v6756_v37 = vmax.f32 %v6692_v12, 0.0 }
 0x5d1   : > { %v6793_v9 = vpack.c.bf16 %v6755_v16, %v6753_v60 }
 0x5d2   : > { %v19458_v58 = vpack.c.bf16 %v6756_v37, %v6754_v28  ;;  %v6536_v27 = vpop.f32.mrb[180].mxu0 }
 0x5d3   : > { %v6693_v35 = vadd.f32 %v19191_v15, %v6536_v27  ;;  %v6538_v14 = vpop.f32.mrb[181].mxu0 }
 0x5d4   : > { %v6694_v26 = vadd.f32 %v19195_v33, %v6538_v14  ;;  %v6540_v48 = vpop.f32.mrb[182].mxu0  ;;  %9620 = vmatprep.mubr.bf16.mxu0 %v19458_v58 }
 0x5d5   : > { %v6695_v53 = vadd.f32 %v19191_v15, %v6540_v48  ;;  %v6542_v5 = vpop.f32.mrb[183].mxu0  ;;  %9621 = vmatmul.mubr.bf16.gmra.mrb[216].mxu0 %v6793_v9  ;;  %v6757_v39 = vmax.f32 %v6693_v35, 0.0 }
 0x5d6   : > { %v6696_v4 = vadd.f32 %v19195_v33, %v6542_v5  ;;  %8730 = vmatmul.mubr.bf16.gmra.mrb[160].mxu1 %v18426_v32  ;;  %v6758_v44 = vmax.f32 %v6694_v26, 0.0 }
 0x5d7   : > { %v6759_v13 = vmax.f32 %v6695_v53, 0.0  ;;  %8739 = vmatprep.mubr.bf16.mxu1 %v21210_v31 }
 0x5d8   : > { %v6760_v8 = vmax.f32 %v6696_v4, 0.0  ;;  %v16606_v4 = vld [vmem:[%s21099_s5 + $0x200] ss:$8 sps:$4 sm:$0xff]  }
 0x5d9   : > { %v6795_v18 = vpack.c.bf16 %v6759_v13, %v6757_v39  ;;  %v16614_v13 = vld [vmem:[%s21099_s5 + $0x214] ss:$8 sps:$4 sm:$0xff]  }
 0x5da   : > { %v19467_v52 = vpack.c.bf16 %v6760_v8, %v6758_v44  ;;  %v6546_v12 = vpop.f32.mrb[184].mxu0 }
 0x5db   : > { %v6697_v60 = vadd.f32 %v19191_v15, %v6546_v12  ;;  %v6548_v16 = vpop.f32.mrb[185].mxu0 }
 0x5dc   : > { %v6698_v28 = vadd.f32 %v19195_v33, %v6548_v16  ;;  %v6550_v37 = vpop.f32.mrb[186].mxu0  ;;  %9630 = vmatprep.mubr.bf16.mxu0 %v19467_v52 }
 0x5dd   : > { %v6699_v32 = vadd.f32 %v19191_v15, %v6550_v37  ;;  %v6552_v9 = vpop.f32.mrb[187].mxu0  ;;  %9631 = vmatmul.mubr.bf16.gmra.mrb[220].mxu0 %v6795_v18  ;;  %v6761_v27 = vmax.f32 %v6697_v60, 0.0  ;;  %v16612_v60 = vld [vmem:[%s21099_s5 + $0x210] ss:$8 sps:$4 sm:$0xff]  }
 0x5de   : > { %v6700_v31 = vadd.f32 %v19195_v33, %v6552_v9  ;;  %8740 = vmatmul.mubr.bf16.gmra.mrb[164].mxu1 %v18442_v55  ;;  %9833 = vmatprep.mubr.bf16.mxu0 %v21190_v51  ;;  %v6762_v14 = vmax.f32 %v6698_v28, 0.0  ;;  %v16615_v9 = vld [vmem:[%s21099_s5 + $0x220] ss:$8 sps:$4 sm:$0xff]  }
 0x5df   : > { %v6763_v35 = vmax.f32 %v6699_v32, 0.0  ;;  %8749 = vmatprep.mubr.bf16.mxu1 %v21211_v43 }
 0x5e0   : > { %v6764_v26 = vmax.f32 %v6700_v31, 0.0  ;;  %v16618_v31 = vld [vmem:[%s21099_s5 + $0x230] ss:$8 sps:$4 sm:$0xff]  }
 0x5e1   : > { %v19477_v48 = vpack.c.bf16 %v6763_v35, %v6761_v27  ;;  %v16623_v27 = vld [vmem:[%s21099_s5 + $0x244] ss:$8 sps:$4 sm:$0xff]   ;;  %v16621_v35 = vld [vmem:[%s21099_s5 + $0x240] ss:$8 sps:$4 sm:$0xff]  }
 0x5e2   : > { %v19479_v53 = vpack.c.bf16 %v6764_v26, %v6762_v14  ;;  %v6556_v5 = vpop.f32.mrb[188].mxu0  ;;  %v16627_v14 = vld [vmem:[%s21099_s5 + $0x250] ss:$8 sps:$4 sm:$0xff]   ;;  %v16632_v26 = vld [vmem:[%s21099_s5 + $0x264] ss:$8 sps:$4 sm:$0xff]  }
 0x5e3   : > { %v6701_v39 = vadd.f32 %v19191_v15, %v6556_v5  ;;  %v6558_v55 = vpop.f32.mrb[189].mxu0  ;;  %v16664_v5 = vld [vmem:[%s21101_s7 + $0x48] sm:$0xff]  }
 0x5e4   : > { %v6702_v43 = vadd.f32 %v19195_v33, %v6558_v55  ;;  %v6560_v44 = vpop.f32.mrb[190].mxu0  ;;  %12391 = vrot.lane.b32.xlu1 %v16664_v5, %s16976_s19  ;;  %v16666_v55 = vld [vmem:[%s21101_s7 + $0x8] sm:$0xff]  }
 0x5e5   : > { %v6703_v8 = vadd.f32 %v19191_v15, %v6560_v44  ;;  %v6562_v18 = vpop.f32.mrb[191].mxu0  ;;  %9834 = vmatmul.mubr.bf16.vlgmr.msra.gmra.mrb[192].mxu0 %v21190_v51  ;;  %v6765_v16 = vmax.f32 %v6701_v39, 0.0  ;;  %v16617_v15 = vld [vmem:[%s21099_s5 + $0x224] ss:$8 sps:$4 sm:$0xff]   ;;  %v16633_v39 = vld [vmem:[%s21099_s5 + $0x270] ss:$8 sps:$4 sm:$0xff]  }
 0x5e6   : > { %v6704_v12 = vadd.f32 %v19195_v33, %v6562_v18  ;;  %8750 = vmatmul.mubr.bf16.gmra.mrb[168].mxu1 %v18478_v47  ;;  %10124 = vmatpush1.bf16.msra.mxu0 %v16606_v4  ;;  %v6766_v37 = vmax.f32 %v6702_v43, 0.0  ;;  %v16665_v4 = vld [vmem:[%s21101_s7] sm:$0xff]   ;;  %v16667_v43 = vld [vmem:[%s21101_s7 + $0x50] sm:$0xff]   ;;  %v16669_v18 = vld [vmem:[%s21101_s7 + $0x58] sm:$0xff]  }
 0x5e7   : > { %v6767_v28 = vmax.f32 %v6703_v8, 0.0  ;;  %8759 = vmatprep.mubr.bf16.mxu1 %v21212_v61  ;;  %10125 = vmatprep.subr.bf16.mxu0 %v16614_v13  ;;  %v16620_v61 = vld [vmem:[%s21099_s5 + $0x234] ss:$8 sps:$4 sm:$0xff]   ;;  %v16642_v8 = vld [vmem:[%s21099_s5 + $0x290] ss:$8 sps:$4 sm:$0xff]  }
 0x5e8   : > { %v6768_v32 = vmax.f32 %v6704_v12, 0.0  ;;  %9843 = vmatprep.mubr.bf16.mxu0 %v21190_v51  ;;  %v16644_v13 = vld [vmem:[%s21099_s5 + $0x294] ss:$8 sps:$4 sm:$0xff]   ;;  %12375 = vrot.lane.b32.xlu1 %v16666_v55, %s16976_s19  ;;  %v16645_v12 = vld [vmem:[%s21099_s5 + $0x2a0] ss:$8 sps:$4 sm:$0xff]  }
 0x5e9   : > { %v19501_v33 = vpack.c.bf16 %v6767_v28, %v6765_v16  ;;  %v16668_v44 = vld [vmem:[%s21101_s7 + $0x10] sm:$0xff]   ;;  %v16671_v16 = vld [vmem:[%s21101_s7 + $0x60] sm:$0xff]  }
 0x5ea   : > { %v19503_v47 = vpack.c.bf16 %v6768_v32, %v6766_v37  ;;  %10126 = vmatpush1.bf16.msra.mxu0 %v16612_v60  ;;  %v16650_v60 = vld [vmem:[%s21099_s5 + $0x2b4] ss:$8 sps:$4 sm:$0xff]   ;;  %v16672_v28 = vld [vmem:[%s21101_s7 + $0x20] sm:$0xff]   ;;  %v16673_v37 = vld [vmem:[%s21101_s7 + $0x68] sm:$0xff]  }
 0x5eb   : > { %10127 = vmatprep.subr.bf16.mxu0 %v16617_v15  ;;  %v16648_v15 = vld [vmem:[%s21099_s5 + $0x2b0] ss:$8 sps:$4 sm:$0xff]   ;;  %v16674_v32 = vld [vmem:[%s21101_s7 + $0x28] sm:$0xff]  }
 0x5ec   : > { %12377 = vrot.lane.b32.xlu1 %v16668_v44, %s16976_s19  ;;  %v16679_v5 = vld [vmem:[%s21100_s6 + $0x180] ss:$8 sps:$4 sm:$0xff]   ;;  %v16693_v55 = vld [vmem:[%s21100_s6 + $0x1c4] ss:$8 sps:$4 sm:$0xff]  }
 0x5ed   : > { %9844 = vmatmul.mubr.bf16.gmra.mrb[196].mxu0 %v21190_v51  ;;  %v16705_v44 = vld [vmem:[%s21100_s6 + $0x204] ss:$8 sps:$4 sm:$0xff]  }
 0x5ee   : > { %8760 = vmatmul.mubr.bf16.gmra.mrb[172].mxu1 %v21193_v24  ;;  %9853 = vmatprep.mubr.bf16.mxu0 %v19247_v50  ;;  %v16629_v24 = vld [vmem:[%s21099_s5 + $0x254] ss:$8 sps:$4 sm:$0xff]  }
 0x5ef   : > { %10128 = vmatpush1.bf16.msra.mxu0 %v16615_v9  ;;  %8769 = vmatprep.mubr.bf16.mxu1 %v21213_v45  ;;  %v16663_v45 = vld [vmem:[%s21101_s7 + $0x40] sm:$0xff]  }
 0x5f0   : > { %10129 = vmatprep.subr.bf16.mxu0 %v16620_v61  ;;  %12389 = vrot.lane.b32.xlu0 %v16663_v45, %s16976_s19  ;;  %v16651_v9 = vld [vmem:[%s21099_s5 + $0x2c0] ss:$8 sps:$4 sm:$0xff]   ;;  %v16656_v61 = vld [vmem:[%s21099_s5 + $0x2d4] ss:$8 sps:$4 sm:$0xff]  }
 0x5f1   : > { %v16678_v45 = vld [vmem:[%s21101_s7 + $0x38] sm:$0xff]  }
 0x5f3   : > { %10130 = vmatpush1.bf16.msra.mxu0 %v16618_v31  ;;  %v16675_v31 = vld [vmem:[%s21101_s7 + $0x70] sm:$0xff]  }
 0x5f4   : > { %10131 = vmatprep.subr.bf16.mxu0 %v16623_v27  ;;  %12373 = vrot.lane.b32.xlu0 %v16665_v4, %s16976_s19  ;;  %v16676_v27 = vld [vmem:[%s21101_s7 + $0x30] sm:$0xff]  }
 0x5f5   : > { %9854 = vmatmul.mubr.bf16.gmra.mrb[200].mxu0 %v19245_v7  ;;  %v16682_v4 = vld [vmem:[%s21100_s6 + $0x190] ss:$8 sps:$4 sm:$0xff]  }
 0x5f6   : > { %8770 = vmatmul.mubr.bf16.gmra.mrb[176].mxu1 %v21196_v57  ;;  %9863 = vmatprep.mubr.bf16.mxu0 %v19269_v17  ;;  %v16630_v57 = vld [vmem:[%s21099_s5 + $0x260] ss:$8 sps:$4 sm:$0xff]  }
 0x5f7   : > { %10132 = vmatpush1.bf16.msra.mxu0 %v16621_v35  ;;  %8779 = vmatprep.mubr.bf16.mxu1 %v21214_v49  ;;  %v16635_v49 = vld [vmem:[%s21099_s5 + $0x274] ss:$8 sps:$4 sm:$0xff]   ;;  %v16654_v35 = vld [vmem:[%s21099_s5 + $0x2d0] ss:$8 sps:$4 sm:$0xff]  }
 0x5f8   : > { %10133 = vmatprep.subr.bf16.mxu0 %v16629_v24  ;;  %12393 = vrot.lane.b32.xlu0 %v16667_v43, %s16976_s19  ;;  %v16659_v24 = vld [vmem:[%s21099_s5 + $0x2e4] ss:$8 sps:$4 sm:$0xff]   ;;  %v16700_v43 = vld [vmem:[%s21100_s6 + $0x1f0] ss:$8 sps:$4 sm:$0xff]  }
 0x5fb   : > { %10134 = vmatpush1.bf16.msra.mxu0 %v16627_v14  ;;  %v16657_v14 = vld [vmem:[%s21099_s5 + $0x2e0] ss:$8 sps:$4 sm:$0xff]  }
 0x5fc   : > { %10135 = vmatprep.subr.bf16.mxu0 %v16632_v26  ;;  %12395 = vrot.lane.b32.xlu0 %v16669_v18, %s16976_s19  ;;  %v16662_v26 = vld [vmem:[%s21099_s5 + $0x2f4] ss:$8 sps:$4 sm:$0xff]   ;;  %v16712_v18 = vld [vmem:[%s21100_s6 + $0x230] ss:$8 sps:$4 sm:$0xff]  }
 0x5fd   : > { %9864 = vmatmul.mubr.bf16.gmra.mrb[204].mxu0 %v19267_v23 }
 0x5fe   : > { %8780 = vmatmul.mubr.bf16.gmra.mrb[180].mxu1 %v21199_v29  ;;  %9873 = vmatprep.mubr.bf16.mxu0 %v19357_v11  ;;  %v16638_v29 = vld [vmem:[%s21099_s5 + $0x284] ss:$8 sps:$4 sm:$0xff]  }
 0x5ff   : > { %10136 = vmatpush1.bf16.msra.mxu0 %v16630_v57  ;;  %8789 = vmatprep.mubr.bf16.mxu1 %v18585_v36  ;;  %v16636_v36 = vld [vmem:[%s21099_s5 + $0x280] ss:$8 sps:$4 sm:$0xff]   ;;  %v16660_v57 = vld [vmem:[%s21099_s5 + $0x2f0] ss:$8 sps:$4 sm:$0xff]  }
 0x600   : > { %10137 = vmatprep.subr.bf16.mxu0 %v16635_v49  ;;  %12397 = vrot.lane.b32.xlu0 %v16671_v16, %s16976_s19  ;;  %v16681_v49 = vld [vmem:[%s21100_s6 + $0x184] ss:$8 sps:$4 sm:$0xff]   ;;  %v21235_v16 = vld [vmem:[#allocation33_spill] sm:$0xff] }
 0x603   : > { %10138 = vmatpush1.bf16.msra.mxu0 %v16633_v39  ;;  %v16687_v39 = vld [vmem:[%s21100_s6 + $0x1a4] ss:$8 sps:$4 sm:$0xff]  }
 0x604   : > { %10139 = vmatprep.subr.bf16.mxu0 %v16638_v29  ;;  %12399 = vrot.lane.b32.xlu0 %v16673_v37, %s16976_s19  ;;  %v16688_v29 = vld [vmem:[%s21100_s6 + $0x1b0] ss:$8 sps:$4 sm:$0xff]   ;;  %v21236_v37 = vld [vmem:[#allocation38_spill] sm:$0xff] }
 0x605   : > { %9874 = vmatmul.mubr.bf16.gmra.mrb[208].mxu0 %v19355_v3 }
 0x606   : > { %8790 = vmatmul.mubr.bf16.gmra.mrb[184].mxu1 %v18590_v30  ;;  %9883 = vmatprep.mubr.bf16.mxu0 %v19391_v19  ;;  %v16647_v30 = vld [vmem:[%s21099_s5 + $0x2a4] ss:$8 sps:$4 sm:$0xff]  }
 0x607   : > { %10140 = vmatpush1.bf16.msra.mxu0 %v16636_v36  ;;  %8799 = vmatprep.mubr.bf16.mxu1 %v18629_v63  ;;  %v16670_v63 = vld [vmem:[%s21101_s7 + $0x18] sm:$0xff]  }
 0x608   : > { %10141 = vmatprep.subr.bf16.mxu0 %v16644_v13  ;;  %12379 = vrot.lane.b32.xlu1 %v16670_v63, %s16976_s19  ;;  %v16694_v36 = vld [vmem:[%s21100_s6 + $0x1d0] ss:$8 sps:$4 sm:$0xff]   ;;  %v16699_v13 = vld [vmem:[%s21100_s6 + $0x1e4] ss:$8 sps:$4 sm:$0xff]  }
 0x609   : > { %12401 = vrot.lane.b32.xlu0 %v16675_v31, %s16976_s19  ;;  %v16717_v63 = vld [vmem:[%s21100_s6 + $0x244] ss:$8 sps:$4 sm:$0xff]  }
 0x60a   : > { %v21237_v31 = vld [vmem:[#allocation42_spill] sm:$0xff] }
 0x60b   : > { %10142 = vmatpush1.bf16.msra.mxu0 %v16642_v8  ;;  %v16706_v8 = vld [vmem:[%s21100_s6 + $0x210] ss:$8 sps:$4 sm:$0xff]  }
 0x60c   : > { %10143 = vmatprep.subr.bf16.mxu0 %v16647_v30  ;;  %12381 = vrot.lane.b32.xlu1 %v16672_v28, %s16976_s19  ;;  %v16711_v30 = vld [vmem:[%s21100_s6 + $0x224] ss:$8 sps:$4 sm:$0xff]  }
 0x60d   : > { %9884 = vmatmul.mubr.bf16.gmra.mrb[212].mxu0 %v19389_v6 }
 0x60e   : > { %8800 = vmatmul.mubr.bf16.gmra.mrb[188].mxu1 %v18631_v34  ;;  %9893 = vmatprep.mubr.bf16.mxu0 %v19440_v40  ;;  %v16653_v34 = vld [vmem:[%s21099_s5 + $0x2c4] ss:$8 sps:$4 sm:$0xff]  }
 0x60f   : > { %10144 = vmatpush1.bf16.msra.mxu0 %v16645_v12  ;;  %8842 = vmatprep.mubr.bf16.mxu1 %v21190_v51  ;;  %v16718_v12 = vld [vmem:[%s21100_s6 + $0x250] ss:$8 sps:$4 sm:$0xff]  }
 0x610   : > { %10145 = vmatprep.subr.bf16.mxu0 %v16650_v60  ;;  %12383 = vrot.lane.b32.xlu1 %v16674_v32, %s16976_s19  ;;  %v16721_v60 = vld [vmem:[%s21100_s6 + $0x260] ss:$8 sps:$4 sm:$0xff]  }
 0x613   : > { %10146 = vmatpush1.bf16.msra.mxu0 %v16648_v15 }
 0x614   : > { %10147 = vmatprep.subr.bf16.mxu0 %v16653_v34  ;;  %12385 = vrot.lane.b32.xlu1 %v16676_v27, %s16976_s19 }
 0x615   : > { %9894 = vmatmul.mubr.bf16.gmra.mrb[216].mxu0 %v19438_v25 }
 0x616   : > { %8843 = vmatmul.mubr.bf16.vlgmr.msra.gmra.mrb[128].mxu1 %v21215_v20  ;;  %9903 = vmatprep.mubr.bf16.mxu0 %v19450_v62  ;;  %v16677_v20 = vld [vmem:[%s21101_s7 + $0x78] sm:$0xff]  }
 0x617   : > { %10148 = vmatpush1.bf16.msra.mxu0 %v16651_v9  ;;  %8852 = vmatprep.mubr.bf16.mxu1 %v21190_v51 }
 0x618   : > { %10149 = vmatprep.subr.bf16.mxu0 %v16656_v61  ;;  %12403 = vrot.lane.b32.xlu0 %v16677_v20, %s16976_s19 }
 0x619   : > { %12387 = vrot.lane.b32.xlu1 %v16678_v45, %s16976_s19  ;;  %v21238_v45 = vld [vmem:[#allocation44_spill] sm:$0xff] }
 0x61b   : > { %10150 = vmatpush1.bf16.msra.mxu0 %v16654_v35 }
 0x61c   : > { %10151 = vmatprep.subr.bf16.mxu0 %v16659_v24 }
 0x61d   : > { %9904 = vmatmul.mubr.bf16.gmra.mrb[220].mxu0 %v19448_v56 }
 0x61e   : > { %8853 = vmatmul.mubr.bf16.gmra.mrb[132].mxu1 %v21216_v54  ;;  %10155 = vmatprep.mubr.bf16.mxu0 %v19247_v50  ;;  %v16684_v54 = vld [vmem:[%s21100_s6 + $0x194] ss:$8 sps:$4 sm:$0xff]  }
 0x61f   : > { %10152 = vmatpush1.bf16.msra.mxu0 %v16657_v14  ;;  %8862 = vmatprep.mubr.bf16.mxu1 %v21190_v51 }
 0x620   : > { %10153 = vmatprep.subr.bf16.mxu0 %v16662_v26 }
 0x623   : > { %10154 = vmatpush1.bf16.msra.mxu0 %v16660_v57 }
 0x624   : > { %10761 = vmatprep.subr.bf16.mxu0 %v16681_v49 }
 0x626   : > { %10156 = vmatmul.mubr.bf16.vlgmr.msra.gmra.mrb[192].mxu0 %v19245_v7  ;;  %8863 = vmatmul.mubr.bf16.gmra.mrb[136].mxu1 %v21217_v22  ;;  %v16685_v7 = vld [vmem:[%s21100_s6 + $0x1a0] ss:$8 sps:$4 sm:$0xff]   ;;  %v16690_v22 = vld [vmem:[%s21100_s6 + $0x1b4] ss:$8 sps:$4 sm:$0xff]  }
 0x627   : > { %10165 = vmatprep.mubr.bf16.mxu0 %v19269_v17  ;;  %8872 = vmatprep.mubr.bf16.mxu1 %v21190_v51 }
 0x628   : > { %10762 = vmatpush1.bf16.msra.mxu0 %v16679_v5  ;;  %v21239_v5 = vld [vmem:[#allocation45_spill] sm:$0xff] }
 0x629   : > { %10763 = vmatprep.subr.bf16.mxu0 %v16684_v54 }
 0x62c   : > { %10764 = vmatpush1.bf16.msra.mxu0 %v16682_v4 }
 0x62d   : > { %10765 = vmatprep.subr.bf16.mxu0 %v16687_v39  ;;  %v16729_v39 = vld [vmem:[%s21100_s6 + $0x284] ss:$8 sps:$4 sm:$0xff]  }
 0x62e   : > { %10166 = vmatmul.mubr.bf16.gmra.mrb[196].mxu0 %v19267_v23  ;;  %8873 = vmatmul.mubr.bf16.gmra.mrb[140].mxu1 %v21218_v38  ;;  %v16691_v23 = vld [vmem:[%s21100_s6 + $0x1c0] ss:$8 sps:$4 sm:$0xff]   ;;  %v16696_v38 = vld [vmem:[%s21100_s6 + $0x1d4] ss:$8 sps:$4 sm:$0xff]  }
 0x62f   : > { %10175 = vmatprep.mubr.bf16.mxu0 %v19357_v11  ;;  %8882 = vmatprep.mubr.bf16.mxu1 %v21190_v51 }
 0x630   : > { %10766 = vmatpush1.bf16.msra.mxu0 %v16685_v7  ;;  %v9067_v7 = vld [vmem:[%s21103_s9] sm:$0x3] }
 0x631   : > { %10767 = vmatprep.subr.bf16.mxu0 %v16690_v22  ;;  %v21240_v22 = vld [vmem:[#allocation6_spill] sm:$0xff] }
 0x634   : > { %10768 = vmatpush1.bf16.msra.mxu0 %v16688_v29  ;;  %v19823_v29 = vrot.slane %v9067_v7, %v21240_v22 }
 0x635   : > { %10769 = vmatprep.subr.bf16.mxu0 %v16693_v55  ;;  %v21241_v55 = vld [vmem:[#allocation7_spill] sm:$0xff] }
 0x636   : > { %10176 = vmatmul.mubr.bf16.gmra.mrb[200].mxu0 %v19355_v3  ;;  %8883 = vmatmul.mubr.bf16.gmra.mrb[144].mxu1 %v21219_v42  ;;  %v16697_v3 = vld [vmem:[%s21100_s6 + $0x1e0] ss:$8 sps:$4 sm:$0xff]   ;;  %v16702_v42 = vld [vmem:[%s21100_s6 + $0x1f4] ss:$8 sps:$4 sm:$0xff]  }
 0x637   : > { %10185 = vmatprep.mubr.bf16.mxu0 %v19391_v19  ;;  %8892 = vmatprep.mubr.bf16.mxu1 %v21190_v51 }
 0x638   : > { %10770 = vmatpush1.bf16.msra.mxu0 %v16691_v23  ;;  %v19826_v23 = vrot.slane %v9067_v7, %v21241_v55 }
 0x639   : > { %10771 = vmatprep.subr.bf16.mxu0 %v16696_v38 }
 0x63c   : > { %10772 = vmatpush1.bf16.msra.mxu0 %v16694_v36 }
 0x63d   : > { %10773 = vmatprep.subr.bf16.mxu0 %v16699_v13 }
 0x63e   : > { %10186 = vmatmul.mubr.bf16.gmra.mrb[204].mxu0 %v19389_v6  ;;  %8893 = vmatmul.mubr.bf16.gmra.mrb[148].mxu1 %v21220_v46  ;;  %v16703_v6 = vld [vmem:[%s21100_s6 + $0x200] ss:$8 sps:$4 sm:$0xff]   ;;  %v16708_v46 = vld [vmem:[%s21100_s6 + $0x214] ss:$8 sps:$4 sm:$0xff]  }
 0x63f   : > { %10195 = vmatprep.mubr.bf16.mxu0 %v19440_v40  ;;  %8902 = vmatprep.mubr.bf16.mxu1 %v21190_v51 }
 0x640   : > { %10774 = vmatpush1.bf16.msra.mxu0 %v16697_v3 }
 0x641   : > { %10775 = vmatprep.subr.bf16.mxu0 %v16702_v42 }
 0x644   : > { %10776 = vmatpush1.bf16.msra.mxu0 %v16700_v43 }
 0x645   : > { %10777 = vmatprep.subr.bf16.mxu0 %v16705_v44 }
 0x646   : > { %10196 = vmatmul.mubr.bf16.gmra.mrb[208].mxu0 %v19438_v25  ;;  %8903 = vmatmul.mubr.bf16.gmra.mrb[152].mxu1 %v21221_v59  ;;  %v16709_v25 = vld [vmem:[%s21100_s6 + $0x220] ss:$8 sps:$4 sm:$0xff]   ;;  %v16714_v59 = vld [vmem:[%s21100_s6 + $0x234] ss:$8 sps:$4 sm:$0xff]  }
 0x647   : > { %10205 = vmatprep.mubr.bf16.mxu0 %v19450_v62  ;;  %8912 = vmatprep.mubr.bf16.mxu1 %v21190_v51 }
 0x648   : > { %10778 = vmatpush1.bf16.msra.mxu0 %v16703_v6 }
 0x649   : > { %10779 = vmatprep.subr.bf16.mxu0 %v16708_v46 }
 0x64c   : > { %10780 = vmatpush1.bf16.msra.mxu0 %v16706_v8 }
 0x64d   : > { %10781 = vmatprep.subr.bf16.mxu0 %v16711_v30 }
 0x64e   : > { %10206 = vmatmul.mubr.bf16.gmra.mrb[212].mxu0 %v19448_v56  ;;  %8913 = vmatmul.mubr.bf16.gmra.mrb[156].mxu1 %v21222_v2  ;;  %v16715_v56 = vld [vmem:[%s21100_s6 + $0x240] ss:$8 sps:$4 sm:$0xff]   ;;  %v16720_v2 = vld [vmem:[%s21100_s6 + $0x254] ss:$8 sps:$4 sm:$0xff]  }
 0x64f   : > { %10215 = vmatprep.mubr.bf16.mxu0 %v19479_v53  ;;  %8922 = vmatprep.mubr.bf16.mxu1 %v21190_v51 }
 0x650   : > { %10782 = vmatpush1.bf16.msra.mxu0 %v16709_v25 }
 0x651   : > { %10783 = vmatprep.subr.bf16.mxu0 %v16714_v59 }
 0x654   : > { %10784 = vmatpush1.bf16.msra.mxu0 %v16712_v18  ;;  %v16727_v18 = vld [vmem:[%s21100_s6 + $0x280] ss:$8 sps:$4 sm:$0xff]  }
 0x655   : > { %10785 = vmatprep.subr.bf16.mxu0 %v16717_v63 }
 0x656   : > { %10216 = vmatmul.mubr.bf16.gmra.mrb[216].mxu0 %v19477_v48  ;;  %8923 = vmatmul.mubr.bf16.gmra.mrb[160].mxu1 %v21223_v10  ;;  %v21234_v48 = vld [vmem:[#allocation29_spill] sm:$0xff]  ;;  %v16723_v10 = vld [vmem:[%s21100_s6 + $0x264] ss:$8 sps:$4 sm:$0xff]   ;;  %v12392_v15 = vpop.permute.xlu1 %12391 }
 0x657   : > { %10225 = vmatprep.mubr.bf16.mxu0 %v19503_v47  ;;  %8932 = vmatprep.mubr.bf16.mxu1 %v21190_v51 }
 0x658   : > { %10786 = vmatpush1.bf16.msra.mxu0 %v16715_v56 }
 0x659   : > { %10787 = vmatprep.subr.bf16.mxu0 %v16720_v2  ;;  %v16732_v2 = vld [vmem:[%s21100_s6 + $0x294] ss:$8 sps:$4 sm:$0xff]  }
 0x65a   : > { %v12376_v32 = vpop.permute.xlu1 %12375 }
 0x65c   : > { %10788 = vmatpush1.bf16.msra.mxu0 %v16718_v12 }
 0x65d   : > { %10789 = vmatprep.subr.bf16.mxu0 %v16723_v10 }
 0x65e   : > { %10226 = vmatmul.mubr.bf16.gmra.mrb[220].mxu0 %v19501_v33  ;;  %8933 = vmatmul.mubr.bf16.gmra.mrb[164].mxu1 %v21226_v1  ;;  %v16726_v1 = vld [vmem:[%s21100_s6 + $0x274] ss:$8 sps:$4 sm:$0xff]   ;;  %v16724_v33 = vld [vmem:[%s21100_s6 + $0x270] ss:$8 sps:$4 sm:$0xff]   ;;  %v12378_v61 = vpop.permute.xlu1 %12377 }
 0x65f   : > { %8942 = vmatprep.mubr.bf16.mxu1 %v21190_v51 }
 0x660   : > { %10790 = vmatpush1.bf16.msra.mxu0 %v16721_v60 }
 0x661   : > { %10791 = vmatprep.subr.bf16.mxu0 %v16726_v1  ;;  %v10268_v1 = vld [vmem:[%s21104_s10] sm:$0x3] }
 0x662   : > { %v12390_v28 = vpop.permute.xlu0 %12389 }
 0x663   : > { %14586 = vmatprep.subr.bf16.mxu1 %v12390_v28 }
 0x664   : > { %10792 = vmatpush1.bf16.msra.mxu0 %v16724_v33 }
 0x665   : > { %10874 = vmatprep.subr.bf16.mxu0 %v16729_v39 }
 0x666   : > { %8943 = vmatmul.mubr.bf16.gmra.mrb[168].mxu1 %v21234_v48  ;;  %v12374_v34 = vpop.permute.xlu0 %12373 }
 0x667   : > { %8952 = vmatprep.mubr.bf16.mxu1 %v21190_v51  ;;  %14587 = vmatpush3.bf16.msra.mxu1 %v12374_v34 }
 0x668   : > { %14588 = vmatprep.subr.bf16.mxu1 %v12392_v15  ;;  %v16730_v15 = vld [vmem:[%s21100_s6 + $0x290] ss:$8 sps:$4 sm:$0xff]  }
 0x66a   : > { %v12394_v9 = vpop.permute.xlu0 %12393 }
 0x66b   : > { %14589 = vmatpush3.bf16.msra.mxu1 %v12376_v32 }
 0x66c   : > { %14590 = vmatprep.subr.bf16.mxu1 %v12394_v9 }
 0x66e   : > { %8953 = vmatmul.mubr.bf16.gmra.mrb[172].mxu1 %v21235_v16  ;;  %v12396_v27 = vpop.permute.xlu0 %12395  ;;  %v21242_v16 = vld [vmem:[#allocation32_spill] sm:$0xff] }
 0x66f   : > { %8962 = vmatprep.mubr.bf16.mxu1 %v21190_v51  ;;  %14591 = vmatpush3.bf16.msra.mxu1 %v12378_v61  ;;  %v19855_v61 = vrot.slane %v10268_v1, %v21240_v22 }
 0x670   : > { %14592 = vmatprep.subr.bf16.mxu1 %v12396_v27 }
 0x672   : > { %v12398_v24 = vpop.permute.xlu0 %12397 }
 0x676   : > { %8963 = vmatmul.mubr.bf16.gmra.mrb[176].mxu1 %v21236_v37  ;;  %v12400_v14 = vpop.permute.xlu0 %12399  ;;  %v16735_v37 = vld [vmem:[%s21100_s6 + $0x2a4] ss:$8 sps:$4 sm:$0xff]  }
 0x677   : > { %8972 = vmatprep.mubr.bf16.mxu1 %v21190_v51 }
 0x67a   : > { %v12380_v35 = vpop.permute.xlu1 %12379 }
 0x67b   : > { %14593 = vmatpush3.bf16.msra.mxu1 %v12380_v35  ;;  %v12402_v57 = vpop.permute.xlu0 %12401  ;;  %v19858_v35 = vrot.slane %v10268_v1, %v21241_v55  ;;  %v16739_v1 = vld [vmem:[%s21100_s6 + $0x2c0] ss:$8 sps:$4 sm:$0xff]  }
 0x67c   : > { %14594 = vmatprep.subr.bf16.mxu1 %v12398_v24 }
 0x67e   : > { %8973 = vmatmul.mubr.bf16.gmra.mrb[180].mxu1 %v21237_v31  ;;  %v12382_v20 = vpop.permute.xlu1 %12381 }
 0x67f   : > { %8982 = vmatprep.mubr.bf16.mxu1 %v21190_v51  ;;  %14595 = vmatpush3.bf16.msra.mxu1 %v12382_v20  ;;  %v16733_v20 = vld [vmem:[%s21100_s6 + $0x2a0] ss:$8 sps:$4 sm:$0xff]  }
 0x680   : > { %14596 = vmatprep.subr.bf16.mxu1 %v12400_v14 }
 0x682   : > { %v12384_v26 = vpop.permute.xlu1 %12383 }
 0x683   : > { %14597 = vmatpush3.bf16.msra.mxu1 %v12384_v26 }
 0x684   : > { %14598 = vmatprep.subr.bf16.mxu1 %v12402_v57  ;;  %v16738_v57 = vld [vmem:[%s21100_s6 + $0x2b4] ss:$8 sps:$4 sm:$0xff]  }
 0x686   : > { %8983 = vmatmul.mubr.bf16.gmra.mrb[184].mxu1 %v21238_v45  ;;  %v12386_v49 = vpop.permute.xlu1 %12385 }
 0x687   : > { %8992 = vmatprep.mubr.bf16.mxu1 %v21190_v51  ;;  %14599 = vmatpush3.bf16.msra.mxu1 %v12386_v49 }
 0x68a   : > { %v12404_v54 = vpop.permute.xlu0 %12403 }
 0x68b   : > { %v12388_v4 = vpop.permute.xlu1 %12387  ;;  %14600 = vmatprep.subr.bf16.mxu1 %v12404_v54 }
 0x68c   : > { %14601 = vmatpush3.bf16.msra.mxu1 %v12388_v4 }
 0x68e   : > { %8993 = vmatmul.mubr.bf16.gmra.mrb[188].mxu1 %v21239_v5 }
 0x6e9   : > { %v8844_v38 = vpop.f32.mrb[128].mxu1 }
 0x6ea   : > { %v9079_v36 = vadd.f32 %v19823_v29, %v8844_v38  ;;  %v8846_v13 = vpop.f32.mrb[129].mxu1 }
 0x6eb   : > { %v9080_v3 = vadd.f32 %v19826_v23, %v8846_v13  ;;  %v8848_v42 = vpop.f32.mrb[130].mxu1  ;;  %v21243_v13 = vld [vmem:[#allocation34_spill] sm:$0xff] }
 0x6ec   : > { %v9081_v43 = vadd.f32 %v19823_v29, %v8848_v42  ;;  %v8850_v44 = vpop.f32.mrb[131].mxu1  ;;  %v9143_v46 = vmax.f32 %v9079_v36, 0.0 }
 0x6ed   : > { %v9082_v6 = vadd.f32 %v19826_v23, %v8850_v44  ;;  %v9144_v30 = vmax.f32 %v9080_v3, 0.0 }
 0x6ee   : > { %v9145_v8 = vmax.f32 %v9081_v43, 0.0 }
 0x6ef   : > { %v9146_v25 = vmax.f32 %v9082_v6, 0.0  ;;  %v16736_v6 = vld [vmem:[%s21100_s6 + $0x2b0] ss:$8 sps:$4 sm:$0xff]  }
 0x6f0   : > { %v9207_v59 = vpack.c.bf16 %v9145_v8, %v9143_v46 }
 0x6f1   : > { %v19835_v63 = vpack.c.bf16 %v9146_v25, %v9144_v30  ;;  %v8854_v56 = vpop.f32.mrb[132].mxu1  ;;  %v16741_v30 = vld [vmem:[%s21100_s6 + $0x2c4] ss:$8 sps:$4 sm:$0xff]  }
 0x6f2   : > { %v9083_v12 = vadd.f32 %v19823_v29, %v8854_v56  ;;  %v8856_v48 = vpop.f32.mrb[133].mxu1  ;;  %10793 = vmatprep.mubr.bf16.mxu0 %v9207_v59 }
 0x6f3   : > { %v9084_v10 = vadd.f32 %v19826_v23, %v8856_v48  ;;  %v8858_v60 = vpop.f32.mrb[134].mxu1  ;;  %10794 = vmatmul.mubr.bf16.vlgmr.msra.gmra.mrb[224].mxu0 %v21242_v16 }
 0x6f4   : > { %v9085_v33 = vadd.f32 %v19823_v29, %v8858_v60  ;;  %v8860_v28 = vpop.f32.mrb[135].mxu1  ;;  %10875 = vmatpush1.bf16.msra.mxu0 %v16727_v18  ;;  %v9147_v32 = vmax.f32 %v9083_v12, 0.0 }
 0x6f5   : > { %v9086_v34 = vadd.f32 %v19826_v23, %v8860_v28  ;;  %10876 = vmatprep.subr.bf16.mxu0 %v16732_v2  ;;  %v9148_v31 = vmax.f32 %v9084_v10, 0.0 }
 0x6f6   : > { %v9149_v9 = vmax.f32 %v9085_v33, 0.0 }
 0x6f7   : > { %v9150_v27 = vmax.f32 %v9086_v34, 0.0 }
 0x6f8   : > { %v9209_v24 = vpack.c.bf16 %v9149_v9, %v9147_v32  ;;  %10877 = vmatpush1.bf16.msra.mxu0 %v16730_v15 }
 0x6f9   : > { %v19863_v45 = vpack.c.bf16 %v9150_v27, %v9148_v31  ;;  %v10157_v14 = vpop.f32.mrb[192].mxu0  ;;  %v8864_v26 = vpop.f32.mrb[136].mxu1  ;;  %10878 = vmatprep.subr.bf16.mxu0 %v16735_v37  ;;  %v16744_v37 = vld [vmem:[%s21100_s6 + $0x2d4] ss:$8 sps:$4 sm:$0xff]  }
 0x6fa   : > { %v10280_v49 = vadd.f32 %v19855_v61, %v10157_v14  ;;  %v9087_v5 = vadd.f32 %v19823_v29, %v8864_v26  ;;  %v10159_v54 = vpop.f32.mrb[193].mxu0  ;;  %v8866_v4 = vpop.f32.mrb[137].mxu1  ;;  %10803 = vmatprep.mubr.bf16.mxu0 %v9209_v24 }
 0x6fb   : > { %v10281_v39 = vadd.f32 %v19858_v35, %v10159_v54  ;;  %v9088_v7 = vadd.f32 %v19826_v23, %v8866_v4  ;;  %v10161_v38 = vpop.f32.mrb[194].mxu0  ;;  %v8868_v36 = vpop.f32.mrb[138].mxu1  ;;  %10804 = vmatmul.mubr.bf16.gmra.mrb[228].mxu0 %v21243_v13  ;;  %v16742_v4 = vld [vmem:[%s21100_s6 + $0x2d0] ss:$8 sps:$4 sm:$0xff]  }
 0x6fc   : > { %v10282_v3 = vadd.f32 %v19855_v61, %v10161_v38  ;;  %v9089_v42 = vadd.f32 %v19823_v29, %v8868_v36  ;;  %v10163_v43 = vpop.f32.mrb[195].mxu0  ;;  %v8870_v44 = vpop.f32.mrb[139].mxu1  ;;  %10879 = vmatpush1.bf16.msra.mxu0 %v16733_v20  ;;  %v10312_v25 = vmax.f32 %v10280_v49, 0.0  ;;  %v9151_v59 = vmax.f32 %v9087_v5, 0.0  ;;  %v16747_v38 = vld [vmem:[%s21100_s6 + $0x2e4] ss:$8 sps:$4 sm:$0xff]  }
 0x6fd   : > { %v10283_v46 = vadd.f32 %v19858_v35, %v10163_v43  ;;  %v9090_v8 = vadd.f32 %v19826_v23, %v8870_v44  ;;  %10880 = vmatprep.subr.bf16.mxu0 %v16738_v57  ;;  %v10313_v2 = vmax.f32 %v10281_v39, 0.0  ;;  %v9152_v12 = vmax.f32 %v9088_v7, 0.0 }
 0x6fe   : > { %v10314_v18 = vmax.f32 %v10282_v3, 0.0  ;;  %v9153_v56 = vmax.f32 %v9089_v42, 0.0 }
 0x6ff   : > { %v10315_v48 = vmax.f32 %v10283_v46, 0.0  ;;  %v9154_v10 = vmax.f32 %v9090_v8, 0.0 }
 0x700   : > { %v19883_v60 = vpack.c.bf16 %v10314_v18, %v10312_v25  ;;  %v19885_v16 = vpack.c.bf16 %v9153_v56, %v9151_v59  ;;  %10881 = vmatpush1.bf16.msra.mxu0 %v16736_v6  ;;  %v16745_v25 = vld [vmem:[%s21100_s6 + $0x2e0] ss:$8 sps:$4 sm:$0xff]  }
 0x701   : > { %v19890_v33 = vpack.c.bf16 %v10315_v48, %v10313_v2  ;;  %v19892_v28 = vpack.c.bf16 %v9154_v10, %v9152_v12  ;;  %v10167_v15 = vpop.f32.mrb[196].mxu0  ;;  %v8874_v34 = vpop.f32.mrb[140].mxu1  ;;  %10882 = vmatprep.subr.bf16.mxu0 %v16741_v30  ;;  %v16750_v12 = vld [vmem:[%s21100_s6 + $0x2f4] ss:$8 sps:$4 sm:$0xff]  }
 0x702   : > { %21244 = vst [vmem:[#allocation37_spill] sm:$0xff] %v19883_v60  ;;  %v10284_v32 = vadd.f32 %v19855_v61, %v10167_v15  ;;  %v9091_v9 = vadd.f32 %v19823_v29, %v8874_v34  ;;  %v10169_v31 = vpop.f32.mrb[197].mxu0  ;;  %v8876_v27 = vpop.f32.mrb[141].mxu1 }
 0x703   : > { %21245 = vst [vmem:[#allocation43_spill] sm:$0xff] %v19890_v33  ;;  %v10285_v24 = vadd.f32 %v19858_v35, %v10169_v31  ;;  %v9092_v20 = vadd.f32 %v19826_v23, %v8876_v27  ;;  %v10171_v14 = vpop.f32.mrb[198].mxu0  ;;  %v8878_v26 = vpop.f32.mrb[142].mxu1 }
 0x704   : > { %v10286_v57 = vadd.f32 %v19855_v61, %v10171_v14  ;;  %v9093_v49 = vadd.f32 %v19823_v29, %v8878_v26  ;;  %v10173_v5 = vpop.f32.mrb[199].mxu0  ;;  %v8880_v54 = vpop.f32.mrb[143].mxu1  ;;  %10883 = vmatpush1.bf16.msra.mxu0 %v16739_v1  ;;  %v10316_v36 = vmax.f32 %v10284_v32, 0.0  ;;  %v9155_v13 = vmax.f32 %v9091_v9, 0.0  ;;  %v16748_v14 = vld [vmem:[%s21100_s6 + $0x2f0] ss:$8 sps:$4 sm:$0xff]  }
 0x705   : > { %v10287_v39 = vadd.f32 %v19858_v35, %v10173_v5  ;;  %v9094_v7 = vadd.f32 %v19826_v23, %v8880_v54  ;;  %10884 = vmatprep.subr.bf16.mxu0 %v16744_v37  ;;  %v10317_v43 = vmax.f32 %v10285_v24, 0.0  ;;  %v9156_v44 = vmax.f32 %v9092_v20, 0.0 }
 0x706   : > { %v10318_v3 = vmax.f32 %v10286_v57, 0.0  ;;  %v9157_v42 = vmax.f32 %v9093_v49, 0.0  ;;  %v16753_v49 = vld [vmem:[%s21100_s6 + $0x4] ss:$8 sps:$4 sm:$0xff]  }
 0x707   : > { %v10319_v6 = vmax.f32 %v10287_v39, 0.0  ;;  %v9158_v46 = vmax.f32 %v9094_v7, 0.0 }
 0x708   : > { %v19911_v8 = vpack.c.bf16 %v10318_v3, %v10316_v36  ;;  %v19913_v30 = vpack.c.bf16 %v9157_v42, %v9155_v13  ;;  %10885 = vmatpush1.bf16.msra.mxu0 %v16742_v4 }
 0x709   : > { %v19918_v59 = vpack.c.bf16 %v10319_v6, %v10317_v43  ;;  %v19920_v18 = vpack.c.bf16 %v9158_v46, %v9156_v44  ;;  %v10177_v56 = vpop.f32.mrb[200].mxu0  ;;  %v8884_v2 = vpop.f32.mrb[144].mxu1  ;;  %10886 = vmatprep.subr.bf16.mxu0 %v16747_v38  ;;  %v19942_v43 = vld [vmem:[%s21101_s7 + $0xc0] sm:$0xff]  }
 0x70a   : > { %21246 = vst [vmem:[#allocation35_spill] sm:$0xff] %v19911_v8  ;;  %v10288_v48 = vadd.f32 %v19855_v61, %v10177_v56  ;;  %v9095_v10 = vadd.f32 %v19823_v29, %v8884_v2  ;;  %v10179_v1 = vpop.f32.mrb[201].mxu0  ;;  %v8886_v15 = vpop.f32.mrb[145].mxu1  ;;  %12421 = vrot.lane.b32.xlu0 %v19942_v43, %s16976_s19 }
 0x70b   : > { %21247 = vst [vmem:[#allocation41_spill] sm:$0xff] %v19918_v59  ;;  %v10289_v34 = vadd.f32 %v19858_v35, %v10179_v1  ;;  %v9096_v37 = vadd.f32 %v19826_v23, %v8886_v15  ;;  %v10181_v32 = vpop.f32.mrb[202].mxu0  ;;  %v8888_v9 = vpop.f32.mrb[146].mxu1 }
 0x70c   : > { %v10290_v31 = vadd.f32 %v19855_v61, %v10181_v32  ;;  %v9097_v27 = vadd.f32 %v19823_v29, %v8888_v9  ;;  %v10183_v24 = vpop.f32.mrb[203].mxu0  ;;  %v8890_v20 = vpop.f32.mrb[147].mxu1  ;;  %10887 = vmatpush1.bf16.msra.mxu0 %v16745_v25  ;;  %v10320_v5 = vmax.f32 %v10288_v48, 0.0  ;;  %v9159_v54 = vmax.f32 %v9095_v10, 0.0 }
 0x70d   : > { %v10291_v26 = vadd.f32 %v19858_v35, %v10183_v24  ;;  %v9098_v57 = vadd.f32 %v19826_v23, %v8890_v20  ;;  %10888 = vmatprep.subr.bf16.mxu0 %v16750_v12  ;;  %v10321_v7 = vmax.f32 %v10289_v34, 0.0  ;;  %v9160_v38 = vmax.f32 %v9096_v37, 0.0  ;;  %v21248_v37 = vld [vmem:[#allocation30_spill] sm:$0xff]  ;;  %v19958_v24 = vld [vmem:[%s21101_s7 + $0xc8] sm:$0xff]  }
 0x70e   : > { %v10322_v4 = vmax.f32 %v10290_v31, 0.0  ;;  %v9161_v39 = vmax.f32 %v9097_v27, 0.0  ;;  %12423 = vrot.lane.b32.xlu0 %v19958_v24, %s16976_s19 }
 0x70f   : > { %v10323_v36 = vmax.f32 %v10291_v26, 0.0  ;;  %v9162_v13 = vmax.f32 %v9098_v57, 0.0 }
 0x710   : > { %v10348_v3 = vpack.c.bf16 %v10322_v4, %v10320_v5  ;;  %v9215_v42 = vpack.c.bf16 %v9161_v39, %v9159_v54  ;;  %10889 = vmatpush1.bf16.msra.mxu0 %v16748_v14 }
 0x711   : > { %v10349_v44 = vpack.c.bf16 %v10323_v36, %v10321_v7  ;;  %v19944_v6 = vpack.c.bf16 %v9162_v13, %v9160_v38  ;;  %v10187_v46 = vpop.f32.mrb[204].mxu0  ;;  %v8894_v25 = vpop.f32.mrb[148].mxu1  ;;  %11227 = vmatprep.subr.bf16.mxu0 %v16753_v49  ;;  %v19967_v13 = vld [vmem:[%s21101_s7 + $0xd0] sm:$0xff]  }
 0x712   : > { %v10292_v56 = vadd.f32 %v19855_v61, %v10187_v46  ;;  %v9099_v2 = vadd.f32 %v19823_v29, %v8894_v25  ;;  %v10189_v12 = vpop.f32.mrb[205].mxu0  ;;  %v8896_v48 = vpop.f32.mrb[149].mxu1  ;;  %10813 = vmatprep.mubr.bf16.mxu0 %v9215_v42  ;;  %12425 = vrot.lane.b32.xlu0 %v19967_v13, %s16976_s19 }
 0x713   : > { %v10293_v10 = vadd.f32 %v19858_v35, %v10189_v12  ;;  %v9100_v1 = vadd.f32 %v19826_v23, %v8896_v48  ;;  %v10191_v15 = vpop.f32.mrb[206].mxu0  ;;  %12501 = vmatprep.mubr.bf16.mxu1 %v10349_v44  ;;  %v8898_v34 = vpop.f32.mrb[150].mxu1  ;;  %10814 = vmatmul.mubr.bf16.gmra.mrb[232].mxu0 %v21248_v37 }
 0x714   : > { %v10294_v32 = vadd.f32 %v19855_v61, %v10191_v15  ;;  %v9101_v9 = vadd.f32 %v19823_v29, %v8898_v34  ;;  %v10193_v31 = vpop.f32.mrb[207].mxu0  ;;  %12502 = vmatmul.mubr.bf16.vlgmr.msra.gmra.mrb[192].mxu1 %v10348_v3  ;;  %v8900_v27 = vpop.f32.mrb[151].mxu1  ;;  %v10324_v26 = vmax.f32 %v10292_v56, 0.0  ;;  %v9163_v57 = vmax.f32 %v9099_v2, 0.0 }
 0x715   : > { %v10295_v20 = vadd.f32 %v19858_v35, %v10193_v31  ;;  %v9102_v14 = vadd.f32 %v19826_v23, %v8900_v27  ;;  %v10325_v54 = vmax.f32 %v10293_v10, 0.0  ;;  %v9164_v4 = vmax.f32 %v9100_v1, 0.0  ;;  %v19983_v31 = vld [vmem:[%s21101_s7 + $0xd8] sm:$0xff]  }
 0x716   : > { %v10326_v49 = vmax.f32 %v10294_v32, 0.0  ;;  %v9165_v5 = vmax.f32 %v9101_v9, 0.0  ;;  %12427 = vrot.lane.b32.xlu0 %v19983_v31, %s16976_s19 }
 0x717   : > { %v10327_v39 = vmax.f32 %v10295_v20, 0.0  ;;  %v9166_v7 = vmax.f32 %v9102_v14, 0.0 }
 0x718   : > { %v10350_v38 = vpack.c.bf16 %v10326_v49, %v10324_v26  ;;  %v9217_v36 = vpack.c.bf16 %v9165_v5, %v9163_v57 }
 0x719   : > { %v10351_v3 = vpack.c.bf16 %v10327_v39, %v10325_v54  ;;  %v19969_v42 = vpack.c.bf16 %v9166_v7, %v9164_v4  ;;  %v10197_v44 = vpop.f32.mrb[208].mxu0  ;;  %v8904_v46 = vpop.f32.mrb[152].mxu1 }
 0x71a   : > { %v10296_v25 = vadd.f32 %v19855_v61, %v10197_v44  ;;  %v9103_v56 = vadd.f32 %v19823_v29, %v8904_v46  ;;  %v10199_v2 = vpop.f32.mrb[209].mxu0  ;;  %v8906_v12 = vpop.f32.mrb[153].mxu1  ;;  %10823 = vmatprep.mubr.bf16.mxu0 %v9217_v36 }
 0x71b   : > { %v10297_v48 = vadd.f32 %v19858_v35, %v10199_v2  ;;  %v9104_v10 = vadd.f32 %v19826_v23, %v8906_v12  ;;  %v10201_v1 = vpop.f32.mrb[210].mxu0  ;;  %12509 = vmatprep.mubr.bf16.mxu1 %v10351_v3  ;;  %v8908_v15 = vpop.f32.mrb[154].mxu1  ;;  %10824 = vmatmul.mubr.bf16.gmra.mrb[236].mxu0 %v19322_v41 }
 0x71c   : > { %v10298_v34 = vadd.f32 %v19855_v61, %v10201_v1  ;;  %v9105_v37 = vadd.f32 %v19823_v29, %v8908_v15  ;;  %v10203_v32 = vpop.f32.mrb[211].mxu0  ;;  %12510 = vmatmul.mubr.bf16.gmra.mrb[196].mxu1 %v10350_v38  ;;  %v8910_v9 = vpop.f32.mrb[155].mxu1  ;;  %v10328_v14 = vmax.f32 %v10296_v25, 0.0  ;;  %v9167_v26 = vmax.f32 %v9103_v56, 0.0  ;;  %v19996_v38 = vld [vmem:[%s21101_s7 + $0xe0] sm:$0xff]  }
 0x71d   : > { %v10299_v27 = vadd.f32 %v19858_v35, %v10203_v32  ;;  %v9106_v20 = vadd.f32 %v19826_v23, %v8910_v9  ;;  %v10329_v49 = vmax.f32 %v10297_v48, 0.0  ;;  %v9168_v5 = vmax.f32 %v9104_v10, 0.0  ;;  %12429 = vrot.lane.b32.xlu0 %v19996_v38, %s16976_s19 }
 0x71e   : > { %v10330_v57 = vmax.f32 %v10298_v34, 0.0  ;;  %v9169_v41 = vmax.f32 %v9105_v37, 0.0 }
 0x71f   : > { %v10331_v54 = vmax.f32 %v10299_v27, 0.0  ;;  %v9170_v4 = vmax.f32 %v9106_v20, 0.0  ;;  %v20013_v27 = vld [vmem:[%s21101_s7 + $0xe8] sm:$0xff]  }
 0x720   : > { %v19989_v39 = vpack.c.bf16 %v10330_v57, %v10328_v14  ;;  %v19991_v7 = vpack.c.bf16 %v9169_v41, %v9167_v26 }
 0x721   : > { %v19998_v36 = vpack.c.bf16 %v10331_v54, %v10329_v49  ;;  %v20000_v3 = vpack.c.bf16 %v9170_v4, %v9168_v5  ;;  %v10207_v44 = vpop.f32.mrb[212].mxu0  ;;  %v8914_v46 = vpop.f32.mrb[156].mxu1  ;;  %12431 = vrot.lane.b32.xlu0 %v20013_v27, %s16976_s19  ;;  %v20022_v5 = vld [vmem:[%s21101_s7 + $0xf0] sm:$0xff]  }
 0x722   : > { %21249 = vst [vmem:[#allocation39_spill] sm:$0xff] %v19989_v39  ;;  %v10300_v25 = vadd.f32 %v19855_v61, %v10207_v44  ;;  %v9107_v56 = vadd.f32 %v19823_v29, %v8914_v46  ;;  %v10209_v2 = vpop.f32.mrb[213].mxu0  ;;  %v8916_v12 = vpop.f32.mrb[157].mxu1 }
 0x723   : > { %21250 = vst [vmem:[#allocation8_spill] sm:$0xff] %v19998_v36  ;;  %v10301_v48 = vadd.f32 %v19858_v35, %v10209_v2  ;;  %v9108_v10 = vadd.f32 %v19826_v23, %v8916_v12  ;;  %v10211_v1 = vpop.f32.mrb[214].mxu0  ;;  %v8918_v15 = vpop.f32.mrb[158].mxu1 }
 0x724   : > { %v10302_v34 = vadd.f32 %v19855_v61, %v10211_v1  ;;  %v9109_v37 = vadd.f32 %v19823_v29, %v8918_v15  ;;  %v10213_v32 = vpop.f32.mrb[215].mxu0  ;;  %v8920_v9 = vpop.f32.mrb[159].mxu1  ;;  %v10332_v26 = vmax.f32 %v10300_v25, 0.0  ;;  %v9171_v57 = vmax.f32 %v9107_v56, 0.0 }
 0x725   : > { %v10303_v20 = vadd.f32 %v19858_v35, %v10213_v32  ;;  %v9110_v14 = vadd.f32 %v19826_v23, %v8920_v9  ;;  %v10333_v54 = vmax.f32 %v10301_v48, 0.0  ;;  %v9172_v4 = vmax.f32 %v9108_v10, 0.0  ;;  %12433 = vrot.lane.b32.xlu0 %v20022_v5, %s16976_s19 }
 0x726   : > { %v10334_v41 = vmax.f32 %v10302_v34, 0.0  ;;  %v9173_v49 = vmax.f32 %v9109_v37, 0.0 }
 0x727   : > { %v10335_v44 = vmax.f32 %v10303_v20, 0.0  ;;  %v9174_v46 = vmax.f32 %v9110_v14, 0.0 }
 0x728   : > { %v20024_v2 = vpack.c.bf16 %v10334_v41, %v10332_v26  ;;  %v20026_v12 = vpack.c.bf16 %v9173_v49, %v9171_v57 }
 0x729   : > { %v20028_v25 = vpack.c.bf16 %v10335_v44, %v10333_v54  ;;  %v20030_v56 = vpack.c.bf16 %v9174_v46, %v9172_v4  ;;  %v10217_v1 = vpop.f32.mrb[216].mxu0  ;;  %v8924_v15 = vpop.f32.mrb[160].mxu1  ;;  %v20043_v54 = vld [vmem:[%s21101_s7 + $0xf8] sm:$0xff]  }
 0x72a   : > { %21251 = vst [vmem:[#allocation10_spill] sm:$0xff] %v20024_v2  ;;  %v10304_v34 = vadd.f32 %v19855_v61, %v10217_v1  ;;  %v9111_v37 = vadd.f32 %v19823_v29, %v8924_v15  ;;  %v10219_v32 = vpop.f32.mrb[217].mxu0  ;;  %v8926_v9 = vpop.f32.mrb[161].mxu1  ;;  %12435 = vrot.lane.b32.xlu0 %v20043_v54, %s16976_s19 }
 0x72b   : > { %21252 = vst [vmem:[#allocation12_spill] sm:$0xff] %v20028_v25  ;;  %v10305_v48 = vadd.f32 %v19858_v35, %v10219_v32  ;;  %v9112_v10 = vadd.f32 %v19826_v23, %v8926_v9  ;;  %v10221_v20 = vpop.f32.mrb[218].mxu0  ;;  %v8928_v14 = vpop.f32.mrb[162].mxu1 }
 0x72c   : > { %v10306_v26 = vadd.f32 %v19855_v61, %v10221_v20  ;;  %v9113_v57 = vadd.f32 %v19823_v29, %v8928_v14  ;;  %v10223_v41 = vpop.f32.mrb[219].mxu0  ;;  %v8930_v49 = vpop.f32.mrb[163].mxu1  ;;  %v10336_v46 = vmax.f32 %v10304_v34, 0.0  ;;  %v9175_v1 = vmax.f32 %v9111_v37, 0.0 }
 0x72d   : > { %v10307_v4 = vadd.f32 %v19858_v35, %v10223_v41  ;;  %v9114_v44 = vadd.f32 %v19826_v23, %v8930_v49  ;;  %v10337_v9 = vmax.f32 %v10305_v48, 0.0  ;;  %v9176_v20 = vmax.f32 %v9112_v10, 0.0  ;;  %v20060_v48 = vld [vmem:[%s21101_s7 + $0x40] sm:$0xff]  }
 0x72e   : > { %v10338_v15 = vmax.f32 %v10306_v26, 0.0  ;;  %v9177_v32 = vmax.f32 %v9113_v57, 0.0  ;;  %12722 = vrot.lane.b32.xlu0 %v20060_v48, %s16977_s17 }
 0x72f   : > { %v10339_v14 = vmax.f32 %v10307_v4, 0.0  ;;  %v9178_v2 = vmax.f32 %v9114_v44, 0.0 }
 0x730   : > { %v20049_v25 = vpack.c.bf16 %v10338_v15, %v10336_v46  ;;  %v9223_v39 = vpack.c.bf16 %v9177_v32, %v9175_v1 }
 0x731   : > { %v20051_v36 = vpack.c.bf16 %v10339_v14, %v10337_v9  ;;  %v20053_v8 = vpack.c.bf16 %v9178_v2, %v9176_v20  ;;  %v10227_v41 = vpop.f32.mrb[220].mxu0  ;;  %v8934_v49 = vpop.f32.mrb[164].mxu1 }
 0x732   : > { %v10308_v34 = vadd.f32 %v19855_v61, %v10227_v41  ;;  %v9115_v37 = vadd.f32 %v19823_v29, %v8934_v49  ;;  %v10229_v26 = vpop.f32.mrb[221].mxu0  ;;  %v8936_v57 = vpop.f32.mrb[165].mxu1  ;;  %10833 = vmatprep.mubr.bf16.mxu0 %v9223_v39 }
 0x733   : > { %v10309_v2 = vadd.f32 %v19858_v35, %v10229_v26  ;;  %v9116_v10 = vadd.f32 %v19826_v23, %v8936_v57  ;;  %v10231_v4 = vpop.f32.mrb[222].mxu0  ;;  %v8938_v44 = vpop.f32.mrb[166].mxu1  ;;  %10834 = vmatmul.mubr.bf16.gmra.mrb[240].mxu0 %v19420_v21  ;;  %v20074_v26 = vld [vmem:[%s21101_s7 + $0x48] sm:$0xff]  }
 0x734   : > { %v10310_v46 = vadd.f32 %v19855_v61, %v10231_v4  ;;  %v9117_v39 = vadd.f32 %v19823_v29, %v8938_v44  ;;  %v10233_v1 = vpop.f32.mrb[223].mxu0  ;;  %v8940_v15 = vpop.f32.mrb[167].mxu1  ;;  %v10340_v20 = vmax.f32 %v10308_v34, 0.0  ;;  %v9179_v14 = vmax.f32 %v9115_v37, 0.0  ;;  %12724 = vrot.lane.b32.xlu0 %v20074_v26, %s16977_s17 }
 0x735   : > { %v10311_v32 = vadd.f32 %v19858_v35, %v10233_v1  ;;  %v9118_v9 = vadd.f32 %v19826_v23, %v8940_v15  ;;  %v10341_v21 = vmax.f32 %v10309_v2, 0.0  ;;  %v9180_v61 = vmax.f32 %v9116_v10, 0.0  ;;  %v20088_v15 = vld [vmem:[%s21101_s7 + $0x50] sm:$0xff]  }
 0x736   : > { %v10342_v41 = vmax.f32 %v10310_v46, 0.0  ;;  %v9181_v49 = vmax.f32 %v9117_v39, 0.0 }
 0x737   : > { %v10343_v57 = vmax.f32 %v10311_v32, 0.0  ;;  %v9182_v4 = vmax.f32 %v9118_v9, 0.0 }
 0x738   : > { %v20078_v44 = vpack.c.bf16 %v10342_v41, %v10340_v20  ;;  %v9225_v35 = vpack.c.bf16 %v9181_v49, %v9179_v14  ;;  %12726 = vrot.lane.b32.xlu0 %v20088_v15, %s16977_s17  ;;  %v20099_v49 = vld [vmem:[%s21101_s7 + $0x58] sm:$0xff]  }
 0x739   : > { %v20080_v1 = vpack.c.bf16 %v10343_v57, %v10341_v21  ;;  %v20082_v34 = vpack.c.bf16 %v9182_v4, %v9180_v61  ;;  %v8944_v37 = vpop.f32.mrb[168].mxu1 }
 0x73a   : > { %21253 = vst [vmem:[#allocation14_spill] sm:$0xff] %v20078_v44  ;;  %v9119_v46 = vadd.f32 %v19823_v29, %v8944_v37  ;;  %v8946_v39 = vpop.f32.mrb[169].mxu1  ;;  %10843 = vmatprep.mubr.bf16.mxu0 %v9225_v35 }
 0x73b   : > { %21254 = vst [vmem:[#allocation16_spill] sm:$0xff] %v20080_v1  ;;  %v9120_v2 = vadd.f32 %v19826_v23, %v8946_v39  ;;  %v8948_v10 = vpop.f32.mrb[170].mxu1  ;;  %10844 = vmatmul.mubr.bf16.gmra.mrb[244].mxu0 %v19429_v0 }
 0x73c   : > { %v9121_v32 = vadd.f32 %v19823_v29, %v8948_v10  ;;  %v8950_v9 = vpop.f32.mrb[171].mxu1  ;;  %v9183_v14 = vmax.f32 %v9119_v46, 0.0  ;;  %12728 = vrot.lane.b32.xlu0 %v20099_v49, %s16977_s17  ;;  %v20111_v46 = vld [vmem:[%s21101_s7 + $0x60] sm:$0xff]  }
 0x73d   : > { %v9122_v20 = vadd.f32 %v19826_v23, %v8950_v9  ;;  %v9184_v21 = vmax.f32 %v9120_v2, 0.0 }
 0x73e   : > { %v9185_v41 = vmax.f32 %v9121_v32, 0.0 }
 0x73f   : > { %v9186_v61 = vmax.f32 %v9122_v20, 0.0 }
 0x740   : > { %v20103_v57 = vpack.c.bf16 %v9185_v41, %v9183_v14  ;;  %12730 = vrot.lane.b32.xlu0 %v20111_v46, %s16977_s17  ;;  %v20121_v41 = vld [vmem:[%s21101_s7 + $0x68] sm:$0xff]  }
 0x741   : > { %v20105_v0 = vpack.c.bf16 %v9186_v61, %v9184_v21  ;;  %v8954_v4 = vpop.f32.mrb[172].mxu1 }
 0x742   : > { %v9123_v35 = vadd.f32 %v19823_v29, %v8954_v4  ;;  %v8956_v37 = vpop.f32.mrb[173].mxu1 }
 0x743   : > { %v9124_v39 = vadd.f32 %v19826_v23, %v8956_v37  ;;  %v8958_v2 = vpop.f32.mrb[174].mxu1 }
 0x744   : > { %v9125_v10 = vadd.f32 %v19823_v29, %v8958_v2  ;;  %v8960_v32 = vpop.f32.mrb[175].mxu1  ;;  %v9187_v20 = vmax.f32 %v9123_v35, 0.0  ;;  %12732 = vrot.lane.b32.xlu0 %v20121_v41, %s16977_s17  ;;  %v20133_v35 = vld [vmem:[%s21101_s7 + $0x70] sm:$0xff]  }
 0x745   : > { %v9126_v9 = vadd.f32 %v19826_v23, %v8960_v32  ;;  %v9188_v21 = vmax.f32 %v9124_v39, 0.0 }
 0x746   : > { %v9189_v14 = vmax.f32 %v9125_v10, 0.0 }
 0x747   : > { %v9190_v61 = vmax.f32 %v9126_v9, 0.0 }
 0x748   : > { %v20125_v4 = vpack.c.bf16 %v9189_v14, %v9187_v20  ;;  %12734 = vrot.lane.b32.xlu0 %v20133_v35, %s16977_s17 }
 0x749   : > { %v20127_v37 = vpack.c.bf16 %v9190_v61, %v9188_v21  ;;  %v8964_v2 = vpop.f32.mrb[176].mxu1 }
 0x74a   : > { %v9127_v59 = vadd.f32 %v19823_v29, %v8964_v2  ;;  %v8966_v32 = vpop.f32.mrb[177].mxu1  ;;  %v20143_v2 = vld [vmem:[%s21101_s7 + $0x78] sm:$0xff]  }
 0x74b   : > { %v9128_v10 = vadd.f32 %v19826_v23, %v8966_v32  ;;  %v8968_v39 = vpop.f32.mrb[178].mxu1 }
 0x74c   : > { %v9129_v9 = vadd.f32 %v19823_v29, %v8968_v39  ;;  %v8970_v20 = vpop.f32.mrb[179].mxu1  ;;  %v9191_v21 = vmax.f32 %v9127_v59, 0.0  ;;  %12736 = vrot.lane.b32.xlu0 %v20143_v2, %s16977_s17 }
 0x74d   : > { %v9130_v14 = vadd.f32 %v19826_v23, %v8970_v20  ;;  %v9192_v60 = vmax.f32 %v9128_v10, 0.0 }
 0x74e   : > { %v9193_v61 = vmax.f32 %v9129_v9, 0.0 }
 0x74f   : > { %v9194_v33 = vmax.f32 %v9130_v14, 0.0 }
 0x750   : > { %v9231_v55 = vpack.c.bf16 %v9193_v61, %v9191_v21  ;;  %12754 = vrot.lane.b32.xlu0 %v19942_v43, %s16977_s17 }
 0x751   : > { %v20147_v32 = vpack.c.bf16 %v9194_v33, %v9192_v60  ;;  %v8974_v22 = vpop.f32.mrb[180].mxu1 }
 0x752   : > { %v9131_v39 = vadd.f32 %v19823_v29, %v8974_v22  ;;  %v8976_v44 = vpop.f32.mrb[181].mxu1  ;;  %10853 = vmatprep.mubr.bf16.mxu0 %v9231_v55 }
 0x753   : > { %v9132_v59 = vadd.f32 %v19826_v23, %v8976_v44  ;;  %v8978_v9 = vpop.f32.mrb[182].mxu1  ;;  %10854 = vmatmul.mubr.bf16.gmra.mrb[248].mxu0 %v19458_v58 }
 0x754   : > { %v9133_v20 = vadd.f32 %v19823_v29, %v8978_v9  ;;  %v8980_v10 = vpop.f32.mrb[183].mxu1  ;;  %v9195_v60 = vmax.f32 %v9131_v39, 0.0  ;;  %12756 = vrot.lane.b32.xlu0 %v19958_v24, %s16977_s17 }
 0x755   : > { %v9134_v14 = vadd.f32 %v19826_v23, %v8980_v10  ;;  %v9196_v22 = vmax.f32 %v9132_v59, 0.0 }
 0x756   : > { %v9197_v33 = vmax.f32 %v9133_v20, 0.0 }
 0x757   : > { %v9198_v55 = vmax.f32 %v9134_v14, 0.0 }
 0x758   : > { %v9233_v21 = vpack.c.bf16 %v9197_v33, %v9195_v60  ;;  %12758 = vrot.lane.b32.xlu0 %v19967_v13, %s16977_s17 }
 0x759   : > { %v20158_v61 = vpack.c.bf16 %v9198_v55, %v9196_v22  ;;  %v8984_v43 = vpop.f32.mrb[184].mxu1  ;;  %v16756_v22 = vld [vmem:[%s21100_s6 + $0x14] ss:$8 sps:$4 sm:$0xff]  }
 0x75a   : > { %v9135_v44 = vadd.f32 %v19823_v29, %v8984_v43  ;;  %v8986_v1 = vpop.f32.mrb[185].mxu1  ;;  %10863 = vmatprep.mubr.bf16.mxu0 %v9233_v21 }
 0x75b   : > { %v9136_v58 = vadd.f32 %v19826_v23, %v8986_v1  ;;  %v8988_v39 = vpop.f32.mrb[186].mxu1  ;;  %10864 = vmatmul.mubr.bf16.gmra.mrb[252].mxu0 %v19467_v52  ;;  %v16751_v52 = vld [vmem:[%s21100_s6] ss:$8 sps:$4 sm:$0xff]  }
 0x75c   : > { %v9137_v24 = vadd.f32 %v19823_v29, %v8988_v39  ;;  %v8990_v59 = vpop.f32.mrb[187].mxu1  ;;  %10906 = vmatprep.mubr.bf16.mxu0 %v21190_v51  ;;  %v9199_v20 = vmax.f32 %v9135_v44, 0.0  ;;  %12760 = vrot.lane.b32.xlu0 %v19983_v31, %s16977_s17  ;;  %v16754_v39 = vld [vmem:[%s21100_s6 + $0x10] ss:$8 sps:$4 sm:$0xff]  }
 0x75d   : > { %v9138_v9 = vadd.f32 %v19826_v23, %v8990_v59  ;;  %v9200_v14 = vmax.f32 %v9136_v58, 0.0 }
 0x75e   : > { %v9201_v10 = vmax.f32 %v9137_v24, 0.0 }
 0x75f   : > { %v9202_v60 = vmax.f32 %v9138_v9, 0.0 }
 0x760   : > { %v20170_v13 = vpack.c.bf16 %v9201_v10, %v9199_v20  ;;  %12762 = vrot.lane.b32.xlu0 %v19996_v38, %s16977_s17  ;;  %v16759_v38 = vld [vmem:[%s21100_s6 + $0x24] ss:$8 sps:$4 sm:$0xff]   ;;  %v16757_v10 = vld [vmem:[%s21100_s6 + $0x20] ss:$8 sps:$4 sm:$0xff]  }
 0x761   : > { %v20175_v1 = vpack.c.bf16 %v9202_v60, %v9200_v14  ;;  %v8994_v33 = vpop.f32.mrb[188].mxu1  ;;  %v16762_v14 = vld [vmem:[%s21100_s6 + $0x34] ss:$8 sps:$4 sm:$0xff]   ;;  %v16765_v60 = vld [vmem:[%s21100_s6 + $0x44] ss:$8 sps:$4 sm:$0xff]  }
 0x762   : > { %v9139_v55 = vadd.f32 %v19823_v29, %v8994_v33  ;;  %v8996_v21 = vpop.f32.mrb[189].mxu1  ;;  %v20237_v33 = vld [vmem:[%s21101_s7] sm:$0xff]  }
 0x763   : > { %v9140_v31 = vadd.f32 %v19826_v23, %v8996_v21  ;;  %v8998_v43 = vpop.f32.mrb[190].mxu1  ;;  %10907 = vmatmul.mubr.bf16.vlgmr.msra.gmra.mrb[224].mxu0 %v19835_v63  ;;  %v20260_v21 = vld [vmem:[%s21101_s7 + $0x8] sm:$0xff]  }
 0x764   : > { %v9141_v44 = vadd.f32 %v19823_v29, %v8998_v43  ;;  %v9000_v58 = vpop.f32.mrb[191].mxu1  ;;  %11228 = vmatpush1.bf16.msra.mxu0 %v16751_v52  ;;  %10916 = vmatprep.mubr.bf16.mxu0 %v21190_v51  ;;  %v9203_v59 = vmax.f32 %v9139_v55, 0.0  ;;  %v16771_v52 = vld [vmem:[%s21100_s6 + $0x64] ss:$8 sps:$4 sm:$0xff]  }
 0x765   : > { %v9142_v24 = vadd.f32 %v19826_v23, %v9000_v58  ;;  %11229 = vmatprep.subr.bf16.mxu0 %v16756_v22  ;;  %12764 = vrot.lane.b32.xlu0 %v20013_v27, %s16977_s17  ;;  %v9204_v29 = vmax.f32 %v9140_v31, 0.0  ;;  %v16760_v27 = vld [vmem:[%s21100_s6 + $0x30] ss:$8 sps:$4 sm:$0xff]   ;;  %v16777_v55 = vld [vmem:[%s21100_s6 + $0x84] ss:$8 sps:$4 sm:$0xff]  }
 0x766   : > { %v9205_v9 = vmax.f32 %v9141_v44, 0.0  ;;  %v16772_v22 = vld [vmem:[%s21100_s6 + $0x70] ss:$8 sps:$4 sm:$0xff]   ;;  %v16783_v44 = vld [vmem:[%s21100_s6 + $0xa4] ss:$8 sps:$4 sm:$0xff]  }
 0x767   : > { %v9206_v63 = vmax.f32 %v9142_v24, 0.0  ;;  %v16778_v31 = vld [vmem:[%s21100_s6 + $0x90] ss:$8 sps:$4 sm:$0xff]   ;;  %v16786_v58 = vld [vmem:[%s21100_s6 + $0xb4] ss:$8 sps:$4 sm:$0xff]  }
 0x768   : > { %v20196_v20 = vpack.c.bf16 %v9205_v9, %v9203_v59  ;;  %11230 = vmatpush1.bf16.msra.mxu0 %v16754_v39  ;;  %v16784_v39 = vld [vmem:[%s21100_s6 + $0xb0] ss:$8 sps:$4 sm:$0xff]   ;;  %v16790_v24 = vld [vmem:[%s21100_s6 + $0xc4] ss:$8 sps:$4 sm:$0xff]  }
 0x769   : > { %v20201_v23 = vpack.c.bf16 %v9206_v63, %v9204_v29  ;;  %11231 = vmatprep.subr.bf16.mxu0 %v16759_v38  ;;  %12766 = vrot.lane.b32.xlu0 %v20022_v5, %s16977_s17  ;;  %v16768_v5 = vld [vmem:[%s21100_s6 + $0x54] ss:$8 sps:$4 sm:$0xff]   ;;  %v16792_v59 = vld [vmem:[%s21100_s6 + $0xd0] ss:$8 sps:$4 sm:$0xff]   ;;  %v16798_v9 = vld [vmem:[%s21100_s6 + $0xe4] ss:$8 sps:$4 sm:$0xff]  }
 0x76a   : > { %v20306_v38 = vld [vmem:[%s21101_s7 + $0x18] sm:$0xff]   ;;  %v20329_v29 = vld [vmem:[%s21101_s7 + $0x20] sm:$0xff]  }
 0x76b   : > { %10917 = vmatmul.mubr.bf16.gmra.mrb[228].mxu0 %v19863_v45  ;;  %v16763_v45 = vld [vmem:[%s21100_s6 + $0x40] ss:$8 sps:$4 sm:$0xff]  }
 0x76c   : > { %11232 = vmatpush1.bf16.msra.mxu0 %v16757_v10  ;;  %10926 = vmatprep.mubr.bf16.mxu0 %v21190_v51  ;;  %v16800_v10 = vld [vmem:[%s21100_s6 + $0xf0] ss:$8 sps:$4 sm:$0xff]  }
 0x76d   : > { %11233 = vmatprep.subr.bf16.mxu0 %v16762_v14  ;;  %12768 = vrot.lane.b32.xlu0 %v20043_v54, %s16977_s17  ;;  %v16766_v54 = vld [vmem:[%s21100_s6 + $0x50] ss:$8 sps:$4 sm:$0xff]   ;;  %v16806_v14 = vld [vmem:[%s21100_s6 + $0x104] ss:$8 sps:$4 sm:$0xff]  }
 0x770   : > { %11234 = vmatpush1.bf16.msra.mxu0 %v16760_v27  ;;  %v20354_v27 = vld [vmem:[%s21101_s7 + $0x28] sm:$0xff]  }
 0x771   : > { %11235 = vmatprep.subr.bf16.mxu0 %v16765_v60  ;;  %12929 = vrot.lane.b32.xlu0 %v20060_v48, %s16978_s18  ;;  %v16774_v48 = vld [vmem:[%s21100_s6 + $0x74] ss:$8 sps:$4 sm:$0xff]  }
 0x772   : > { %v16811_v60 = vld [vmem:[%s21100_s6 + $0x114] ss:$8 sps:$4 sm:$0xff]  }
 0x773   : > { %10927 = vmatmul.mubr.bf16.gmra.mrb[232].mxu0 %v19944_v6  ;;  %v16769_v6 = vld [vmem:[%s21100_s6 + $0x60] ss:$8 sps:$4 sm:$0xff]  }
 0x774   : > { %11236 = vmatpush1.bf16.msra.mxu0 %v16763_v45  ;;  %10936 = vmatprep.mubr.bf16.mxu0 %v21190_v51  ;;  %v16809_v45 = vld [vmem:[%s21100_s6 + $0x110] ss:$8 sps:$4 sm:$0xff]  }
 0x775   : > { %11237 = vmatprep.subr.bf16.mxu0 %v16768_v5  ;;  %12913 = vrot.lane.b32.xlu0 %v20237_v33, %s16978_s18  ;;  %v16815_v5 = vld [vmem:[%s21100_s6 + $0x124] ss:$8 sps:$4 sm:$0xff]  }
 0x778   : > { %11238 = vmatpush1.bf16.msra.mxu0 %v16766_v54 }
 0x779   : > { %11239 = vmatprep.subr.bf16.mxu0 %v16771_v52  ;;  %12931 = vrot.lane.b32.xlu0 %v20074_v26, %s16978_s18  ;;  %v16780_v26 = vld [vmem:[%s21100_s6 + $0x94] ss:$8 sps:$4 sm:$0xff]   ;;  %v16813_v52 = vld [vmem:[%s21100_s6 + $0x120] ss:$8 sps:$4 sm:$0xff]  }
 0x77b   : > { %10937 = vmatmul.mubr.bf16.gmra.mrb[236].mxu0 %v19969_v42  ;;  %v16775_v42 = vld [vmem:[%s21100_s6 + $0x80] ss:$8 sps:$4 sm:$0xff]  }
 0x77c   : > { %11240 = vmatpush1.bf16.msra.mxu0 %v16769_v6  ;;  %10946 = vmatprep.mubr.bf16.mxu0 %v21190_v51  ;;  %v12422_v43 = vpop.permute.xlu0 %12421  ;;  %v16818_v6 = vld [vmem:[%s21100_s6 + $0x134] ss:$8 sps:$4 sm:$0xff]  }
 0x77d   : > { %11241 = vmatprep.subr.bf16.mxu0 %v16774_v48  ;;  %12915 = vrot.lane.b32.xlu0 %v20260_v21, %s16978_s18 }
 0x77e   : > { %14614 = vmatprep.subr.bf16.mxu1 %v12422_v43  ;;  %v16822_v43 = vld [vmem:[%s21100_s6 + $0x150] ss:$8 sps:$4 sm:$0xff]  }
 0x780   : > { %11242 = vmatpush1.bf16.msra.mxu0 %v16772_v22  ;;  %v20339_v63 = vpop.permute.xlu0 %12423  ;;  %v16816_v22 = vld [vmem:[%s21100_s6 + $0x130] ss:$8 sps:$4 sm:$0xff]  }
 0x781   : > { %11243 = vmatprep.subr.bf16.mxu0 %v16777_v55  ;;  %12933 = vrot.lane.b32.xlu0 %v20088_v15, %s16978_s18  ;;  %v20283_v15 = vld [vmem:[%s21101_s7 + $0x10] sm:$0xff]   ;;  %v16821_v55 = vld [vmem:[%s21100_s6 + $0x144] ss:$8 sps:$4 sm:$0xff]  }
 0x783   : > { %10947 = vmatmul.mubr.bf16.gmra.mrb[240].mxu0 %v20053_v8  ;;  %v16781_v8 = vld [vmem:[%s21100_s6 + $0xa0] ss:$8 sps:$4 sm:$0xff]  }
 0x784   : > { %11244 = vmatpush1.bf16.msra.mxu0 %v16775_v42  ;;  %10956 = vmatprep.mubr.bf16.mxu0 %v21190_v51  ;;  %v16819_v42 = vld [vmem:[%s21100_s6 + $0x140] ss:$8 sps:$4 sm:$0xff]  }
 0x785   : > { %11245 = vmatprep.subr.bf16.mxu0 %v16780_v26  ;;  %12917 = vrot.lane.b32.xlu0 %v20283_v15, %s16978_s18  ;;  %v16824_v26 = vld [vmem:[%s21100_s6 + $0x154] ss:$8 sps:$4 sm:$0xff]  }
 0x788   : > { %11246 = vmatpush1.bf16.msra.mxu0 %v16778_v31 }
 0x789   : > { %11247 = vmatprep.subr.bf16.mxu0 %v16783_v44  ;;  %12935 = vrot.lane.b32.xlu0 %v20099_v49, %s16978_s18  ;;  %v16794_v49 = vld [vmem:[%s21100_s6 + $0xd4] ss:$8 sps:$4 sm:$0xff]   ;;  %v16827_v44 = vld [vmem:[%s21100_s6 + $0x164] ss:$8 sps:$4 sm:$0xff]  }
 0x78b   : > { %10957 = vmatmul.mubr.bf16.gmra.mrb[244].mxu0 %v20082_v34  ;;  %v16788_v34 = vld [vmem:[%s21100_s6 + $0xc0] ss:$8 sps:$4 sm:$0xff]  }
 0x78c   : > { %11248 = vmatpush1.bf16.msra.mxu0 %v16781_v8  ;;  %10966 = vmatprep.mubr.bf16.mxu0 %v21190_v51 }
 0x78d   : > { %11249 = vmatprep.subr.bf16.mxu0 %v16786_v58  ;;  %12919 = vrot.lane.b32.xlu0 %v20306_v38, %s16978_s18  ;;  %v16825_v58 = vld [vmem:[%s21100_s6 + $0x160] ss:$8 sps:$4 sm:$0xff]  }
 0x790   : > { %11250 = vmatpush1.bf16.msra.mxu0 %v16784_v39  ;;  %v16830_v39 = vld [vmem:[%s21100_s6 + $0x174] ss:$8 sps:$4 sm:$0xff]  }
 0x791   : > { %11251 = vmatprep.subr.bf16.mxu0 %v16790_v24  ;;  %12937 = vrot.lane.b32.xlu0 %v20111_v46, %s16978_s18  ;;  %v16796_v46 = vld [vmem:[%s21100_s6 + $0xe0] ss:$8 sps:$4 sm:$0xff]   ;;  %v16828_v24 = vld [vmem:[%s21100_s6 + $0x170] ss:$8 sps:$4 sm:$0xff]  }
 0x793   : > { %10967 = vmatmul.mubr.bf16.gmra.mrb[248].mxu0 %v20147_v32  ;;  %v16802_v32 = vld [vmem:[%s21100_s6 + $0xf4] ss:$8 sps:$4 sm:$0xff]  }
 0x794   : > { %11252 = vmatpush1.bf16.msra.mxu0 %v16788_v34  ;;  %10976 = vmatprep.mubr.bf16.mxu0 %v21190_v51  ;;  %v16833_v34 = vld [vmem:[%s21100_s6 + $0x304] ss:$8 sps:$4 sm:$0xff]  }
 0x795   : > { %11253 = vmatprep.subr.bf16.mxu0 %v16794_v49  ;;  %12921 = vrot.lane.b32.xlu0 %v20329_v29, %s16978_s18 }
 0x798   : > { %11254 = vmatpush1.bf16.msra.mxu0 %v16792_v59 }
 0x799   : > { %11255 = vmatprep.subr.bf16.mxu0 %v16798_v9  ;;  %12939 = vrot.lane.b32.xlu0 %v20121_v41, %s16978_s18  ;;  %v20358_v41 = vpop.permute.xlu0 %12425 }
 0x79b   : > { %10977 = vmatmul.mubr.bf16.gmra.mrb[252].mxu0 %v20158_v61  ;;  %v16804_v61 = vld [vmem:[%s21100_s6 + $0x100] ss:$8 sps:$4 sm:$0xff]  }
 0x79c   : > { %11256 = vmatpush1.bf16.msra.mxu0 %v16796_v46  ;;  %11259 = vmatprep.mubr.bf16.mxu0 %v21190_v51 }
 0x79d   : > { %11257 = vmatprep.subr.bf16.mxu0 %v16802_v32  ;;  %12923 = vrot.lane.b32.xlu0 %v20354_v27, %s16978_s18  ;;  %v20376_v54 = vpop.permute.xlu0 %12427 }
 0x7a0   : > { %11258 = vmatpush1.bf16.msra.mxu0 %v16800_v10 }
 0x7a1   : > { %11340 = vmatprep.subr.bf16.mxu0 %v16806_v14  ;;  %12941 = vrot.lane.b32.xlu0 %v20133_v35, %s16978_s18  ;;  %v20381_v35 = vld [vmem:[%s21101_s7 + $0x30] sm:$0xff]   ;;  %v20394_v48 = vpop.permute.xlu0 %12429  ;;  %v16831_v14 = vld [vmem:[%s21100_s6 + $0x300] ss:$8 sps:$4 sm:$0xff]  }
 0x7a3   : > { %11260 = vmatmul.mubr.bf16.vlgmr.msra.gmra.mrb[224].mxu0 %v21190_v51 }
 0x7a4   : > { %11341 = vmatpush1.bf16.msra.mxu0 %v16804_v61  ;;  %11269 = vmatprep.mubr.bf16.mxu0 %v21190_v51  ;;  %v16836_v61 = vld [vmem:[%s21100_s6 + $0x314] ss:$8 sps:$4 sm:$0xff]  }
 0x7a5   : > { %11342 = vmatprep.subr.bf16.mxu0 %v16811_v60  ;;  %12925 = vrot.lane.b32.xlu0 %v20381_v35, %s16978_s18  ;;  %v20416_v31 = vpop.permute.xlu0 %12431 }
 0x7a8   : > { %11343 = vmatpush1.bf16.msra.mxu0 %v16809_v45  ;;  %v16834_v45 = vld [vmem:[%s21100_s6 + $0x310] ss:$8 sps:$4 sm:$0xff]  }
 0x7a9   : > { %11344 = vmatprep.subr.bf16.mxu0 %v16815_v5  ;;  %12943 = vrot.lane.b32.xlu0 %v20143_v2, %s16978_s18  ;;  %v20406_v2 = vld [vmem:[%s21101_s7 + $0x38] sm:$0xff]   ;;  %v20426_v8 = vpop.permute.xlu0 %12433  ;;  %v16839_v5 = vld [vmem:[%s21100_s6 + $0x324] ss:$8 sps:$4 sm:$0xff]  }
 0x7ab   : > { %11270 = vmatmul.mubr.bf16.gmra.mrb[228].mxu0 %v21190_v51 }
 0x7ac   : > { %11279 = vmatprep.mubr.bf16.mxu0 %v19885_v16  ;;  %11345 = vmatpush1.bf16.msra.mxu0 %v16813_v52 }
 0x7ad   : > { %11346 = vmatprep.subr.bf16.mxu0 %v16818_v6  ;;  %12927 = vrot.lane.b32.xlu0 %v20406_v2, %s16978_s18  ;;  %v20442_v49 = vpop.permute.xlu0 %12435 }
 0x7b0   : > { %11347 = vmatpush1.bf16.msra.mxu0 %v16816_v22 }
 0x7b1   : > { %11348 = vmatprep.subr.bf16.mxu0 %v16821_v55  ;;  %v20445_v59 = vpop.permute.xlu0 %12722  ;;  %v16837_v55 = vld [vmem:[%s21100_s6 + $0x320] ss:$8 sps:$4 sm:$0xff]  }
 0x7b3   : > { %11280 = vmatmul.mubr.bf16.gmra.mrb[232].mxu0 %v19247_v50 }
 0x7b4   : > { %11289 = vmatprep.mubr.bf16.mxu0 %v19913_v30  ;;  %11349 = vmatpush1.bf16.msra.mxu0 %v16819_v42 }
 0x7b5   : > { %11350 = vmatprep.subr.bf16.mxu0 %v16824_v26  ;;  %v20448_v9 = vpop.permute.xlu0 %12724 }
 0x7b8   : > { %11351 = vmatpush1.bf16.msra.mxu0 %v16822_v43  ;;  %v16842_v43 = vld [vmem:[%s21100_s6 + $0x334] ss:$8 sps:$4 sm:$0xff]  }
 0x7b9   : > { %11352 = vmatprep.subr.bf16.mxu0 %v16827_v44  ;;  %v20452_v46 = vpop.permute.xlu0 %12726 }
 0x7bb   : > { %11290 = vmatmul.mubr.bf16.gmra.mrb[236].mxu0 %v19269_v17 }
 0x7bc   : > { %11299 = vmatprep.mubr.bf16.mxu0 %v19991_v7  ;;  %11353 = vmatpush1.bf16.msra.mxu0 %v16825_v58 }
 0x7bd   : > { %11354 = vmatprep.subr.bf16.mxu0 %v16830_v39  ;;  %v20456_v32 = vpop.permute.xlu0 %12728  ;;  %v16840_v39 = vld [vmem:[%s21100_s6 + $0x330] ss:$8 sps:$4 sm:$0xff]  }
 0x7c0   : > { %11355 = vmatpush1.bf16.msra.mxu0 %v16828_v24  ;;  %v16845_v24 = vld [vmem:[%s21100_s6 + $0x344] ss:$8 sps:$4 sm:$0xff]  }
 0x7c1   : > { %11766 = vmatprep.subr.bf16.mxu0 %v16833_v34  ;;  %v20459_v10 = vpop.permute.xlu0 %12730 }
 0x7c3   : > { %11300 = vmatmul.mubr.bf16.gmra.mrb[240].mxu0 %v19357_v11 }
 0x7c4   : > { %11309 = vmatprep.mubr.bf16.mxu0 %v20026_v12 }
 0x7c5   : > { %v20468_v60 = vpop.permute.xlu0 %12732 }
 0x7c9   : > { %v20478_v6 = vpop.permute.xlu0 %12734 }
 0x7cb   : > { %11310 = vmatmul.mubr.bf16.gmra.mrb[244].mxu0 %v19391_v19 }
 0x7cc   : > { %11319 = vmatprep.mubr.bf16.mxu0 %v20103_v57 }
 0x7cd   : > { %v20498_v34 = vpop.permute.xlu0 %12736 }
 0x7d3   : > { %11320 = vmatmul.mubr.bf16.gmra.mrb[248].mxu0 %v19440_v40 }
 0x7d4   : > { %11329 = vmatprep.mubr.bf16.mxu0 %v20125_v4 }
 0x7db   : > { %11330 = vmatmul.mubr.bf16.gmra.mrb[252].mxu0 %v19450_v62 }
 0x7dc   : > { %11372 = vmatprep.mubr.bf16.mxu0 %v21190_v51 }
 0x7e3   : > { %11373 = vmatmul.mubr.bf16.vlgmr.msra.gmra.mrb[224].mxu0 %v21190_v51 }
 0x7e4   : > { %11767 = vmatpush1.bf16.msra.mxu0 %v16831_v14  ;;  %11382 = vmatprep.mubr.bf16.mxu0 %v21190_v51 }
 0x7e5   : > { %11768 = vmatprep.subr.bf16.mxu0 %v16836_v61 }
 0x7e7   : > { %v14602_v52 = vpop.f32.mrb[192].mxu1 }
 0x7e8   : > { %v14603_v22 = vpop.f32.mrb[193].mxu1  ;;  %11769 = vmatpush1.bf16.msra.mxu0 %v16834_v45  ;;  %v16843_v45 = vld [vmem:[%s21100_s6 + $0x340] ss:$8 sps:$4 sm:$0xff]  }
 0x7e9   : > { %v20483_v42 = vadd.f32 %v14603_v22, %v14602_v52  ;;  %v14605_v26 = vpop.f32.mrb[194].mxu1  ;;  %11770 = vmatprep.subr.bf16.mxu0 %v16839_v5  ;;  %v16848_v22 = vld [vmem:[%s21100_s6 + $0x354] ss:$8 sps:$4 sm:$0xff]  }
 0x7ea   : > { %v14606_v44 = vpop.f32.mrb[195].mxu1 }
 0x7eb   : > { %21255 = vst [vmem:[#allocation18_spill] sm:$0xff] %v20483_v42  ;;  %v20488_v58 = vadd.f32 %v14606_v44, %v14605_v26  ;;  %11383 = vmatmul.mubr.bf16.gmra.mrb[228].mxu0 %v21190_v51  ;;  %v16846_v44 = vld [vmem:[%s21100_s6 + $0x350] ss:$8 sps:$4 sm:$0xff]  }
 0x7ec   : > { %11771 = vmatpush1.bf16.msra.mxu0 %v16837_v55  ;;  %11392 = vmatprep.mubr.bf16.mxu0 %v21190_v51 }
 0x7ed   : > { %21256 = vst [vmem:[#allocation20_spill] sm:$0xff] %v20488_v58  ;;  %11772 = vmatprep.subr.bf16.mxu0 %v16842_v43  ;;  %v20511_v43 = vpop.permute.xlu0 %12754 }
 0x7ef   : > { %v14608_v14 = vpop.f32.mrb[196].mxu1 }
 0x7f0   : > { %v14609_v61 = vpop.f32.mrb[197].mxu1  ;;  %11773 = vmatpush1.bf16.msra.mxu0 %v16840_v39  ;;  %v16851_v39 = vld [vmem:[%s21100_s6 + $0x364] ss:$8 sps:$4 sm:$0xff]  }
 0x7f1   : > { %v20503_v5 = vadd.f32 %v14609_v61, %v14608_v14  ;;  %v14611_v52 = vpop.f32.mrb[198].mxu1  ;;  %11774 = vmatprep.subr.bf16.mxu0 %v16845_v24  ;;  %v16849_v24 = vld [vmem:[%s21100_s6 + $0x360] ss:$8 sps:$4 sm:$0xff]   ;;  %v16854_v14 = vld [vmem:[%s21100_s6 + $0x374] ss:$8 sps:$4 sm:$0xff]   ;;  %v20526_v61 = vpop.permute.xlu0 %12756 }
 0x7f2   : > { %v14612_v55 = vpop.f32.mrb[199].mxu1 }
 0x7f3   : > { %21257 = vst [vmem:[#allocation22_spill] sm:$0xff] %v20503_v5  ;;  %v20508_v26 = vadd.f32 %v14612_v55, %v14611_v52  ;;  %11393 = vmatmul.mubr.bf16.gmra.mrb[232].mxu0 %v19892_v28  ;;  %v16857_v52 = vld [vmem:[%s21100_s6 + $0x384] ss:$8 sps:$4 sm:$0xff]   ;;  %v16855_v55 = vld [vmem:[%s21100_s6 + $0x380] ss:$8 sps:$4 sm:$0xff]  }
 0x7f4   : > { %11775 = vmatpush1.bf16.msra.mxu0 %v16843_v45  ;;  %11402 = vmatprep.mubr.bf16.mxu0 %v21190_v51  ;;  %v16852_v45 = vld [vmem:[%s21100_s6 + $0x370] ss:$8 sps:$4 sm:$0xff]   ;;  %v16873_v5 = vld [vmem:[%s21100_s6 + $0x3e0] ss:$8 sps:$4 sm:$0xff]  }
 0x7f5   : > { %21258 = vst [vmem:[#allocation24_spill] sm:$0xff] %v20508_v26  ;;  %11776 = vmatprep.subr.bf16.mxu0 %v16848_v22  ;;  %v20536_v22 = vpop.permute.xlu0 %12758 }
 0x7f6   : > { %21259 = vst [vmem:[#allocation26_spill] sm:$0xff] %v20536_v22 }
 0x7f8   : > { %11777 = vmatpush1.bf16.msra.mxu0 %v16846_v44  ;;  %v16860_v44 = vld [vmem:[%s21100_s6 + $0x394] ss:$8 sps:$4 sm:$0xff]  }
 0x7f9   : > { %11778 = vmatprep.subr.bf16.mxu0 %v16851_v39  ;;  %v16858_v39 = vld [vmem:[%s21100_s6 + $0x390] ss:$8 sps:$4 sm:$0xff]  }
 0x7fb   : > { %11403 = vmatmul.mubr.bf16.gmra.mrb[236].mxu0 %v19920_v18 }
 0x7fc   : > { %11779 = vmatpush1.bf16.msra.mxu0 %v16849_v24  ;;  %11412 = vmatprep.mubr.bf16.mxu0 %v21190_v51  ;;  %v16863_v24 = vld [vmem:[%s21100_s6 + $0x3a4] ss:$8 sps:$4 sm:$0xff]  }
 0x7fd   : > { %11780 = vmatprep.subr.bf16.mxu0 %v16854_v14  ;;  %v20552_v14 = vpop.permute.xlu0 %12760 }
 0x7fe   : > { %21260 = vst [vmem:[#allocation28_spill] sm:$0xff] %v20552_v14 }
 0x800   : > { %11781 = vmatpush1.bf16.msra.mxu0 %v16852_v45  ;;  %v16861_v45 = vld [vmem:[%s21100_s6 + $0x3a0] ss:$8 sps:$4 sm:$0xff]  }
 0x801   : > { %11782 = vmatprep.subr.bf16.mxu0 %v16857_v52  ;;  %v16866_v52 = vld [vmem:[%s21100_s6 + $0x3b4] ss:$8 sps:$4 sm:$0xff]  }
 0x803   : > { %11413 = vmatmul.mubr.bf16.gmra.mrb[240].mxu0 %v20000_v3 }
 0x804   : > { %11783 = vmatpush1.bf16.msra.mxu0 %v16855_v55  ;;  %11422 = vmatprep.mubr.bf16.mxu0 %v21190_v51  ;;  %v20561_v55 = vpop.permute.xlu0 %12762 }
 0x805   : > { %11784 = vmatprep.subr.bf16.mxu0 %v16860_v44  ;;  %21261 = vst [vmem:[#allocation31_spill] sm:$0xff] %v20561_v55  ;;  %v16864_v44 = vld [vmem:[%s21100_s6 + $0x3b0] ss:$8 sps:$4 sm:$0xff]  }
 0x808   : > { %11785 = vmatpush1.bf16.msra.mxu0 %v16858_v39  ;;  %v16869_v39 = vld [vmem:[%s21100_s6 + $0x3c4] ss:$8 sps:$4 sm:$0xff]   ;;  %v20576_v26 = vpop.permute.xlu0 %12764 }
 0x809   : > { %11786 = vmatprep.subr.bf16.mxu0 %v16863_v24  ;;  %v16867_v24 = vld [vmem:[%s21100_s6 + $0x3c0] ss:$8 sps:$4 sm:$0xff]   ;;  %21262 = vst [vmem:[#allocation36_spill] sm:$0xff] %v20576_v26 }
 0x80b   : > { %11423 = vmatmul.mubr.bf16.gmra.mrb[244].mxu0 %v20030_v56 }
 0x80c   : > { %11787 = vmatpush1.bf16.msra.mxu0 %v16861_v45  ;;  %11432 = vmatprep.mubr.bf16.mxu0 %v21190_v51  ;;  %v16872_v45 = vld [vmem:[%s21100_s6 + $0x3d4] ss:$8 sps:$4 sm:$0xff]  }
 0x80d   : > { %11788 = vmatprep.subr.bf16.mxu0 %v16866_v52  ;;  %v16870_v52 = vld [vmem:[%s21100_s6 + $0x3d0] ss:$8 sps:$4 sm:$0xff]  }
 0x810   : > { %11789 = vmatpush1.bf16.msra.mxu0 %v16864_v44  ;;  %v16875_v44 = vld [vmem:[%s21100_s6 + $0x3e4] ss:$8 sps:$4 sm:$0xff]  }
 0x811   : > { %11790 = vmatprep.subr.bf16.mxu0 %v16869_v39  ;;  %v20586_v39 = vpop.permute.xlu0 %12766 }
 0x812   : > { %21263 = vst [vmem:[#allocation40_spill] sm:$0xff] %v20586_v39 }
 0x813   : > { %11433 = vmatmul.mubr.bf16.gmra.mrb[248].mxu0 %v20105_v0 }
 0x814   : > { %11791 = vmatpush1.bf16.msra.mxu0 %v16867_v24  ;;  %11442 = vmatprep.mubr.bf16.mxu0 %v21190_v51  ;;  %v16878_v24 = vld [vmem:[%s21100_s6 + $0x3f4] ss:$8 sps:$4 sm:$0xff]  }
 0x815   : > { %11792 = vmatprep.subr.bf16.mxu0 %v16872_v45  ;;  %v16876_v45 = vld [vmem:[%s21100_s6 + $0x3f0] ss:$8 sps:$4 sm:$0xff]   ;;  %v20602_v58 = vpop.permute.xlu0 %12768 }
 0x816   : > { %21264 = vst [vmem:[#allocation9_spill] sm:$0xff] %v20602_v58  ;;  %v20697_v58 = vld [vmem:[%s21101_s7 + $0xa8] sm:$0xff]  }
 0x818   : > { %11793 = vmatpush1.bf16.msra.mxu0 %v16870_v52  ;;  %v16881_v52 = vld [vmem:[%s21100_s6 + $0x404] ss:$8 sps:$4 sm:$0xff]  }
 0x819   : > { %11794 = vmatprep.subr.bf16.mxu0 %v16875_v44  ;;  %v16879_v44 = vld [vmem:[%s21100_s6 + $0x400] ss:$8 sps:$4 sm:$0xff]  }
 0x81b   : > { %11443 = vmatmul.mubr.bf16.gmra.mrb[252].mxu0 %v20127_v37 }
 0x81c   : > { %11795 = vmatpush1.bf16.msra.mxu0 %v16873_v5  ;;  %11798 = vmatprep.mubr.bf16.mxu0 %v19885_v16  ;;  %v16884_v16 = vld [vmem:[%s21100_s6 + $0x414] ss:$8 sps:$4 sm:$0xff]   ;;  %v12930_v5 = vpop.permute.xlu0 %12929 }
 0x81d   : > { %11796 = vmatprep.subr.bf16.mxu0 %v16878_v24  ;;  %v16882_v24 = vld [vmem:[%s21100_s6 + $0x410] ss:$8 sps:$4 sm:$0xff]  }
 0x820   : > { %11797 = vmatpush1.bf16.msra.mxu0 %v16876_v45  ;;  %v16887_v45 = vld [vmem:[%s21100_s6 + $0x424] ss:$8 sps:$4 sm:$0xff]  }
 0x821   : > { %11879 = vmatprep.subr.bf16.mxu0 %v16881_v52  ;;  %v16885_v52 = vld [vmem:[%s21100_s6 + $0x420] ss:$8 sps:$4 sm:$0xff]  }
 0x823   : > { %11799 = vmatmul.mubr.bf16.vlgmr.msra.gmra.mrb[224].mxu0 %v19247_v50  ;;  %v16890_v50 = vld [vmem:[%s21100_s6 + $0x434] ss:$8 sps:$4 sm:$0xff]  }
 0x824   : > { %11808 = vmatprep.mubr.bf16.mxu0 %v19913_v30  ;;  %11880 = vmatpush1.bf16.msra.mxu0 %v16879_v44  ;;  %v20624_v30 = vpop.permute.xlu0 %12913  ;;  %v20630_v44 = vld [vmem:[%s21101_s7 + $0x80] sm:$0xff]  }
 0x825   : > { %11881 = vmatprep.subr.bf16.mxu0 %v16884_v16  ;;  %v16888_v16 = vld [vmem:[%s21100_s6 + $0x430] ss:$8 sps:$4 sm:$0xff]   ;;  %12405 = vrot.lane.b32.xlu1 %v20630_v44, %s16976_s19 }
 0x828   : > { %11882 = vmatpush1.bf16.msra.mxu0 %v16882_v24  ;;  %v16893_v24 = vld [vmem:[%s21100_s6 + $0x444] ss:$8 sps:$4 sm:$0xff]  }
 0x829   : > { %11883 = vmatprep.subr.bf16.mxu0 %v16887_v45  ;;  %v12932_v45 = vpop.permute.xlu0 %12931 }
 0x82b   : > { %11809 = vmatmul.mubr.bf16.gmra.mrb[228].mxu0 %v19269_v17  ;;  %v20644_v17 = vld [vmem:[%s21101_s7 + $0x88] sm:$0xff]  }
 0x82c   : > { %11818 = vmatprep.mubr.bf16.mxu0 %v19991_v7  ;;  %11884 = vmatpush1.bf16.msra.mxu0 %v16885_v52  ;;  %v16891_v7 = vld [vmem:[%s21100_s6 + $0x440] ss:$8 sps:$4 sm:$0xff]   ;;  %v16896_v52 = vld [vmem:[%s21100_s6 + $0x454] ss:$8 sps:$4 sm:$0xff]  }
 0x82d   : > { %11885 = vmatprep.subr.bf16.mxu0 %v16890_v50  ;;  %12407 = vrot.lane.b32.xlu1 %v20644_v17, %s16976_s19  ;;  %v20657_v50 = vld [vmem:[%s21101_s7 + $0x90] sm:$0xff]   ;;  %v12916_v42 = vpop.permute.xlu0 %12915 }
 0x830   : > { %11886 = vmatpush1.bf16.msra.mxu0 %v16888_v16  ;;  %v16894_v16 = vld [vmem:[%s21100_s6 + $0x450] ss:$8 sps:$4 sm:$0xff]  }
 0x831   : > { %11887 = vmatprep.subr.bf16.mxu0 %v16893_v24  ;;  %v16899_v24 = vld [vmem:[%s21100_s6 + $0x464] ss:$8 sps:$4 sm:$0xff]   ;;  %12409 = vrot.lane.b32.xlu1 %v20657_v50, %s16976_s19 }
 0x833   : > { %11819 = vmatmul.mubr.bf16.gmra.mrb[232].mxu0 %v19357_v11  ;;  %v20672_v11 = vld [vmem:[%s21101_s7 + $0x98] sm:$0xff]  }
 0x834   : > { %11828 = vmatprep.mubr.bf16.mxu0 %v20026_v12  ;;  %11888 = vmatpush1.bf16.msra.mxu0 %v16891_v7  ;;  %v16897_v12 = vld [vmem:[%s21100_s6 + $0x460] ss:$8 sps:$4 sm:$0xff]   ;;  %v16902_v7 = vld [vmem:[%s21100_s6 + $0x474] ss:$8 sps:$4 sm:$0xff]  }
 0x835   : > { %11889 = vmatprep.subr.bf16.mxu0 %v16896_v52  ;;  %12411 = vrot.lane.b32.xlu1 %v20672_v11, %s16976_s19  ;;  %v20685_v52 = vld [vmem:[%s21101_s7 + $0xa0] sm:$0xff]  }
 0x838   : > { %11890 = vmatpush1.bf16.msra.mxu0 %v16894_v16  ;;  %v12934_v16 = vpop.permute.xlu0 %12933 }
 0x839   : > { %11891 = vmatprep.subr.bf16.mxu0 %v16899_v24  ;;  %v16900_v24 = vld [vmem:[%s21100_s6 + $0x470] ss:$8 sps:$4 sm:$0xff]   ;;  %12413 = vrot.lane.b32.xlu1 %v20685_v52, %s16976_s19 }
 0x83b   : > { %11829 = vmatmul.mubr.bf16.gmra.mrb[236].mxu0 %v19391_v19  ;;  %v20704_v19 = vld [vmem:[%s21101_s7 + $0xb0] sm:$0xff]  }
 0x83c   : > { %11838 = vmatprep.mubr.bf16.mxu0 %v20103_v57  ;;  %11892 = vmatpush1.bf16.msra.mxu0 %v16897_v12  ;;  %v12918_v39 = vpop.permute.xlu0 %12917  ;;  %v20713_v57 = vld [vmem:[%s21101_s7 + $0xb8] sm:$0xff]  }
 0x83d   : > { %11893 = vmatprep.subr.bf16.mxu0 %v16902_v7  ;;  %12415 = vrot.lane.b32.xlu1 %v20697_v58, %s16976_s19  ;;  %v12024_v7 = vld [vmem:[%s21104_s10] sm:$0x3] }
 0x840   : > { %11894 = vmatpush1.bf16.msra.mxu0 %v16900_v24 }
 0x841   : > { %14754 = vmatprep.subr.bf16.mxu0 %v12930_v5  ;;  %12417 = vrot.lane.b32.xlu1 %v20704_v19, %s16976_s19  ;;  %v12936_v5 = vpop.permute.xlu0 %12935 }
 0x843   : > { %11839 = vmatmul.mubr.bf16.gmra.mrb[240].mxu0 %v19440_v40 }
 0x844   : > { %11848 = vmatprep.mubr.bf16.mxu0 %v20125_v4 }
 0x845   : > { %12419 = vrot.lane.b32.xlu1 %v20713_v57, %s16976_s19  ;;  %v12920_v12 = vpop.permute.xlu0 %12919  ;;  %s1012_s19 = scalar_lea.vmem %s21095_s1, %s13291_s29 }
 0x849   : > { %12706 = vrot.lane.b32.xlu1 %v20237_v33, %s16977_s17  ;;  %v12938_v40 = vpop.permute.xlu0 %12937 }
 0x84b   : > { %11849 = vmatmul.mubr.bf16.gmra.mrb[244].mxu0 %v19450_v62 }
 0x84c   : > { %11858 = vmatprep.mubr.bf16.mxu0 %v20170_v13 }
 0x84d   : > { %12708 = vrot.lane.b32.xlu1 %v20260_v21, %s16977_s17  ;;  %v12922_v4 = vpop.permute.xlu0 %12921 }
 0x851   : > { %12710 = vrot.lane.b32.xlu1 %v20283_v15, %s16977_s17  ;;  %v12940_v62 = vpop.permute.xlu0 %12939 }
 0x853   : > { %11859 = vmatmul.mubr.bf16.gmra.mrb[248].mxu0 %v19479_v53 }
 0x854   : > { %11868 = vmatprep.mubr.bf16.mxu0 %v20196_v20  ;;  %v21266_v20 = vld [vmem:[#allocation14_spill] sm:$0xff] }
 0x855   : > { %12712 = vrot.lane.b32.xlu1 %v20306_v38, %s16977_s17  ;;  %v12924_v53 = vpop.permute.xlu0 %12923 }
 0x859   : > { %12714 = vrot.lane.b32.xlu1 %v20329_v29, %s16977_s17 }
 0x85b   : > { %11869 = vmatmul.mubr.bf16.gmra.mrb[252].mxu0 %v19503_v47  ;;  %v12942_v47 = vpop.permute.xlu0 %12941 }
 0x85c   : > { %11911 = vmatprep.mubr.bf16.mxu0 %v21190_v51 }
 0x85d   : > { %12716 = vrot.lane.b32.xlu1 %v20354_v27, %s16977_s17 }
 0x861   : > { %12718 = vrot.lane.b32.xlu1 %v20381_v35, %s16977_s17 }
 0x863   : > { %11912 = vmatmul.mubr.bf16.vlgmr.msra.gmra.mrb[224].mxu0 %v19892_v28  ;;  %v12926_v28 = vpop.permute.xlu0 %12925 }
 0x864   : > { %11921 = vmatprep.mubr.bf16.mxu0 %v21190_v51  ;;  %14755 = vmatpush3.bf16.msra.mxu0 %v20624_v30  ;;  %v20846_v30 = vld [vmem:[%s21101_s7 + $0xf8] sm:$0xff]  }
 0x865   : > { %14756 = vmatprep.subr.bf16.mxu0 %v12932_v45  ;;  %12720 = vrot.lane.b32.xlu1 %v20406_v2, %s16977_s17  ;;  %v16943_v45 = vld [vmem:[%s21101_s7 + $0x40] sm:$0xff]  }
 0x868   : > { %14757 = vmatpush3.bf16.msra.mxu0 %v12916_v42  ;;  %v20835_v42 = vld [vmem:[%s21101_s7 + $0xf0] sm:$0xff]  }
 0x869   : > { %14758 = vmatprep.subr.bf16.mxu0 %v12934_v16  ;;  %12738 = vrot.lane.b32.xlu1 %v20630_v44, %s16977_s17 }
 0x86b   : > { %11922 = vmatmul.mubr.bf16.gmra.mrb[228].mxu0 %v19920_v18  ;;  %v12944_v18 = vpop.permute.xlu0 %12943 }
 0x86c   : > { %11931 = vmatprep.mubr.bf16.mxu0 %v21190_v51  ;;  %14759 = vmatpush3.bf16.msra.mxu0 %v12918_v39 }
 0x86d   : > { %14760 = vmatprep.subr.bf16.mxu0 %v12936_v5  ;;  %12740 = vrot.lane.b32.xlu1 %v20644_v17, %s16977_s17  ;;  %v21268_v5 = vld [vmem:[#allocation7_spill] sm:$0xff] }
 0x86f   : > { %v12928_v13 = vpop.permute.xlu0 %12927 }
 0x870   : > { %14761 = vmatpush3.bf16.msra.mxu0 %v12920_v12  ;;  %v20866_v12 = vrot.slane %v12024_v7, %v21268_v5 }
 0x871   : > { %14762 = vmatprep.subr.bf16.mxu0 %v12938_v40  ;;  %12742 = vrot.lane.b32.xlu1 %v20657_v50, %s16977_s17 }
 0x873   : > { %11932 = vmatmul.mubr.bf16.gmra.mrb[232].mxu0 %v20000_v3  ;;  %v20771_v3 = vld [vmem:[%s21101_s7 + $0xc0] sm:$0xff]  }
 0x874   : > { %11941 = vmatprep.mubr.bf16.mxu0 %v21190_v51  ;;  %14763 = vmatpush3.bf16.msra.mxu0 %v12922_v4 }
 0x875   : > { %14764 = vmatprep.subr.bf16.mxu0 %v12940_v62  ;;  %12744 = vrot.lane.b32.xlu1 %v20672_v11, %s16977_s17 }
 0x878   : > { %14765 = vmatpush3.bf16.msra.mxu0 %v12924_v53 }
 0x879   : > { %14766 = vmatprep.subr.bf16.mxu0 %v12942_v47  ;;  %12746 = vrot.lane.b32.xlu1 %v20685_v52, %s16977_s17 }
 0x87b   : > { %11942 = vmatmul.mubr.bf16.gmra.mrb[236].mxu0 %v20030_v56  ;;  %v20782_v56 = vld [vmem:[%s21101_s7 + $0xc8] sm:$0xff]  }
 0x87c   : > { %11951 = vmatprep.mubr.bf16.mxu0 %v21190_v51  ;;  %14767 = vmatpush3.bf16.msra.mxu0 %v12926_v28 }
 0x87d   : > { %14768 = vmatprep.subr.bf16.mxu0 %v12944_v18  ;;  %12748 = vrot.lane.b32.xlu1 %v20697_v58, %s16977_s17 }
 0x880   : > { %14769 = vmatpush3.bf16.msra.mxu0 %v12928_v13 }
 0x881   : > { %12750 = vrot.lane.b32.xlu1 %v20704_v19, %s16977_s17 }
 0x883   : > { %11952 = vmatmul.mubr.bf16.gmra.mrb[240].mxu0 %v20105_v0  ;;  %v20793_v0 = vld [vmem:[%s21101_s7 + $0xd0] sm:$0xff]  }
 0x884   : > { %11961 = vmatprep.mubr.bf16.mxu0 %v21190_v51 }
 0x885   : > { %12752 = vrot.lane.b32.xlu1 %v20713_v57, %s16977_s17  ;;  %s16980_s17 = smov 126  }
 0x889   : > { %12961 = vrot.lane.b32.xlu1 %v20771_v3, %s16978_s18 }
 0x88b   : > { %11962 = vmatmul.mubr.bf16.gmra.mrb[244].mxu0 %v20127_v37 }
 0x88c   : > { %11971 = vmatprep.mubr.bf16.mxu0 %v21190_v51 }
 0x88d   : > { %12945 = vrot.lane.b32.xlu1 %v20630_v44, %s16978_s18 }
 0x891   : > { %12963 = vrot.lane.b32.xlu1 %v20782_v56, %s16978_s18 }
 0x893   : > { %11972 = vmatmul.mubr.bf16.gmra.mrb[248].mxu0 %v20175_v1  ;;  %v21265_v1 = vld [vmem:[#allocation16_spill] sm:$0xff] }
 0x894   : > { %11981 = vmatprep.mubr.bf16.mxu0 %v21190_v51 }
 0x895   : > { %12947 = vrot.lane.b32.xlu1 %v20644_v17, %s16978_s18 }
 0x897   : > { %v12406_v51 = vpop.permute.xlu1 %12405 }
 0x898   : > { %14615 = vmatpush3.bf16.msra.mxu1 %v12406_v51 }
 0x899   : > { %12965 = vrot.lane.b32.xlu1 %v20793_v0, %s16978_s18  ;;  %14616 = vmatprep.subr.bf16.mxu1 %v20339_v63 }
 0x89b   : > { %11982 = vmatmul.mubr.bf16.gmra.mrb[252].mxu0 %v20201_v23  ;;  %v20825_v23 = vld [vmem:[%s21101_s7 + $0xe8] sm:$0xff]  }
 0x89c   : > { %13041 = vmatprep.mubr.bf16.mxu0 %v20051_v36  ;;  %v20806_v36 = vld [vmem:[%s21101_s7 + $0xd8] sm:$0xff]  }
 0x89d   : > { %12949 = vrot.lane.b32.xlu1 %v20657_v50, %s16978_s18 }
 0x89f   : > { %v12408_v37 = vpop.permute.xlu1 %12407 }
 0x8a0   : > { %14617 = vmatpush3.bf16.msra.mxu1 %v12408_v37 }
 0x8a1   : > { %14618 = vmatprep.subr.bf16.mxu1 %v20358_v41  ;;  %12967 = vrot.lane.b32.xlu1 %v20806_v36, %s16978_s18 }
 0x8a3   : > { %13042 = vmatmul.mubr.bf16.vlgmr.msra.gmra.mrb[0].mxu0 %v20049_v25  ;;  %v20816_v25 = vld [vmem:[%s21101_s7 + $0xe0] sm:$0xff]   ;;  %v12410_v63 = vpop.permute.xlu1 %12409 }
 0x8a4   : > { %13049 = vmatprep.mubr.bf16.mxu0 %v21265_v1  ;;  %14619 = vmatpush3.bf16.msra.mxu1 %v12410_v63 }
 0x8a5   : > { %12951 = vrot.lane.b32.xlu1 %v20672_v11, %s16978_s18  ;;  %14620 = vmatprep.subr.bf16.mxu1 %v20376_v54 }
 0x8a7   : > { %v12412_v41 = vpop.permute.xlu1 %12411 }
 0x8a8   : > { %14621 = vmatpush3.bf16.msra.mxu1 %v12412_v41 }
 0x8a9   : > { %12969 = vrot.lane.b32.xlu1 %v20816_v25, %s16978_s18  ;;  %14622 = vmatprep.subr.bf16.mxu1 %v20394_v48 }
 0x8ab   : > { %13050 = vmatmul.mubr.bf16.gmra.mrb[4].mxu0 %v21266_v20  ;;  %v12414_v39 = vpop.permute.xlu1 %12413 }
 0x8ac   : > { %14623 = vmatpush3.bf16.msra.mxu1 %v12414_v39 }
 0x8ad   : > { %12953 = vrot.lane.b32.xlu1 %v20685_v52, %s16978_s18  ;;  %14624 = vmatprep.subr.bf16.mxu1 %v20416_v31 }
 0x8af   : > { %v12416_v54 = vpop.permute.xlu1 %12415 }
 0x8b0   : > { %14625 = vmatpush3.bf16.msra.mxu1 %v12416_v54 }
 0x8b1   : > { %12971 = vrot.lane.b32.xlu1 %v20825_v23, %s16978_s18  ;;  %14626 = vmatprep.subr.bf16.mxu1 %v20426_v8  ;;  %v21267_v8 = vld [vmem:[#allocation6_spill] sm:$0xff] }
 0x8b2   : > { %v20863_v24 = vrot.slane %v12024_v7, %v21267_v8 }
 0x8b3   : > { %v12418_v48 = vpop.permute.xlu1 %12417 }
 0x8b4   : > { %14627 = vmatpush3.bf16.msra.mxu1 %v12418_v48 }
 0x8b5   : > { %12955 = vrot.lane.b32.xlu1 %v20697_v58, %s16978_s18  ;;  %14628 = vmatprep.subr.bf16.mxu1 %v20442_v49 }
 0x8b7   : > { %v12420_v31 = vpop.permute.xlu1 %12419 }
 0x8b8   : > { %14629 = vmatpush3.bf16.msra.mxu1 %v12420_v31 }
 0x8b9   : > { %12973 = vrot.lane.b32.xlu1 %v20835_v42, %s16978_s18  ;;  %14642 = vmatprep.subr.bf16.mxu1 %v16943_v45 }
 0x8bb   : > { %v20860_v16 = vpop.permute.xlu1 %12706 }
 0x8bd   : > { %12957 = vrot.lane.b32.xlu1 %v20704_v19, %s16978_s18 }
 0x8bf   : > { %v20869_v62 = vpop.permute.xlu1 %12708 }
 0x8c1   : > { %12975 = vrot.lane.b32.xlu1 %v20846_v30, %s16978_s18 }
 0x8c3   : > { %v20876_v41 = vpop.permute.xlu1 %12710 }
 0x8c5   : > { %12959 = vrot.lane.b32.xlu1 %v20713_v57, %s16978_s18 }
 0x936   : > { %v11913_v49 = vpop.f32.mrb[224].mxu0 }
 0x937   : > { %v12036_v40 = vadd.f32 %v20863_v24, %v11913_v49  ;;  %v11915_v4 = vpop.f32.mrb[225].mxu0 }
 0x938   : > { %v12037_v53 = vadd.f32 %v20866_v12, %v11915_v4  ;;  %v11917_v47 = vpop.f32.mrb[226].mxu0 }
 0x939   : > { %v12038_v28 = vadd.f32 %v20863_v24, %v11917_v47  ;;  %v11919_v18 = vpop.f32.mrb[227].mxu0  ;;  %v12068_v51 = vmax.f32 %v12036_v40, 0.0 }
 0x93a   : > { %v12039_v13 = vadd.f32 %v20866_v12, %v11919_v18  ;;  %v12069_v1 = vmax.f32 %v12037_v53, 0.0  ;;  %v20884_v53 = vpop.permute.xlu1 %12712 }
 0x93b   : > { %v12070_v37 = vmax.f32 %v12038_v28, 0.0 }
 0x93c   : > { %v12071_v20 = vmax.f32 %v12039_v13, 0.0 }
 0x93d   : > { %v20874_v63 = vpack.c.bf16 %v12070_v37, %v12068_v51 }
 0x93e   : > { %v20878_v39 = vpack.c.bf16 %v12071_v20, %v12069_v1  ;;  %v11923_v54 = vpop.f32.mrb[228].mxu0 }
 0x93f   : > { %v12040_v48 = vadd.f32 %v20863_v24, %v11923_v54  ;;  %v11925_v31 = vpop.f32.mrb[229].mxu0 }
 0x940   : > { %v12041_v45 = vadd.f32 %v20866_v12, %v11925_v31  ;;  %v11927_v7 = vpop.f32.mrb[230].mxu0 }
 0x941   : > { %v12042_v8 = vadd.f32 %v20863_v24, %v11927_v7  ;;  %v11929_v5 = vpop.f32.mrb[231].mxu0  ;;  %v12072_v40 = vmax.f32 %v12040_v48, 0.0  ;;  %v20893_v48 = vpop.permute.xlu1 %12714 }
 0x942   : > { %v12043_v49 = vadd.f32 %v20866_v12, %v11929_v5  ;;  %v12073_v47 = vmax.f32 %v12041_v45, 0.0 }
 0x943   : > { %v12074_v4 = vmax.f32 %v12042_v8, 0.0 }
 0x944   : > { %v12075_v28 = vmax.f32 %v12043_v49, 0.0 }
 0x945   : > { %v20886_v18 = vpack.c.bf16 %v12074_v4, %v12072_v40  ;;  %v20897_v55 = vpop.permute.xlu1 %12716 }
 0x946   : > { %v20888_v13 = vpack.c.bf16 %v12075_v28, %v12073_v47  ;;  %v11933_v51 = vpop.f32.mrb[232].mxu0 }
 0x947   : > { %v12044_v37 = vadd.f32 %v20863_v24, %v11933_v51  ;;  %v11935_v1 = vpop.f32.mrb[233].mxu0 }
 0x948   : > { %v12045_v20 = vadd.f32 %v20866_v12, %v11935_v1  ;;  %v11937_v54 = vpop.f32.mrb[234].mxu0 }
 0x949   : > { %v12046_v31 = vadd.f32 %v20863_v24, %v11937_v54  ;;  %v11939_v7 = vpop.f32.mrb[235].mxu0  ;;  %v12076_v45 = vmax.f32 %v12044_v37, 0.0 }
 0x94a   : > { %v12047_v8 = vadd.f32 %v20866_v12, %v11939_v7  ;;  %v12077_v49 = vmax.f32 %v12045_v20, 0.0  ;;  %v16944_v7 = vld [vmem:[%s21101_s7 + $0x48] sm:$0xff]  }
 0x94b   : > { %v12078_v5 = vmax.f32 %v12046_v31, 0.0 }
 0x94c   : > { %v12079_v40 = vmax.f32 %v12047_v8, 0.0 }
 0x94d   : > { %v12104_v4 = vpack.c.bf16 %v12078_v5, %v12076_v45  ;;  %v20906_v5 = vpop.permute.xlu1 %12718 }
 0x94e   : > { %v12105_v47 = vpack.c.bf16 %v12079_v40, %v12077_v49  ;;  %v11943_v28 = vpop.f32.mrb[236].mxu0 }
 0x94f   : > { %v12048_v51 = vadd.f32 %v20863_v24, %v11943_v28  ;;  %v11945_v26 = vpop.f32.mrb[237].mxu0 }
 0x950   : > { %v12049_v1 = vadd.f32 %v20866_v12, %v11945_v26  ;;  %v11947_v54 = vpop.f32.mrb[238].mxu0  ;;  %12550 = vmatprep.mubr.bf16.mxu1 %v12105_v47 }
 0x951   : > { %v12050_v14 = vadd.f32 %v20863_v24, %v11947_v54  ;;  %v11949_v22 = vpop.f32.mrb[239].mxu0  ;;  %12551 = vmatmul.mubr.bf16.vlgmr.msra.gmra.mrb[200].mxu1 %v12104_v4  ;;  %v12080_v20 = vmax.f32 %v12048_v51, 0.0 }
 0x952   : > { %v12051_v37 = vadd.f32 %v20866_v12, %v11949_v22  ;;  %14643 = vmatpush3.bf16.msra.mxu1 %v20237_v33  ;;  %v12081_v8 = vmax.f32 %v12049_v1, 0.0  ;;  %v16945_v33 = vld [vmem:[%s21101_s7 + $0x50] sm:$0xff]  }
 0x953   : > { %v12082_v31 = vmax.f32 %v12050_v14, 0.0  ;;  %14644 = vmatprep.subr.bf16.mxu1 %v16944_v7 }
 0x954   : > { %v12083_v45 = vmax.f32 %v12051_v37, 0.0 }
 0x955   : > { %v12106_v26 = vpack.c.bf16 %v12082_v31, %v12080_v20  ;;  %v16946_v20 = vld [vmem:[%s21101_s7 + $0x58] sm:$0xff]   ;;  %v20921_v31 = vpop.permute.xlu1 %12720 }
 0x956   : > { %v12107_v49 = vpack.c.bf16 %v12083_v45, %v12081_v8  ;;  %14645 = vmatpush3.bf16.msra.mxu1 %v20260_v21  ;;  %v11953_v40 = vpop.f32.mrb[240].mxu0  ;;  %v21269_v21 = vld [vmem:[#allocation43_spill] sm:$0xff] }
 0x957   : > { %v12052_v22 = vadd.f32 %v20863_v24, %v11953_v40  ;;  %v11955_v4 = vpop.f32.mrb[241].mxu0  ;;  %14646 = vmatprep.subr.bf16.mxu1 %v16945_v33 }
 0x958   : > { %v12053_v14 = vadd.f32 %v20866_v12, %v11955_v4  ;;  %v11957_v47 = vpop.f32.mrb[242].mxu0  ;;  %12558 = vmatprep.mubr.bf16.mxu1 %v12107_v49 }
 0x959   : > { %v12054_v28 = vadd.f32 %v20863_v24, %v11957_v47  ;;  %v11959_v51 = vpop.f32.mrb[243].mxu0  ;;  %12559 = vmatmul.mubr.bf16.gmra.mrb[204].mxu1 %v12106_v26  ;;  %v12084_v54 = vmax.f32 %v12052_v22, 0.0  ;;  %v16947_v22 = vld [vmem:[%s21101_s7 + $0x60] sm:$0xff]  }
 0x95a   : > { %v12055_v1 = vadd.f32 %v20866_v12, %v11959_v51  ;;  %14647 = vmatpush3.bf16.msra.mxu1 %v20283_v15  ;;  %12631 = vmatprep.mubr.bf16.mxu1 %v21269_v21  ;;  %v12085_v7 = vmax.f32 %v12053_v14, 0.0  ;;  %v16948_v21 = vld [vmem:[%s21101_s7 + $0x68] sm:$0xff]  }
 0x95b   : > { %v12086_v37 = vmax.f32 %v12054_v28, 0.0  ;;  %14648 = vmatprep.subr.bf16.mxu1 %v16946_v20  ;;  %v20934_v28 = vpop.permute.xlu1 %12738 }
 0x95c   : > { %v12087_v8 = vmax.f32 %v12055_v1, 0.0 }
 0x95d   : > { %v20923_v45 = vpack.c.bf16 %v12086_v37, %v12084_v54 }
 0x95e   : > { %v20925_v26 = vpack.c.bf16 %v12087_v8, %v12085_v7  ;;  %14649 = vmatpush3.bf16.msra.mxu1 %v20306_v38  ;;  %v11963_v15 = vpop.f32.mrb[244].mxu0 }
 0x95f   : > { %v12056_v49 = vadd.f32 %v20863_v24, %v11963_v15  ;;  %v11965_v40 = vpop.f32.mrb[245].mxu0  ;;  %14650 = vmatprep.subr.bf16.mxu1 %v16947_v22 }
 0x960   : > { %v12057_v4 = vadd.f32 %v20866_v12, %v11965_v40  ;;  %v11967_v33 = vpop.f32.mrb[246].mxu0 }
 0x961   : > { %v12058_v14 = vadd.f32 %v20863_v24, %v11967_v33  ;;  %v11969_v47 = vpop.f32.mrb[247].mxu0  ;;  %v12088_v38 = vmax.f32 %v12056_v49, 0.0  ;;  %v20950_v49 = vpop.permute.xlu1 %12740 }
 0x962   : > { %v12059_v51 = vadd.f32 %v20866_v12, %v11969_v47  ;;  %14651 = vmatpush3.bf16.msra.mxu1 %v20329_v29  ;;  %v12089_v54 = vmax.f32 %v12057_v4, 0.0  ;;  %v16949_v29 = vld [vmem:[%s21101_s7 + $0x70] sm:$0xff]  }
 0x963   : > { %v12090_v1 = vmax.f32 %v12058_v14, 0.0  ;;  %14652 = vmatprep.subr.bf16.mxu1 %v16948_v21 }
 0x964   : > { %v12091_v37 = vmax.f32 %v12059_v51, 0.0 }
 0x965   : > { %v20941_v20 = vpack.c.bf16 %v12090_v1, %v12088_v38  ;;  %v16950_v38 = vld [vmem:[%s21101_s7 + $0x78] sm:$0xff]  }
 0x966   : > { %v20943_v7 = vpack.c.bf16 %v12091_v37, %v12089_v54  ;;  %14653 = vmatpush3.bf16.msra.mxu1 %v20354_v27  ;;  %v11973_v8 = vpop.f32.mrb[248].mxu0  ;;  %v20961_v37 = vpop.permute.xlu1 %12742 }
 0x967   : > { %v12060_v15 = vadd.f32 %v20863_v24, %v11973_v8  ;;  %v11975_v40 = vpop.f32.mrb[249].mxu0  ;;  %14654 = vmatprep.subr.bf16.mxu1 %v16949_v29 }
 0x968   : > { %v12061_v22 = vadd.f32 %v20866_v12, %v11975_v40  ;;  %v11977_v4 = vpop.f32.mrb[250].mxu0 }
 0x969   : > { %v12062_v33 = vadd.f32 %v20863_v24, %v11977_v4  ;;  %v11979_v14 = vpop.f32.mrb[251].mxu0  ;;  %v12092_v27 = vmax.f32 %v12060_v15, 0.0 }
 0x96a   : > { %v12063_v47 = vadd.f32 %v20866_v12, %v11979_v14  ;;  %14655 = vmatpush3.bf16.msra.mxu1 %v20381_v35  ;;  %v12093_v1 = vmax.f32 %v12061_v22, 0.0 }
 0x96b   : > { %v12094_v51 = vmax.f32 %v12062_v33, 0.0  ;;  %14656 = vmatprep.subr.bf16.mxu1 %v16950_v38  ;;  %v21270_v33 = vld [vmem:[#allocation37_spill] sm:$0xff]  ;;  %v20975_v38 = vpop.permute.xlu1 %12744 }
 0x96c   : > { %v12095_v21 = vmax.f32 %v12063_v47, 0.0 }
 0x96d   : > { %v20959_v54 = vpack.c.bf16 %v12094_v51, %v12092_v27  ;;  %v21271_v27 = vld [vmem:[#allocation41_spill] sm:$0xff] }
 0x96e   : > { %v20963_v8 = vpack.c.bf16 %v12095_v21, %v12093_v1  ;;  %14657 = vmatpush3.bf16.msra.mxu1 %v20406_v2  ;;  %v11983_v40 = vpop.f32.mrb[252].mxu0 }
 0x96f   : > { %v12064_v35 = vadd.f32 %v20863_v24, %v11983_v40  ;;  %v11985_v15 = vpop.f32.mrb[253].mxu0  ;;  %14670 = vmatprep.subr.bf16.mxu1 %v20771_v3 }
 0x970   : > { %v12065_v29 = vadd.f32 %v20866_v12, %v11985_v15  ;;  %v11987_v4 = vpop.f32.mrb[254].mxu0 }
 0x971   : > { %v12066_v22 = vadd.f32 %v20863_v24, %v11987_v4  ;;  %12632 = vmatmul.mubr.bf16.vlgmr.msra.gmra.mrb[208].mxu1 %v21270_v33  ;;  %v11989_v14 = vpop.f32.mrb[255].mxu0  ;;  %v12096_v2 = vmax.f32 %v12064_v35, 0.0  ;;  %v21272_v35 = vld [vmem:[#allocation35_spill] sm:$0xff]  ;;  %v20986_v4 = vpop.permute.xlu1 %12746 }
 0x972   : > { %v12067_v47 = vadd.f32 %v20866_v12, %v11989_v14  ;;  %12639 = vmatprep.mubr.bf16.mxu1 %v21271_v27  ;;  %14671 = vmatpush3.bf16.msra.mxu1 %v20630_v44  ;;  %v12097_v3 = vmax.f32 %v12065_v29, 0.0  ;;  %v21284_v27 = vld [vmem:[#allocation20_spill] sm:$0xff] }
 0x973   : > { %v12098_v51 = vmax.f32 %v12066_v22, 0.0  ;;  %14672 = vmatprep.subr.bf16.mxu1 %v20782_v56 }
 0x974   : > { %v12099_v1 = vmax.f32 %v12067_v47, 0.0 }
 0x975   : > { %v20977_v21 = vpack.c.bf16 %v12098_v51, %v12096_v2  ;;  %v12749_v22 = vpop.permute.xlu1 %12748 }
 0x976   : > { %v20979_v24 = vpack.c.bf16 %v12099_v1, %v12097_v3  ;;  %14673 = vmatpush3.bf16.msra.mxu1 %v20644_v17  ;;  %v14770_v40 = vpop.f32.mrb[0].mxu0 }
 0x977   : > { %v14771_v12 = vpop.f32.mrb[1].mxu0  ;;  %14674 = vmatprep.subr.bf16.mxu1 %v20793_v0 }
 0x978   : > { %v20983_v15 = vadd.f32 %v14771_v12, %v14770_v40  ;;  %v14773_v44 = vpop.f32.mrb[2].mxu0 }
 0x979   : > { %12640 = vmatmul.mubr.bf16.gmra.mrb[212].mxu1 %v21272_v35  ;;  %v14774_v56 = vpop.f32.mrb[3].mxu0 }
 0x97a   : > { %14675 = vmatpush3.bf16.msra.mxu1 %v20657_v50  ;;  %12680 = vmatprep.mubr.bf16.mxu1 %v20878_v39  ;;  %v20990_v29 = vadd.f32 %v14774_v56, %v14773_v44  ;;  %v12751_v39 = vpop.permute.xlu1 %12750  ;;  %v21286_v44 = vld [vmem:[#allocation24_spill] sm:$0xff] }
 0x97b   : > { %14676 = vmatprep.subr.bf16.mxu1 %v20806_v36  ;;  %v21279_v36 = vld [vmem:[#allocation31_spill] sm:$0xff] }
 0x97e   : > { %14677 = vmatpush3.bf16.msra.mxu1 %v20672_v11  ;;  %v14776_v17 = vpop.f32.mrb[4].mxu0  ;;  %v12753_v11 = vpop.permute.xlu1 %12752 }
 0x97f   : > { %v14777_v0 = vpop.f32.mrb[5].mxu0  ;;  %14678 = vmatprep.subr.bf16.mxu1 %v20816_v25 }
 0x980   : > { %v20995_v33 = vadd.f32 %v14777_v0, %v14776_v17  ;;  %v14779_v14 = vpop.f32.mrb[6].mxu0 }
 0x981   : > { %v14780_v47 = vpop.f32.mrb[7].mxu0 }
 0x982   : > { %14679 = vmatpush3.bf16.msra.mxu1 %v20685_v52  ;;  %v20998_v50 = vadd.f32 %v14780_v47, %v14779_v14  ;;  %v12962_v52 = vpop.permute.xlu1 %12961 }
 0x983   : > { %14680 = vmatprep.subr.bf16.mxu1 %v20825_v23  ;;  %v21281_v23 = vld [vmem:[#allocation40_spill] sm:$0xff] }
 0x986   : > { %14681 = vmatpush3.bf16.msra.mxu1 %v20697_v58  ;;  %v12946_v58 = vpop.permute.xlu1 %12945 }
 0x987   : > { %14682 = vmatprep.subr.bf16.mxu1 %v20835_v42 }
 0x98a   : > { %14683 = vmatpush3.bf16.msra.mxu1 %v20704_v19  ;;  %v21273_v19 = vld [vmem:[#allocation8_spill] sm:$0xff] }
 0x98b   : > { %14684 = vmatprep.subr.bf16.mxu1 %v20846_v30  ;;  %v21282_v30 = vld [vmem:[#allocation9_spill] sm:$0xff] }
 0x98e   : > { %14685 = vmatpush3.bf16.msra.mxu1 %v20713_v57  ;;  %v21275_v57 = vld [vmem:[#allocation12_spill] sm:$0xff] }
 0x98f   : > { %14698 = vmatprep.subr.bf16.mxu1 %v20445_v59  ;;  %v12964_v59 = vpop.permute.xlu1 %12963 }
 0x991   : > { %12681 = vmatmul.mubr.bf16.vlgmr.msra.gmra.mrb[216].mxu1 %v20874_v63 }
 0x992   : > { %12688 = vmatprep.mubr.bf16.mxu1 %v20888_v13  ;;  %14699 = vmatpush3.bf16.msra.mxu1 %v20860_v16  ;;  %v13135_v13 = vld [vmem:[%s1012_s19 + $0x8] sm:$0xff] }
 0x993   : > { %14700 = vmatprep.subr.bf16.mxu1 %v20448_v9  ;;  %v12948_v9 = vpop.permute.xlu1 %12947  ;;  %13144 = vrot.lane.b32.xlu1 %v13135_v13, %s16979_s26 }
 0x996   : > { %14701 = vmatpush3.bf16.msra.mxu1 %v20869_v62 }
 0x997   : > { %14702 = vmatprep.subr.bf16.mxu1 %v20452_v46  ;;  %v12966_v46 = vpop.permute.xlu1 %12965 }
 0x999   : > { %12689 = vmatmul.mubr.bf16.gmra.mrb[220].mxu1 %v20886_v18  ;;  %v13134_v18 = vld [vmem:[%s1012_s19] sm:$0xff] }
 0x99a   : > { %14703 = vmatpush3.bf16.msra.mxu1 %v20876_v41  ;;  %12834 = vmatprep.mubr.bf16.mxu1 %v21273_v19 }
 0x99b   : > { %14704 = vmatprep.subr.bf16.mxu1 %v20456_v32  ;;  %v12950_v32 = vpop.permute.xlu1 %12949  ;;  %13142 = vrot.lane.b32.xlu0 %v13134_v18, %s16979_s26 }
 0x99e   : > { %14705 = vmatpush3.bf16.msra.mxu1 %v20884_v53 }
 0x99f   : > { %14706 = vmatprep.subr.bf16.mxu1 %v20459_v10  ;;  %v21274_v10 = vld [vmem:[#allocation39_spill] sm:$0xff] }
 0x9a2   : > { %14707 = vmatpush3.bf16.msra.mxu1 %v20893_v48 }
 0x9a3   : > { %14708 = vmatprep.subr.bf16.mxu1 %v20468_v60  ;;  %v12968_v60 = vpop.permute.xlu1 %12967 }
 0x9a6   : > { %14709 = vmatpush3.bf16.msra.mxu1 %v20897_v55  ;;  %v21277_v55 = vld [vmem:[#allocation10_spill] sm:$0xff] }
 0x9a7   : > { %14710 = vmatprep.subr.bf16.mxu1 %v20478_v6  ;;  %v21276_v6 = vld [vmem:[#allocation26_spill] sm:$0xff] }
 0x9aa   : > { %14711 = vmatpush3.bf16.msra.mxu1 %v20906_v5  ;;  %v13136_v5 = vld [vmem:[%s1012_s19 + $0x10] sm:$0xff] }
 0x9ab   : > { %14712 = vmatprep.subr.bf16.mxu1 %v20498_v34  ;;  %v21278_v34 = vld [vmem:[#allocation28_spill] sm:$0xff]  ;;  %13146 = vrot.lane.b32.xlu0 %v13136_v5, %s16979_s26 }
 0x9ae   : > { %14713 = vmatpush3.bf16.msra.mxu1 %v20921_v31  ;;  %v13137_v31 = vld [vmem:[%s1012_s19 + $0x18] sm:$0xff] }
 0x9af   : > { %14726 = vmatprep.subr.bf16.mxu1 %v20511_v43  ;;  %v12952_v43 = vpop.permute.xlu1 %12951  ;;  %13148 = vrot.lane.b32.xlu1 %v13137_v31, %s16979_s26 }
 0x9b1   : > { %12835 = vmatmul.mubr.bf16.vlgmr.msra.gmra.mrb[224].mxu1 %v21274_v10 }
 0x9b2   : > { %12842 = vmatprep.mubr.bf16.mxu1 %v21275_v57  ;;  %14727 = vmatpush3.bf16.msra.mxu1 %v20934_v28 }
 0x9b3   : > { %14728 = vmatprep.subr.bf16.mxu1 %v20526_v61  ;;  %v12970_v25 = vpop.permute.xlu1 %12969  ;;  %v21280_v61 = vld [vmem:[#allocation36_spill] sm:$0xff] }
 0x9b6   : > { %14729 = vmatpush3.bf16.msra.mxu1 %v20950_v49  ;;  %v21283_v49 = vld [vmem:[#allocation18_spill] sm:$0xff] }
 0x9b7   : > { %14730 = vmatprep.subr.bf16.mxu1 %v21276_v6  ;;  %v12954_v42 = vpop.permute.xlu1 %12953 }
 0x9b9   : > { %12843 = vmatmul.mubr.bf16.gmra.mrb[228].mxu1 %v21277_v55 }
 0x9ba   : > { %14731 = vmatpush3.bf16.msra.mxu1 %v20961_v37  ;;  %12883 = vmatprep.mubr.bf16.mxu1 %v20925_v26 }
 0x9bb   : > { %14732 = vmatprep.subr.bf16.mxu1 %v21278_v34  ;;  %v12972_v16 = vpop.permute.xlu1 %12971 }
 0x9be   : > { %14733 = vmatpush3.bf16.msra.mxu1 %v20975_v38 }
 0x9bf   : > { %14734 = vmatprep.subr.bf16.mxu1 %v21279_v36  ;;  %v12956_v62 = vpop.permute.xlu1 %12955 }
 0x9c2   : > { %14735 = vmatpush3.bf16.msra.mxu1 %v20986_v4 }
 0x9c3   : > { %14736 = vmatprep.subr.bf16.mxu1 %v21280_v61  ;;  %v12974_v63 = vpop.permute.xlu1 %12973 }
 0x9c6   : > { %14737 = vmatpush3.bf16.msra.mxu1 %v12749_v22 }
 0x9c7   : > { %14738 = vmatprep.subr.bf16.mxu1 %v21281_v23  ;;  %v12958_v41 = vpop.permute.xlu1 %12957 }
 0x9ca   : > { %14739 = vmatpush3.bf16.msra.mxu1 %v12751_v39 }
 0x9cb   : > { %14740 = vmatprep.subr.bf16.mxu1 %v21282_v30  ;;  %v12976_v53 = vpop.permute.xlu1 %12975 }
 0x9ce   : > { %14741 = vmatpush3.bf16.msra.mxu1 %v12753_v11 }
 0x9cf   : > { %14782 = vmatprep.subr.bf16.mxu1 %v12962_v52  ;;  %v12960_v48 = vpop.permute.xlu1 %12959 }
 0x9d1   : > { %12884 = vmatmul.mubr.bf16.vlgmr.msra.gmra.mrb[232].mxu1 %v20923_v45 }
 0x9d2   : > { %12891 = vmatprep.mubr.bf16.mxu1 %v20943_v7  ;;  %14783 = vmatpush3.bf16.msra.mxu1 %v12946_v58 }
 0x9d3   : > { %14784 = vmatprep.subr.bf16.mxu1 %v12964_v59 }
 0x9d6   : > { %14785 = vmatpush3.bf16.msra.mxu1 %v12948_v9 }
 0x9d7   : > { %14786 = vmatprep.subr.bf16.mxu1 %v12966_v46 }
 0x9d9   : > { %12892 = vmatmul.mubr.bf16.gmra.mrb[236].mxu1 %v20941_v20 }
 0x9da   : > { %14787 = vmatpush3.bf16.msra.mxu1 %v12950_v32  ;;  %13090 = vmatprep.mubr.bf16.mxu1 %v20963_v8 }
 0x9db   : > { %14788 = vmatprep.subr.bf16.mxu1 %v12968_v60 }
 0x9de   : > { %14789 = vmatpush3.bf16.msra.mxu1 %v12952_v43 }
 0x9df   : > { %14790 = vmatprep.subr.bf16.mxu1 %v12970_v25 }
 0x9e2   : > { %14791 = vmatpush3.bf16.msra.mxu1 %v12954_v42 }
 0x9e3   : > { %14792 = vmatprep.subr.bf16.mxu1 %v12972_v16 }
 0x9e6   : > { %14793 = vmatpush3.bf16.msra.mxu1 %v12956_v62 }
 0x9e7   : > { %14794 = vmatprep.subr.bf16.mxu1 %v12974_v63 }
 0x9ea   : > { %14795 = vmatpush3.bf16.msra.mxu1 %v12958_v41 }
 0x9eb   : > { %14796 = vmatprep.subr.bf16.mxu1 %v12976_v53 }
 0x9ee   : > { %14797 = vmatpush3.bf16.msra.mxu1 %v12960_v48 }
 0x9f1   : > { %13091 = vmatmul.mubr.bf16.vlgmr.msra.gmra.mrb[240].mxu1 %v20959_v54 }
 0x9f2   : > { %13098 = vmatprep.mubr.bf16.mxu1 %v20979_v24  ;;  %v21285_v24 = vld [vmem:[#allocation22_spill] sm:$0xff] }
 0x9f9   : > { %13099 = vmatmul.mubr.bf16.gmra.mrb[244].mxu1 %v20977_v21 }
 0xa24   : > { %v14630_v45 = vpop.f32.mrb[200].mxu1 }
 0xa25   : > { %v14631_v26 = vpop.f32.mrb[201].mxu1 }
 0xa26   : > { %v14632_v28 = vadd.f32 %v14631_v26, %v14630_v45  ;;  %v14633_v20 = vpop.f32.mrb[202].mxu1 }
 0xa27   : > { %v14634_v7 = vpop.f32.mrb[203].mxu1 }
 0xa28   : > { %v12553_v37 = vadd.f32 %v14632_v28, %v21283_v49  ;;  %v14635_v8 = vadd.f32 %v14634_v7, %v14633_v20 }
 0xa2a   : > { %v12556_v54 = vadd.f32 %v14635_v8, %v21284_v27 }
 0xa2c   : > { %v14636_v2 = vpop.f32.mrb[204].mxu1 }
 0xa2d   : > { %v14637_v51 = vpop.f32.mrb[205].mxu1 }
 0xa2e   : > { %v14638_v38 = vadd.f32 %v14637_v51, %v14636_v2  ;;  %v14639_v3 = vpop.f32.mrb[206].mxu1 }
 0xa2f   : > { %v14640_v1 = vpop.f32.mrb[207].mxu1 }
 0xa30   : > { %v12561_v40 = vadd.f32 %v14638_v38, %v21285_v24  ;;  %v14641_v12 = vadd.f32 %v14640_v1, %v14639_v3 }
 0xa32   : > { %v12564_v21 = vadd.f32 %v14641_v12, %v21286_v44 }
 0xa44   : > { %v14658_v35 = vpop.f32.mrb[208].mxu1 }
 0xa45   : > { %v14659_v56 = vpop.f32.mrb[209].mxu1 }
 0xa46   : > { %v14660_v4 = vadd.f32 %v14659_v56, %v14658_v35  ;;  %v14661_v17 = vpop.f32.mrb[210].mxu1 }
 0xa47   : > { %v14662_v0 = vpop.f32.mrb[211].mxu1 }
 0xa48   : > { %v12634_v22 = vadd.f32 %v14660_v4, %v12553_v37  ;;  %v14663_v14 = vadd.f32 %v14662_v0, %v14661_v17 }
 0xa4a   : > { %v12637_v47 = vadd.f32 %v14663_v14, %v12556_v54 }
 0xa4c   : > { %v14664_v39 = vpop.f32.mrb[212].mxu1 }
 0xa4d   : > { %v14665_v11 = vpop.f32.mrb[213].mxu1 }
 0xa4e   : > { %v14666_v52 = vadd.f32 %v14665_v11, %v14664_v39  ;;  %v14667_v58 = vpop.f32.mrb[214].mxu1 }
 0xa4f   : > { %v14668_v19 = vpop.f32.mrb[215].mxu1 }
 0xa50   : > { %v12642_v59 = vadd.f32 %v14666_v52, %v12561_v40  ;;  %v14669_v9 = vadd.f32 %v14668_v19, %v14667_v58  ;;  %v14582_v58 = vld [vmem:[%s21105_s11] ss:$0 sm:$0xff] }
 0xa52   : > { %v12645_v46 = vadd.f32 %v14669_v9, %v12564_v21 }
 0xa64   : > { %v14686_v32 = vpop.f32.mrb[216].mxu1 }
 0xa65   : > { %v14687_v10 = vpop.f32.mrb[217].mxu1 }
 0xa66   : > { %v14688_v57 = vadd.f32 %v14687_v10, %v14686_v32  ;;  %v14689_v60 = vpop.f32.mrb[218].mxu1 }
 0xa67   : > { %v14690_v6 = vpop.f32.mrb[219].mxu1 }
 0xa68   : > { %v12683_v55 = vadd.f32 %v14688_v57, %v12634_v22  ;;  %v14691_v34 = vadd.f32 %v14690_v6, %v14689_v60 }
 0xa6a   : > { %v12686_v43 = vadd.f32 %v14691_v34, %v12637_v47 }
 0xa6c   : > { %v14692_v36 = vpop.f32.mrb[220].mxu1 }
 0xa6d   : > { %v14693_v25 = vpop.f32.mrb[221].mxu1 }
 0xa6e   : > { %v14694_v61 = vadd.f32 %v14693_v25, %v14692_v36  ;;  %v14695_v23 = vpop.f32.mrb[222].mxu1 }
 0xa6f   : > { %v14696_v42 = vpop.f32.mrb[223].mxu1 }
 0xa70   : > { %v12691_v30 = vadd.f32 %v14694_v61, %v12642_v59  ;;  %v14697_v16 = vadd.f32 %v14696_v42, %v14695_v23 }
 0xa72   : > { %v12694_v62 = vadd.f32 %v14697_v16, %v12645_v46 }
 0xa84   : > { %v14714_v63 = vpop.f32.mrb[224].mxu1 }
 0xa85   : > { %v14715_v41 = vpop.f32.mrb[225].mxu1 }
 0xa86   : > { %v14716_v53 = vadd.f32 %v14715_v41, %v14714_v63  ;;  %v14717_v18 = vpop.f32.mrb[226].mxu1 }
 0xa87   : > { %v14718_v13 = vpop.f32.mrb[227].mxu1 }
 0xa88   : > { %v14719_v48 = vadd.f32 %v14718_v13, %v14717_v18  ;;  %v13143_v18 = vpop.permute.xlu0 %13142 }
 0xa8c   : > { %v14720_v5 = vpop.f32.mrb[228].mxu1 }
 0xa8d   : > { %v14721_v31 = vpop.f32.mrb[229].mxu1 }
 0xa8e   : > { %v14722_v45 = vadd.f32 %v14721_v31, %v14720_v5  ;;  %v14723_v26 = vpop.f32.mrb[230].mxu1 }
 0xa8f   : > { %v14724_v28 = vpop.f32.mrb[231].mxu1 }
 0xa90   : > { %v14725_v20 = vadd.f32 %v14724_v28, %v14723_v26 }
 0xaa4   : > { %v14742_v7 = vpop.f32.mrb[232].mxu1 }
 0xaa5   : > { %v14743_v49 = vpop.f32.mrb[233].mxu1 }
 0xaa6   : > { %v14744_v37 = vadd.f32 %v14743_v49, %v14742_v7  ;;  %v14745_v8 = vpop.f32.mrb[234].mxu1 }
 0xaa7   : > { %v14746_v27 = vpop.f32.mrb[235].mxu1 }
 0xaa8   : > { %v12886_v54 = vadd.f32 %v14744_v37, %v14716_v53  ;;  %v14747_v2 = vadd.f32 %v14746_v27, %v14745_v8 }
 0xaaa   : > { %v12900_v51 = vadd.f32 %v12886_v54, %v12683_v55  ;;  %v12889_v38 = vadd.f32 %v14747_v2, %v14719_v48  ;;  %v13145_v48 = vpop.permute.xlu1 %13144 }
 0xaac   : > { %v12901_v3 = vadd.f32 %v12889_v38, %v12686_v43  ;;  %v14748_v1 = vpop.f32.mrb[236].mxu1 }
 0xaad   : > { %v14749_v24 = vpop.f32.mrb[237].mxu1 }
 0xaae   : > { %v14750_v40 = vadd.f32 %v14749_v24, %v14748_v1  ;;  %v14751_v12 = vpop.f32.mrb[238].mxu1  ;;  %v13149_v26 = vpop.permute.xlu1 %13148 }
 0xaaf   : > { %v14752_v44 = vpop.f32.mrb[239].mxu1 }
 0xab0   : > { %v12894_v21 = vadd.f32 %v14750_v40, %v14722_v45  ;;  %v14753_v35 = vadd.f32 %v14752_v44, %v14751_v12  ;;  %v16981_v12 = vmov 0.0  }
 0xab2   : > { %v12902_v56 = vadd.f32 %v12894_v21, %v12691_v30  ;;  %v12897_v4 = vadd.f32 %v14753_v35, %v14725_v20 }
 0xab4   : > { %v12903_v17 = vadd.f32 %v12897_v4, %v12694_v62 }
 0xac4   : > { %v14798_v0 = vpop.f32.mrb[240].mxu1 }
 0xac5   : > { %v14799_v22 = vpop.f32.mrb[241].mxu1 }
 0xac6   : > { %v14800_v14 = vadd.f32 %v14799_v22, %v14798_v0  ;;  %v14801_v47 = vpop.f32.mrb[242].mxu1 }
 0xac7   : > { %v14802_v39 = vpop.f32.mrb[243].mxu1 }
 0xac8   : > { %v13093_v11 = vadd.f32 %v14800_v14, %v20983_v15  ;;  %v14803_v52 = vadd.f32 %v14802_v39, %v14801_v47 }
 0xaca   : > { %v13107_v19 = vadd.f32 %v13093_v11, %v12900_v51  ;;  %v13096_v59 = vadd.f32 %v14803_v52, %v20990_v29 }
 0xacc   : > { %v13118_v9 = vadd.f32 %v14582_v58, %v13107_v19  ;;  %v13108_v46 = vadd.f32 %v13096_v59, %v12901_v3  ;;  %v14804_v32 = vpop.f32.mrb[244].mxu1 }
 0xacd   : > { %v14805_v10 = vpop.f32.mrb[245].mxu1 }
 0xace   : > { %v13122_v57 = vmul.f32 0.5, %v13118_v9  ;;  %v13119_v60 = vadd.f32 %v14582_v58, %v13108_v46  ;;  %v14806_v6 = vadd.f32 %v14805_v10, %v14804_v32  ;;  %v14807_v55 = vpop.f32.mrb[246].mxu1 }
 0xacf   : > { %v14808_v34 = vpop.f32.mrb[247].mxu1 }
 0xad0   : > { %v13126_v43 = vmul.f32 1.442695, %v13122_v57  ;;  %v13123_v36 = vmul.f32 0.5, %v13119_v60  ;;  %v13101_v15 = vadd.f32 %v14806_v6, %v20995_v33  ;;  %v14809_v25 = vadd.f32 %v14808_v34, %v14807_v55 }
 0xad2   : > { %v13128_v61 = vmul.f32 1.442695, %v13123_v36  ;;  %v13109_v23 = vadd.f32 %v13101_v15, %v12902_v56  ;;  %v13104_v42 = vadd.f32 %v14809_v25, %v20998_v50  ;;  %16911 = vpow2.f32 %v13126_v43  ;;  %v13147_v50 = vpop.permute.xlu0 %13146 }
 0xad4   : > { %v13120_v29 = vadd.f32 %v14582_v58, %v13109_v23  ;;  %v13110_v30 = vadd.f32 %v13104_v42, %v12903_v17  ;;  %16913 = vpow2.f32 %v13128_v61 }
 0xad6   : > { %v13124_v16 = vmul.f32 0.5, %v13120_v29  ;;  %v13121_v62 = vadd.f32 %v14582_v58, %v13110_v30 }
 0xad8   : > { %v13130_v63 = vmul.f32 1.442695, %v13124_v16  ;;  %v13125_v41 = vmul.f32 0.5, %v13121_v62 }
 0xada   : > { %v13132_v53 = vmul.f32 1.442695, %v13125_v41  ;;  %16915 = vpow2.f32 %v13130_v63 }
 0xadc   : > { %v16912_v13 = vpop.eup %16911  ;;  %16917 = vpow2.f32 %v13132_v53 }
 0xadd   : > { %v13154_v33 = vmul.f32 %v16912_v13, %v13143_v18 }
 0xade   : > { %v16914_v5 = vpop.eup %16913 }
 0xadf   : > { %v13155_v31 = vmul.f32 %v16914_v5, %v13145_v48  ;;  %13162 = vrot.lane.b32.xlu0 %v13154_v33, %s16980_s17 }
 0xae1   : > { %13164 = vrot.lane.b32.xlu1 %v13155_v31, %s16980_s17 }
 0xae4   : > { %v16916_v45 = vpop.eup %16915 }
 0xae5   : > { %v13156_v28 = vmul.f32 %v16916_v45, %v13147_v50 }
 0xae6   : > { %v16918_v20 = vpop.eup %16917 }
 0xae7   : > { %v13157_v7 = vmul.f32 %v16918_v20, %v13149_v26  ;;  %13166 = vrot.lane.b32.xlu0 %v13156_v28, %s16980_s17 }
 0xae9   : > { %13168 = vrot.lane.b32.xlu1 %v13157_v7, %s16980_s17 }
 0xaeb   : > { %13187 = vrot.lane.b32.xlu0 %v13118_v9, %s16979_s26 }
 0xaed   : > { %13189 = vrot.lane.b32.xlu1 %v13119_v60, %s16979_s26 }
 0xaef   : > { %13191 = vrot.lane.b32.xlu0 %v13120_v29, %s16979_s26 }
 0xaf1   : > { %13193 = vrot.lane.b32.xlu1 %v13121_v62, %s16979_s26 }
 0xb51   : > { %v13163_v49 = vpop.permute.xlu0 %13162 }
 0xb52   : > { %v13174_v37 = vadd.f32 %v13163_v49, %v13118_v9 }
 0xb53   : > { %v13165_v8 = vpop.permute.xlu1 %13164 }
 0xb54   : > { %13179 = vst.msk [vmem:[%s1018_s14] sm:$0xff] %vm13178_vm1, %v13174_v37  ;;  %v13175_v27 = vadd.f32 %v13165_v8, %v13119_v60 }
 0xb56   : > { %13180 = vst.msk [vmem:[%s1018_s14 + $0x8] sm:$0xff] %vm13178_vm1, %v13175_v27 }
 0xb59   : > { %v13167_v54 = vpop.permute.xlu0 %13166 }
 0xb5a   : > { %v13176_v2 = vadd.f32 %v13167_v54, %v13120_v29 }
 0xb5b   : > { %v13169_v51 = vpop.permute.xlu1 %13168 }
 0xb5c   : > { %13181 = vst.msk [vmem:[%s1018_s14 + $0x10] sm:$0xff] %vm13178_vm1, %v13176_v2  ;;  %v13177_v38 = vadd.f32 %v13169_v51, %v13121_v62 }
 0xb5d   : > { %v13188_v3 = vpop.permute.xlu0 %13187 }
 0xb5e   : > { %13182 = vst.msk [vmem:[%s1018_s14 + $0x18] sm:$0xff] %vm13178_vm1, %v13177_v38 }
 0xb5f   : > { %13200 = vst.msk [vmem:[%s1018_s14] sm:$0xff] %vm13199_vm2, %v13188_v3  ;;  %v13190_v1 = vpop.permute.xlu1 %13189 }
 0xb60   : > { %13201 = vst.msk [vmem:[%s1018_s14 + $0x8] sm:$0xff] %vm13199_vm2, %v13190_v1 }
 0xb61   : > { %v13192_v24 = vpop.permute.xlu0 %13191  ;;  %13205 = vst.msk [vmem:[%s1018_s14] sm:$0xff] %vm13204_vm3, %v16981_v12  ;;  %13206 = vst.msk [vmem:[%s1018_s14 + $0x8] sm:$0xff] %vm13204_vm3, %v16981_v12 }
 0xb62   : > { %13202 = vst.msk [vmem:[%s1018_s14 + $0x10] sm:$0xff] %vm13199_vm2, %v13192_v24 }
 0xb63   : > { %v13194_v40 = vpop.permute.xlu1 %13193  ;;  %13207 = vst.msk [vmem:[%s1018_s14 + $0x10] sm:$0xff] %vm13204_vm3, %v16981_v12 }
 0xb64   : > { %13203 = vst.msk [vmem:[%s1018_s14 + $0x18] sm:$0xff] %vm13199_vm2, %v13194_v40 }
 0xb65   : > { %13208 = vst.msk [vmem:[%s1018_s14 + $0x18] sm:$0xff] %vm13204_vm3, %v16981_v12 }
 0xb66 PF: > { %p19_p9 = scmp.ge.s32.totalorder %s17064_s25, 4   ;;  %s21287_s21 = smov %s16969_s22 }
 0xb67   : > { %s21288_s22 = smov %s17073_s28  ;;  %s21289_s23 = smov %s17064_s25 }
 0xb68   :  { %21 = sbr.rel (!%p19_p9) target bundleno = 2 (0x2), region = 166 }

</bundles_post_ra>
